<compile_context>
chip_gen: v7x
topology: tpu7x:2x2x1
jax: 0.10.0
libtpu: 0.0.40
codegen_flags: <defaults>
</compile_context>

<pallas_src>
import math
import functools

import jax
import jax.numpy as jnp
from jax import lax
from jax.experimental import pallas as pl
from jax.experimental.pallas import tpu as pltpu


# ----------------------------- tiled matmul -------------------------------

def _matmul_kernel(x_ref, w_ref, o_ref, acc_ref):
    @pl.when(pl.program_id(2) == 0)
    def _init():
        acc_ref[...] = jnp.zeros_like(acc_ref)

    acc_ref[...] += jnp.dot(x_ref[...], w_ref[...],
                            preferred_element_type=jnp.float32)

    @pl.when(pl.program_id(2) == pl.num_programs(2) - 1)
    def _finalize():
        o_ref[...] = acc_ref[...].astype(o_ref.dtype)


def _pick_tile(dim, pref):
    if dim <= pref:
        return dim
    for t in (pref, pref // 2, pref // 4):
        if t >= 1 and dim % t == 0:
            return t
    return dim  # fall back to a single (full) block along this dim


def tiled_matmul(x, w, *, tm=256, tn=256, tk=256):
    """y = x @ w with BlockSpec double-buffered pipelining + f32 accumulator."""
    M, K = x.shape
    K2, N = w.shape
    assert K == K2
    tm = _pick_tile(M, tm)
    tn = _pick_tile(N, tn)
    tk = _pick_tile(K, tk)
    itemsize = jnp.dtype(x.dtype).itemsize
    cost = pl.CostEstimate(
        flops=int(2 * M * N * K),
        transcendentals=0,
        bytes_accessed=int(itemsize * (M * K + K * N + M * N)),
    )
    return pl.pallas_call(
        _matmul_kernel,
        out_shape=jax.ShapeDtypeStruct((M, N), x.dtype),
        grid=(M // tm, N // tn, K // tk),
        in_specs=[
            pl.BlockSpec((tm, tk), lambda i, j, k: (i, k)),
            pl.BlockSpec((tk, tn), lambda i, j, k: (k, j)),
        ],
        out_specs=pl.BlockSpec((tm, tn), lambda i, j, k: (i, j)),
        scratch_shapes=[pltpu.VMEM((tm, tn), jnp.float32)],
        compiler_params=pltpu.CompilerParams(
            dimension_semantics=("parallel", "parallel", "arbitrary")),
        cost_estimate=cost,
    )(x, w)


# ------------------------ flash attention kernel ---------------------------

def _flash_attn_kernel(q_ref, k_ref, v_ref, cq_ref, sq_ref, ck_ref, sk_ref,
                       o_ref, m_ref, l_ref, acc_ref,
                       *, n_rep, head_dim, blk, causal, use_rope, scale):
    qi = pl.program_id(2)
    ki = pl.program_id(3)
    nk = pl.num_programs(3)

    @pl.when(ki == 0)
    def _init():
        m_ref[...] = jnp.full_like(m_ref, -jnp.inf)
        l_ref[...] = jnp.zeros_like(l_ref)
        acc_ref[...] = jnp.zeros_like(acc_ref)

    q_start = qi * blk
    k_start = ki * blk

    def _rope(x, cos, sin):
        if not use_rope:
            return x
        # split-half layout: rotate-half = roll by head_dim//2 on the lane axis
        rot = pltpu.roll(x, head_dim // 2, axis=1)
        return x * cos + rot * sin

    def _compute():
        k_blk = k_ref[0]                         # (blk, D)
        v_blk = v_ref[0]                         # (blk, D)
        k_rot = _rope(k_blk.astype(jnp.float32), ck_ref[...],
                      sk_ref[...]).astype(k_blk.dtype)
        if causal:
            row = q_start + lax.broadcasted_iota(jnp.int32, (blk, blk), 0)
            col = k_start + lax.broadcasted_iota(jnp.int32, (blk, blk), 1)
            keep = col <= row                    # shared across the group's heads
        for r in range(n_rep):
            q_blk = q_ref[0, :, r * head_dim:(r + 1) * head_dim]   # (blk, D)
            q_rot = _rope(q_blk.astype(jnp.float32), cq_ref[...],
                          sq_ref[...]).astype(q_blk.dtype)
            # contract minor dims directly: no k.T / XLU transpose
            s = lax.dot_general(q_rot, k_rot, (((1,), (1,)), ((), ())),
                                preferred_element_type=jnp.float32) * scale
            if causal:
                s = jnp.where(keep, s, -jnp.inf)
            m_prev = m_ref[r]
            m_new = jnp.maximum(m_prev, jnp.max(s, axis=-1, keepdims=True))
            alpha = jnp.exp(m_prev - m_new)
            p = jnp.exp(s - m_new)
            l_ref[r] = alpha * l_ref[r] + jnp.sum(p, axis=-1, keepdims=True)
            acc_ref[r] = alpha * acc_ref[r] + jnp.dot(
                p.astype(v_blk.dtype), v_blk, preferred_element_type=jnp.float32)
            m_ref[r] = m_new

    if causal:
        # Skip KV tiles that are entirely above the causal diagonal.
        pl.when(k_start <= q_start + blk - 1)(_compute)
    else:
        _compute()

    @pl.when(ki == nk - 1)
    def _finalize():
        for r in range(n_rep):
            inv_l = pl.reciprocal(l_ref[r], approx=False)
            o_ref[0, :, r * head_dim:(r + 1) * head_dim] = (
                acc_ref[r] * inv_l).astype(o_ref.dtype)


def flash_attention(qkv3, cos_t, sin_t, *, n_head, n_kv_head, head_dim,
                    causal, use_rope, blk=128):
    """qkv3: (B, S, (H + 2*H_kv) * D) fused projection output (Q split-half
    permuted for RoPE).  Returns attention output in (B, S, H*D) layout."""
    B, S, NT = qkv3.shape
    n_rep = n_head // n_kv_head
    E = n_head * head_dim
    assert NT == (n_head + 2 * n_kv_head) * head_dim
    assert head_dim % 128 == 0, "head_dim must be a multiple of 128"
    blk = min(blk, S)
    assert S % blk == 0 and blk % 8 == 0
    qt = S // blk
    kt = S // blk
    scale = 1.0 / math.sqrt(head_dim)

    def _kv_row(ki, qi):
        # For causal attention, KV tiles past the diagonal are skipped; clamp
        # the block index so the (unused) DMA re-uses the already-resident tile.
        return jnp.minimum(ki, qi) if causal else ki

    q_spec = pl.BlockSpec((1, blk, n_rep * head_dim),
                          lambda b, g, qi, ki: (b, qi, g))
    k_spec = pl.BlockSpec((1, blk, head_dim),
                          lambda b, g, qi, ki: (b, _kv_row(ki, qi), n_head + g))
    v_spec = pl.BlockSpec((1, blk, head_dim),
                          lambda b, g, qi, ki: (b, _kv_row(ki, qi),
                                                n_head + n_kv_head + g))
    cq_spec = pl.BlockSpec((blk, head_dim), lambda b, g, qi, ki: (qi, 0))
    ck_spec = pl.BlockSpec((blk, head_dim),
                           lambda b, g, qi, ki: (_kv_row(ki, qi), 0))
    o_spec = pl.BlockSpec((1, blk, n_rep * head_dim),
                          lambda b, g, qi, ki: (b, qi, g))

    kernel = functools.partial(
        _flash_attn_kernel, n_rep=n_rep, head_dim=head_dim, blk=blk,
        causal=causal, use_rope=use_rope, scale=scale)

    itemsize = jnp.dtype(qkv3.dtype).itemsize
    cost = pl.CostEstimate(
        flops=int(4 * B * n_head * S * S * head_dim),
        transcendentals=int(B * n_head * S * S),
        bytes_accessed=int(itemsize * (qkv3.size + B * S * E)),
    )

    return pl.pallas_call(
        kernel,
        out_shape=jax.ShapeDtypeStruct((B, S, E), qkv3.dtype),
        grid=(B, n_kv_head, qt, kt),
        in_specs=[q_spec, k_spec, v_spec, cq_spec, cq_spec, ck_spec, ck_spec],
        out_specs=o_spec,
        scratch_shapes=[
            pltpu.VMEM((n_rep, blk, 1), jnp.float32),         # m
            pltpu.VMEM((n_rep, blk, 1), jnp.float32),         # l
            pltpu.VMEM((n_rep, blk, head_dim), jnp.float32),  # acc
        ],
        compiler_params=pltpu.CompilerParams(
            dimension_semantics=("parallel", "parallel", "parallel",
                                 "arbitrary")),
        cost_estimate=cost,
    )(qkv3, qkv3, qkv3, cos_t, sin_t, cos_t, sin_t)


# ------------------------------ full forward ------------------------------

def _split_half_cols(w, n_heads, head_dim):
    """Permute per-head output columns from interleaved (r0,i0,r1,i1,...) to
    split-half (r..., i...) so RoPE becomes a rotate-half.  The q.k score is
    invariant to this common permutation, so the module output is unchanged."""
    e_in = w.shape[0]
    perm = jnp.concatenate([jnp.arange(0, head_dim, 2),
                            jnp.arange(1, head_dim, 2)])
    w3 = w.reshape(e_in, n_heads, head_dim)
    return w3[:, :, perm].reshape(e_in, n_heads * head_dim)


def attention_forward(x, params, freqs_cos, freqs_sin, n_head, n_kv_head,
                      is_causal=True):
    """Eval-mode forward (dropout = 0, use_kv_cache = False)."""
    # TODO(synk): stateful KV-cache decode path (use_kv_cache=True) not implemented.
    B, S, E = x.shape
    assert E % n_head == 0 and n_head % n_kv_head == 0
    head_dim = E // n_head
    use_rope = freqs_cos is not None and freqs_sin is not None

    # One-time weight prep (would be folded into checkpoint loading).
    wq = _split_half_cols(params["wq"], n_head, head_dim) if use_rope else params["wq"]
    wk = _split_half_cols(params["wk"], n_kv_head, head_dim) if use_rope else params["wk"]
    w_qkv = jnp.concatenate([wq, wk, params["wv"]], axis=1)

    # Fused, tiled Q/K/V projection: x is read from HBM once.
    qkv = tiled_matmul(x.reshape(B * S, E), w_qkv)
    qkv3 = qkv.reshape(B, S, -1)

    # Tiny (S, head_dim) RoPE tables in rotate-half form (no (B,S,H,D) broadcast).
    if use_rope:
        cos_t = jnp.concatenate([freqs_cos, freqs_cos], axis=-1).astype(jnp.float32)
        sin_t = jnp.concatenate([-freqs_sin, freqs_sin], axis=-1).astype(jnp.float32)
    else:
        cos_t = jnp.ones((S, head_dim), jnp.float32)
        sin_t = jnp.zeros((S, head_dim), jnp.float32)

    attn = flash_attention(qkv3, cos_t, sin_t, n_head=n_head,
                           n_kv_head=n_kv_head, head_dim=head_dim,
                           causal=is_causal, use_rope=use_rope)

    out = tiled_matmul(attn.reshape(B * S, E), params["wo"])
    return out.reshape(B, S, E)


# ---------------------------- pure-JAX reference ---------------------------

def reference_forward(x, params, cos, sin, n_head, n_kv_head):
    B, S, E = x.shape
    D = E // n_head
    n_rep = n_head // n_kv_head
    xq = (x @ params["wq"]).reshape(B, S, n_head, D)
    xk = (x @ params["wk"]).reshape(B, S, n_kv_head, D)
    xv = (x @ params["wv"]).reshape(B, S, n_kv_head, D)

    def rope(t):
        tr, ti = t[..., 0::2], t[..., 1::2]
        c = cos[None, :, None, :]
        s = sin[None, :, None, :]
        out_r = tr * c - ti * s
        out_i = tr * s + ti * c
        return jnp.stack([out_r, out_i], axis=-1).reshape(t.shape)

    xq, xk = rope(xq), rope(xk)
    xk = jnp.repeat(xk, n_rep, axis=2)
    xv = jnp.repeat(xv, n_rep, axis=2)
    q = xq.transpose(0, 2, 1, 3)
    k = xk.transpose(0, 2, 1, 3)
    v = xv.transpose(0, 2, 1, 3)
    att = jnp.einsum("bhqd,bhkd->bhqk", q, k) / math.sqrt(D)
    mask = jnp.triu(jnp.full((S, S), -jnp.inf), k=1)
    att = att + mask[None, None]
    att = jax.nn.softmax(att, axis=-1)
    out = jnp.einsum("bhqk,bhkd->bhqd", att, v)
    out = out.transpose(0, 2, 1, 3).reshape(B, S, E)
    return out @ params["wo"]


# ---------------------------------- main -----------------------------------

if __name__ == "__main__":
    B, S = 2, 256
    n_head, n_kv_head, head_dim = 4, 2, 128
    n_embd = n_head * head_dim  # 512

    key = jax.random.PRNGKey(0)
    k1, k2, k3, k4, k5 = jax.random.split(key, 5)
    params = {
        "wq": 0.02 * jax.random.normal(k1, (n_embd, n_head * head_dim), jnp.float32),
        "wk": 0.02 * jax.random.normal(k2, (n_embd, n_kv_head * head_dim), jnp.float32),
        "wv": 0.02 * jax.random.normal(k3, (n_embd, n_kv_head * head_dim), jnp.float32),
        "wo": 0.02 * jax.random.normal(k4, (n_head * head_dim, n_embd), jnp.float32),
    }
    x = jax.random.normal(k5, (B, S, n_embd), jnp.float32)

    # RoPE tables: (S, head_dim // 2), interleaved-complex convention.
    inv_freq = 1.0 / (10000.0 ** (jnp.arange(0, head_dim, 2, dtype=jnp.float32)
                                  / head_dim))
    t = jnp.arange(S, dtype=jnp.float32)
    angles = jnp.outer(t, inv_freq)
    freqs_cos = jnp.cos(angles)
    freqs_sin = jnp.sin(angles)

    fwd = jax.jit(functools.partial(attention_forward, n_head=n_head,
                                    n_kv_head=n_kv_head, is_causal=True))
    out = jax.block_until_ready(fwd(x, params, freqs_cos, freqs_sin))

    ref = reference_forward(x, params, freqs_cos, freqs_sin, n_head, n_kv_head)
    max_err = float(jnp.max(jnp.abs(out - ref)))
    assert max_err < 2e-4, f"mismatch vs reference: {max_err}"
    print("KERNEL_OK")
</pallas_src>

<mosaic_0001>
module attributes {stable_mosaic.version = 11 : i64} {
  func.func @_matmul_kernel(%arg0: i32, %arg1: i32, %arg2: i32, %arg3: memref<256x256xf32, #tpu.memory_space<vmem>>, %arg4: memref<256x256xf32, #tpu.memory_space<vmem>>, %arg5: memref<256x256xf32, #tpu.memory_space<vmem>>, %arg6: memref<256x256xf32, #tpu.memory_space<vmem>>) attributes {dimension_semantics = [#tpu.dimension_semantics<parallel>, #tpu.dimension_semantics<parallel>, #tpu.dimension_semantics<arbitrary>], iteration_bounds = array<i64: 2, 4, 2>, scalar_prefetch = 0 : i64, scratch_operands = 1 : i64, tpu.core_type = #tpu.core_type<tc>, window_params = [{transform_indices = @transform_0, window_bounds = array<i64: 256, 256>}, {transform_indices = @transform_1, window_bounds = array<i64: 256, 256>}, {transform_indices = @transform_2, window_bounds = array<i64: 256, 256>}]} {
    %c0_i32 = arith.constant 0 : i32
    %0 = arith.cmpi eq, %arg2, %c0_i32 : i32
    %1 = arith.extui %0 : i1 to i32
    %c0_i32_0 = arith.constant 0 : i32
    %2 = arith.cmpi ne, %1, %c0_i32_0 : i32
    scf.if %2 {
      %cst_9 = arith.constant 0.000000e+00 : f32
      %12 = vector.broadcast %cst_9 : f32 to vector<256x256xf32>
      %c0_10 = arith.constant 0 : index
      %c0_11 = arith.constant 0 : index
      %13 = vector.load %arg6[%c0_10, %c0_11] : memref<256x256xf32, #tpu.memory_space<vmem>>, vector<256x256xf32>
      tpu.vector_store %arg6[%c0_10, %c0_11], %12 {strides = array<i32>} : memref<256x256xf32, #tpu.memory_space<vmem>>, vector<256x256xf32>,
    } else {
    }
    %c0 = arith.constant 0 : index
    %c0_1 = arith.constant 0 : index
    %3 = vector.load %arg6[%c0, %c0_1] : memref<256x256xf32, #tpu.memory_space<vmem>>, vector<256x256xf32>
    %c0_2 = arith.constant 0 : index
    %c0_3 = arith.constant 0 : index
    %4 = vector.load %arg3[%c0_2, %c0_3] : memref<256x256xf32, #tpu.memory_space<vmem>>, vector<256x256xf32>
    %c0_4 = arith.constant 0 : index
    %c0_5 = arith.constant 0 : index
    %5 = vector.load %arg4[%c0_4, %c0_5] : memref<256x256xf32, #tpu.memory_space<vmem>>, vector<256x256xf32>
    %cst = arith.constant dense<0.000000e+00> : vector<256x256xf32>
    %6 = tpu.matmul %4, %5, %cst {dimension_numbers = #tpu.dot_dimension_numbers<[1], [0], [0], [1], [0, 0, 1, 1], [], []>} : vector<256x256xf32>, vector<256x256xf32>, vector<256x256xf32> -> vector<256x256xf32>
    %7 = arith.addf %3, %6 : vector<256x256xf32>
    %c0_6 = arith.constant 0 : index
    %c0_7 = arith.constant 0 : index
    %8 = vector.load %arg6[%c0_6, %c0_7] : memref<256x256xf32, #tpu.memory_space<vmem>>, vector<256x256xf32>
    tpu.vector_store %arg6[%c0_6, %c0_7], %7 {strides = array<i32>} : memref<256x256xf32, #tpu.memory_space<vmem>>, vector<256x256xf32>,
    %c1_i32 = arith.constant 1 : i32
    %9 = arith.cmpi eq, %arg2, %c1_i32 : i32
    %10 = arith.extui %9 : i1 to i32
    %c0_i32_8 = arith.constant 0 : i32
    %11 = arith.cmpi ne, %10, %c0_i32_8 : i32
    scf.if %11 {
      %c0_9 = arith.constant 0 : index
      %c0_10 = arith.constant 0 : index
      %12 = vector.load %arg6[%c0_9, %c0_10] : memref<256x256xf32, #tpu.memory_space<vmem>>, vector<256x256xf32>
      %c0_11 = arith.constant 0 : index
      %c0_12 = arith.constant 0 : index
      %13 = vector.load %arg5[%c0_11, %c0_12] : memref<256x256xf32, #tpu.memory_space<vmem>>, vector<256x256xf32>
      tpu.vector_store %arg5[%c0_11, %c0_12], %12 {strides = array<i32>} : memref<256x256xf32, #tpu.memory_space<vmem>>, vector<256x256xf32>,
    } else {
    }
    return
  }
  func.func @transform_0(%arg0: i32, %arg1: i32, %arg2: i32) -> (i32, i32) {
    %c0_i32 = arith.constant 0 : i32
    return %arg0, %arg2 : i32, i32
  }
  func.func @transform_1(%arg0: i32, %arg1: i32, %arg2: i32) -> (i32, i32) {
    %c0_i32 = arith.constant 0 : i32
    return %arg2, %arg1 : i32, i32
  }
  func.func @transform_2(%arg0: i32, %arg1: i32, %arg2: i32) -> (i32, i32) {
    %c0_i32 = arith.constant 0 : i32
    return %arg0, %arg1 : i32, i32
  }
}

module attributes {stable_mosaic.version = 11 : i64} {
  func.func @_flash_attn_kernel(%arg0: i32, %arg1: i32, %arg2: i32, %arg3: i32, %arg4: memref<1x128x256xf32, #tpu.memory_space<vmem>>, %arg5: memref<1x128x128xf32, #tpu.memory_space<vmem>>, %arg6: memref<1x128x128xf32, #tpu.memory_space<vmem>>, %arg7: memref<128x128xf32, #tpu.memory_space<vmem>>, %arg8: memref<128x128xf32, #tpu.memory_space<vmem>>, %arg9: memref<128x128xf32, #tpu.memory_space<vmem>>, %arg10: memref<128x128xf32, #tpu.memory_space<vmem>>, %arg11: memref<1x128x256xf32, #tpu.memory_space<vmem>>, %arg12: memref<2x128x1xf32, #tpu.memory_space<vmem>>, %arg13: memref<2x128x1xf32, #tpu.memory_space<vmem>>, %arg14: memref<2x128x128xf32, #tpu.memory_space<vmem>>) attributes {dimension_semantics = [#tpu.dimension_semantics<parallel>, #tpu.dimension_semantics<parallel>, #tpu.dimension_semantics<parallel>, #tpu.dimension_semantics<arbitrary>], iteration_bounds = array<i64: 2, 2, 2, 2>, scalar_prefetch = 0 : i64, scratch_operands = 3 : i64, tpu.core_type = #tpu.core_type<tc>, window_params = [{transform_indices = @transform_0, window_bounds = array<i64: 1, 128, 256>}, {transform_indices = @transform_1, window_bounds = array<i64: 1, 128, 128>}, {transform_indices = @transform_2, window_bounds = array<i64: 1, 128, 128>}, {transform_indices = @transform_3, window_bounds = array<i64: 128, 128>}, {transform_indices = @transform_4, window_bounds = array<i64: 128, 128>}, {transform_indices = @transform_5, window_bounds = array<i64: 128, 128>}, {transform_indices = @transform_6, window_bounds = array<i64: 128, 128>}, {transform_indices = @transform_7, window_bounds = array<i64: 1, 128, 256>}]} {
    %c0_i32 = arith.constant 0 : i32
    %0 = arith.cmpi eq, %arg3, %c0_i32 : i32
    %1 = arith.extui %0 : i1 to i32
    %c0_i32_0 = arith.constant 0 : i32
    %2 = arith.cmpi ne, %1, %c0_i32_0 : i32
    scf.if %2 {
      %cst = arith.constant 0xFF800000 : f32
      %13 = vector.broadcast %cst : f32 to vector<2x128x1xf32>
      %c0 = arith.constant 0 : index
      %c0_6 = arith.constant 0 : index
      %c0_7 = arith.constant 0 : index
      %14 = vector.load %arg12[%c0, %c0_6, %c0_7] : memref<2x128x1xf32, #tpu.memory_space<vmem>>, vector<2x128x1xf32>
      tpu.vector_store %arg12[%c0, %c0_6, %c0_7], %13 {strides = array<i32>} : memref<2x128x1xf32, #tpu.memory_space<vmem>>, vector<2x128x1xf32>,
      %cst_8 = arith.constant 0.000000e+00 : f32
      %15 = vector.broadcast %cst_8 : f32 to vector<2x128x1xf32>
      %c0_9 = arith.constant 0 : index
      %c0_10 = arith.constant 0 : index
      %c0_11 = arith.constant 0 : index
      %16 = vector.load %arg13[%c0_9, %c0_10, %c0_11] : memref<2x128x1xf32, #tpu.memory_space<vmem>>, vector<2x128x1xf32>
      tpu.vector_store %arg13[%c0_9, %c0_10, %c0_11], %15 {strides = array<i32>} : memref<2x128x1xf32, #tpu.memory_space<vmem>>, vector<2x128x1xf32>,
      %cst_12 = arith.constant 0.000000e+00 : f32
      %17 = vector.broadcast %cst_12 : f32 to vector<2x128x128xf32>
      %c0_13 = arith.constant 0 : index
      %c0_14 = arith.constant 0 : index
      %c0_15 = arith.constant 0 : index
      %18 = vector.load %arg14[%c0_13, %c0_14, %c0_15] : memref<2x128x128xf32, #tpu.memory_space<vmem>>, vector<2x128x128xf32>
      tpu.vector_store %arg14[%c0_13, %c0_14, %c0_15], %17 {strides = array<i32>} : memref<2x128x128xf32, #tpu.memory_space<vmem>>, vector<2x128x128xf32>,
    } else {
    }
    %c128_i32 = arith.constant 128 : i32
    %3 = arith.muli %arg2, %c128_i32 : i32
    %c128_i32_1 = arith.constant 128 : i32
    %4 = arith.muli %arg3, %c128_i32_1 : i32
    %c128_i32_2 = arith.constant 128 : i32
    %5 = arith.addi %3, %c128_i32_2 : i32
    %c1_i32 = arith.constant 1 : i32
    %6 = arith.subi %5, %c1_i32 : i32
    %7 = arith.cmpi sle, %4, %6 : i32
    %8 = arith.extui %7 : i1 to i32
    %c0_i32_3 = arith.constant 0 : i32
    %9 = arith.cmpi ne, %8, %c0_i32_3 : i32
    scf.if %9 {
      %c0 = arith.constant 0 : index
      %c0_6 = arith.constant 0 : index
      %c0_7 = arith.constant 0 : index
      %13 = vector.load %arg5[%c0, %c0_6, %c0_7] : memref<1x128x128xf32, #tpu.memory_space<vmem>>, vector<1x128x128xf32>
      %14 = vector.shape_cast %13 : vector<1x128x128xf32> to vector<128x128xf32>
      %c0_8 = arith.constant 0 : index
      %c0_9 = arith.constant 0 : index
      %c0_10 = arith.constant 0 : index
      %15 = vector.load %arg6[%c0_8, %c0_9, %c0_10] : memref<1x128x128xf32, #tpu.memory_space<vmem>>, vector<1x128x128xf32>
      %16 = vector.shape_cast %15 : vector<1x128x128xf32> to vector<128x128xf32>
      %c0_11 = arith.constant 0 : index
      %c0_12 = arith.constant 0 : index
      %17 = vector.load %arg9[%c0_11, %c0_12] : memref<128x128xf32, #tpu.memory_space<vmem>>, vector<128x128xf32>
      %c0_13 = arith.constant 0 : index
      %c0_14 = arith.constant 0 : index
      %18 = vector.load %arg10[%c0_13, %c0_14] : memref<128x128xf32, #tpu.memory_space<vmem>>, vector<128x128xf32>
      %c64_i32 = arith.constant 64 : i32
      %19 = tpu.dynamic_rotate %14 by %c64_i32 dim 1 : vector<128x128xf32>, i32 -> vector<128x128xf32>
      %20 = arith.mulf %14, %17 : vector<128x128xf32>
      %21 = arith.mulf %19, %18 : vector<128x128xf32>
      %22 = arith.addf %20, %21 : vector<128x128xf32>
      %23 = tpu.iota {dimensions = array<i32: 0>} : vector<128x128xi32>
      %24 = vector.broadcast %3 : i32 to vector<128x128xi32>
      %25 = arith.addi %24, %23 : vector<128x128xi32>
      %26 = tpu.iota {dimensions = array<i32: 1>} : vector<128x128xi32>
      %27 = vector.broadcast %4 : i32 to vector<128x128xi32>
      %28 = arith.addi %27, %26 : vector<128x128xi32>
      %29 = arith.cmpi sle, %28, %25 : vector<128x128xi32>
      %c0_15 = arith.constant 0 : index
      %c0_16 = arith.constant 0 : index
      %c0_17 = arith.constant 0 : index
      %30 = vector.load %arg4[%c0_15, %c0_16, %c0_17] : memref<1x128x256xf32, #tpu.memory_space<vmem>>, vector<1x128x128xf32>
      %31 = vector.shape_cast %30 : vector<1x128x128xf32> to vector<128x128xf32>
      %c0_18 = arith.constant 0 : index
      %c0_19 = arith.constant 0 : index
      %32 = vector.load %arg7[%c0_18, %c0_19] : memref<128x128xf32, #tpu.memory_space<vmem>>, vector<128x128xf32>
      %c0_20 = arith.constant 0 : index
      %c0_21 = arith.constant 0 : index
      %33 = vector.load %arg8[%c0_20, %c0_21] : memref<128x128xf32, #tpu.memory_space<vmem>>, vector<128x128xf32>
      %c64_i32_22 = arith.constant 64 : i32
      %34 = tpu.dynamic_rotate %31 by %c64_i32_22 dim 1 : vector<128x128xf32>, i32 -> vector<128x128xf32>
      %35 = arith.mulf %31, %32 : vector<128x128xf32>
      %36 = arith.mulf %34, %33 : vector<128x128xf32>
      %37 = arith.addf %35, %36 : vector<128x128xf32>
      %cst = arith.constant dense<0.000000e+00> : vector<128x128xf32>
      %38 = tpu.matmul %37, %22, %cst {dimension_numbers = #tpu.dot_dimension_numbers<[1], [1], [0], [0], [0, 0, 1, 0], [], []>} : vector<128x128xf32>, vector<128x128xf32>, vector<128x128xf32> -> vector<128x128xf32>
      %cst_23 = arith.constant 0.0883883461 : f32
      %39 = vector.broadcast %cst_23 : f32 to vector<128x128xf32>
      %40 = arith.mulf %38, %39 : vector<128x128xf32>
      %cst_24 = arith.constant 0xFF800000 : f32
      %41 = vector.broadcast %cst_24 : f32 to vector<128x128xf32>
      %42 = arith.select %29, %40, %41 : vector<128x128xi1>, vector<128x128xf32>
      %c0_25 = arith.constant 0 : index
      %c0_26 = arith.constant 0 : index
      %c0_27 = arith.constant 0 : index
      %43 = vector.load %arg12[%c0_25, %c0_26, %c0_27] : memref<2x128x1xf32, #tpu.memory_space<vmem>>, vector<1x128x1xf32>
      %44 = vector.shape_cast %43 : vector<1x128x1xf32> to vector<128x1xf32>
      %cst_28 = arith.constant dense<0xFF800000> : vector<128xf32>
      %45 = vector.multi_reduction <maximumf>, %42, %cst_28 [1] : vector<128x128xf32> to vector<128xf32>
      %46 = vector.shape_cast %45 : vector<128xf32> to vector<128x1xf32>
      %47 = arith.maximumf %44, %46 : vector<128x1xf32>
      %48 = arith.subf %44, %47 : vector<128x1xf32>
      %49 = math.exp %48 : vector<128x1xf32>
      %50 = vector.broadcast %47 : vector<128x1xf32> to vector<128x128xf32>
      %51 = arith.subf %42, %50 : vector<128x128xf32>
      %52 = math.exp %51 : vector<128x128xf32>
      %c0_29 = arith.constant 0 : index
      %c0_30 = arith.constant 0 : index
      %c0_31 = arith.constant 0 : index
      %53 = vector.load %arg13[%c0_29, %c0_30, %c0_31] : memref<2x128x1xf32, #tpu.memory_space<vmem>>, vector<1x128x1xf32>
      %54 = vector.shape_cast %53 : vector<1x128x1xf32> to vector<128x1xf32>
      %55 = arith.mulf %49, %54 : vector<128x1xf32>
      %cst_32 = arith.constant dense<0.000000e+00> : vector<128xf32>
      %56 = vector.multi_reduction <add>, %52, %cst_32 [1] : vector<128x128xf32> to vector<128xf32>
      %57 = vector.shape_cast %56 : vector<128xf32> to vector<128x1xf32>
      %58 = arith.addf %55, %57 : vector<128x1xf32>
      %c0_33 = arith.constant 0 : index
      %c0_34 = arith.constant 0 : index
      %c0_35 = arith.constant 0 : index
      %59 = vector.load %arg13[%c0_33, %c0_34, %c0_35] : memref<2x128x1xf32, #tpu.memory_space<vmem>>, vector<1x128x1xf32>
      %60 = vector.shape_cast %59 : vector<1x128x1xf32> to vector<128x1xf32>
      %61 = vector.shape_cast %58 : vector<128x1xf32> to vector<1x128x1xf32>
      tpu.vector_store %arg13[%c0_33, %c0_34, %c0_35], %61 {strides = array<i32>} : memref<2x128x1xf32, #tpu.memory_space<vmem>>, vector<1x128x1xf32>,
      %c0_36 = arith.constant 0 : index
      %c0_37 = arith.constant 0 : index
      %c0_38 = arith.constant 0 : index
      %62 = vector.load %arg14[%c0_36, %c0_37, %c0_38] : memref<2x128x128xf32, #tpu.memory_space<vmem>>, vector<1x128x128xf32>
      %63 = vector.shape_cast %62 : vector<1x128x128xf32> to vector<128x128xf32>
      %64 = vector.broadcast %49 : vector<128x1xf32> to vector<128x128xf32>
      %65 = arith.mulf %64, %63 : vector<128x128xf32>
      %cst_39 = arith.constant dense<0.000000e+00> : vector<128x128xf32>
      %66 = tpu.matmul %52, %16, %cst_39 {dimension_numbers = #tpu.dot_dimension_numbers<[1], [0], [0], [1], [0, 0, 1, 1], [], []>} : vector<128x128xf32>, vector<128x128xf32>, vector<128x128xf32> -> vector<128x128xf32>
      %67 = arith.addf %65, %66 : vector<128x128xf32>
      %c0_40 = arith.constant 0 : index
      %c0_41 = arith.constant 0 : index
      %c0_42 = arith.constant 0 : index
      %68 = vector.load %arg14[%c0_40, %c0_41, %c0_42] : memref<2x128x128xf32, #tpu.memory_space<vmem>>, vector<1x128x128xf32>
      %69 = vector.shape_cast %68 : vector<1x128x128xf32> to vector<128x128xf32>
      %70 = vector.shape_cast %67 : vector<128x128xf32> to vector<1x128x128xf32>
      tpu.vector_store %arg14[%c0_40, %c0_41, %c0_42], %70 {strides = array<i32>} : memref<2x128x128xf32, #tpu.memory_space<vmem>>, vector<1x128x128xf32>,
      %c0_43 = arith.constant 0 : index
      %c0_44 = arith.constant 0 : index
      %c0_45 = arith.constant 0 : index
      %71 = vector.load %arg12[%c0_43, %c0_44, %c0_45] : memref<2x128x1xf32, #tpu.memory_space<vmem>>, vector<1x128x1xf32>
      %72 = vector.shape_cast %71 : vector<1x128x1xf32> to vector<128x1xf32>
      %73 = vector.shape_cast %47 : vector<128x1xf32> to vector<1x128x1xf32>
      tpu.vector_store %arg12[%c0_43, %c0_44, %c0_45], %73 {strides = array<i32>} : memref<2x128x1xf32, #tpu.memory_space<vmem>>, vector<1x128x1xf32>,
      %c0_46 = arith.constant 0 : index
      %c0_47 = arith.constant 0 : index
      %c128 = arith.constant 128 : index
      %74 = vector.load %arg4[%c0_46, %c0_47, %c128] : memref<1x128x256xf32, #tpu.memory_space<vmem>>, vector<1x128x128xf32>
      %75 = vector.shape_cast %74 : vector<1x128x128xf32> to vector<128x128xf32>
      %c0_48 = arith.constant 0 : index
      %c0_49 = arith.constant 0 : index
      %76 = vector.load %arg7[%c0_48, %c0_49] : memref<128x128xf32, #tpu.memory_space<vmem>>, vector<128x128xf32>
      %c0_50 = arith.constant 0 : index
      %c0_51 = arith.constant 0 : index
      %77 = vector.load %arg8[%c0_50, %c0_51] : memref<128x128xf32, #tpu.memory_space<vmem>>, vector<128x128xf32>
      %c64_i32_52 = arith.constant 64 : i32
      %78 = tpu.dynamic_rotate %75 by %c64_i32_52 dim 1 : vector<128x128xf32>, i32 -> vector<128x128xf32>
      %79 = arith.mulf %75, %76 : vector<128x128xf32>
      %80 = arith.mulf %78, %77 : vector<128x128xf32>
      %81 = arith.addf %79, %80 : vector<128x128xf32>
      %cst_53 = arith.constant dense<0.000000e+00> : vector<128x128xf32>
      %82 = tpu.matmul %81, %22, %cst_53 {dimension_numbers = #tpu.dot_dimension_numbers<[1], [1], [0], [0], [0, 0, 1, 0], [], []>} : vector<128x128xf32>, vector<128x128xf32>, vector<128x128xf32> -> vector<128x128xf32>
      %cst_54 = arith.constant 0.0883883461 : f32
      %83 = vector.broadcast %cst_54 : f32 to vector<128x128xf32>
      %84 = arith.mulf %82, %83 : vector<128x128xf32>
      %cst_55 = arith.constant 0xFF800000 : f32
      %85 = vector.broadcast %cst_55 : f32 to vector<128x128xf32>
      %86 = arith.select %29, %84, %85 : vector<128x128xi1>, vector<128x128xf32>
      %c1 = arith.constant 1 : index
      %c0_56 = arith.constant 0 : index
      %c0_57 = arith.constant 0 : index
      %87 = vector.load %arg12[%c1, %c0_56, %c0_57] : memref<2x128x1xf32, #tpu.memory_space<vmem>>, vector<1x128x1xf32>
      %88 = vector.shape_cast %87 : vector<1x128x1xf32> to vector<128x1xf32>
      %cst_58 = arith.constant dense<0xFF800000> : vector<128xf32>
      %89 = vector.multi_reduction <maximumf>, %86, %cst_58 [1] : vector<128x128xf32> to vector<128xf32>
      %90 = vector.shape_cast %89 : vector<128xf32> to vector<128x1xf32>
      %91 = arith.maximumf %88, %90 : vector<128x1xf32>
      %92 = arith.subf %88, %91 : vector<128x1xf32>
      %93 = math.exp %92 : vector<128x1xf32>
      %94 = vector.broadcast %91 : vector<128x1xf32> to vector<128x128xf32>
      %95 = arith.subf %86, %94 : vector<128x128xf32>
      %96 = math.exp %95 : vector<128x128xf32>
      %c1_59 = arith.constant 1 : index
      %c0_60 = arith.constant 0 : index
      %c0_61 = arith.constant 0 : index
      %97 = vector.load %arg13[%c1_59, %c0_60, %c0_61] : memref<2x128x1xf32, #tpu.memory_space<vmem>>, vector<1x128x1xf32>
      %98 = vector.shape_cast %97 : vector<1x128x1xf32> to vector<128x1xf32>
      %99 = arith.mulf %93, %98 : vector<128x1xf32>
      %cst_62 = arith.constant dense<0.000000e+00> : vector<128xf32>
      %100 = vector.multi_reduction <add>, %96, %cst_62 [1] : vector<128x128xf32> to vector<128xf32>
      %101 = vector.shape_cast %100 : vector<128xf32> to vector<128x1xf32>
      %102 = arith.addf %99, %101 : vector<128x1xf32>
      %c1_63 = arith.constant 1 : index
      %c0_64 = arith.constant 0 : index
      %c0_65 = arith.constant 0 : index
      %103 = vector.load %arg13[%c1_63, %c0_64, %c0_65] : memref<2x128x1xf32, #tpu.memory_space<vmem>>, vector<1x128x1xf32>
      %104 = vector.shape_cast %103 : vector<1x128x1xf32> to vector<128x1xf32>
      %105 = vector.shape_cast %102 : vector<128x1xf32> to vector<1x128x1xf32>
      tpu.vector_store %arg13[%c1_63, %c0_64, %c0_65], %105 {strides = array<i32>} : memref<2x128x1xf32, #tpu.memory_space<vmem>>, vector<1x128x1xf32>,
      %c1_66 = arith.constant 1 : index
      %c0_67 = arith.constant 0 : index
      %c0_68 = arith.constant 0 : index
      %106 = vector.load %arg14[%c1_66, %c0_67, %c0_68] : memref<2x128x128xf32, #tpu.memory_space<vmem>>, vector<1x128x128xf32>
      %107 = vector.shape_cast %106 : vector<1x128x128xf32> to vector<128x128xf32>
      %108 = vector.broadcast %93 : vector<128x1xf32> to vector<128x128xf32>
      %109 = arith.mulf %108, %107 : vector<128x128xf32>
      %cst_69 = arith.constant dense<0.000000e+00> : vector<128x128xf32>
      %110 = tpu.matmul %96, %16, %cst_69 {dimension_numbers = #tpu.dot_dimension_numbers<[1], [0], [0], [1], [0, 0, 1, 1], [], []>} : vector<128x128xf32>, vector<128x128xf32>, vector<128x128xf32> -> vector<128x128xf32>
      %111 = arith.addf %109, %110 : vector<128x128xf32>
      %c1_70 = arith.constant 1 : index
      %c0_71 = arith.constant 0 : index
      %c0_72 = arith.constant 0 : index
      %112 = vector.load %arg14[%c1_70, %c0_71, %c0_72] : memref<2x128x128xf32, #tpu.memory_space<vmem>>, vector<1x128x128xf32>
      %113 = vector.shape_cast %112 : vector<1x128x128xf32> to vector<128x128xf32>
      %114 = vector.shape_cast %111 : vector<128x128xf32> to vector<1x128x128xf32>
      tpu.vector_store %arg14[%c1_70, %c0_71, %c0_72], %114 {strides = array<i32>} : memref<2x128x128xf32, #tpu.memory_space<vmem>>, vector<1x128x128xf32>,
      %c1_73 = arith.constant 1 : index
      %c0_74 = arith.constant 0 : index
      %c0_75 = arith.constant 0 : index
      %115 = vector.load %arg12[%c1_73, %c0_74, %c0_75] : memref<2x128x1xf32, #tpu.memory_space<vmem>>, vector<1x128x1xf32>
      %116 = vector.shape_cast %115 : vector<1x128x1xf32> to vector<128x1xf32>
      %117 = vector.shape_cast %91 : vector<128x1xf32> to vector<1x128x1xf32>
      tpu.vector_store %arg12[%c1_73, %c0_74, %c0_75], %117 {strides = array<i32>} : memref<2x128x1xf32, #tpu.memory_space<vmem>>, vector<1x128x1xf32>,
    } else {
    }
    %c1_i32_4 = arith.constant 1 : i32
    %10 = arith.cmpi eq, %arg3, %c1_i32_4 : i32
    %11 = arith.extui %10 : i1 to i32
    %c0_i32_5 = arith.constant 0 : i32
    %12 = arith.cmpi ne, %11, %c0_i32_5 : i32
    scf.if %12 {
      %c0 = arith.constant 0 : index
      %c0_6 = arith.constant 0 : index
      %c0_7 = arith.constant 0 : index
      %13 = vector.load %arg13[%c0, %c0_6, %c0_7] : memref<2x128x1xf32, #tpu.memory_space<vmem>>, vector<1x128x1xf32>
      %14 = vector.shape_cast %13 : vector<1x128x1xf32> to vector<128x1xf32>
      %15 = tpu.reciprocal %14 : vector<128x1xf32> -> vector<128x1xf32>
      %c0_8 = arith.constant 0 : index
      %c0_9 = arith.constant 0 : index
      %c0_10 = arith.constant 0 : index
      %16 = vector.load %arg14[%c0_8, %c0_9, %c0_10] : memref<2x128x128xf32, #tpu.memory_space<vmem>>, vector<1x128x128xf32>
      %17 = vector.shape_cast %16 : vector<1x128x128xf32> to vector<128x128xf32>
      %18 = vector.broadcast %15 : vector<128x1xf32> to vector<128x128xf32>
      %19 = arith.mulf %17, %18 : vector<128x128xf32>
      %c0_11 = arith.constant 0 : index
      %c0_12 = arith.constant 0 : index
      %c0_13 = arith.constant 0 : index
      %20 = vector.load %arg11[%c0_11, %c0_12, %c0_13] : memref<1x128x256xf32, #tpu.memory_space<vmem>>, vector<1x128x128xf32>
      %21 = vector.shape_cast %20 : vector<1x128x128xf32> to vector<128x128xf32>
      %22 = vector.shape_cast %19 : vector<128x128xf32> to vector<1x128x128xf32>
      tpu.vector_store %arg11[%c0_11, %c0_12, %c0_13], %22 {strides = array<i32>} : memref<1x128x256xf32, #tpu.memory_space<vmem>>, vector<1x128x128xf32>,
      %c1 = arith.constant 1 : index
      %c0_14 = arith.constant 0 : index
      %c0_15 = arith.constant 0 : index
      %23 = vector.load %arg13[%c1, %c0_14, %c0_15] : memref<2x128x1xf32, #tpu.memory_space<vmem>>, vector<1x128x1xf32>
      %24 = vector.shape_cast %23 : vector<1x128x1xf32> to vector<128x1xf32>
      %25 = tpu.reciprocal %24 : vector<128x1xf32> -> vector<128x1xf32>
      %c1_16 = arith.constant 1 : index
      %c0_17 = arith.constant 0 : index
      %c0_18 = arith.constant 0 : index
      %26 = vector.load %arg14[%c1_16, %c0_17, %c0_18] : memref<2x128x128xf32, #tpu.memory_space<vmem>>, vector<1x128x128xf32>
      %27 = vector.shape_cast %26 : vector<1x128x128xf32> to vector<128x128xf32>
      %28 = vector.broadcast %25 : vector<128x1xf32> to vector<128x128xf32>
      %29 = arith.mulf %27, %28 : vector<128x128xf32>
      %c0_19 = arith.constant 0 : index
      %c0_20 = arith.constant 0 : index
      %c128 = arith.constant 128 : index
      %30 = vector.load %arg11[%c0_19, %c0_20, %c128] : memref<1x128x256xf32, #tpu.memory_space<vmem>>, vector<1x128x128xf32>
      %31 = vector.shape_cast %30 : vector<1x128x128xf32> to vector<128x128xf32>
      %32 = vector.shape_cast %29 : vector<128x128xf32> to vector<1x128x128xf32>
      tpu.vector_store %arg11[%c0_19, %c0_20, %c128], %32 {strides = array<i32>} : memref<1x128x256xf32, #tpu.memory_space<vmem>>, vector<1x128x128xf32>,
    } else {
    }
    return
  }
  func.func @transform_0(%arg0: i32, %arg1: i32, %arg2: i32, %arg3: i32) -> (i32, i32, i32) {
    %c0_i32 = arith.constant 0 : i32
    return %arg0, %arg2, %arg1 : i32, i32, i32
  }
  func.func @transform_1(%arg0: i32, %arg1: i32, %arg2: i32, %arg3: i32) -> (i32, i32, i32) {
    %0 = arith.minsi %arg3, %arg2 : i32
    %c4_i32 = arith.constant 4 : i32
    %1 = arith.addi %c4_i32, %arg1 : i32
    %c0_i32 = arith.constant 0 : i32
    return %arg0, %0, %1 : i32, i32, i32
  }
  func.func @transform_2(%arg0: i32, %arg1: i32, %arg2: i32, %arg3: i32) -> (i32, i32, i32) {
    %0 = arith.minsi %arg3, %arg2 : i32
    %c6_i32 = arith.constant 6 : i32
    %1 = arith.addi %c6_i32, %arg1 : i32
    %c0_i32 = arith.constant 0 : i32
    return %arg0, %0, %1 : i32, i32, i32
  }
  func.func @transform_3(%arg0: i32, %arg1: i32, %arg2: i32, %arg3: i32) -> (i32, i32) {
    %c0_i32 = arith.constant 0 : i32
    %c0_i32_0 = arith.constant 0 : i32
    return %arg2, %c0_i32 : i32, i32
  }
  func.func @transform_4(%arg0: i32, %arg1: i32, %arg2: i32, %arg3: i32) -> (i32, i32) {
    %c0_i32 = arith.constant 0 : i32
    %c0_i32_0 = arith.constant 0 : i32
    return %arg2, %c0_i32 : i32, i32
  }
  func.func @transform_5(%arg0: i32, %arg1: i32, %arg2: i32, %arg3: i32) -> (i32, i32) {
    %0 = arith.minsi %arg3, %arg2 : i32
    %c0_i32 = arith.constant 0 : i32
    %c0_i32_0 = arith.constant 0 : i32
    return %0, %c0_i32 : i32, i32
  }
  func.func @transform_6(%arg0: i32, %arg1: i32, %arg2: i32, %arg3: i32) -> (i32, i32) {
    %0 = arith.minsi %arg3, %arg2 : i32
    %c0_i32 = arith.constant 0 : i32
    %c0_i32_0 = arith.constant 0 : i32
    return %0, %c0_i32 : i32, i32
  }
  func.func @transform_7(%arg0: i32, %arg1: i32, %arg2: i32, %arg3: i32) -> (i32, i32, i32) {
    %c0_i32 = arith.constant 0 : i32
    return %arg0, %arg2, %arg1 : i32, i32, i32
  }
}

module attributes {stable_mosaic.version = 11 : i64} {
  func.func @_matmul_kernel(%arg0: i32, %arg1: i32, %arg2: i32, %arg3: memref<256x256xf32, #tpu.memory_space<vmem>>, %arg4: memref<256x256xf32, #tpu.memory_space<vmem>>, %arg5: memref<256x256xf32, #tpu.memory_space<vmem>>, %arg6: memref<256x256xf32, #tpu.memory_space<vmem>>) attributes {dimension_semantics = [#tpu.dimension_semantics<parallel>, #tpu.dimension_semantics<parallel>, #tpu.dimension_semantics<arbitrary>], iteration_bounds = array<i64: 2, 2, 2>, scalar_prefetch = 0 : i64, scratch_operands = 1 : i64, tpu.core_type = #tpu.core_type<tc>, window_params = [{transform_indices = @transform_0, window_bounds = array<i64: 256, 256>}, {transform_indices = @transform_1, window_bounds = array<i64: 256, 256>}, {transform_indices = @transform_2, window_bounds = array<i64: 256, 256>}]} {
    %c0_i32 = arith.constant 0 : i32
    %0 = arith.cmpi eq, %arg2, %c0_i32 : i32
    %1 = arith.extui %0 : i1 to i32
    %c0_i32_0 = arith.constant 0 : i32
    %2 = arith.cmpi ne, %1, %c0_i32_0 : i32
    scf.if %2 {
      %cst_9 = arith.constant 0.000000e+00 : f32
      %12 = vector.broadcast %cst_9 : f32 to vector<256x256xf32>
      %c0_10 = arith.constant 0 : index
      %c0_11 = arith.constant 0 : index
      %13 = vector.load %arg6[%c0_10, %c0_11] : memref<256x256xf32, #tpu.memory_space<vmem>>, vector<256x256xf32>
      tpu.vector_store %arg6[%c0_10, %c0_11], %12 {strides = array<i32>} : memref<256x256xf32, #tpu.memory_space<vmem>>, vector<256x256xf32>,
    } else {
    }
    %c0 = arith.constant 0 : index
    %c0_1 = arith.constant 0 : index
    %3 = vector.load %arg6[%c0, %c0_1] : memref<256x256xf32, #tpu.memory_space<vmem>>, vector<256x256xf32>
    %c0_2 = arith.constant 0 : index
    %c0_3 = arith.constant 0 : index
    %4 = vector.load %arg3[%c0_2, %c0_3] : memref<256x256xf32, #tpu.memory_space<vmem>>, vector<256x256xf32>
    %c0_4 = arith.constant 0 : index
    %c0_5 = arith.constant 0 : index
    %5 = vector.load %arg4[%c0_4, %c0_5] : memref<256x256xf32, #tpu.memory_space<vmem>>, vector<256x256xf32>
    %cst = arith.constant dense<0.000000e+00> : vector<256x256xf32>
    %6 = tpu.matmul %4, %5, %cst {dimension_numbers = #tpu.dot_dimension_numbers<[1], [0], [0], [1], [0, 0, 1, 1], [], []>} : vector<256x256xf32>, vector<256x256xf32>, vector<256x256xf32> -> vector<256x256xf32>
    %7 = arith.addf %3, %6 : vector<256x256xf32>
    %c0_6 = arith.constant 0 : index
    %c0_7 = arith.constant 0 : index
    %8 = vector.load %arg6[%c0_6, %c0_7] : memref<256x256xf32, #tpu.memory_space<vmem>>, vector<256x256xf32>
    tpu.vector_store %arg6[%c0_6, %c0_7], %7 {strides = array<i32>} : memref<256x256xf32, #tpu.memory_space<vmem>>, vector<256x256xf32>,
    %c1_i32 = arith.constant 1 : i32
    %9 = arith.cmpi eq, %arg2, %c1_i32 : i32
    %10 = arith.extui %9 : i1 to i32
    %c0_i32_8 = arith.constant 0 : i32
    %11 = arith.cmpi ne, %10, %c0_i32_8 : i32
    scf.if %11 {
      %c0_9 = arith.constant 0 : index
      %c0_10 = arith.constant 0 : index
      %12 = vector.load %arg6[%c0_9, %c0_10] : memref<256x256xf32, #tpu.memory_space<vmem>>, vector<256x256xf32>
      %c0_11 = arith.constant 0 : index
      %c0_12 = arith.constant 0 : index
      %13 = vector.load %arg5[%c0_11, %c0_12] : memref<256x256xf32, #tpu.memory_space<vmem>>, vector<256x256xf32>
      tpu.vector_store %arg5[%c0_11, %c0_12], %12 {strides = array<i32>} : memref<256x256xf32, #tpu.memory_space<vmem>>, vector<256x256xf32>,
    } else {
    }
    return
  }
  func.func @transform_0(%arg0: i32, %arg1: i32, %arg2: i32) -> (i32, i32) {
    %c0_i32 = arith.constant 0 : i32
    return %arg0, %arg2 : i32, i32
  }
  func.func @transform_1(%arg0: i32, %arg1: i32, %arg2: i32) -> (i32, i32) {
    %c0_i32 = arith.constant 0 : i32
    return %arg2, %arg1 : i32, i32
  }
  func.func @transform_2(%arg0: i32, %arg1: i32, %arg2: i32) -> (i32, i32) {
    %c0_i32 = arith.constant 0 : i32
    return %arg0, %arg1 : i32, i32
  }
}

</mosaic_0001>

<bundles_post_ra>
// kernel: attention_forward.3
= control target key start
LH: loop header
LB: loop body
LE: loop exit
PB: predicated region body
PF: predicated region fallthrough
CT: control target
= control target key end

     0   :  { %s2720_s0 = inlined_call_operand.vmem [shape: f32[512,512], index: 0, kind: input, shape index: {}]   ;;  %s2721_s1 = inlined_call_operand.vmem [shape: f32[512,1024], index: 1, kind: input, shape index: {}]   ;;  %s2722_s2 = inlined_call_operand.vmem [shape: f32[512,1024], index: 2, kind: output, shape index: {}]  }
   0x1   :  { %2725 = sst [smem:[#allocation8_spill]] %s2720_s0 }
   0x2   :  { %2726 = sst [smem:[#allocation9_spill]] %s2722_s2 }
   0x3   :  { %s1872_s9 = smov 0   ;;  %s1874_s10 = smov 0  }
   0x4   :  { %s1876_s11 = smov 0   ;;  %s1878_s12 = smov 0  }
   0x5   :  { %s1880_s13 = smov 0   ;;  %s1882_s14 = smov 0  }
   0x6   :  { %s1884_s15 = smov 0   ;;  %s1886_s16 = smov 0  }
   0x7   :  { %s1888_s17 = smov 0   ;;  %s1890_s18 = smov 0  }
   0x8   :  { %s1892_s19 = smov 0   ;;  %s1894_s20 = smov 0  }
   0x9   :  { %s1896_s21 = smov 0  }
   0xa LB: > { %s24_s23 = sadd.s32 1, %s1842_s18  ;;  %s27_s24 = sadd.s32 1, %s1846_s19  ;;  %s1854_s21 = sphi %s1896_s21, %s12_s21   ;;  %s1850_s20 = sphi %s1894_s20, %s2750_s20   ;;  %s1846_s19 = sphi %s1892_s19, %s2749_s19   ;;  %s1842_s18 = sphi %s1890_s18, %s2748_s18   ;;  %s1838_s17 = sphi %s1888_s17, %s2747_s17   ;;  %s1834_s16 = sphi %s1886_s16, %s2746_s16   ;;  %s1830_s15 = sphi %s1884_s15, %s2745_s15   ;;  %s1826_s14 = sphi %s1882_s14, %s2744_s14   ;;  %s1822_s13 = sphi %s1880_s13, %s2743_s13   ;;  %s1818_s12 = sphi %s1878_s12, %s2742_s12   ;;  %s1814_s11 = sphi %s1876_s11, %s2741_s11   ;;  %s1810_s10 = sphi %s1874_s10, %s2740_s10   ;;  %s1806_s9 = sphi %s1872_s9, %s2739_s9  }
   0xb   : > { %p25_p0 = scmp.ge.s32.totalorder %s24_s23, 2  ;;  %s31_s25 = sadd.s32 1, %s1850_s20 }
   0xc   : > { %s40_s26 = sadd.s32 1, %s1826_s14  ;;  %p47_p1 = scmp.ne.s32.totalorder %s1826_s14, %s1822_s13 }
   0xd   : > { %s2752_s23 = smov (%p25_p0, %s24_s23), 0  ;;  %s2754_s24 = smov (!%p25_p0, %s27_s24), %s1846_s19 }
   0xe   : > { %2727 = sst [smem:[#allocation6_spill]] %s2752_s23  ;;  %s36_s27 = ssub.s32 %s1842_s18, %s2752_s23 }
   0xf   : > { %p29_p2 = scmp.ge.s32.totalorder %s2754_s24, 4  ;;  %p48_p3 = scmp.eq.s32.totalorder %s1854_s21, 0 }
  0x10   : > { %s68_s28 = sadd.s32 1, %s1818_s12  ;;  %p75_p4 = scmp.ne.s32.totalorder %s1818_s12, %s1814_s11 }
  0x11   : > { %s2756_s24 = smov (%p29_p2, %s2754_s24), 0  ;;  %s2758_s25 = smov (!%p29_p2, %s31_s25), %s1850_s20 }
  0x12   : > { %2728 = sst [smem:[#allocation7_spill]] %s2756_s24  ;;  %p1956_p5 = por %p48_p3, %p47_p1 }
  0x13   : > { %s64_s30 = ssub.s32 %s1846_s19, %s2756_s24  ;;  %p33_p6 = scmp.ge.s32.totalorder %s2758_s25, 2 }
  0x14   : > { %s65_s3 = sor.u32 %s64_s30, %s36_s27  ;;  %p1962_p8 = por %p75_p4, %p48_p3 }
  0x15   : > { %p66_p7 = scmp.eq.s32.totalorder %s65_s3, 0  ;;  %s2760_s25 = smov (%p33_p6, %s2758_s25), 0 }
  0x16   : > { %s35_s6 = ssub.s32 %s1850_s20, %s2760_s25  ;;  %s96_s7 = sadd.s32 1, %s1810_s10 }
  0x17   : > { %s1969_s5 = scalar_select %p66_p7, %s1818_s12, %s68_s28  }
  0x18   : > { %s37_s8 = sor.u32 %s36_s27, %s35_s6  ;;  %s93_s22 = sor.u32 %s64_s30, %s35_s6 }
  0x19   : > { %p38_p9 = scmp.eq.s32.totalorder %s37_s8, 0  ;;  %p94_p10 = scmp.eq.s32.totalorder %s93_s22, 0 }
  0x1a   : > { %p106_p11 = scmp.ne.s32.totalorder %s1810_s10, %s1806_s9  ;;  %s2731_s24 = sadd.s32 4294967295, %s1854_s21  }
  0x1b   : > { %p107_p12 = scmp.eq.s32.totalorder %s2731_s24, 15  ;;  %p1524_p0 = scmp.ge.s32.totalorder %s1854_s21, 16 }
  0x1c   : > { %s1979_s23 = scalar_select %p38_p9, %s1826_s14, %s40_s26  }
  0x1d   : > { %s1982_s3 = scalar_select %p94_p10, %s1810_s10, %s96_s7  }
  0x1e   : > { %p1984_p13 = por %p107_p12, %p106_p11  ;;  %129 = sbr.rel (%p1524_p0) target bundleno = 118 (0x76), region = 16 }
  0x25   : > { %132 = sbr.rel (!%p1956_p5) target bundleno = 79 (0x4f), region = 20  ;;  %s134_s22 = sand.u32 (%p1956_p5), 1, %s1826_s14  }
  0x26   : > { %s1527_s27 = sshll.u32 (%p1956_p5), %s1842_s18, 1  ;;  %s1525_s24 = sshll.u32 (%p1956_p5), %s134_s22, 9 }
  0x27   : > { %s1548_s26 = sshll.u32 (%p1956_p5), %s1850_s20, 7  ;;  %s2733_s0 = sld [smem:[#allocation8_spill]] (%p1956_p5) }
  0x28   : > { %s140_s28 = sadd.s32 (%p1956_p5), %s1548_s26, %s1527_s27  ;;  %s2002_s29 = scalar_lea.vmem (%p1956_p5), [#allocation3], %s1525_s24 }
  0x29   : > { %s1529_s30 = sshll.u32 (%p1956_p5), %s140_s28, 3 }
  0x2d   : > { %s1997_s8 = scalar_lea.vmem %s2733_s0, %s1529_s30 }
  0x2e   : > { %v155_v0 = vld [vmem:[%s1997_s8] sm:$0xff]  ;;  %v157_v1 = vld [vmem:[%s1997_s8 + $0x8] sm:$0xff] }
  0x2f   : > { %v159_v2 = vld [vmem:[%s1997_s8 + $0x20] sm:$0xff]  ;;  %156 = vst [vmem:[%s2002_s29] sm:$0xff] %v155_v0  ;;  %158 = vst [vmem:[%s2002_s29 + $0x8] sm:$0xff] %v157_v1  ;;  %v161_v3 = vld [vmem:[%s1997_s8 + $0x28] sm:$0xff] }
  0x30   : > { %160 = vst [vmem:[%s2002_s29 + $0x10] sm:$0xff] %v159_v2  ;;  %v163_v4 = vld [vmem:[%s1997_s8 + $0x40] sm:$0xff]  ;;  %v165_v5 = vld [vmem:[%s1997_s8 + $0x48] sm:$0xff]  ;;  %162 = vst [vmem:[%s2002_s29 + $0x18] sm:$0xff] %v161_v3 }
  0x31   : > { %164 = vst [vmem:[%s2002_s29 + $0x20] sm:$0xff] %v163_v4  ;;  %166 = vst [vmem:[%s2002_s29 + $0x28] sm:$0xff] %v165_v5  ;;  %v167_v6 = vld [vmem:[%s1997_s8 + $0x60] sm:$0xff]  ;;  %v169_v7 = vld [vmem:[%s1997_s8 + $0x68] sm:$0xff] }
  0x32   : > { %v171_v8 = vld [vmem:[%s1997_s8 + $0x80] sm:$0xff]  ;;  %168 = vst [vmem:[%s2002_s29 + $0x30] sm:$0xff] %v167_v6  ;;  %170 = vst [vmem:[%s2002_s29 + $0x38] sm:$0xff] %v169_v7  ;;  %v173_v9 = vld [vmem:[%s1997_s8 + $0x88] sm:$0xff] }
  0x33   : > { %172 = vst [vmem:[%s2002_s29 + $0x40] sm:$0xff] %v171_v8  ;;  %v175_v10 = vld [vmem:[%s1997_s8 + $0xa0] sm:$0xff]  ;;  %v177_v11 = vld [vmem:[%s1997_s8 + $0xa8] sm:$0xff]  ;;  %174 = vst [vmem:[%s2002_s29 + $0x48] sm:$0xff] %v173_v9 }
  0x34   : > { %176 = vst [vmem:[%s2002_s29 + $0x50] sm:$0xff] %v175_v10  ;;  %178 = vst [vmem:[%s2002_s29 + $0x58] sm:$0xff] %v177_v11  ;;  %v179_v12 = vld [vmem:[%s1997_s8 + $0xc0] sm:$0xff]  ;;  %v181_v13 = vld [vmem:[%s1997_s8 + $0xc8] sm:$0xff] }
  0x35   : > { %v183_v14 = vld [vmem:[%s1997_s8 + $0xe0] sm:$0xff]  ;;  %180 = vst [vmem:[%s2002_s29 + $0x60] sm:$0xff] %v179_v12  ;;  %182 = vst [vmem:[%s2002_s29 + $0x68] sm:$0xff] %v181_v13  ;;  %v185_v15 = vld [vmem:[%s1997_s8 + $0xe8] sm:$0xff] }
  0x36   : > { %184 = vst [vmem:[%s2002_s29 + $0x70] sm:$0xff] %v183_v14  ;;  %v187_v16 = vld [vmem:[%s1997_s8 + $0x100] sm:$0xff]  ;;  %v189_v17 = vld [vmem:[%s1997_s8 + $0x108] sm:$0xff]  ;;  %186 = vst [vmem:[%s2002_s29 + $0x78] sm:$0xff] %v185_v15 }
  0x37   : > { %188 = vst [vmem:[%s2002_s29 + $0x80] sm:$0xff] %v187_v16  ;;  %190 = vst [vmem:[%s2002_s29 + $0x88] sm:$0xff] %v189_v17  ;;  %v191_v18 = vld [vmem:[%s1997_s8 + $0x120] sm:$0xff]  ;;  %v193_v19 = vld [vmem:[%s1997_s8 + $0x128] sm:$0xff] }
  0x38   : > { %v195_v20 = vld [vmem:[%s1997_s8 + $0x140] sm:$0xff]  ;;  %192 = vst [vmem:[%s2002_s29 + $0x90] sm:$0xff] %v191_v18  ;;  %194 = vst [vmem:[%s2002_s29 + $0x98] sm:$0xff] %v193_v19  ;;  %v197_v21 = vld [vmem:[%s1997_s8 + $0x148] sm:$0xff] }
  0x39   : > { %196 = vst [vmem:[%s2002_s29 + $0xa0] sm:$0xff] %v195_v20  ;;  %v199_v22 = vld [vmem:[%s1997_s8 + $0x160] sm:$0xff]  ;;  %v201_v23 = vld [vmem:[%s1997_s8 + $0x168] sm:$0xff]  ;;  %198 = vst [vmem:[%s2002_s29 + $0xa8] sm:$0xff] %v197_v21 }
  0x3a   : > { %200 = vst [vmem:[%s2002_s29 + $0xb0] sm:$0xff] %v199_v22  ;;  %202 = vst [vmem:[%s2002_s29 + $0xb8] sm:$0xff] %v201_v23  ;;  %v203_v24 = vld [vmem:[%s1997_s8 + $0x180] sm:$0xff]  ;;  %v205_v25 = vld [vmem:[%s1997_s8 + $0x188] sm:$0xff] }
  0x3b   : > { %v207_v26 = vld [vmem:[%s1997_s8 + $0x1a0] sm:$0xff]  ;;  %204 = vst [vmem:[%s2002_s29 + $0xc0] sm:$0xff] %v203_v24  ;;  %206 = vst [vmem:[%s2002_s29 + $0xc8] sm:$0xff] %v205_v25  ;;  %v209_v27 = vld [vmem:[%s1997_s8 + $0x1a8] sm:$0xff] }
  0x3c   : > { %208 = vst [vmem:[%s2002_s29 + $0xd0] sm:$0xff] %v207_v26  ;;  %v211_v28 = vld [vmem:[%s1997_s8 + $0x1c0] sm:$0xff]  ;;  %v213_v29 = vld [vmem:[%s1997_s8 + $0x1c8] sm:$0xff]  ;;  %210 = vst [vmem:[%s2002_s29 + $0xd8] sm:$0xff] %v209_v27 }
  0x3d   : > { %212 = vst [vmem:[%s2002_s29 + $0xe0] sm:$0xff] %v211_v28  ;;  %214 = vst [vmem:[%s2002_s29 + $0xe8] sm:$0xff] %v213_v29  ;;  %v215_v30 = vld [vmem:[%s1997_s8 + $0x1e0] sm:$0xff]  ;;  %v217_v31 = vld [vmem:[%s1997_s8 + $0x1e8] sm:$0xff] }
  0x3e   : > { %v219_v32 = vld [vmem:[%s1997_s8 + $0x200] sm:$0xff]  ;;  %216 = vst [vmem:[%s2002_s29 + $0xf0] sm:$0xff] %v215_v30  ;;  %218 = vst [vmem:[%s2002_s29 + $0xf8] sm:$0xff] %v217_v31  ;;  %v221_v33 = vld [vmem:[%s1997_s8 + $0x208] sm:$0xff] }
  0x3f   : > { %220 = vst [vmem:[%s2002_s29 + $0x100] sm:$0xff] %v219_v32  ;;  %v223_v34 = vld [vmem:[%s1997_s8 + $0x220] sm:$0xff]  ;;  %v225_v35 = vld [vmem:[%s1997_s8 + $0x228] sm:$0xff]  ;;  %222 = vst [vmem:[%s2002_s29 + $0x108] sm:$0xff] %v221_v33 }
  0x40   : > { %224 = vst [vmem:[%s2002_s29 + $0x110] sm:$0xff] %v223_v34  ;;  %226 = vst [vmem:[%s2002_s29 + $0x118] sm:$0xff] %v225_v35  ;;  %v227_v36 = vld [vmem:[%s1997_s8 + $0x240] sm:$0xff]  ;;  %v229_v37 = vld [vmem:[%s1997_s8 + $0x248] sm:$0xff] }
  0x41   : > { %v231_v38 = vld [vmem:[%s1997_s8 + $0x260] sm:$0xff]  ;;  %228 = vst [vmem:[%s2002_s29 + $0x120] sm:$0xff] %v227_v36  ;;  %230 = vst [vmem:[%s2002_s29 + $0x128] sm:$0xff] %v229_v37  ;;  %v233_v39 = vld [vmem:[%s1997_s8 + $0x268] sm:$0xff] }
  0x42   : > { %232 = vst [vmem:[%s2002_s29 + $0x130] sm:$0xff] %v231_v38  ;;  %v235_v40 = vld [vmem:[%s1997_s8 + $0x280] sm:$0xff]  ;;  %v237_v41 = vld [vmem:[%s1997_s8 + $0x288] sm:$0xff]  ;;  %234 = vst [vmem:[%s2002_s29 + $0x138] sm:$0xff] %v233_v39 }
  0x43   : > { %236 = vst [vmem:[%s2002_s29 + $0x140] sm:$0xff] %v235_v40  ;;  %238 = vst [vmem:[%s2002_s29 + $0x148] sm:$0xff] %v237_v41  ;;  %v239_v42 = vld [vmem:[%s1997_s8 + $0x2a0] sm:$0xff]  ;;  %v241_v43 = vld [vmem:[%s1997_s8 + $0x2a8] sm:$0xff] }
  0x44   : > { %v243_v44 = vld [vmem:[%s1997_s8 + $0x2c0] sm:$0xff]  ;;  %240 = vst [vmem:[%s2002_s29 + $0x150] sm:$0xff] %v239_v42  ;;  %242 = vst [vmem:[%s2002_s29 + $0x158] sm:$0xff] %v241_v43  ;;  %v245_v45 = vld [vmem:[%s1997_s8 + $0x2c8] sm:$0xff] }
  0x45   : > { %244 = vst [vmem:[%s2002_s29 + $0x160] sm:$0xff] %v243_v44  ;;  %v247_v46 = vld [vmem:[%s1997_s8 + $0x2e0] sm:$0xff]  ;;  %v249_v47 = vld [vmem:[%s1997_s8 + $0x2e8] sm:$0xff]  ;;  %246 = vst [vmem:[%s2002_s29 + $0x168] sm:$0xff] %v245_v45 }
  0x46   : > { %248 = vst [vmem:[%s2002_s29 + $0x170] sm:$0xff] %v247_v46  ;;  %250 = vst [vmem:[%s2002_s29 + $0x178] sm:$0xff] %v249_v47  ;;  %v251_v48 = vld [vmem:[%s1997_s8 + $0x300] sm:$0xff]  ;;  %v253_v49 = vld [vmem:[%s1997_s8 + $0x308] sm:$0xff] }
  0x47   : > { %v255_v50 = vld [vmem:[%s1997_s8 + $0x320] sm:$0xff]  ;;  %252 = vst [vmem:[%s2002_s29 + $0x180] sm:$0xff] %v251_v48  ;;  %254 = vst [vmem:[%s2002_s29 + $0x188] sm:$0xff] %v253_v49  ;;  %v257_v51 = vld [vmem:[%s1997_s8 + $0x328] sm:$0xff] }
  0x48   : > { %256 = vst [vmem:[%s2002_s29 + $0x190] sm:$0xff] %v255_v50  ;;  %v259_v52 = vld [vmem:[%s1997_s8 + $0x340] sm:$0xff]  ;;  %v261_v53 = vld [vmem:[%s1997_s8 + $0x348] sm:$0xff]  ;;  %258 = vst [vmem:[%s2002_s29 + $0x198] sm:$0xff] %v257_v51 }
  0x49   : > { %260 = vst [vmem:[%s2002_s29 + $0x1a0] sm:$0xff] %v259_v52  ;;  %262 = vst [vmem:[%s2002_s29 + $0x1a8] sm:$0xff] %v261_v53  ;;  %v263_v54 = vld [vmem:[%s1997_s8 + $0x360] sm:$0xff]  ;;  %v265_v55 = vld [vmem:[%s1997_s8 + $0x368] sm:$0xff] }
  0x4a   : > { %v267_v56 = vld [vmem:[%s1997_s8 + $0x380] sm:$0xff]  ;;  %264 = vst [vmem:[%s2002_s29 + $0x1b0] sm:$0xff] %v263_v54  ;;  %266 = vst [vmem:[%s2002_s29 + $0x1b8] sm:$0xff] %v265_v55  ;;  %v269_v57 = vld [vmem:[%s1997_s8 + $0x388] sm:$0xff] }
  0x4b   : > { %268 = vst [vmem:[%s2002_s29 + $0x1c0] sm:$0xff] %v267_v56  ;;  %v271_v58 = vld [vmem:[%s1997_s8 + $0x3a0] sm:$0xff]  ;;  %v273_v59 = vld [vmem:[%s1997_s8 + $0x3a8] sm:$0xff]  ;;  %270 = vst [vmem:[%s2002_s29 + $0x1c8] sm:$0xff] %v269_v57 }
  0x4c   : > { %272 = vst [vmem:[%s2002_s29 + $0x1d0] sm:$0xff] %v271_v58  ;;  %274 = vst [vmem:[%s2002_s29 + $0x1d8] sm:$0xff] %v273_v59  ;;  %v275_v60 = vld [vmem:[%s1997_s8 + $0x3c0] sm:$0xff]  ;;  %v277_v61 = vld [vmem:[%s1997_s8 + $0x3c8] sm:$0xff] }
  0x4d   : > { %v279_v62 = vld [vmem:[%s1997_s8 + $0x3e0] sm:$0xff]  ;;  %276 = vst [vmem:[%s2002_s29 + $0x1e0] sm:$0xff] %v275_v60  ;;  %278 = vst [vmem:[%s2002_s29 + $0x1e8] sm:$0xff] %v277_v61  ;;  %v281_v63 = vld [vmem:[%s1997_s8 + $0x3e8] sm:$0xff] }
  0x4e   : > { %280 = vst [vmem:[%s2002_s29 + $0x1f0] sm:$0xff] %v279_v62  ;;  %282 = vst [vmem:[%s2002_s29 + $0x1f8] sm:$0xff] %v281_v63 }
  0x4f PF: > { %288 = sbr.rel (!%p1962_p8) target bundleno = 118 (0x76), region = 43  ;;  %s290_s22 = sand.u32 (%p1962_p8), 1, %s1818_s12  }
  0x50   : > { %s1532_s27 = sshll.u32 (%p1962_p8), %s1846_s19, 1  ;;  %s1530_s24 = sshll.u32 (%p1962_p8), %s290_s22, 9 }
  0x51   : > { %s1549_s26 = sshll.u32 (%p1962_p8), %s1842_s18, 8  ;;  %s2142_s4 = scalar_lea.vmem (%p1962_p8), [#allocation4], %s1530_s24 }
  0x52   : > { %s296_s28 = sadd.s32 (%p1962_p8), %s1549_s26, %s1532_s27 }
  0x53   : > { %s1534_s30 = sshll.u32 (%p1962_p8), %s296_s28, 3 }
  0x54   : > { %s2137_s0 = scalar_lea.vmem (%p1962_p8), %s2721_s1, %s1534_s30 }
  0x55   : > { %v311_v0 = vld [vmem:[%s2137_s0] sm:$0xff] (%p1962_p8)  ;;  %v313_v1 = vld [vmem:[%s2137_s0 + $0x8] sm:$0xff] (%p1962_p8) }
  0x56   : > { %v315_v2 = vld [vmem:[%s2137_s0 + $0x40] sm:$0xff]  ;;  %312 = vst [vmem:[%s2142_s4] sm:$0xff] %v311_v0  ;;  %314 = vst [vmem:[%s2142_s4 + $0x8] sm:$0xff] %v313_v1  ;;  %v317_v3 = vld [vmem:[%s2137_s0 + $0x48] sm:$0xff] }
  0x57   : > { %316 = vst [vmem:[%s2142_s4 + $0x10] sm:$0xff] %v315_v2  ;;  %v319_v4 = vld [vmem:[%s2137_s0 + $0x80] sm:$0xff]  ;;  %v321_v5 = vld [vmem:[%s2137_s0 + $0x88] sm:$0xff]  ;;  %318 = vst [vmem:[%s2142_s4 + $0x18] sm:$0xff] %v317_v3 }
  0x58   : > { %320 = vst [vmem:[%s2142_s4 + $0x20] sm:$0xff] %v319_v4  ;;  %322 = vst [vmem:[%s2142_s4 + $0x28] sm:$0xff] %v321_v5  ;;  %v323_v6 = vld [vmem:[%s2137_s0 + $0xc0] sm:$0xff]  ;;  %v325_v7 = vld [vmem:[%s2137_s0 + $0xc8] sm:$0xff] }
  0x59   : > { %v327_v8 = vld [vmem:[%s2137_s0 + $0x100] sm:$0xff]  ;;  %324 = vst [vmem:[%s2142_s4 + $0x30] sm:$0xff] %v323_v6  ;;  %326 = vst [vmem:[%s2142_s4 + $0x38] sm:$0xff] %v325_v7  ;;  %v329_v9 = vld [vmem:[%s2137_s0 + $0x108] sm:$0xff] }
  0x5a   : > { %328 = vst [vmem:[%s2142_s4 + $0x40] sm:$0xff] %v327_v8  ;;  %v331_v10 = vld [vmem:[%s2137_s0 + $0x140] sm:$0xff]  ;;  %v333_v11 = vld [vmem:[%s2137_s0 + $0x148] sm:$0xff]  ;;  %330 = vst [vmem:[%s2142_s4 + $0x48] sm:$0xff] %v329_v9 }
  0x5b   : > { %332 = vst [vmem:[%s2142_s4 + $0x50] sm:$0xff] %v331_v10  ;;  %334 = vst [vmem:[%s2142_s4 + $0x58] sm:$0xff] %v333_v11  ;;  %v335_v12 = vld [vmem:[%s2137_s0 + $0x180] sm:$0xff]  ;;  %v337_v13 = vld [vmem:[%s2137_s0 + $0x188] sm:$0xff] }
  0x5c   : > { %v339_v14 = vld [vmem:[%s2137_s0 + $0x1c0] sm:$0xff]  ;;  %336 = vst [vmem:[%s2142_s4 + $0x60] sm:$0xff] %v335_v12  ;;  %338 = vst [vmem:[%s2142_s4 + $0x68] sm:$0xff] %v337_v13  ;;  %v341_v15 = vld [vmem:[%s2137_s0 + $0x1c8] sm:$0xff] }
  0x5d   : > { %340 = vst [vmem:[%s2142_s4 + $0x70] sm:$0xff] %v339_v14  ;;  %v343_v16 = vld [vmem:[%s2137_s0 + $0x200] sm:$0xff]  ;;  %v345_v17 = vld [vmem:[%s2137_s0 + $0x208] sm:$0xff]  ;;  %342 = vst [vmem:[%s2142_s4 + $0x78] sm:$0xff] %v341_v15 }
  0x5e   : > { %344 = vst [vmem:[%s2142_s4 + $0x80] sm:$0xff] %v343_v16  ;;  %346 = vst [vmem:[%s2142_s4 + $0x88] sm:$0xff] %v345_v17  ;;  %v347_v18 = vld [vmem:[%s2137_s0 + $0x240] sm:$0xff]  ;;  %v349_v19 = vld [vmem:[%s2137_s0 + $0x248] sm:$0xff] }
  0x5f   : > { %v351_v20 = vld [vmem:[%s2137_s0 + $0x280] sm:$0xff]  ;;  %348 = vst [vmem:[%s2142_s4 + $0x90] sm:$0xff] %v347_v18  ;;  %350 = vst [vmem:[%s2142_s4 + $0x98] sm:$0xff] %v349_v19  ;;  %v353_v21 = vld [vmem:[%s2137_s0 + $0x288] sm:$0xff] }
  0x60   : > { %352 = vst [vmem:[%s2142_s4 + $0xa0] sm:$0xff] %v351_v20  ;;  %v355_v22 = vld [vmem:[%s2137_s0 + $0x2c0] sm:$0xff]  ;;  %v357_v23 = vld [vmem:[%s2137_s0 + $0x2c8] sm:$0xff]  ;;  %354 = vst [vmem:[%s2142_s4 + $0xa8] sm:$0xff] %v353_v21 }
  0x61   : > { %356 = vst [vmem:[%s2142_s4 + $0xb0] sm:$0xff] %v355_v22  ;;  %358 = vst [vmem:[%s2142_s4 + $0xb8] sm:$0xff] %v357_v23  ;;  %v359_v24 = vld [vmem:[%s2137_s0 + $0x300] sm:$0xff]  ;;  %v361_v25 = vld [vmem:[%s2137_s0 + $0x308] sm:$0xff] }
  0x62   : > { %v363_v26 = vld [vmem:[%s2137_s0 + $0x340] sm:$0xff]  ;;  %360 = vst [vmem:[%s2142_s4 + $0xc0] sm:$0xff] %v359_v24  ;;  %362 = vst [vmem:[%s2142_s4 + $0xc8] sm:$0xff] %v361_v25  ;;  %v365_v27 = vld [vmem:[%s2137_s0 + $0x348] sm:$0xff] }
  0x63   : > { %364 = vst [vmem:[%s2142_s4 + $0xd0] sm:$0xff] %v363_v26  ;;  %v367_v28 = vld [vmem:[%s2137_s0 + $0x380] sm:$0xff]  ;;  %v369_v29 = vld [vmem:[%s2137_s0 + $0x388] sm:$0xff]  ;;  %366 = vst [vmem:[%s2142_s4 + $0xd8] sm:$0xff] %v365_v27 }
  0x64   : > { %368 = vst [vmem:[%s2142_s4 + $0xe0] sm:$0xff] %v367_v28  ;;  %370 = vst [vmem:[%s2142_s4 + $0xe8] sm:$0xff] %v369_v29  ;;  %v371_v30 = vld [vmem:[%s2137_s0 + $0x3c0] sm:$0xff]  ;;  %v373_v31 = vld [vmem:[%s2137_s0 + $0x3c8] sm:$0xff] }
  0x65   : > { %v375_v32 = vld [vmem:[%s2137_s0 + $0x400] sm:$0xff]  ;;  %372 = vst [vmem:[%s2142_s4 + $0xf0] sm:$0xff] %v371_v30  ;;  %374 = vst [vmem:[%s2142_s4 + $0xf8] sm:$0xff] %v373_v31  ;;  %v377_v33 = vld [vmem:[%s2137_s0 + $0x408] sm:$0xff] }
  0x66   : > { %376 = vst [vmem:[%s2142_s4 + $0x100] sm:$0xff] %v375_v32  ;;  %v379_v34 = vld [vmem:[%s2137_s0 + $0x440] sm:$0xff]  ;;  %v381_v35 = vld [vmem:[%s2137_s0 + $0x448] sm:$0xff]  ;;  %378 = vst [vmem:[%s2142_s4 + $0x108] sm:$0xff] %v377_v33 }
  0x67   : > { %380 = vst [vmem:[%s2142_s4 + $0x110] sm:$0xff] %v379_v34  ;;  %382 = vst [vmem:[%s2142_s4 + $0x118] sm:$0xff] %v381_v35  ;;  %v383_v36 = vld [vmem:[%s2137_s0 + $0x480] sm:$0xff]  ;;  %v385_v37 = vld [vmem:[%s2137_s0 + $0x488] sm:$0xff] }
  0x68   : > { %v387_v38 = vld [vmem:[%s2137_s0 + $0x4c0] sm:$0xff]  ;;  %384 = vst [vmem:[%s2142_s4 + $0x120] sm:$0xff] %v383_v36  ;;  %386 = vst [vmem:[%s2142_s4 + $0x128] sm:$0xff] %v385_v37  ;;  %v389_v39 = vld [vmem:[%s2137_s0 + $0x4c8] sm:$0xff] }
  0x69   : > { %388 = vst [vmem:[%s2142_s4 + $0x130] sm:$0xff] %v387_v38  ;;  %v391_v40 = vld [vmem:[%s2137_s0 + $0x500] sm:$0xff]  ;;  %v393_v41 = vld [vmem:[%s2137_s0 + $0x508] sm:$0xff]  ;;  %390 = vst [vmem:[%s2142_s4 + $0x138] sm:$0xff] %v389_v39 }
  0x6a   : > { %392 = vst [vmem:[%s2142_s4 + $0x140] sm:$0xff] %v391_v40  ;;  %394 = vst [vmem:[%s2142_s4 + $0x148] sm:$0xff] %v393_v41  ;;  %v395_v42 = vld [vmem:[%s2137_s0 + $0x540] sm:$0xff]  ;;  %v397_v43 = vld [vmem:[%s2137_s0 + $0x548] sm:$0xff] }
  0x6b   : > { %v399_v44 = vld [vmem:[%s2137_s0 + $0x580] sm:$0xff]  ;;  %396 = vst [vmem:[%s2142_s4 + $0x150] sm:$0xff] %v395_v42  ;;  %398 = vst [vmem:[%s2142_s4 + $0x158] sm:$0xff] %v397_v43  ;;  %v401_v45 = vld [vmem:[%s2137_s0 + $0x588] sm:$0xff] }
  0x6c   : > { %400 = vst [vmem:[%s2142_s4 + $0x160] sm:$0xff] %v399_v44  ;;  %v403_v46 = vld [vmem:[%s2137_s0 + $0x5c0] sm:$0xff]  ;;  %v405_v47 = vld [vmem:[%s2137_s0 + $0x5c8] sm:$0xff]  ;;  %402 = vst [vmem:[%s2142_s4 + $0x168] sm:$0xff] %v401_v45 }
  0x6d   : > { %404 = vst [vmem:[%s2142_s4 + $0x170] sm:$0xff] %v403_v46  ;;  %406 = vst [vmem:[%s2142_s4 + $0x178] sm:$0xff] %v405_v47  ;;  %v407_v48 = vld [vmem:[%s2137_s0 + $0x600] sm:$0xff]  ;;  %v409_v49 = vld [vmem:[%s2137_s0 + $0x608] sm:$0xff] }
  0x6e   : > { %v411_v50 = vld [vmem:[%s2137_s0 + $0x640] sm:$0xff]  ;;  %408 = vst [vmem:[%s2142_s4 + $0x180] sm:$0xff] %v407_v48  ;;  %410 = vst [vmem:[%s2142_s4 + $0x188] sm:$0xff] %v409_v49  ;;  %v413_v51 = vld [vmem:[%s2137_s0 + $0x648] sm:$0xff] }
  0x6f   : > { %412 = vst [vmem:[%s2142_s4 + $0x190] sm:$0xff] %v411_v50  ;;  %v415_v52 = vld [vmem:[%s2137_s0 + $0x680] sm:$0xff]  ;;  %v417_v53 = vld [vmem:[%s2137_s0 + $0x688] sm:$0xff]  ;;  %414 = vst [vmem:[%s2142_s4 + $0x198] sm:$0xff] %v413_v51 }
  0x70   : > { %416 = vst [vmem:[%s2142_s4 + $0x1a0] sm:$0xff] %v415_v52  ;;  %418 = vst [vmem:[%s2142_s4 + $0x1a8] sm:$0xff] %v417_v53  ;;  %v419_v54 = vld [vmem:[%s2137_s0 + $0x6c0] sm:$0xff]  ;;  %v421_v55 = vld [vmem:[%s2137_s0 + $0x6c8] sm:$0xff] }
  0x71   : > { %v423_v56 = vld [vmem:[%s2137_s0 + $0x700] sm:$0xff]  ;;  %420 = vst [vmem:[%s2142_s4 + $0x1b0] sm:$0xff] %v419_v54  ;;  %422 = vst [vmem:[%s2142_s4 + $0x1b8] sm:$0xff] %v421_v55  ;;  %v425_v57 = vld [vmem:[%s2137_s0 + $0x708] sm:$0xff] }
  0x72   : > { %424 = vst [vmem:[%s2142_s4 + $0x1c0] sm:$0xff] %v423_v56  ;;  %v427_v58 = vld [vmem:[%s2137_s0 + $0x740] sm:$0xff]  ;;  %v429_v59 = vld [vmem:[%s2137_s0 + $0x748] sm:$0xff]  ;;  %426 = vst [vmem:[%s2142_s4 + $0x1c8] sm:$0xff] %v425_v57 }
  0x73   : > { %428 = vst [vmem:[%s2142_s4 + $0x1d0] sm:$0xff] %v427_v58  ;;  %430 = vst [vmem:[%s2142_s4 + $0x1d8] sm:$0xff] %v429_v59  ;;  %v431_v60 = vld [vmem:[%s2137_s0 + $0x780] sm:$0xff]  ;;  %v433_v61 = vld [vmem:[%s2137_s0 + $0x788] sm:$0xff] }
  0x74   : > { %v435_v62 = vld [vmem:[%s2137_s0 + $0x7c0] sm:$0xff]  ;;  %432 = vst [vmem:[%s2142_s4 + $0x1e0] sm:$0xff] %v431_v60  ;;  %434 = vst [vmem:[%s2142_s4 + $0x1e8] sm:$0xff] %v433_v61  ;;  %v437_v63 = vld [vmem:[%s2137_s0 + $0x7c8] sm:$0xff] }
  0x75   : > { %436 = vst [vmem:[%s2142_s4 + $0x1f0] sm:$0xff] %v435_v62  ;;  %438 = vst [vmem:[%s2142_s4 + $0x1f8] sm:$0xff] %v437_v63 }
  0x76 PF: > { %p1535_p1 = scmp.ge.s32.totalorder %s1854_s21, 1  ;;  %p443_p2 = scmp.lt.s32.totalorder %s1854_s21, 17 }
  0x78   : > { %p444_p3 = pnand %p1535_p1, %p443_p2 }
  0x79   : > { %s450_s8 = sand.u32 (!%p444_p3), 1, %s1822_s13   ;;  %s457_s29 = sand.u32 (!%p444_p3), 1, %s1814_s11  }
  0x7a   : > { %447 = sbr.rel (%p444_p3) target bundleno = 567 (0x237), region = 66  ;;  %s1536_s22 = sshll.u32 (!%p444_p3), %s450_s8, 9 }
  0x7b   : > { %s1537_s27 = sshll.u32 (!%p444_p3), %s457_s29, 9  ;;  %s478_s24 = sand.u32 (!%p444_p3), 1, %s1806_s9  }
  0x7c   : > { %s1538_s26 = sshll.u32 (!%p444_p3), %s478_s24, 9  ;;  %s2274_s28 = scalar_lea.vmem (!%p444_p3), [#allocation3], %s1536_s22 }
  0x7d   : > { %s2276_s0 = scalar_lea.vmem (!%p444_p3), [#allocation4], %s1537_s27  ;;  %s2278_s30 = scalar_lea.vmem (!%p444_p3), [#allocation5], %s1538_s26 }
  0x7e   : > { %p1539_p4 = scmp.ne.s32.totalorder (!%p444_p3), %s1830_s15, 0 }
  0x81   : > { %490 = sbr.rel (%p1539_p4) target bundleno = 162 (0xa2), region = 78  ;;  %v1856_v0 = vmov (!%p1539_p4), 0.0  }
  0x82   : > { %491 = vst [vmem:[#allocation2] sm:$0xff] (!%p1539_p4), %v1856_v0  ;;  %492 = vst [vmem:[#allocation2 + $0x8] sm:$0xff] (!%p1539_p4), %v1856_v0 }
  0x83   : > { %493 = vst [vmem:[#allocation2 + $0x10] sm:$0xff] (!%p1539_p4), %v1856_v0  ;;  %494 = vst [vmem:[#allocation2 + $0x18] sm:$0xff] (!%p1539_p4), %v1856_v0 }
  0x84   : > { %495 = vst [vmem:[#allocation2 + $0x20] sm:$0xff] (!%p1539_p4), %v1856_v0  ;;  %496 = vst [vmem:[#allocation2 + $0x28] sm:$0xff] (!%p1539_p4), %v1856_v0 }
  0x85   : > { %497 = vst [vmem:[#allocation2 + $0x30] sm:$0xff] (!%p1539_p4), %v1856_v0  ;;  %498 = vst [vmem:[#allocation2 + $0x38] sm:$0xff] (!%p1539_p4), %v1856_v0 }
  0x86   : > { %499 = vst [vmem:[#allocation2 + $0x40] sm:$0xff] (!%p1539_p4), %v1856_v0  ;;  %500 = vst [vmem:[#allocation2 + $0x48] sm:$0xff] (!%p1539_p4), %v1856_v0 }
  0x87   : > { %501 = vst [vmem:[#allocation2 + $0x50] sm:$0xff] (!%p1539_p4), %v1856_v0  ;;  %502 = vst [vmem:[#allocation2 + $0x58] sm:$0xff] (!%p1539_p4), %v1856_v0 }
  0x88   : > { %503 = vst [vmem:[#allocation2 + $0x60] sm:$0xff] %v1856_v0  ;;  %504 = vst [vmem:[#allocation2 + $0x68] sm:$0xff] %v1856_v0 }
  0x89   : > { %505 = vst [vmem:[#allocation2 + $0x70] sm:$0xff] %v1856_v0  ;;  %506 = vst [vmem:[#allocation2 + $0x78] sm:$0xff] %v1856_v0 }
  0x8a   : > { %507 = vst [vmem:[#allocation2 + $0x80] sm:$0xff] %v1856_v0  ;;  %508 = vst [vmem:[#allocation2 + $0x88] sm:$0xff] %v1856_v0 }
  0x8b   : > { %509 = vst [vmem:[#allocation2 + $0x90] sm:$0xff] %v1856_v0  ;;  %510 = vst [vmem:[#allocation2 + $0x98] sm:$0xff] %v1856_v0 }
  0x8c   : > { %511 = vst [vmem:[#allocation2 + $0xa0] sm:$0xff] %v1856_v0  ;;  %512 = vst [vmem:[#allocation2 + $0xa8] sm:$0xff] %v1856_v0 }
  0x8d   : > { %513 = vst [vmem:[#allocation2 + $0xb0] sm:$0xff] %v1856_v0  ;;  %514 = vst [vmem:[#allocation2 + $0xb8] sm:$0xff] %v1856_v0 }
  0x8e   : > { %515 = vst [vmem:[#allocation2 + $0xc0] sm:$0xff] %v1856_v0  ;;  %516 = vst [vmem:[#allocation2 + $0xc8] sm:$0xff] %v1856_v0 }
  0x8f   : > { %517 = vst [vmem:[#allocation2 + $0xd0] sm:$0xff] %v1856_v0  ;;  %518 = vst [vmem:[#allocation2 + $0xd8] sm:$0xff] %v1856_v0 }
  0x90   : > { %519 = vst [vmem:[#allocation2 + $0xe0] sm:$0xff] %v1856_v0  ;;  %520 = vst [vmem:[#allocation2 + $0xe8] sm:$0xff] %v1856_v0 }
  0x91   : > { %521 = vst [vmem:[#allocation2 + $0xf0] sm:$0xff] %v1856_v0  ;;  %522 = vst [vmem:[#allocation2 + $0xf8] sm:$0xff] %v1856_v0 }
  0x92   : > { %523 = vst [vmem:[#allocation2 + $0x100] sm:$0xff] %v1856_v0  ;;  %524 = vst [vmem:[#allocation2 + $0x108] sm:$0xff] %v1856_v0 }
  0x93   : > { %525 = vst [vmem:[#allocation2 + $0x110] sm:$0xff] %v1856_v0  ;;  %526 = vst [vmem:[#allocation2 + $0x118] sm:$0xff] %v1856_v0 }
  0x94   : > { %527 = vst [vmem:[#allocation2 + $0x120] sm:$0xff] %v1856_v0  ;;  %528 = vst [vmem:[#allocation2 + $0x128] sm:$0xff] %v1856_v0 }
  0x95   : > { %529 = vst [vmem:[#allocation2 + $0x130] sm:$0xff] %v1856_v0  ;;  %530 = vst [vmem:[#allocation2 + $0x138] sm:$0xff] %v1856_v0 }
  0x96   : > { %531 = vst [vmem:[#allocation2 + $0x140] sm:$0xff] %v1856_v0  ;;  %532 = vst [vmem:[#allocation2 + $0x148] sm:$0xff] %v1856_v0 }
  0x97   : > { %533 = vst [vmem:[#allocation2 + $0x150] sm:$0xff] %v1856_v0  ;;  %534 = vst [vmem:[#allocation2 + $0x158] sm:$0xff] %v1856_v0 }
  0x98   : > { %535 = vst [vmem:[#allocation2 + $0x160] sm:$0xff] %v1856_v0  ;;  %536 = vst [vmem:[#allocation2 + $0x168] sm:$0xff] %v1856_v0 }
  0x99   : > { %537 = vst [vmem:[#allocation2 + $0x170] sm:$0xff] %v1856_v0  ;;  %538 = vst [vmem:[#allocation2 + $0x178] sm:$0xff] %v1856_v0 }
  0x9a   : > { %539 = vst [vmem:[#allocation2 + $0x180] sm:$0xff] %v1856_v0  ;;  %540 = vst [vmem:[#allocation2 + $0x188] sm:$0xff] %v1856_v0 }
  0x9b   : > { %541 = vst [vmem:[#allocation2 + $0x190] sm:$0xff] %v1856_v0  ;;  %542 = vst [vmem:[#allocation2 + $0x198] sm:$0xff] %v1856_v0 }
  0x9c   : > { %543 = vst [vmem:[#allocation2 + $0x1a0] sm:$0xff] %v1856_v0  ;;  %544 = vst [vmem:[#allocation2 + $0x1a8] sm:$0xff] %v1856_v0 }
  0x9d   : > { %545 = vst [vmem:[#allocation2 + $0x1b0] sm:$0xff] %v1856_v0  ;;  %546 = vst [vmem:[#allocation2 + $0x1b8] sm:$0xff] %v1856_v0 }
  0x9e   : > { %547 = vst [vmem:[#allocation2 + $0x1c0] sm:$0xff] %v1856_v0  ;;  %548 = vst [vmem:[#allocation2 + $0x1c8] sm:$0xff] %v1856_v0 }
  0x9f   : > { %549 = vst [vmem:[#allocation2 + $0x1d0] sm:$0xff] %v1856_v0  ;;  %550 = vst [vmem:[#allocation2 + $0x1d8] sm:$0xff] %v1856_v0 }
  0xa0   : > { %551 = vst [vmem:[#allocation2 + $0x1e0] sm:$0xff] %v1856_v0  ;;  %552 = vst [vmem:[#allocation2 + $0x1e8] sm:$0xff] %v1856_v0 }
  0xa1   : > { %553 = vst [vmem:[#allocation2 + $0x1f0] sm:$0xff] %v1856_v0  ;;  %554 = vst [vmem:[#allocation2 + $0x1f8] sm:$0xff] %v1856_v0 }
  0xa2 PF: > { %v684_v1 = vld [vmem:[%s2276_s0 + $0x8] sm:$0xff]  ;;  %v686_v2 = vld [vmem:[%s2276_s0 + $0x18] sm:$0xff]  ;;  %v683_v3 = vld [vmem:[%s2276_s0] sm:$0xff]  ;;  %p1540_p5 = scmp.ne.s32.totalorder %s1830_s15, 1 }
  0xa3   : > { %v1551_v4 = vpack.c.bf16 %v686_v2, %v684_v1  ;;  %v685_v5 = vld [vmem:[%s2276_s0 + $0x10] sm:$0xff]  ;;  %v688_v6 = vld [vmem:[%s2276_s0 + $0x28] sm:$0xff]  ;;  %v690_v7 = vld [vmem:[%s2276_s0 + $0x38] sm:$0xff] }
  0xa4   : > { %v1553_v8 = vpack.c.bf16 %v685_v5, %v683_v3  ;;  %v1555_v9 = vpack.c.bf16 %v690_v7, %v688_v6  ;;  %v687_v10 = vld [vmem:[%s2276_s0 + $0x20] sm:$0xff]  ;;  %v689_v11 = vld [vmem:[%s2276_s0 + $0x30] sm:$0xff]  ;;  %v692_v12 = vld [vmem:[%s2276_s0 + $0x48] sm:$0xff] }
  0xa5   : > { %1552 = vmatprep.subr.bf16.mxu0 %v1551_v4  ;;  %1615 = vmatprep.subr.bf16.mxu1 %v1551_v4  ;;  %v694_v13 = vld [vmem:[%s2276_s0 + $0x58] sm:$0xff]  ;;  %v1557_v14 = vpack.c.bf16 %v689_v11, %v687_v10  ;;  %v691_v16 = vld [vmem:[%s2276_s0 + $0x40] sm:$0xff]  ;;  %v693_v17 = vld [vmem:[%s2276_s0 + $0x50] sm:$0xff] }
  0xa6   : > { %1554 = vmatpush1.bf16.msra.mxu0 %v1553_v8  ;;  %1631 = vmatpush1.bf16.msra.mxu1 %v1553_v8  ;;  %v1559_v15 = vpack.c.bf16 %v694_v13, %v692_v12  ;;  %v696_v18 = vld [vmem:[%s2276_s0 + $0x68] sm:$0xff]  ;;  %v698_v19 = vld [vmem:[%s2276_s0 + $0x78] sm:$0xff]  ;;  %v1561_v20 = vpack.c.bf16 %v693_v17, %v691_v16  ;;  %v695_v22 = vld [vmem:[%s2276_s0 + $0x60] sm:$0xff] }
  0xa7   : > { %1556 = vmatprep.subr.bf16.mxu0 %v1555_v9  ;;  %1616 = vmatprep.subr.bf16.mxu1 %v1555_v9  ;;  %v1563_v21 = vpack.c.bf16 %v698_v19, %v696_v18  ;;  %v697_v23 = vld [vmem:[%s2276_s0 + $0x70] sm:$0xff]  ;;  %v700_v24 = vld [vmem:[%s2276_s0 + $0x88] sm:$0xff]  ;;  %v702_v25 = vld [vmem:[%s2276_s0 + $0x98] sm:$0xff] }
  0xa8   : > { %v1565_v26 = vpack.c.bf16 %v697_v23, %v695_v22  ;;  %v1567_v27 = vpack.c.bf16 %v702_v25, %v700_v24  ;;  %v699_v28 = vld [vmem:[%s2276_s0 + $0x80] sm:$0xff]  ;;  %v701_v29 = vld [vmem:[%s2276_s0 + $0x90] sm:$0xff]  ;;  %v704_v30 = vld [vmem:[%s2276_s0 + $0xa8] sm:$0xff] }
  0xa9   : > { %v706_v31 = vld [vmem:[%s2276_s0 + $0xb8] sm:$0xff]  ;;  %v1569_v32 = vpack.c.bf16 %v701_v29, %v699_v28  ;;  %v703_v34 = vld [vmem:[%s2276_s0 + $0xa0] sm:$0xff]  ;;  %v705_v35 = vld [vmem:[%s2276_s0 + $0xb0] sm:$0xff] }
  0xaa   : > { %1558 = vmatpush1.bf16.msra.mxu0 %v1557_v14  ;;  %1632 = vmatpush1.bf16.msra.mxu1 %v1557_v14  ;;  %v1571_v33 = vpack.c.bf16 %v706_v31, %v704_v30  ;;  %v708_v36 = vld [vmem:[%s2276_s0 + $0xc8] sm:$0xff]  ;;  %v710_v37 = vld [vmem:[%s2276_s0 + $0xd8] sm:$0xff]  ;;  %v1573_v38 = vpack.c.bf16 %v705_v35, %v703_v34  ;;  %v707_v39 = vld [vmem:[%s2276_s0 + $0xc0] sm:$0xff] }
  0xab   : > { %1560 = vmatprep.subr.bf16.mxu0 %v1559_v15  ;;  %1617 = vmatprep.subr.bf16.mxu1 %v1559_v15  ;;  %v1575_v40 = vpack.c.bf16 %v710_v37, %v708_v36  ;;  %v709_v41 = vld [vmem:[%s2276_s0 + $0xd0] sm:$0xff]  ;;  %v620_v42 = vld [vmem:[%s2274_s28 + $0x8] sm:$0xff]  ;;  %v714_v45 = vld [vmem:[%s2276_s0 + $0xf8] sm:$0xff] }
  0xac   : > { %v652_v43 = vld [vmem:[%s2274_s28 + $0x108] sm:$0xff]  ;;  %811 = vmatprep.mubr.f32.mxu0 %v620_v42  ;;  %v1577_v46 = vpack.c.bf16 %v709_v41, %v707_v39  ;;  %v711_v48 = vld [vmem:[%s2276_s0 + $0xe0] sm:$0xff]  ;;  %v713_v49 = vld [vmem:[%s2276_s0 + $0xf0] sm:$0xff] }
  0xad   : > { %v712_v44 = vld [vmem:[%s2276_s0 + $0xe8] sm:$0xff]  ;;  %907 = vmatprep.mubr.f32.mxu1 %v652_v43  ;;  %v718_v51 = vld [vmem:[%s2276_s0 + $0x118] sm:$0xff]  ;;  %v1581_v52 = vpack.c.bf16 %v713_v49, %v711_v48  ;;  %v715_v54 = vld [vmem:[%s2276_s0 + $0x100] sm:$0xff] }
  0xae   : > { %1562 = vmatpush1.bf16.msra.mxu0 %v1561_v20  ;;  %1633 = vmatpush1.bf16.msra.mxu1 %v1561_v20  ;;  %v1579_v47 = vpack.c.bf16 %v714_v45, %v712_v44  ;;  %v716_v50 = vld [vmem:[%s2276_s0 + $0x108] sm:$0xff]  ;;  %v717_v55 = vld [vmem:[%s2276_s0 + $0x110] sm:$0xff]  ;;  %v722_v57 = vld [vmem:[%s2276_s0 + $0x138] sm:$0xff] }
  0xaf   : > { %1564 = vmatprep.subr.bf16.mxu0 %v1563_v21  ;;  %1618 = vmatprep.subr.bf16.mxu1 %v1563_v21  ;;  %v1583_v53 = vpack.c.bf16 %v718_v51, %v716_v50  ;;  %v720_v56 = vld [vmem:[%s2276_s0 + $0x128] sm:$0xff]  ;;  %v1585_v58 = vpack.c.bf16 %v717_v55, %v715_v54  ;;  %v719_v60 = vld [vmem:[%s2276_s0 + $0x120] sm:$0xff]  ;;  %v721_v61 = vld [vmem:[%s2276_s0 + $0x130] sm:$0xff] }
  0xb0   : > { %v1587_v59 = vpack.c.bf16 %v722_v57, %v720_v56  ;;  %v724_v62 = vld [vmem:[%s2276_s0 + $0x148] sm:$0xff]  ;;  %v726_v63 = vld [vmem:[%s2276_s0 + $0x158] sm:$0xff]  ;;  %v1589_v0 = vpack.c.bf16 %v721_v61, %v719_v60  ;;  %v723_v2 = vld [vmem:[%s2276_s0 + $0x140] sm:$0xff] }
  0xb1   : > { %v1591_v1 = vpack.c.bf16 %v726_v63, %v724_v62  ;;  %v725_v3 = vld [vmem:[%s2276_s0 + $0x150] sm:$0xff]  ;;  %v728_v4 = vld [vmem:[%s2276_s0 + $0x168] sm:$0xff]  ;;  %v730_v5 = vld [vmem:[%s2276_s0 + $0x178] sm:$0xff] }
  0xb2   : > { %1566 = vmatpush1.bf16.msra.mxu0 %v1565_v26  ;;  %1634 = vmatpush1.bf16.msra.mxu1 %v1565_v26  ;;  %v1593_v6 = vpack.c.bf16 %v725_v3, %v723_v2  ;;  %v1595_v7 = vpack.c.bf16 %v730_v5, %v728_v4  ;;  %v727_v8 = vld [vmem:[%s2276_s0 + $0x160] sm:$0xff]  ;;  %v729_v9 = vld [vmem:[%s2276_s0 + $0x170] sm:$0xff]  ;;  %v732_v10 = vld [vmem:[%s2276_s0 + $0x188] sm:$0xff] }
  0xb3   : > { %1568 = vmatprep.subr.bf16.mxu0 %v1567_v27  ;;  %1619 = vmatprep.subr.bf16.mxu1 %v1567_v27  ;;  %v734_v11 = vld [vmem:[%s2276_s0 + $0x198] sm:$0xff]  ;;  %v1597_v12 = vpack.c.bf16 %v729_v9, %v727_v8  ;;  %v731_v14 = vld [vmem:[%s2276_s0 + $0x180] sm:$0xff]  ;;  %v733_v15 = vld [vmem:[%s2276_s0 + $0x190] sm:$0xff] }
  0xb4   : > { %v1599_v13 = vpack.c.bf16 %v734_v11, %v732_v10  ;;  %v736_v16 = vld [vmem:[%s2276_s0 + $0x1a8] sm:$0xff]  ;;  %v738_v17 = vld [vmem:[%s2276_s0 + $0x1b8] sm:$0xff]  ;;  %v1601_v18 = vpack.c.bf16 %v733_v15, %v731_v14  ;;  %v735_v20 = vld [vmem:[%s2276_s0 + $0x1a0] sm:$0xff] }
  0xb5   : > { %v1603_v19 = vpack.c.bf16 %v738_v17, %v736_v16  ;;  %v737_v21 = vld [vmem:[%s2276_s0 + $0x1b0] sm:$0xff]  ;;  %v740_v22 = vld [vmem:[%s2276_s0 + $0x1c8] sm:$0xff]  ;;  %v742_v23 = vld [vmem:[%s2276_s0 + $0x1d8] sm:$0xff] }
  0xb6   : > { %1570 = vmatpush1.bf16.msra.mxu0 %v1569_v32  ;;  %1635 = vmatpush1.bf16.msra.mxu1 %v1569_v32  ;;  %v1605_v24 = vpack.c.bf16 %v737_v21, %v735_v20  ;;  %v1607_v25 = vpack.c.bf16 %v742_v23, %v740_v22  ;;  %v739_v26 = vld [vmem:[%s2276_s0 + $0x1c0] sm:$0xff]  ;;  %v741_v27 = vld [vmem:[%s2276_s0 + $0x1d0] sm:$0xff]  ;;  %v744_v28 = vld [vmem:[%s2276_s0 + $0x1e8] sm:$0xff] }
  0xb7   : > { %1572 = vmatprep.subr.bf16.mxu0 %v1571_v33  ;;  %1620 = vmatprep.subr.bf16.mxu1 %v1571_v33  ;;  %v746_v29 = vld [vmem:[%s2276_s0 + $0x1f8] sm:$0xff]  ;;  %v1609_v30 = vpack.c.bf16 %v741_v27, %v739_v26  ;;  %v743_v32 = vld [vmem:[%s2276_s0 + $0x1e0] sm:$0xff]  ;;  %v745_v33 = vld [vmem:[%s2276_s0 + $0x1f0] sm:$0xff] }
  0xb8   : > { %v1611_v31 = vpack.c.bf16 %v746_v29, %v744_v28  ;;  %v1613_v34 = vpack.c.bf16 %v745_v33, %v743_v32  ;;  %v619_v35 = vld [vmem:[%s2274_s28] sm:$0xff]  ;;  %v622_v37 = vld [vmem:[%s2274_s28 + $0x18] sm:$0xff]  ;;  %v621_v39 = vld [vmem:[%s2274_s28 + $0x10] sm:$0xff] }
  0xb9   : > { %v651_v36 = vld [vmem:[%s2274_s28 + $0x100] sm:$0xff]  ;;  %v624_v41 = vld [vmem:[%s2274_s28 + $0x28] sm:$0xff]  ;;  %v626_v45 = vld [vmem:[%s2274_s28 + $0x38] sm:$0xff] }
  0xba   : > { %1574 = vmatpush1.bf16.msra.mxu0 %v1573_v38  ;;  %1636 = vmatpush1.bf16.msra.mxu1 %v1573_v38  ;;  %v654_v38 = vld [vmem:[%s2274_s28 + $0x118] sm:$0xff]  ;;  %v656_v42 = vld [vmem:[%s2274_s28 + $0x128] sm:$0xff]  ;;  %v623_v43 = vld [vmem:[%s2274_s28 + $0x20] sm:$0xff] }
  0xbb   : > { %1576 = vmatprep.subr.bf16.mxu0 %v1575_v40  ;;  %1621 = vmatprep.subr.bf16.mxu1 %v1575_v40  ;;  %v653_v40 = vld [vmem:[%s2274_s28 + $0x110] sm:$0xff]  ;;  %v655_v44 = vld [vmem:[%s2274_s28 + $0x120] sm:$0xff]  ;;  %v628_v49 = vld [vmem:[%s2274_s28 + $0x48] sm:$0xff] }
  0xbc   : > { %v657_v48 = vld [vmem:[%s2274_s28 + $0x130] sm:$0xff]  ;;  %v660_v50 = vld [vmem:[%s2274_s28 + $0x148] sm:$0xff]  ;;  %v627_v51 = vld [vmem:[%s2274_s28 + $0x40] sm:$0xff] }
  0xbd   : > { %v662_v54 = vld [vmem:[%s2274_s28 + $0x158] sm:$0xff]  ;;  %v629_v55 = vld [vmem:[%s2274_s28 + $0x50] sm:$0xff]  ;;  %v632_v57 = vld [vmem:[%s2274_s28 + $0x68] sm:$0xff] }
  0xbe   : > { %1578 = vmatpush1.bf16.msra.mxu0 %v1577_v46  ;;  %1637 = vmatpush1.bf16.msra.mxu1 %v1577_v46  ;;  %v658_v46 = vld [vmem:[%s2274_s28 + $0x138] sm:$0xff]  ;;  %v661_v56 = vld [vmem:[%s2274_s28 + $0x150] sm:$0xff]  ;;  %v663_v60 = vld [vmem:[%s2274_s28 + $0x160] sm:$0xff] }
  0xbf   : > { %1580 = vmatprep.subr.bf16.mxu0 %v1579_v47  ;;  %1622 = vmatprep.subr.bf16.mxu1 %v1579_v47  ;;  %v625_v47 = vld [vmem:[%s2274_s28 + $0x30] sm:$0xff]  ;;  %v634_v61 = vld [vmem:[%s2274_s28 + $0x78] sm:$0xff]  ;;  %v668_v2 = vld [vmem:[%s2274_s28 + $0x188] sm:$0xff] }
  0xc0   : > { %v666_v62 = vld [vmem:[%s2274_s28 + $0x178] sm:$0xff]  ;;  %v633_v63 = vld [vmem:[%s2274_s28 + $0x70] sm:$0xff]  ;;  %v635_v3 = vld [vmem:[%s2274_s28 + $0x80] sm:$0xff] }
  0xc1   : > { %v667_v4 = vld [vmem:[%s2274_s28 + $0x180] sm:$0xff]  ;;  %v638_v5 = vld [vmem:[%s2274_s28 + $0x98] sm:$0xff]  ;;  %v669_v8 = vld [vmem:[%s2274_s28 + $0x190] sm:$0xff] }
  0xc2   : > { %1582 = vmatpush1.bf16.msra.mxu0 %v1581_v52  ;;  %1638 = vmatpush1.bf16.msra.mxu1 %v1581_v52  ;;  %v659_v52 = vld [vmem:[%s2274_s28 + $0x140] sm:$0xff]  ;;  %v640_v9 = vld [vmem:[%s2274_s28 + $0xa8] sm:$0xff]  ;;  %v674_v14 = vld [vmem:[%s2274_s28 + $0x1b8] sm:$0xff] }
  0xc3   : > { %1584 = vmatprep.subr.bf16.mxu0 %v1583_v53  ;;  %1623 = vmatprep.subr.bf16.mxu1 %v1583_v53  ;;  %v630_v53 = vld [vmem:[%s2274_s28 + $0x58] sm:$0xff]  ;;  %v672_v10 = vld [vmem:[%s2274_s28 + $0x1a8] sm:$0xff]  ;;  %v639_v11 = vld [vmem:[%s2274_s28 + $0xa0] sm:$0xff] }
  0xc4   : > { %v641_v15 = vld [vmem:[%s2274_s28 + $0xb0] sm:$0xff]  ;;  %v644_v17 = vld [vmem:[%s2274_s28 + $0xc8] sm:$0xff]  ;;  %v675_v20 = vld [vmem:[%s2274_s28 + $0x1c0] sm:$0xff] }
  0xc5   : > { %v673_v16 = vld [vmem:[%s2274_s28 + $0x1b0] sm:$0xff]  ;;  %v646_v21 = vld [vmem:[%s2274_s28 + $0xd8] sm:$0xff]  ;;  %v680_v26 = vld [vmem:[%s2274_s28 + $0x1e8] sm:$0xff] }
  0xc6   : > { %1586 = vmatpush1.bf16.msra.mxu0 %v1585_v58  ;;  %1639 = vmatpush1.bf16.msra.mxu1 %v1585_v58  ;;  %v664_v58 = vld [vmem:[%s2274_s28 + $0x168] sm:$0xff]  ;;  %v678_v22 = vld [vmem:[%s2274_s28 + $0x1d8] sm:$0xff]  ;;  %v645_v23 = vld [vmem:[%s2274_s28 + $0xd0] sm:$0xff] }
  0xc7   : > { %1588 = vmatprep.subr.bf16.mxu0 %v1587_v59  ;;  %1624 = vmatprep.subr.bf16.mxu1 %v1587_v59  ;;  %v631_v59 = vld [vmem:[%s2274_s28 + $0x60] sm:$0xff]  ;;  %v650_v29 = vld [vmem:[%s2274_s28 + $0xf8] sm:$0xff]  ;;  %v681_v32 = vld [vmem:[%s2274_s28 + $0x1f0] sm:$0xff] }
  0xc8   : > { %v647_v27 = vld [vmem:[%s2274_s28 + $0xe0] sm:$0xff] }
  0xc9   : > { %v679_v28 = vld [vmem:[%s2274_s28 + $0x1e0] sm:$0xff] }
  0xca   : > { %1590 = vmatpush1.bf16.msra.mxu0 %v1589_v0  ;;  %1640 = vmatpush1.bf16.msra.mxu1 %v1589_v0  ;;  %v665_v0 = vld [vmem:[%s2274_s28 + $0x170] sm:$0xff]  ;;  %v555_v33 = vld [vmem:[#allocation2] sm:$0xff] }
  0xcb   : > { %1592 = vmatprep.subr.bf16.mxu0 %v1591_v1  ;;  %1625 = vmatprep.subr.bf16.mxu1 %v1591_v1  ;;  %v636_v1 = vld [vmem:[%s2274_s28 + $0x88] sm:$0xff] }
  0xce   : > { %1594 = vmatpush1.bf16.msra.mxu0 %v1593_v6  ;;  %1641 = vmatpush1.bf16.msra.mxu1 %v1593_v6  ;;  %v670_v6 = vld [vmem:[%s2274_s28 + $0x198] sm:$0xff] }
  0xcf   : > { %1596 = vmatprep.subr.bf16.mxu0 %v1595_v7  ;;  %1626 = vmatprep.subr.bf16.mxu1 %v1595_v7  ;;  %v637_v7 = vld [vmem:[%s2274_s28 + $0x90] sm:$0xff] }
  0xd2   : > { %1598 = vmatpush1.bf16.msra.mxu0 %v1597_v12  ;;  %1642 = vmatpush1.bf16.msra.mxu1 %v1597_v12  ;;  %v671_v12 = vld [vmem:[%s2274_s28 + $0x1a0] sm:$0xff] }
  0xd3   : > { %1600 = vmatprep.subr.bf16.mxu0 %v1599_v13  ;;  %1627 = vmatprep.subr.bf16.mxu1 %v1599_v13  ;;  %v642_v13 = vld [vmem:[%s2274_s28 + $0xb8] sm:$0xff] }
  0xd6   : > { %1602 = vmatpush1.bf16.msra.mxu0 %v1601_v18  ;;  %1643 = vmatpush1.bf16.msra.mxu1 %v1601_v18  ;;  %v676_v18 = vld [vmem:[%s2274_s28 + $0x1c8] sm:$0xff] }
  0xd7   : > { %1604 = vmatprep.subr.bf16.mxu0 %v1603_v19  ;;  %1628 = vmatprep.subr.bf16.mxu1 %v1603_v19  ;;  %v643_v19 = vld [vmem:[%s2274_s28 + $0xc0] sm:$0xff] }
  0xda   : > { %1606 = vmatpush1.bf16.msra.mxu0 %v1605_v24  ;;  %1644 = vmatpush1.bf16.msra.mxu1 %v1605_v24  ;;  %v677_v24 = vld [vmem:[%s2274_s28 + $0x1d0] sm:$0xff] }
  0xdb   : > { %1608 = vmatprep.subr.bf16.mxu0 %v1607_v25  ;;  %1629 = vmatprep.subr.bf16.mxu1 %v1607_v25  ;;  %v648_v25 = vld [vmem:[%s2274_s28 + $0xe8] sm:$0xff] }
  0xde   : > { %1610 = vmatpush1.bf16.msra.mxu0 %v1609_v30  ;;  %1645 = vmatpush1.bf16.msra.mxu1 %v1609_v30  ;;  %v682_v30 = vld [vmem:[%s2274_s28 + $0x1f8] sm:$0xff] }
  0xdf   : > { %1612 = vmatprep.subr.bf16.mxu0 %v1611_v31  ;;  %1630 = vmatprep.subr.bf16.mxu1 %v1611_v31  ;;  %v649_v31 = vld [vmem:[%s2274_s28 + $0xf0] sm:$0xff] }
  0xe2   : > { %1614 = vmatpush1.bf16.msra.mxu0 %v1613_v34  ;;  %1646 = vmatpush1.bf16.msra.mxu1 %v1613_v34  ;;  %v587_v34 = vld [vmem:[#allocation2 + $0x100] sm:$0xff] }
  0xe5   : > { %812 = vmatmul.mubr.f32.vlgmr.msra.gmra.mrb[0].mxu0 %v619_v35  ;;  %908 = vmatmul.mubr.f32.vlgmr.msra.gmra.mrb[0].mxu1 %v651_v36  ;;  %v556_v35 = vld [vmem:[#allocation2 + $0x8] sm:$0xff] }
  0xe6   : > { %817 = vmatprep.mubr.f32.mxu0 %v622_v37  ;;  %913 = vmatprep.mubr.f32.mxu1 %v654_v38  ;;  %v588_v36 = vld [vmem:[#allocation2 + $0x108] sm:$0xff] }
  0xe9   : > { %818 = vmatmul.mubr.f32.gmra.mrb[2].mxu0 %v621_v39  ;;  %914 = vmatmul.mubr.f32.gmra.mrb[2].mxu1 %v653_v40 }
  0xea   : > { %823 = vmatprep.mubr.f32.mxu0 %v624_v41  ;;  %919 = vmatprep.mubr.f32.mxu1 %v656_v42 }
  0xed   : > { %824 = vmatmul.mubr.f32.gmra.mrb[4].mxu0 %v623_v43  ;;  %920 = vmatmul.mubr.f32.gmra.mrb[4].mxu1 %v655_v44 }
  0xee   : > { %829 = vmatprep.mubr.f32.mxu0 %v626_v45  ;;  %925 = vmatprep.mubr.f32.mxu1 %v658_v46  ;;  %v557_v45 = vld [vmem:[#allocation2 + $0x10] sm:$0xff] }
  0xef   : > { %v589_v46 = vld [vmem:[#allocation2 + $0x110] sm:$0xff] }
  0xf1   : > { %830 = vmatmul.mubr.f32.gmra.mrb[6].mxu0 %v625_v47  ;;  %926 = vmatmul.mubr.f32.gmra.mrb[6].mxu1 %v657_v48  ;;  %v558_v47 = vld [vmem:[#allocation2 + $0x18] sm:$0xff] }
  0xf2   : > { %835 = vmatprep.mubr.f32.mxu0 %v628_v49  ;;  %931 = vmatprep.mubr.f32.mxu1 %v660_v50  ;;  %v590_v48 = vld [vmem:[#allocation2 + $0x118] sm:$0xff] }
  0xf5   : > { %836 = vmatmul.mubr.f32.gmra.mrb[8].mxu0 %v627_v51  ;;  %932 = vmatmul.mubr.f32.gmra.mrb[8].mxu1 %v659_v52 }
  0xf6   : > { %841 = vmatprep.mubr.f32.mxu0 %v630_v53  ;;  %937 = vmatprep.mubr.f32.mxu1 %v662_v54 }
  0xf9   : > { %842 = vmatmul.mubr.f32.gmra.mrb[10].mxu0 %v629_v55  ;;  %938 = vmatmul.mubr.f32.gmra.mrb[10].mxu1 %v661_v56 }
  0xfa   : > { %847 = vmatprep.mubr.f32.mxu0 %v632_v57  ;;  %943 = vmatprep.mubr.f32.mxu1 %v664_v58  ;;  %v559_v57 = vld [vmem:[#allocation2 + $0x20] sm:$0xff] }
  0xfb   : > { %v591_v58 = vld [vmem:[#allocation2 + $0x120] sm:$0xff] }
  0xfd   : > { %848 = vmatmul.mubr.f32.gmra.mrb[12].mxu0 %v631_v59  ;;  %944 = vmatmul.mubr.f32.gmra.mrb[12].mxu1 %v663_v60  ;;  %v560_v59 = vld [vmem:[#allocation2 + $0x28] sm:$0xff] }
  0xfe   : > { %853 = vmatprep.mubr.f32.mxu0 %v634_v61  ;;  %949 = vmatprep.mubr.f32.mxu1 %v666_v62  ;;  %v592_v60 = vld [vmem:[#allocation2 + $0x128] sm:$0xff] }
 0x101   : > { %854 = vmatmul.mubr.f32.gmra.mrb[14].mxu0 %v633_v63  ;;  %950 = vmatmul.mubr.f32.gmra.mrb[14].mxu1 %v665_v0 }
 0x102   : > { %859 = vmatprep.mubr.f32.mxu0 %v636_v1  ;;  %955 = vmatprep.mubr.f32.mxu1 %v668_v2 }
 0x105   : > { %860 = vmatmul.mubr.f32.gmra.mrb[16].mxu0 %v635_v3  ;;  %956 = vmatmul.mubr.f32.gmra.mrb[16].mxu1 %v667_v4 }
 0x106   : > { %865 = vmatprep.mubr.f32.mxu0 %v638_v5  ;;  %961 = vmatprep.mubr.f32.mxu1 %v670_v6  ;;  %v561_v5 = vld [vmem:[#allocation2 + $0x30] sm:$0xff] }
 0x107   : > { %v593_v6 = vld [vmem:[#allocation2 + $0x130] sm:$0xff] }
 0x109   : > { %866 = vmatmul.mubr.f32.gmra.mrb[18].mxu0 %v637_v7  ;;  %962 = vmatmul.mubr.f32.gmra.mrb[18].mxu1 %v669_v8  ;;  %v562_v7 = vld [vmem:[#allocation2 + $0x38] sm:$0xff] }
 0x10a   : > { %871 = vmatprep.mubr.f32.mxu0 %v640_v9  ;;  %967 = vmatprep.mubr.f32.mxu1 %v672_v10  ;;  %v594_v8 = vld [vmem:[#allocation2 + $0x138] sm:$0xff] }
 0x10d   : > { %872 = vmatmul.mubr.f32.gmra.mrb[20].mxu0 %v639_v11  ;;  %968 = vmatmul.mubr.f32.gmra.mrb[20].mxu1 %v671_v12 }
 0x10e   : > { %877 = vmatprep.mubr.f32.mxu0 %v642_v13  ;;  %973 = vmatprep.mubr.f32.mxu1 %v674_v14 }
 0x111   : > { %878 = vmatmul.mubr.f32.gmra.mrb[22].mxu0 %v641_v15  ;;  %974 = vmatmul.mubr.f32.gmra.mrb[22].mxu1 %v673_v16 }
 0x112   : > { %883 = vmatprep.mubr.f32.mxu0 %v644_v17  ;;  %979 = vmatprep.mubr.f32.mxu1 %v676_v18  ;;  %v563_v17 = vld [vmem:[#allocation2 + $0x40] sm:$0xff] }
 0x113   : > { %v595_v18 = vld [vmem:[#allocation2 + $0x140] sm:$0xff] }
 0x115   : > { %884 = vmatmul.mubr.f32.gmra.mrb[24].mxu0 %v643_v19  ;;  %980 = vmatmul.mubr.f32.gmra.mrb[24].mxu1 %v675_v20  ;;  %v564_v19 = vld [vmem:[#allocation2 + $0x48] sm:$0xff] }
 0x116   : > { %889 = vmatprep.mubr.f32.mxu0 %v646_v21  ;;  %985 = vmatprep.mubr.f32.mxu1 %v678_v22  ;;  %v596_v20 = vld [vmem:[#allocation2 + $0x148] sm:$0xff] }
 0x119   : > { %890 = vmatmul.mubr.f32.gmra.mrb[26].mxu0 %v645_v23  ;;  %986 = vmatmul.mubr.f32.gmra.mrb[26].mxu1 %v677_v24 }
 0x11a   : > { %895 = vmatprep.mubr.f32.mxu0 %v648_v25  ;;  %991 = vmatprep.mubr.f32.mxu1 %v680_v26 }
 0x11d   : > { %896 = vmatmul.mubr.f32.gmra.mrb[28].mxu0 %v647_v27  ;;  %992 = vmatmul.mubr.f32.gmra.mrb[28].mxu1 %v679_v28 }
 0x11e   : > { %901 = vmatprep.mubr.f32.mxu0 %v650_v29  ;;  %997 = vmatprep.mubr.f32.mxu1 %v682_v30  ;;  %v565_v29 = vld [vmem:[#allocation2 + $0x50] sm:$0xff] }
 0x11f   : > { %v597_v30 = vld [vmem:[#allocation2 + $0x150] sm:$0xff] }
 0x121   : > { %902 = vmatmul.mubr.f32.gmra.mrb[30].mxu0 %v649_v31  ;;  %998 = vmatmul.mubr.f32.gmra.mrb[30].mxu1 %v681_v32  ;;  %v566_v31 = vld [vmem:[#allocation2 + $0x58] sm:$0xff] }
 0x122   : > { %v598_v32 = vld [vmem:[#allocation2 + $0x158] sm:$0xff] }
 0x1b8   : > { %v813_v37 = vpop.f32.mrb[0].mxu0  ;;  %v909_v38 = vpop.f32.mrb[0].mxu1 }
 0x1b9   : > { %v1004_v39 = vadd.f32 %v813_v37, %v555_v33  ;;  %v1036_v40 = vadd.f32 %v909_v38, %v587_v34  ;;  %v815_v41 = vpop.f32.mrb[1].mxu0  ;;  %v911_v42 = vpop.f32.mrb[1].mxu1 }
 0x1ba   : > { %v1005_v43 = vadd.f32 %v815_v41, %v556_v35  ;;  %v1037_v44 = vadd.f32 %v911_v42, %v588_v36  ;;  %v567_v41 = vld [vmem:[#allocation2 + $0x60] sm:$0xff] }
 0x1bb   : > { %1068 = vst [vmem:[#allocation2] sm:$0xff] %v1004_v39  ;;  %1100 = vst [vmem:[#allocation2 + $0x100] sm:$0xff] %v1036_v40  ;;  %v599_v42 = vld [vmem:[#allocation2 + $0x160] sm:$0xff] }
 0x1bc   : > { %1069 = vst [vmem:[#allocation2 + $0x8] sm:$0xff] %v1005_v43  ;;  %1101 = vst [vmem:[#allocation2 + $0x108] sm:$0xff] %v1037_v44  ;;  %v819_v49 = vpop.f32.mrb[2].mxu0  ;;  %v915_v50 = vpop.f32.mrb[2].mxu1  ;;  %v568_v43 = vld [vmem:[#allocation2 + $0x68] sm:$0xff] }
 0x1bd   : > { %v1006_v51 = vadd.f32 %v819_v49, %v557_v45  ;;  %v1038_v52 = vadd.f32 %v915_v50, %v589_v46  ;;  %v821_v53 = vpop.f32.mrb[3].mxu0  ;;  %v917_v54 = vpop.f32.mrb[3].mxu1  ;;  %v600_v44 = vld [vmem:[#allocation2 + $0x168] sm:$0xff] }
 0x1be   : > { %v1007_v55 = vadd.f32 %v821_v53, %v558_v47  ;;  %v1039_v56 = vadd.f32 %v917_v54, %v590_v48  ;;  %v569_v53 = vld [vmem:[#allocation2 + $0x70] sm:$0xff] }
 0x1bf   : > { %1070 = vst [vmem:[#allocation2 + $0x10] sm:$0xff] %v1006_v51  ;;  %1102 = vst [vmem:[#allocation2 + $0x110] sm:$0xff] %v1038_v52  ;;  %v601_v54 = vld [vmem:[#allocation2 + $0x170] sm:$0xff] }
 0x1c0   : > { %1071 = vst [vmem:[#allocation2 + $0x18] sm:$0xff] %v1007_v55  ;;  %1103 = vst [vmem:[#allocation2 + $0x118] sm:$0xff] %v1039_v56  ;;  %v825_v61 = vpop.f32.mrb[4].mxu0  ;;  %v921_v62 = vpop.f32.mrb[4].mxu1  ;;  %v570_v55 = vld [vmem:[#allocation2 + $0x78] sm:$0xff] }
 0x1c1   : > { %v1008_v63 = vadd.f32 %v825_v61, %v559_v57  ;;  %v1040_v0 = vadd.f32 %v921_v62, %v591_v58  ;;  %v827_v1 = vpop.f32.mrb[5].mxu0  ;;  %v923_v2 = vpop.f32.mrb[5].mxu1  ;;  %v602_v56 = vld [vmem:[#allocation2 + $0x178] sm:$0xff] }
 0x1c2   : > { %v1009_v3 = vadd.f32 %v827_v1, %v560_v59  ;;  %v1041_v4 = vadd.f32 %v923_v2, %v592_v60  ;;  %v571_v1 = vld [vmem:[#allocation2 + $0x80] sm:$0xff] }
 0x1c3   : > { %1072 = vst [vmem:[#allocation2 + $0x20] sm:$0xff] %v1008_v63  ;;  %1104 = vst [vmem:[#allocation2 + $0x120] sm:$0xff] %v1040_v0  ;;  %v603_v2 = vld [vmem:[#allocation2 + $0x180] sm:$0xff] }
 0x1c4   : > { %1073 = vst [vmem:[#allocation2 + $0x28] sm:$0xff] %v1009_v3  ;;  %1105 = vst [vmem:[#allocation2 + $0x128] sm:$0xff] %v1041_v4  ;;  %v831_v9 = vpop.f32.mrb[6].mxu0  ;;  %v927_v10 = vpop.f32.mrb[6].mxu1  ;;  %v572_v3 = vld [vmem:[#allocation2 + $0x88] sm:$0xff] }
 0x1c5   : > { %v1010_v11 = vadd.f32 %v831_v9, %v561_v5  ;;  %v1042_v12 = vadd.f32 %v927_v10, %v593_v6  ;;  %v833_v13 = vpop.f32.mrb[7].mxu0  ;;  %v929_v14 = vpop.f32.mrb[7].mxu1  ;;  %v604_v4 = vld [vmem:[#allocation2 + $0x188] sm:$0xff] }
 0x1c6   : > { %v1011_v15 = vadd.f32 %v833_v13, %v562_v7  ;;  %v1043_v16 = vadd.f32 %v929_v14, %v594_v8  ;;  %v573_v13 = vld [vmem:[#allocation2 + $0x90] sm:$0xff] }
 0x1c7   : > { %1074 = vst [vmem:[#allocation2 + $0x30] sm:$0xff] %v1010_v11  ;;  %1106 = vst [vmem:[#allocation2 + $0x130] sm:$0xff] %v1042_v12  ;;  %v605_v14 = vld [vmem:[#allocation2 + $0x190] sm:$0xff] }
 0x1c8   : > { %1075 = vst [vmem:[#allocation2 + $0x38] sm:$0xff] %v1011_v15  ;;  %1107 = vst [vmem:[#allocation2 + $0x138] sm:$0xff] %v1043_v16  ;;  %v837_v21 = vpop.f32.mrb[8].mxu0  ;;  %v933_v22 = vpop.f32.mrb[8].mxu1  ;;  %v574_v15 = vld [vmem:[#allocation2 + $0x98] sm:$0xff] }
 0x1c9   : > { %v1012_v23 = vadd.f32 %v837_v21, %v563_v17  ;;  %v1044_v24 = vadd.f32 %v933_v22, %v595_v18  ;;  %v839_v25 = vpop.f32.mrb[9].mxu0  ;;  %v935_v26 = vpop.f32.mrb[9].mxu1  ;;  %v606_v16 = vld [vmem:[#allocation2 + $0x198] sm:$0xff] }
 0x1ca   : > { %v1013_v27 = vadd.f32 %v839_v25, %v564_v19  ;;  %v1045_v28 = vadd.f32 %v935_v26, %v596_v20  ;;  %v575_v25 = vld [vmem:[#allocation2 + $0xa0] sm:$0xff] }
 0x1cb   : > { %1076 = vst [vmem:[#allocation2 + $0x40] sm:$0xff] %v1012_v23  ;;  %1108 = vst [vmem:[#allocation2 + $0x140] sm:$0xff] %v1044_v24  ;;  %v607_v26 = vld [vmem:[#allocation2 + $0x1a0] sm:$0xff] }
 0x1cc   : > { %1077 = vst [vmem:[#allocation2 + $0x48] sm:$0xff] %v1013_v27  ;;  %1109 = vst [vmem:[#allocation2 + $0x148] sm:$0xff] %v1045_v28  ;;  %v843_v33 = vpop.f32.mrb[10].mxu0  ;;  %v939_v34 = vpop.f32.mrb[10].mxu1  ;;  %v576_v27 = vld [vmem:[#allocation2 + $0xa8] sm:$0xff] }
 0x1cd   : > { %v1014_v35 = vadd.f32 %v843_v33, %v565_v29  ;;  %v1046_v36 = vadd.f32 %v939_v34, %v597_v30  ;;  %v845_v37 = vpop.f32.mrb[11].mxu0  ;;  %v941_v38 = vpop.f32.mrb[11].mxu1  ;;  %v608_v28 = vld [vmem:[#allocation2 + $0x1a8] sm:$0xff] }
 0x1ce   : > { %v1015_v39 = vadd.f32 %v845_v37, %v566_v31  ;;  %v1047_v40 = vadd.f32 %v941_v38, %v598_v32  ;;  %v577_v37 = vld [vmem:[#allocation2 + $0xb0] sm:$0xff] }
 0x1cf   : > { %1078 = vst [vmem:[#allocation2 + $0x50] sm:$0xff] %v1014_v35  ;;  %1110 = vst [vmem:[#allocation2 + $0x150] sm:$0xff] %v1046_v36  ;;  %v609_v38 = vld [vmem:[#allocation2 + $0x1b0] sm:$0xff] }
 0x1d0   : > { %1079 = vst [vmem:[#allocation2 + $0x58] sm:$0xff] %v1015_v39  ;;  %1111 = vst [vmem:[#allocation2 + $0x158] sm:$0xff] %v1047_v40  ;;  %v849_v45 = vpop.f32.mrb[12].mxu0  ;;  %v945_v46 = vpop.f32.mrb[12].mxu1  ;;  %v578_v39 = vld [vmem:[#allocation2 + $0xb8] sm:$0xff] }
 0x1d1   : > { %v1016_v47 = vadd.f32 %v849_v45, %v567_v41  ;;  %v1048_v48 = vadd.f32 %v945_v46, %v599_v42  ;;  %v851_v49 = vpop.f32.mrb[13].mxu0  ;;  %v947_v50 = vpop.f32.mrb[13].mxu1  ;;  %v610_v40 = vld [vmem:[#allocation2 + $0x1b8] sm:$0xff] }
 0x1d2   : > { %v1017_v51 = vadd.f32 %v851_v49, %v568_v43  ;;  %v1049_v52 = vadd.f32 %v947_v50, %v600_v44  ;;  %v579_v49 = vld [vmem:[#allocation2 + $0xc0] sm:$0xff] }
 0x1d3   : > { %1080 = vst [vmem:[#allocation2 + $0x60] sm:$0xff] %v1016_v47  ;;  %1112 = vst [vmem:[#allocation2 + $0x160] sm:$0xff] %v1048_v48  ;;  %v611_v50 = vld [vmem:[#allocation2 + $0x1c0] sm:$0xff] }
 0x1d4   : > { %1081 = vst [vmem:[#allocation2 + $0x68] sm:$0xff] %v1017_v51  ;;  %1113 = vst [vmem:[#allocation2 + $0x168] sm:$0xff] %v1049_v52  ;;  %v855_v57 = vpop.f32.mrb[14].mxu0  ;;  %v951_v58 = vpop.f32.mrb[14].mxu1  ;;  %v580_v51 = vld [vmem:[#allocation2 + $0xc8] sm:$0xff] }
 0x1d5   : > { %v1018_v59 = vadd.f32 %v855_v57, %v569_v53  ;;  %v1050_v60 = vadd.f32 %v951_v58, %v601_v54  ;;  %v857_v61 = vpop.f32.mrb[15].mxu0  ;;  %v953_v62 = vpop.f32.mrb[15].mxu1  ;;  %v612_v52 = vld [vmem:[#allocation2 + $0x1c8] sm:$0xff] }
 0x1d6   : > { %v1019_v63 = vadd.f32 %v857_v61, %v570_v55  ;;  %v1051_v0 = vadd.f32 %v953_v62, %v602_v56  ;;  %v581_v61 = vld [vmem:[#allocation2 + $0xd0] sm:$0xff] }
 0x1d7   : > { %1082 = vst [vmem:[#allocation2 + $0x70] sm:$0xff] %v1018_v59  ;;  %1114 = vst [vmem:[#allocation2 + $0x170] sm:$0xff] %v1050_v60  ;;  %v613_v62 = vld [vmem:[#allocation2 + $0x1d0] sm:$0xff] }
 0x1d8   : > { %1083 = vst [vmem:[#allocation2 + $0x78] sm:$0xff] %v1019_v63  ;;  %1115 = vst [vmem:[#allocation2 + $0x178] sm:$0xff] %v1051_v0  ;;  %v861_v5 = vpop.f32.mrb[16].mxu0  ;;  %v957_v6 = vpop.f32.mrb[16].mxu1  ;;  %v582_v63 = vld [vmem:[#allocation2 + $0xd8] sm:$0xff] }
 0x1d9   : > { %v1020_v7 = vadd.f32 %v861_v5, %v571_v1  ;;  %v1052_v8 = vadd.f32 %v957_v6, %v603_v2  ;;  %v863_v9 = vpop.f32.mrb[17].mxu0  ;;  %v959_v10 = vpop.f32.mrb[17].mxu1  ;;  %v614_v0 = vld [vmem:[#allocation2 + $0x1d8] sm:$0xff] }
 0x1da   : > { %v1021_v11 = vadd.f32 %v863_v9, %v572_v3  ;;  %v1053_v12 = vadd.f32 %v959_v10, %v604_v4  ;;  %v583_v9 = vld [vmem:[#allocation2 + $0xe0] sm:$0xff] }
 0x1db   : > { %1084 = vst [vmem:[#allocation2 + $0x80] sm:$0xff] %v1020_v7  ;;  %1116 = vst [vmem:[#allocation2 + $0x180] sm:$0xff] %v1052_v8  ;;  %v615_v10 = vld [vmem:[#allocation2 + $0x1e0] sm:$0xff] }
 0x1dc   : > { %1085 = vst [vmem:[#allocation2 + $0x88] sm:$0xff] %v1021_v11  ;;  %1117 = vst [vmem:[#allocation2 + $0x188] sm:$0xff] %v1053_v12  ;;  %v867_v17 = vpop.f32.mrb[18].mxu0  ;;  %v963_v18 = vpop.f32.mrb[18].mxu1  ;;  %v584_v11 = vld [vmem:[#allocation2 + $0xe8] sm:$0xff] }
 0x1dd   : > { %v1022_v19 = vadd.f32 %v867_v17, %v573_v13  ;;  %v1054_v20 = vadd.f32 %v963_v18, %v605_v14  ;;  %v869_v21 = vpop.f32.mrb[19].mxu0  ;;  %v965_v22 = vpop.f32.mrb[19].mxu1  ;;  %v616_v12 = vld [vmem:[#allocation2 + $0x1e8] sm:$0xff] }
 0x1de   : > { %v1023_v23 = vadd.f32 %v869_v21, %v574_v15  ;;  %v1055_v24 = vadd.f32 %v965_v22, %v606_v16  ;;  %v585_v21 = vld [vmem:[#allocation2 + $0xf0] sm:$0xff] }
 0x1df   : > { %1086 = vst [vmem:[#allocation2 + $0x90] sm:$0xff] %v1022_v19  ;;  %1118 = vst [vmem:[#allocation2 + $0x190] sm:$0xff] %v1054_v20  ;;  %v617_v22 = vld [vmem:[#allocation2 + $0x1f0] sm:$0xff] }
 0x1e0   : > { %1087 = vst [vmem:[#allocation2 + $0x98] sm:$0xff] %v1023_v23  ;;  %1119 = vst [vmem:[#allocation2 + $0x198] sm:$0xff] %v1055_v24  ;;  %v873_v29 = vpop.f32.mrb[20].mxu0  ;;  %v969_v30 = vpop.f32.mrb[20].mxu1  ;;  %v586_v23 = vld [vmem:[#allocation2 + $0xf8] sm:$0xff] }
 0x1e1   : > { %v1024_v31 = vadd.f32 %v873_v29, %v575_v25  ;;  %v1056_v32 = vadd.f32 %v969_v30, %v607_v26  ;;  %v875_v33 = vpop.f32.mrb[21].mxu0  ;;  %v971_v34 = vpop.f32.mrb[21].mxu1  ;;  %v618_v24 = vld [vmem:[#allocation2 + $0x1f8] sm:$0xff] }
 0x1e2   : > { %v1025_v35 = vadd.f32 %v875_v33, %v576_v27  ;;  %v1057_v36 = vadd.f32 %v971_v34, %v608_v28  ;;  %v1136_v33 = vld [vmem:[#allocation2] sm:$0xff] (!%p1540_p5)  ;;  %v1137_v34 = vld [vmem:[#allocation2 + $0x8] sm:$0xff] (!%p1540_p5) }
 0x1e3   : > { %1088 = vst [vmem:[#allocation2 + $0xa0] sm:$0xff] %v1024_v31  ;;  %1120 = vst [vmem:[#allocation2 + $0x1a0] sm:$0xff] %v1056_v32 }
 0x1e4   : > { %1089 = vst [vmem:[#allocation2 + $0xa8] sm:$0xff] %v1025_v35  ;;  %1121 = vst [vmem:[#allocation2 + $0x1a8] sm:$0xff] %v1057_v36  ;;  %v879_v41 = vpop.f32.mrb[22].mxu0  ;;  %v975_v42 = vpop.f32.mrb[22].mxu1  ;;  %v1138_v35 = vld [vmem:[#allocation2 + $0x10] sm:$0xff] (!%p1540_p5)  ;;  %v1139_v36 = vld [vmem:[#allocation2 + $0x18] sm:$0xff] (!%p1540_p5) }
 0x1e5   : > { %v1026_v43 = vadd.f32 %v879_v41, %v577_v37  ;;  %v1058_v44 = vadd.f32 %v975_v42, %v609_v38  ;;  %v881_v45 = vpop.f32.mrb[23].mxu0  ;;  %v977_v46 = vpop.f32.mrb[23].mxu1  ;;  %1200 = vst [vmem:[%s2278_s30] sm:$0xff] (!%p1540_p5), %v1136_v33  ;;  %1201 = vst [vmem:[%s2278_s30 + $0x8] sm:$0xff] (!%p1540_p5), %v1137_v34  ;;  %v1140_v37 = vld [vmem:[#allocation2 + $0x20] sm:$0xff] (!%p1540_p5)  ;;  %v1141_v38 = vld [vmem:[#allocation2 + $0x28] sm:$0xff] (!%p1540_p5) }
 0x1e6   : > { %v1027_v47 = vadd.f32 %v881_v45, %v578_v39  ;;  %v1059_v48 = vadd.f32 %v977_v46, %v610_v40  ;;  %1202 = vst [vmem:[%s2278_s30 + $0x10] sm:$0xff] (!%p1540_p5), %v1138_v35  ;;  %1203 = vst [vmem:[%s2278_s30 + $0x18] sm:$0xff] (!%p1540_p5), %v1139_v36  ;;  %v1142_v39 = vld [vmem:[#allocation2 + $0x30] sm:$0xff] (!%p1540_p5)  ;;  %v1143_v40 = vld [vmem:[#allocation2 + $0x38] sm:$0xff] (!%p1540_p5) }
 0x1e7   : > { %1090 = vst [vmem:[#allocation2 + $0xb0] sm:$0xff] %v1026_v43  ;;  %1122 = vst [vmem:[#allocation2 + $0x1b0] sm:$0xff] %v1058_v44  ;;  %v1144_v41 = vld [vmem:[#allocation2 + $0x40] sm:$0xff] (!%p1540_p5)  ;;  %v1145_v42 = vld [vmem:[#allocation2 + $0x48] sm:$0xff] (!%p1540_p5) }
 0x1e8   : > { %1091 = vst [vmem:[#allocation2 + $0xb8] sm:$0xff] %v1027_v47  ;;  %1123 = vst [vmem:[#allocation2 + $0x1b8] sm:$0xff] %v1059_v48  ;;  %v885_v53 = vpop.f32.mrb[24].mxu0  ;;  %v981_v54 = vpop.f32.mrb[24].mxu1  ;;  %v1146_v43 = vld [vmem:[#allocation2 + $0x50] sm:$0xff] (!%p1540_p5)  ;;  %v1147_v44 = vld [vmem:[#allocation2 + $0x58] sm:$0xff] (!%p1540_p5) }
 0x1e9   : > { %v1028_v55 = vadd.f32 %v885_v53, %v579_v49  ;;  %v1060_v56 = vadd.f32 %v981_v54, %v611_v50  ;;  %v887_v57 = vpop.f32.mrb[25].mxu0  ;;  %v983_v58 = vpop.f32.mrb[25].mxu1  ;;  %1204 = vst [vmem:[%s2278_s30 + $0x20] sm:$0xff] (!%p1540_p5), %v1140_v37  ;;  %1205 = vst [vmem:[%s2278_s30 + $0x28] sm:$0xff] (!%p1540_p5), %v1141_v38  ;;  %v1148_v45 = vld [vmem:[#allocation2 + $0x60] sm:$0xff] (!%p1540_p5)  ;;  %v1149_v46 = vld [vmem:[#allocation2 + $0x68] sm:$0xff] (!%p1540_p5) }
 0x1ea   : > { %v1029_v59 = vadd.f32 %v887_v57, %v580_v51  ;;  %v1061_v60 = vadd.f32 %v983_v58, %v612_v52  ;;  %1206 = vst [vmem:[%s2278_s30 + $0x30] sm:$0xff] (!%p1540_p5), %v1142_v39  ;;  %1207 = vst [vmem:[%s2278_s30 + $0x38] sm:$0xff] (!%p1540_p5), %v1143_v40  ;;  %v1150_v47 = vld [vmem:[#allocation2 + $0x70] sm:$0xff] (!%p1540_p5)  ;;  %v1151_v48 = vld [vmem:[#allocation2 + $0x78] sm:$0xff] (!%p1540_p5) }
 0x1eb   : > { %1092 = vst [vmem:[#allocation2 + $0xc0] sm:$0xff] %v1028_v55  ;;  %1124 = vst [vmem:[#allocation2 + $0x1c0] sm:$0xff] %v1060_v56  ;;  %v1152_v49 = vld [vmem:[#allocation2 + $0x80] sm:$0xff] (!%p1540_p5)  ;;  %v1153_v50 = vld [vmem:[#allocation2 + $0x88] sm:$0xff] (!%p1540_p5) }
 0x1ec   : > { %1093 = vst [vmem:[#allocation2 + $0xc8] sm:$0xff] %v1029_v59  ;;  %1125 = vst [vmem:[#allocation2 + $0x1c8] sm:$0xff] %v1061_v60  ;;  %v891_v1 = vpop.f32.mrb[26].mxu0  ;;  %v987_v2 = vpop.f32.mrb[26].mxu1  ;;  %v1154_v51 = vld [vmem:[#allocation2 + $0x90] sm:$0xff] (!%p1540_p5)  ;;  %v1155_v52 = vld [vmem:[#allocation2 + $0x98] sm:$0xff] (!%p1540_p5) }
 0x1ed   : > { %v1030_v3 = vadd.f32 %v891_v1, %v581_v61  ;;  %v1062_v4 = vadd.f32 %v987_v2, %v613_v62  ;;  %v893_v5 = vpop.f32.mrb[27].mxu0  ;;  %v989_v6 = vpop.f32.mrb[27].mxu1  ;;  %1208 = vst [vmem:[%s2278_s30 + $0x40] sm:$0xff] (!%p1540_p5), %v1144_v41  ;;  %1209 = vst [vmem:[%s2278_s30 + $0x48] sm:$0xff] (!%p1540_p5), %v1145_v42  ;;  %v1156_v53 = vld [vmem:[#allocation2 + $0xa0] sm:$0xff] (!%p1540_p5)  ;;  %v1157_v54 = vld [vmem:[#allocation2 + $0xa8] sm:$0xff] (!%p1540_p5) }
 0x1ee   : > { %v1031_v7 = vadd.f32 %v893_v5, %v582_v63  ;;  %v1063_v8 = vadd.f32 %v989_v6, %v614_v0  ;;  %1210 = vst [vmem:[%s2278_s30 + $0x50] sm:$0xff] (!%p1540_p5), %v1146_v43  ;;  %1211 = vst [vmem:[%s2278_s30 + $0x58] sm:$0xff] (!%p1540_p5), %v1147_v44  ;;  %v1158_v55 = vld [vmem:[#allocation2 + $0xb0] sm:$0xff] (!%p1540_p5)  ;;  %v1168_v1 = vld [vmem:[#allocation2 + $0x100] sm:$0xff] (!%p1540_p5) }
 0x1ef   : > { %1094 = vst [vmem:[#allocation2 + $0xd0] sm:$0xff] %v1030_v3  ;;  %1126 = vst [vmem:[#allocation2 + $0x1d0] sm:$0xff] %v1062_v4  ;;  %v1159_v56 = vld [vmem:[#allocation2 + $0xb8] sm:$0xff] (!%p1540_p5)  ;;  %v1169_v2 = vld [vmem:[#allocation2 + $0x108] sm:$0xff] (!%p1540_p5) }
 0x1f0   : > { %1095 = vst [vmem:[#allocation2 + $0xd8] sm:$0xff] %v1031_v7  ;;  %1127 = vst [vmem:[#allocation2 + $0x1d8] sm:$0xff] %v1063_v8  ;;  %v897_v13 = vpop.f32.mrb[28].mxu0  ;;  %v993_v14 = vpop.f32.mrb[28].mxu1  ;;  %v1170_v3 = vld [vmem:[#allocation2 + $0x110] sm:$0xff] (!%p1540_p5)  ;;  %v1171_v4 = vld [vmem:[#allocation2 + $0x118] sm:$0xff] (!%p1540_p5) }
 0x1f1   : > { %v1032_v15 = vadd.f32 %v897_v13, %v583_v9  ;;  %v1064_v16 = vadd.f32 %v993_v14, %v615_v10  ;;  %v899_v17 = vpop.f32.mrb[29].mxu0  ;;  %v995_v18 = vpop.f32.mrb[29].mxu1  ;;  %1212 = vst [vmem:[%s2278_s30 + $0x60] sm:$0xff] (!%p1540_p5), %v1148_v45  ;;  %1213 = vst [vmem:[%s2278_s30 + $0x68] sm:$0xff] (!%p1540_p5), %v1149_v46  ;;  %v1172_v5 = vld [vmem:[#allocation2 + $0x120] sm:$0xff] (!%p1540_p5)  ;;  %v1173_v6 = vld [vmem:[#allocation2 + $0x128] sm:$0xff] (!%p1540_p5) }
 0x1f2   : > { %v1033_v19 = vadd.f32 %v899_v17, %v584_v11  ;;  %v1065_v20 = vadd.f32 %v995_v18, %v616_v12  ;;  %1135 = sbr.rel (%p1540_p5) target bundleno = 527 (0x20f), region = 82  ;;  %1214 = vst [vmem:[%s2278_s30 + $0x70] sm:$0xff] (!%p1540_p5), %v1150_v47  ;;  %1215 = vst [vmem:[%s2278_s30 + $0x78] sm:$0xff] (!%p1540_p5), %v1151_v48  ;;  %v1160_v57 = vld [vmem:[#allocation2 + $0xc0] sm:$0xff] (!%p1540_p5)  ;;  %v1174_v7 = vld [vmem:[#allocation2 + $0x130] sm:$0xff] (!%p1540_p5) }
 0x1f3   : > { %1096 = vst [vmem:[#allocation2 + $0xe0] sm:$0xff] %v1032_v15  ;;  %1128 = vst [vmem:[#allocation2 + $0x1e0] sm:$0xff] %v1064_v16  ;;  %v1161_v58 = vld [vmem:[#allocation2 + $0xc8] sm:$0xff] (!%p1540_p5)  ;;  %v1175_v8 = vld [vmem:[#allocation2 + $0x138] sm:$0xff] (!%p1540_p5) }
 0x1f4   : > { %1097 = vst [vmem:[#allocation2 + $0xe8] sm:$0xff] %v1033_v19  ;;  %1129 = vst [vmem:[#allocation2 + $0x1e8] sm:$0xff] %v1065_v20  ;;  %v903_v25 = vpop.f32.mrb[30].mxu0  ;;  %v999_v26 = vpop.f32.mrb[30].mxu1  ;;  %v1176_v9 = vld [vmem:[#allocation2 + $0x140] sm:$0xff] (!%p1540_p5)  ;;  %v1177_v10 = vld [vmem:[#allocation2 + $0x148] sm:$0xff] (!%p1540_p5) }
 0x1f5   : > { %v1034_v27 = vadd.f32 %v903_v25, %v585_v21  ;;  %v1066_v28 = vadd.f32 %v999_v26, %v617_v22  ;;  %v905_v29 = vpop.f32.mrb[31].mxu0  ;;  %v1001_v30 = vpop.f32.mrb[31].mxu1  ;;  %1216 = vst [vmem:[%s2278_s30 + $0x80] sm:$0xff] (!%p1540_p5), %v1152_v49  ;;  %1217 = vst [vmem:[%s2278_s30 + $0x88] sm:$0xff] (!%p1540_p5), %v1153_v50  ;;  %v1178_v11 = vld [vmem:[#allocation2 + $0x150] sm:$0xff] (!%p1540_p5)  ;;  %v1179_v12 = vld [vmem:[#allocation2 + $0x158] sm:$0xff] (!%p1540_p5) }
 0x1f6   : > { %v1035_v31 = vadd.f32 %v905_v29, %v586_v23  ;;  %v1067_v32 = vadd.f32 %v1001_v30, %v618_v24  ;;  %1218 = vst [vmem:[%s2278_s30 + $0x90] sm:$0xff] (!%p1540_p5), %v1154_v51  ;;  %1219 = vst [vmem:[%s2278_s30 + $0x98] sm:$0xff] (!%p1540_p5), %v1155_v52  ;;  %v1162_v59 = vld [vmem:[#allocation2 + $0xd0] sm:$0xff] (!%p1540_p5)  ;;  %v1180_v13 = vld [vmem:[#allocation2 + $0x160] sm:$0xff] (!%p1540_p5) }
 0x1f7   : > { %1098 = vst [vmem:[#allocation2 + $0xf0] sm:$0xff] %v1034_v27  ;;  %1130 = vst [vmem:[#allocation2 + $0x1f0] sm:$0xff] %v1066_v28  ;;  %v1163_v60 = vld [vmem:[#allocation2 + $0xd8] sm:$0xff] (!%p1540_p5)  ;;  %v1181_v14 = vld [vmem:[#allocation2 + $0x168] sm:$0xff] (!%p1540_p5) }
 0x1f8   : > { %1099 = vst [vmem:[#allocation2 + $0xf8] sm:$0xff] %v1035_v31  ;;  %1131 = vst [vmem:[#allocation2 + $0x1f8] sm:$0xff] %v1067_v32  ;;  %v1182_v15 = vld [vmem:[#allocation2 + $0x170] sm:$0xff] (!%p1540_p5)  ;;  %v1183_v16 = vld [vmem:[#allocation2 + $0x178] sm:$0xff] (!%p1540_p5) }
 0x1f9   : > { %1220 = vst [vmem:[%s2278_s30 + $0xa0] sm:$0xff] %v1156_v53  ;;  %1221 = vst [vmem:[%s2278_s30 + $0xa8] sm:$0xff] %v1157_v54  ;;  %v1184_v17 = vld [vmem:[#allocation2 + $0x180] sm:$0xff]  ;;  %v1185_v18 = vld [vmem:[#allocation2 + $0x188] sm:$0xff] }
 0x1fa   : > { %1222 = vst [vmem:[%s2278_s30 + $0xb0] sm:$0xff] %v1158_v55  ;;  %1223 = vst [vmem:[%s2278_s30 + $0xb8] sm:$0xff] %v1159_v56  ;;  %v1164_v61 = vld [vmem:[#allocation2 + $0xe0] sm:$0xff]  ;;  %v1186_v19 = vld [vmem:[#allocation2 + $0x190] sm:$0xff] }
 0x1fb   : > { %1224 = vst [vmem:[%s2278_s30 + $0xc0] sm:$0xff] %v1160_v57  ;;  %1225 = vst [vmem:[%s2278_s30 + $0xc8] sm:$0xff] %v1161_v58  ;;  %v1165_v62 = vld [vmem:[#allocation2 + $0xe8] sm:$0xff]  ;;  %v1187_v20 = vld [vmem:[#allocation2 + $0x198] sm:$0xff] }
 0x1fc   : > { %1226 = vst [vmem:[%s2278_s30 + $0xd0] sm:$0xff] %v1162_v59  ;;  %1227 = vst [vmem:[%s2278_s30 + $0xd8] sm:$0xff] %v1163_v60  ;;  %v1188_v21 = vld [vmem:[#allocation2 + $0x1a0] sm:$0xff]  ;;  %v1189_v22 = vld [vmem:[#allocation2 + $0x1a8] sm:$0xff] }
 0x1fd   : > { %1228 = vst [vmem:[%s2278_s30 + $0xe0] sm:$0xff] %v1164_v61  ;;  %1229 = vst [vmem:[%s2278_s30 + $0xe8] sm:$0xff] %v1165_v62  ;;  %v1190_v23 = vld [vmem:[#allocation2 + $0x1b0] sm:$0xff]  ;;  %v1191_v24 = vld [vmem:[#allocation2 + $0x1b8] sm:$0xff] }
 0x1fe   : > { %v1166_v63 = vld [vmem:[#allocation2 + $0xf0] sm:$0xff]  ;;  %1232 = vst [vmem:[%s2278_s30 + $0x100] sm:$0xff] %v1168_v1  ;;  %1233 = vst [vmem:[%s2278_s30 + $0x108] sm:$0xff] %v1169_v2  ;;  %v1192_v25 = vld [vmem:[#allocation2 + $0x1c0] sm:$0xff] }
 0x1ff   : > { %v1167_v0 = vld [vmem:[#allocation2 + $0xf8] sm:$0xff]  ;;  %1230 = vst [vmem:[%s2278_s30 + $0xf0] sm:$0xff] %v1166_v63  ;;  %1234 = vst [vmem:[%s2278_s30 + $0x110] sm:$0xff] %v1170_v3  ;;  %v1193_v26 = vld [vmem:[#allocation2 + $0x1c8] sm:$0xff] }
 0x200   : > { %1231 = vst [vmem:[%s2278_s30 + $0xf8] sm:$0xff] %v1167_v0  ;;  %1235 = vst [vmem:[%s2278_s30 + $0x118] sm:$0xff] %v1171_v4  ;;  %v1194_v27 = vld [vmem:[#allocation2 + $0x1d0] sm:$0xff]  ;;  %v1195_v28 = vld [vmem:[#allocation2 + $0x1d8] sm:$0xff] }
 0x201   : > { %1236 = vst [vmem:[%s2278_s30 + $0x120] sm:$0xff] %v1172_v5  ;;  %1237 = vst [vmem:[%s2278_s30 + $0x128] sm:$0xff] %v1173_v6  ;;  %v1196_v29 = vld [vmem:[#allocation2 + $0x1e0] sm:$0xff]  ;;  %v1197_v30 = vld [vmem:[#allocation2 + $0x1e8] sm:$0xff] }
 0x202   : > { %1238 = vst [vmem:[%s2278_s30 + $0x130] sm:$0xff] %v1174_v7  ;;  %1239 = vst [vmem:[%s2278_s30 + $0x138] sm:$0xff] %v1175_v8  ;;  %v1198_v31 = vld [vmem:[#allocation2 + $0x1f0] sm:$0xff]  ;;  %v1199_v32 = vld [vmem:[#allocation2 + $0x1f8] sm:$0xff] }
 0x203   : > { %1240 = vst [vmem:[%s2278_s30 + $0x140] sm:$0xff] %v1176_v9  ;;  %1241 = vst [vmem:[%s2278_s30 + $0x148] sm:$0xff] %v1177_v10 }
 0x204   : > { %1242 = vst [vmem:[%s2278_s30 + $0x150] sm:$0xff] %v1178_v11  ;;  %1243 = vst [vmem:[%s2278_s30 + $0x158] sm:$0xff] %v1179_v12 }
 0x205   : > { %1244 = vst [vmem:[%s2278_s30 + $0x160] sm:$0xff] %v1180_v13  ;;  %1245 = vst [vmem:[%s2278_s30 + $0x168] sm:$0xff] %v1181_v14 }
 0x206   : > { %1246 = vst [vmem:[%s2278_s30 + $0x170] sm:$0xff] %v1182_v15  ;;  %1247 = vst [vmem:[%s2278_s30 + $0x178] sm:$0xff] %v1183_v16 }
 0x207   : > { %1248 = vst [vmem:[%s2278_s30 + $0x180] sm:$0xff] %v1184_v17  ;;  %1249 = vst [vmem:[%s2278_s30 + $0x188] sm:$0xff] %v1185_v18 }
 0x208   : > { %1250 = vst [vmem:[%s2278_s30 + $0x190] sm:$0xff] %v1186_v19  ;;  %1251 = vst [vmem:[%s2278_s30 + $0x198] sm:$0xff] %v1187_v20 }
 0x209   : > { %1252 = vst [vmem:[%s2278_s30 + $0x1a0] sm:$0xff] %v1188_v21  ;;  %1253 = vst [vmem:[%s2278_s30 + $0x1a8] sm:$0xff] %v1189_v22 }
 0x20a   : > { %1254 = vst [vmem:[%s2278_s30 + $0x1b0] sm:$0xff] %v1190_v23  ;;  %1255 = vst [vmem:[%s2278_s30 + $0x1b8] sm:$0xff] %v1191_v24 }
 0x20b   : > { %1256 = vst [vmem:[%s2278_s30 + $0x1c0] sm:$0xff] %v1192_v25  ;;  %1257 = vst [vmem:[%s2278_s30 + $0x1c8] sm:$0xff] %v1193_v26 }
 0x20c   : > { %1258 = vst [vmem:[%s2278_s30 + $0x1d0] sm:$0xff] %v1194_v27  ;;  %1259 = vst [vmem:[%s2278_s30 + $0x1d8] sm:$0xff] %v1195_v28 }
 0x20d   : > { %1260 = vst [vmem:[%s2278_s30 + $0x1e0] sm:$0xff] %v1196_v29  ;;  %1261 = vst [vmem:[%s2278_s30 + $0x1e8] sm:$0xff] %v1197_v30 }
 0x20e   : > { %1262 = vst [vmem:[%s2278_s30 + $0x1f0] sm:$0xff] %v1198_v31  ;;  %1263 = vst [vmem:[%s2278_s30 + $0x1f8] sm:$0xff] %v1199_v32 }
 0x20f PF: > { %1270 = sbr.rel (!%p1984_p13) target bundleno = 567 (0x237), region = 86  ;;  %s1543_s9 = sshll.u32 (%p1984_p13), %s1834_s16, 1  ;;  %v1289_v33 = vld [vmem:[%s2278_s30] sm:$0xff] (%p1984_p13)  ;;  %v1291_v34 = vld [vmem:[%s2278_s30 + $0x8] sm:$0xff] (%p1984_p13)  ;;  %v1293_v35 = vld [vmem:[%s2278_s30 + $0x10] sm:$0xff] (%p1984_p13) }
 0x210   : > { %s1550_s11 = sshll.u32 (%p1984_p13), %s1838_s17, 8  ;;  %v1295_v36 = vld [vmem:[%s2278_s30 + $0x18] sm:$0xff] (%p1984_p13)  ;;  %v1297_v37 = vld [vmem:[%s2278_s30 + $0x20] sm:$0xff] (%p1984_p13)  ;;  %v1299_v38 = vld [vmem:[%s2278_s30 + $0x28] sm:$0xff] (%p1984_p13)  ;;  %s2734_s7 = sld [smem:[#allocation9_spill]] (%p1984_p13) }
 0x211   : > { %s1274_s2 = sadd.s32 (%p1984_p13), %s1550_s11, %s1543_s9  ;;  %v1301_v39 = vld [vmem:[%s2278_s30 + $0x30] sm:$0xff] (%p1984_p13)  ;;  %v1303_v40 = vld [vmem:[%s2278_s30 + $0x38] sm:$0xff] (%p1984_p13)  ;;  %v1305_v41 = vld [vmem:[%s2278_s30 + $0x40] sm:$0xff] (%p1984_p13) }
 0x212   : > { %s1545_s13 = sshll.u32 (%p1984_p13), %s1274_s2, 3  ;;  %v1307_v42 = vld [vmem:[%s2278_s30 + $0x48] sm:$0xff] (%p1984_p13)  ;;  %v1309_v43 = vld [vmem:[%s2278_s30 + $0x50] sm:$0xff] (%p1984_p13)  ;;  %v1311_v44 = vld [vmem:[%s2278_s30 + $0x58] sm:$0xff] (%p1984_p13) }
 0x213   : > { %v1313_v45 = vld [vmem:[%s2278_s30 + $0x60] sm:$0xff] (%p1984_p13)  ;;  %v1315_v46 = vld [vmem:[%s2278_s30 + $0x68] sm:$0xff] (%p1984_p13)  ;;  %v1317_v47 = vld [vmem:[%s2278_s30 + $0x70] sm:$0xff] (%p1984_p13) }
 0x214   : > { %v1319_v48 = vld [vmem:[%s2278_s30 + $0x78] sm:$0xff] (%p1984_p13)  ;;  %v1321_v49 = vld [vmem:[%s2278_s30 + $0x80] sm:$0xff] (%p1984_p13)  ;;  %v1323_v50 = vld [vmem:[%s2278_s30 + $0x88] sm:$0xff] (%p1984_p13) }
 0x215   : > { %v1325_v51 = vld [vmem:[%s2278_s30 + $0x90] sm:$0xff] (%p1984_p13)  ;;  %v1327_v52 = vld [vmem:[%s2278_s30 + $0x98] sm:$0xff] (%p1984_p13)  ;;  %v1329_v53 = vld [vmem:[%s2278_s30 + $0xa0] sm:$0xff] (%p1984_p13) }
 0x216   : > { %s2554_s4 = scalar_lea.vmem %s2734_s7, %s1545_s13  ;;  %v1331_v54 = vld [vmem:[%s2278_s30 + $0xa8] sm:$0xff]  ;;  %v1333_v55 = vld [vmem:[%s2278_s30 + $0xb0] sm:$0xff]  ;;  %v1335_v56 = vld [vmem:[%s2278_s30 + $0xb8] sm:$0xff] }
 0x217   : > { %1290 = vst [vmem:[%s2554_s4] sm:$0xff] %v1289_v33  ;;  %1292 = vst [vmem:[%s2554_s4 + $0x8] sm:$0xff] %v1291_v34  ;;  %v1337_v57 = vld [vmem:[%s2278_s30 + $0xc0] sm:$0xff]  ;;  %v1339_v58 = vld [vmem:[%s2278_s30 + $0xc8] sm:$0xff] }
 0x218   : > { %1294 = vst [vmem:[%s2554_s4 + $0x40] sm:$0xff] %v1293_v35  ;;  %1296 = vst [vmem:[%s2554_s4 + $0x48] sm:$0xff] %v1295_v36  ;;  %v1341_v59 = vld [vmem:[%s2278_s30 + $0xd0] sm:$0xff]  ;;  %v1343_v60 = vld [vmem:[%s2278_s30 + $0xd8] sm:$0xff] }
 0x219   : > { %1298 = vst [vmem:[%s2554_s4 + $0x80] sm:$0xff] %v1297_v37  ;;  %1300 = vst [vmem:[%s2554_s4 + $0x88] sm:$0xff] %v1299_v38  ;;  %v1345_v61 = vld [vmem:[%s2278_s30 + $0xe0] sm:$0xff]  ;;  %v1347_v62 = vld [vmem:[%s2278_s30 + $0xe8] sm:$0xff] }
 0x21a   : > { %1302 = vst [vmem:[%s2554_s4 + $0xc0] sm:$0xff] %v1301_v39  ;;  %1304 = vst [vmem:[%s2554_s4 + $0xc8] sm:$0xff] %v1303_v40  ;;  %v1349_v63 = vld [vmem:[%s2278_s30 + $0xf0] sm:$0xff]  ;;  %v1351_v0 = vld [vmem:[%s2278_s30 + $0xf8] sm:$0xff] }
 0x21b   : > { %1306 = vst [vmem:[%s2554_s4 + $0x100] sm:$0xff] %v1305_v41  ;;  %1308 = vst [vmem:[%s2554_s4 + $0x108] sm:$0xff] %v1307_v42  ;;  %v1353_v1 = vld [vmem:[%s2278_s30 + $0x100] sm:$0xff]  ;;  %v1355_v2 = vld [vmem:[%s2278_s30 + $0x108] sm:$0xff] }
 0x21c   : > { %1310 = vst [vmem:[%s2554_s4 + $0x140] sm:$0xff] %v1309_v43  ;;  %1312 = vst [vmem:[%s2554_s4 + $0x148] sm:$0xff] %v1311_v44  ;;  %v1357_v3 = vld [vmem:[%s2278_s30 + $0x110] sm:$0xff]  ;;  %v1359_v4 = vld [vmem:[%s2278_s30 + $0x118] sm:$0xff] }
 0x21d   : > { %1314 = vst [vmem:[%s2554_s4 + $0x180] sm:$0xff] %v1313_v45  ;;  %1316 = vst [vmem:[%s2554_s4 + $0x188] sm:$0xff] %v1315_v46  ;;  %v1361_v5 = vld [vmem:[%s2278_s30 + $0x120] sm:$0xff]  ;;  %v1363_v6 = vld [vmem:[%s2278_s30 + $0x128] sm:$0xff] }
 0x21e   : > { %1318 = vst [vmem:[%s2554_s4 + $0x1c0] sm:$0xff] %v1317_v47  ;;  %1320 = vst [vmem:[%s2554_s4 + $0x1c8] sm:$0xff] %v1319_v48  ;;  %v1365_v7 = vld [vmem:[%s2278_s30 + $0x130] sm:$0xff]  ;;  %v1367_v8 = vld [vmem:[%s2278_s30 + $0x138] sm:$0xff] }
 0x21f   : > { %1322 = vst [vmem:[%s2554_s4 + $0x200] sm:$0xff] %v1321_v49  ;;  %1324 = vst [vmem:[%s2554_s4 + $0x208] sm:$0xff] %v1323_v50  ;;  %v1369_v9 = vld [vmem:[%s2278_s30 + $0x140] sm:$0xff]  ;;  %v1371_v10 = vld [vmem:[%s2278_s30 + $0x148] sm:$0xff] }
 0x220   : > { %1326 = vst [vmem:[%s2554_s4 + $0x240] sm:$0xff] %v1325_v51  ;;  %1328 = vst [vmem:[%s2554_s4 + $0x248] sm:$0xff] %v1327_v52  ;;  %v1373_v11 = vld [vmem:[%s2278_s30 + $0x150] sm:$0xff]  ;;  %v1375_v12 = vld [vmem:[%s2278_s30 + $0x158] sm:$0xff] }
 0x221   : > { %1330 = vst [vmem:[%s2554_s4 + $0x280] sm:$0xff] %v1329_v53  ;;  %1332 = vst [vmem:[%s2554_s4 + $0x288] sm:$0xff] %v1331_v54  ;;  %v1377_v13 = vld [vmem:[%s2278_s30 + $0x160] sm:$0xff]  ;;  %v1379_v14 = vld [vmem:[%s2278_s30 + $0x168] sm:$0xff] }
 0x222   : > { %1334 = vst [vmem:[%s2554_s4 + $0x2c0] sm:$0xff] %v1333_v55  ;;  %1336 = vst [vmem:[%s2554_s4 + $0x2c8] sm:$0xff] %v1335_v56  ;;  %v1381_v15 = vld [vmem:[%s2278_s30 + $0x170] sm:$0xff]  ;;  %v1383_v16 = vld [vmem:[%s2278_s30 + $0x178] sm:$0xff] }
 0x223   : > { %1338 = vst [vmem:[%s2554_s4 + $0x300] sm:$0xff] %v1337_v57  ;;  %1340 = vst [vmem:[%s2554_s4 + $0x308] sm:$0xff] %v1339_v58  ;;  %v1385_v17 = vld [vmem:[%s2278_s30 + $0x180] sm:$0xff]  ;;  %v1387_v18 = vld [vmem:[%s2278_s30 + $0x188] sm:$0xff] }
 0x224   : > { %1342 = vst [vmem:[%s2554_s4 + $0x340] sm:$0xff] %v1341_v59  ;;  %1344 = vst [vmem:[%s2554_s4 + $0x348] sm:$0xff] %v1343_v60  ;;  %v1389_v19 = vld [vmem:[%s2278_s30 + $0x190] sm:$0xff]  ;;  %v1391_v20 = vld [vmem:[%s2278_s30 + $0x198] sm:$0xff] }
 0x225   : > { %1346 = vst [vmem:[%s2554_s4 + $0x380] sm:$0xff] %v1345_v61  ;;  %1348 = vst [vmem:[%s2554_s4 + $0x388] sm:$0xff] %v1347_v62  ;;  %v1393_v21 = vld [vmem:[%s2278_s30 + $0x1a0] sm:$0xff]  ;;  %v1395_v22 = vld [vmem:[%s2278_s30 + $0x1a8] sm:$0xff] }
 0x226   : > { %1350 = vst [vmem:[%s2554_s4 + $0x3c0] sm:$0xff] %v1349_v63  ;;  %1352 = vst [vmem:[%s2554_s4 + $0x3c8] sm:$0xff] %v1351_v0  ;;  %v1397_v23 = vld [vmem:[%s2278_s30 + $0x1b0] sm:$0xff]  ;;  %v1399_v24 = vld [vmem:[%s2278_s30 + $0x1b8] sm:$0xff] }
 0x227   : > { %1354 = vst [vmem:[%s2554_s4 + $0x400] sm:$0xff] %v1353_v1  ;;  %1356 = vst [vmem:[%s2554_s4 + $0x408] sm:$0xff] %v1355_v2  ;;  %v1401_v25 = vld [vmem:[%s2278_s30 + $0x1c0] sm:$0xff]  ;;  %v1403_v26 = vld [vmem:[%s2278_s30 + $0x1c8] sm:$0xff] }
 0x228   : > { %1358 = vst [vmem:[%s2554_s4 + $0x440] sm:$0xff] %v1357_v3  ;;  %1360 = vst [vmem:[%s2554_s4 + $0x448] sm:$0xff] %v1359_v4  ;;  %v1405_v27 = vld [vmem:[%s2278_s30 + $0x1d0] sm:$0xff]  ;;  %v1407_v28 = vld [vmem:[%s2278_s30 + $0x1d8] sm:$0xff] }
 0x229   : > { %1362 = vst [vmem:[%s2554_s4 + $0x480] sm:$0xff] %v1361_v5  ;;  %1364 = vst [vmem:[%s2554_s4 + $0x488] sm:$0xff] %v1363_v6  ;;  %v1409_v29 = vld [vmem:[%s2278_s30 + $0x1e0] sm:$0xff]  ;;  %v1411_v30 = vld [vmem:[%s2278_s30 + $0x1e8] sm:$0xff] }
 0x22a   : > { %1366 = vst [vmem:[%s2554_s4 + $0x4c0] sm:$0xff] %v1365_v7  ;;  %1368 = vst [vmem:[%s2554_s4 + $0x4c8] sm:$0xff] %v1367_v8  ;;  %v1413_v31 = vld [vmem:[%s2278_s30 + $0x1f0] sm:$0xff]  ;;  %v1415_v32 = vld [vmem:[%s2278_s30 + $0x1f8] sm:$0xff] }
 0x22b   : > { %1370 = vst [vmem:[%s2554_s4 + $0x500] sm:$0xff] %v1369_v9  ;;  %1372 = vst [vmem:[%s2554_s4 + $0x508] sm:$0xff] %v1371_v10 }
 0x22c   : > { %1374 = vst [vmem:[%s2554_s4 + $0x540] sm:$0xff] %v1373_v11  ;;  %1376 = vst [vmem:[%s2554_s4 + $0x548] sm:$0xff] %v1375_v12 }
 0x22d   : > { %1378 = vst [vmem:[%s2554_s4 + $0x580] sm:$0xff] %v1377_v13  ;;  %1380 = vst [vmem:[%s2554_s4 + $0x588] sm:$0xff] %v1379_v14 }
 0x22e   : > { %1382 = vst [vmem:[%s2554_s4 + $0x5c0] sm:$0xff] %v1381_v15  ;;  %1384 = vst [vmem:[%s2554_s4 + $0x5c8] sm:$0xff] %v1383_v16 }
 0x22f   : > { %1386 = vst [vmem:[%s2554_s4 + $0x600] sm:$0xff] %v1385_v17  ;;  %1388 = vst [vmem:[%s2554_s4 + $0x608] sm:$0xff] %v1387_v18 }
 0x230   : > { %1390 = vst [vmem:[%s2554_s4 + $0x640] sm:$0xff] %v1389_v19  ;;  %1392 = vst [vmem:[%s2554_s4 + $0x648] sm:$0xff] %v1391_v20 }
 0x231   : > { %1394 = vst [vmem:[%s2554_s4 + $0x680] sm:$0xff] %v1393_v21  ;;  %1396 = vst [vmem:[%s2554_s4 + $0x688] sm:$0xff] %v1395_v22 }
 0x232   : > { %1398 = vst [vmem:[%s2554_s4 + $0x6c0] sm:$0xff] %v1397_v23  ;;  %1400 = vst [vmem:[%s2554_s4 + $0x6c8] sm:$0xff] %v1399_v24 }
 0x233   : > { %1402 = vst [vmem:[%s2554_s4 + $0x700] sm:$0xff] %v1401_v25  ;;  %1404 = vst [vmem:[%s2554_s4 + $0x708] sm:$0xff] %v1403_v26 }
 0x234   : > { %1406 = vst [vmem:[%s2554_s4 + $0x740] sm:$0xff] %v1405_v27  ;;  %1408 = vst [vmem:[%s2554_s4 + $0x748] sm:$0xff] %v1407_v28 }
 0x235   : > { %1410 = vst [vmem:[%s2554_s4 + $0x780] sm:$0xff] %v1409_v29  ;;  %1412 = vst [vmem:[%s2554_s4 + $0x788] sm:$0xff] %v1411_v30 }
 0x236   : > { %1414 = vst [vmem:[%s2554_s4 + $0x7c0] sm:$0xff] %v1413_v31  ;;  %1416 = vst [vmem:[%s2554_s4 + $0x7c8] sm:$0xff] %v1415_v32 }
 0x237 PF: > { %s12_s21 = sadd.s32 1, %s1854_s21   ;;  %s2736_s8 = sld [smem:[#allocation6_spill]] }
 0x238   : > { %p2676_p6 = scmp.ge.s32.totalorder %s12_s21, 18   ;;  %s2737_s29 = sld [smem:[#allocation7_spill]] }
 0x239   : > { %s2739_s9 = smov %s1810_s10  ;;  %s2740_s10 = smov %s1982_s3 }
 0x23a   : > { %s2741_s11 = smov %s1818_s12  ;;  %s2742_s12 = smov %s1969_s5 }
 0x23b   : > { %s2743_s13 = smov %s1826_s14  ;;  %s2744_s14 = smov %s1979_s23 }
 0x23c   : > { %s2745_s15 = smov %s1842_s18  ;;  %s2746_s16 = smov %s1846_s19 }
 0x23d   : > { %s2747_s17 = smov %s1850_s20  ;;  %s2748_s18 = smov %s2736_s8 }
 0x23e   : > { %s2749_s19 = smov %s2737_s29  ;;  %s2750_s20 = smov %s2760_s25 }
 0x23f   :  { %11 = sbr.rel (!%p2676_p6) target bundleno = 10 (0xa), region = 148 }

// kernel: neg.1
= control target key start
LH: loop header
LB: loop body
LE: loop exit
PB: predicated region body
PF: predicated region fallthrough
CT: control target
= control target key end

     0   :  { %s264_s0 = inlined_call_operand.vmem [shape: f32[256,64], index: 0, kind: input, shape index: {}]   ;;  %s265_s1 = inlined_call_operand.vmem [shape: f32[256,64], index: 1, kind: output, shape index: {}]  }
   0x1   :  { %v2_v0 = vld [vmem:[%s264_s0] sm:$0xff]  ;;  %v128_v1 = vld [vmem:[%s264_s0 + $0x10] sm:$0xff]  ;;  %v142_v14 = vld [vmem:[%s264_s0 + $0x8] sm:$0xff] }
   0x2   :  { %v130_v2 = vld [vmem:[%s264_s0 + $0x20] sm:$0xff]  ;;  %v5_v3 = vxor.u32 2147483648, %v2_v0  ;;  %v12_v4 = vxor.u32 2147483648, %v128_v1  ;;  %v132_v6 = vld [vmem:[%s264_s0 + $0x30] sm:$0xff]  ;;  %v68_v17 = vxor.u32 2147483648, %v142_v14  ;;  %v144_v18 = vld [vmem:[%s264_s0 + $0x18] sm:$0xff] }
   0x3   :  { %v20_v5 = vxor.u32 2147483648, %v130_v2  ;;  %v134_v7 = vld [vmem:[%s264_s0 + $0x40] sm:$0xff]  ;;  %v136_v8 = vld [vmem:[%s264_s0 + $0x50] sm:$0xff]  ;;  %v28_v9 = vxor.u32 2147483648, %v132_v6  ;;  %v146_v19 = vld [vmem:[%s264_s0 + $0x28] sm:$0xff]  ;;  %v76_v21 = vxor.u32 2147483648, %v144_v18 }
   0x4   :  { %v36_v10 = vxor.u32 2147483648, %v134_v7  ;;  %v44_v11 = vxor.u32 2147483648, %v136_v8  ;;  %v138_v12 = vld [vmem:[%s264_s0 + $0x60] sm:$0xff]  ;;  %v140_v13 = vld [vmem:[%s264_s0 + $0x70] sm:$0xff]  ;;  %7 = vst [vmem:[%s265_s1] sm:$0xff] %v5_v3  ;;  %129 = vst [vmem:[%s265_s1 + $0x10] sm:$0xff] %v12_v4  ;;  %v84_v22 = vxor.u32 2147483648, %v146_v19 }
   0x5   :  { %131 = vst [vmem:[%s265_s1 + $0x20] sm:$0xff] %v20_v5  ;;  %v52_v15 = vxor.u32 2147483648, %v138_v12  ;;  %v60_v16 = vxor.u32 2147483648, %v140_v13  ;;  %v148_v20 = vld [vmem:[%s264_s0 + $0x38] sm:$0xff]  ;;  %133 = vst [vmem:[%s265_s1 + $0x30] sm:$0xff] %v28_v9  ;;  %v150_v24 = vld [vmem:[%s264_s0 + $0x48] sm:$0xff] }
   0x6   :  { %135 = vst [vmem:[%s265_s1 + $0x40] sm:$0xff] %v36_v10  ;;  %137 = vst [vmem:[%s265_s1 + $0x50] sm:$0xff] %v44_v11  ;;  %v92_v23 = vxor.u32 2147483648, %v148_v20  ;;  %v152_v25 = vld [vmem:[%s264_s0 + $0x58] sm:$0xff]  ;;  %v154_v26 = vld [vmem:[%s264_s0 + $0x68] sm:$0xff]  ;;  %v100_v27 = vxor.u32 2147483648, %v150_v24 }
   0x7   :  { %139 = vst [vmem:[%s265_s1 + $0x60] sm:$0xff] %v52_v15  ;;  %141 = vst [vmem:[%s265_s1 + $0x70] sm:$0xff] %v60_v16  ;;  %v108_v28 = vxor.u32 2147483648, %v152_v25  ;;  %v116_v29 = vxor.u32 2147483648, %v154_v26  ;;  %v156_v30 = vld [vmem:[%s264_s0 + $0x78] sm:$0xff] }
   0x8   :  { %143 = vst [vmem:[%s265_s1 + $0x8] sm:$0xff] %v68_v17  ;;  %145 = vst [vmem:[%s265_s1 + $0x18] sm:$0xff] %v76_v21  ;;  %v124_v31 = vxor.u32 2147483648, %v156_v30 }
   0x9   :  { %147 = vst [vmem:[%s265_s1 + $0x28] sm:$0xff] %v84_v22  ;;  %149 = vst [vmem:[%s265_s1 + $0x38] sm:$0xff] %v92_v23 }
   0xa   :  { %151 = vst [vmem:[%s265_s1 + $0x48] sm:$0xff] %v100_v27  ;;  %153 = vst [vmem:[%s265_s1 + $0x58] sm:$0xff] %v108_v28 }
   0xb   :  { %155 = vst [vmem:[%s265_s1 + $0x68] sm:$0xff] %v116_v29  ;;  %157 = vst [vmem:[%s265_s1 + $0x78] sm:$0xff] %v124_v31 }

// kernel: attention_forward.5
= control target key start
LH: loop header
LB: loop body
LE: loop exit
PB: predicated region body
PF: predicated region fallthrough
CT: control target
= control target key end

     0   :  { %s2580_s0 = inlined_call_operand.vmem [shape: f32[512,512], index: 0, kind: input, shape index: {}]   ;;  %s2581_s1 = inlined_call_operand.vmem [shape: f32[512,512], index: 1, kind: input, shape index: {}]   ;;  %s2582_s2 = inlined_call_operand.hbm [shape: f32[512,512], index: 2, kind: output, shape index: {}]  }
   0x1   :  { %2586 = sst [smem:[#allocation12_spill]] %s2580_s0 }
   0x2   :  { %2587 = sst [smem:[#allocation13_spill]] %s2582_s2 }
   0x3   :  { %7 = vsyncpa [#allocation6], 0 }
   0x4   :  { %9 = vsyncpa [#allocation6 + $0x1], 0  ;;  %s1810_s9 = smov 0   ;;  %s1812_s10 = smov 0  }
   0x5   :  { %s1814_s11 = smov 0   ;;  %s1816_s12 = smov 0  }
   0x6   :  { %s1818_s13 = smov 0   ;;  %s1820_s14 = smov 0  }
   0x7   :  { %s1822_s15 = smov 0   ;;  %s1824_s16 = smov 0  }
   0x8   :  { %s1826_s17 = smov 0   ;;  %s1828_s18 = smov 0  }
   0x9   :  { %s1830_s19 = smov 0   ;;  %s1832_s20 = smov 0  }
   0xa   :  { %s1834_s21 = smov 0   ;;  %s1836_s22 = smov 0  }
   0xb LB: > { %2588 = sst [smem:[#allocation8_spill]] %s1768_s17  ;;  %s27_s25 = sadd.s32 1, %s1776_s19  ;;  %s1788_s22 = sphi %s1836_s22, %s15_s22   ;;  %s1784_s21 = sphi %s1834_s21, %s2617_s21   ;;  %s1780_s20 = sphi %s1832_s20, %s2616_s20   ;;  %s1776_s19 = sphi %s1830_s19, %s2615_s19   ;;  %s1772_s18 = sphi %s1828_s18, %s2614_s18   ;;  %s1768_s17 = sphi %s1826_s17, %s2613_s17   ;;  %s1764_s16 = sphi %s1824_s16, %s2612_s16   ;;  %s1760_s15 = sphi %s1822_s15, %s2611_s15   ;;  %s1756_s14 = sphi %s1820_s14, %s2610_s14   ;;  %s1752_s13 = sphi %s1818_s13, %s2609_s13   ;;  %s1748_s12 = sphi %s1816_s12, %s2608_s12   ;;  %s1744_s11 = sphi %s1814_s11, %s2607_s11   ;;  %s1740_s10 = sphi %s1812_s10, %s2606_s10   ;;  %s1736_s9 = sphi %s1810_s9, %s2605_s9  }
   0xc   : > { %2589 = sst [smem:[#allocation9_spill]] %s1772_s18  ;;  %s30_s26 = sadd.s32 1, %s1780_s20 }
   0xd   : > { %p28_p0 = scmp.ge.s32.totalorder %s27_s25, 2  ;;  %s34_s27 = sadd.s32 1, %s1784_s21 }
   0xe   : > { %s43_s28 = sadd.s32 1, %s1760_s15  ;;  %p50_p1 = scmp.ne.s32.totalorder %s1760_s15, %s1756_s14 }
   0xf   : > { %s2619_s25 = smov (%p28_p0, %s27_s25), 0  ;;  %s2621_s26 = smov (!%p28_p0, %s30_s26), %s1780_s20 }
  0x10   : > { %2590 = sst [smem:[#allocation10_spill]] %s2619_s25  ;;  %s39_s29 = ssub.s32 %s1776_s19, %s2619_s25 }
  0x11   : > { %p51_p2 = scmp.eq.s32.totalorder %s1788_s22, 0  ;;  %p32_p3 = scmp.ge.s32.totalorder %s2621_s26, 2 }
  0x12   : > { %s71_s30 = sadd.s32 1, %s1752_s13  ;;  %p78_p5 = scmp.ne.s32.totalorder %s1752_s13, %s1748_s12 }
  0x13   : > { %p1895_p4 = por %p51_p2, %p50_p1  ;;  %s2623_s26 = smov (%p32_p3, %s2621_s26), 0 }
  0x14   : > { %2592 = sst [smem:[#allocation11_spill]] %s2623_s26  ;;  %s2625_s27 = smov (!%p32_p3, %s34_s27), %s1784_s21 }
  0x15   : > { %s67_s4 = ssub.s32 %s1780_s20, %s2623_s26  ;;  %p1906_p6 = por %p78_p5, %p51_p2 }
  0x16   : > { %p36_p7 = scmp.ge.s32.totalorder %s2625_s27, 2  ;;  %s68_s6 = sor.u32 %s67_s4, %s39_s29 }
  0x17   : > { %p69_p8 = scmp.eq.s32.totalorder %s68_s6, 0  ;;  %s99_s7 = sadd.s32 1, %s1744_s11 }
  0x18   : > { %s2627_s27 = smov (%p36_p7, %s2625_s27), 0  ;;  %p109_p9 = scmp.ne.s32.totalorder %s1744_s11, %s1740_s10 }
  0x19   : > { %s1914_s8 = scalar_select %p69_p8, %s1752_s13, %s71_s30  }
  0x1a   : > { %s38_s24 = ssub.s32 %s1784_s21, %s2627_s27  ;;  %s2594_s25 = sadd.s32 4294967295, %s1788_s22  }
  0x1b   : > { %s40_s23 = sor.u32 %s39_s29, %s38_s24  ;;  %s96_s26 = sor.u32 %s67_s4, %s38_s24 }
  0x1c   : > { %p41_p10 = scmp.eq.s32.totalorder %s40_s23, 0  ;;  %p97_p11 = scmp.eq.s32.totalorder %s96_s26, 0 }
  0x1d   : > { %p110_p12 = scmp.eq.s32.totalorder %s2594_s25, 7  ;;  %p115_p13 = scmp.ne.s32.totalorder %s1740_s10, %s1736_s9 }
  0x1e   : > { %s1925_s2 = scalar_select %p41_p10, %s1760_s15, %s43_s28  }
  0x1f   : > { %s1928_s18 = scalar_select %p97_p11, %s1744_s11, %s99_s7  }
  0x20   : > { %p1930_p0 = por %p110_p12, %p109_p9  ;;  %s2596_s17 = sadd.s32 4294967294, %s1788_s22  }
  0x21   : > { %p116_p1 = scmp.eq.s32.totalorder %s2596_s17, 7  ;;  %p1400_p3 = scmp.ge.s32.totalorder %s1788_s22, 8 }
  0x23   : > { %p1936_p2 = por %p116_p1, %p115_p13  ;;  %132 = sbr.rel (%p1400_p3) target bundleno = 123 (0x7b), region = 16 }
  0x2a   : > { %135 = sbr.rel (!%p1895_p4) target bundleno = 84 (0x54), region = 20  ;;  %s137_s23 = sand.u32 (%p1895_p4), 1, %s1760_s15  }
  0x2b   : > { %s1403_s24 = sshll.u32 (%p1895_p4), %s1776_s19, 1  ;;  %s1401_s25 = sshll.u32 (%p1895_p4), %s137_s23, 9 }
  0x2c   : > { %s1424_s26 = sshll.u32 (%p1895_p4), %s1784_s21, 7  ;;  %s2598_s0 = sld [smem:[#allocation12_spill]] (%p1895_p4) }
  0x2d   : > { %s143_s28 = sadd.s32 (%p1895_p4), %s1424_s26, %s1403_s24  ;;  %s1954_s3 = scalar_lea.vmem (%p1895_p4), [#allocation3], %s1401_s25 }
  0x2e   : > { %s1405_s29 = sshll.u32 (%p1895_p4), %s143_s28, 3 }
  0x32   : > { %s1949_s7 = scalar_lea.vmem %s2598_s0, %s1405_s29 }
  0x33   : > { %v158_v0 = vld [vmem:[%s1949_s7] sm:$0xff]  ;;  %v160_v1 = vld [vmem:[%s1949_s7 + $0x8] sm:$0xff] }
  0x34   : > { %v162_v2 = vld [vmem:[%s1949_s7 + $0x20] sm:$0xff]  ;;  %159 = vst [vmem:[%s1954_s3] sm:$0xff] %v158_v0  ;;  %161 = vst [vmem:[%s1954_s3 + $0x8] sm:$0xff] %v160_v1  ;;  %v164_v3 = vld [vmem:[%s1949_s7 + $0x28] sm:$0xff] }
  0x35   : > { %163 = vst [vmem:[%s1954_s3 + $0x10] sm:$0xff] %v162_v2  ;;  %v166_v4 = vld [vmem:[%s1949_s7 + $0x40] sm:$0xff]  ;;  %v168_v5 = vld [vmem:[%s1949_s7 + $0x48] sm:$0xff]  ;;  %165 = vst [vmem:[%s1954_s3 + $0x18] sm:$0xff] %v164_v3 }
  0x36   : > { %167 = vst [vmem:[%s1954_s3 + $0x20] sm:$0xff] %v166_v4  ;;  %169 = vst [vmem:[%s1954_s3 + $0x28] sm:$0xff] %v168_v5  ;;  %v170_v6 = vld [vmem:[%s1949_s7 + $0x60] sm:$0xff]  ;;  %v172_v7 = vld [vmem:[%s1949_s7 + $0x68] sm:$0xff] }
  0x37   : > { %v174_v8 = vld [vmem:[%s1949_s7 + $0x80] sm:$0xff]  ;;  %171 = vst [vmem:[%s1954_s3 + $0x30] sm:$0xff] %v170_v6  ;;  %173 = vst [vmem:[%s1954_s3 + $0x38] sm:$0xff] %v172_v7  ;;  %v176_v9 = vld [vmem:[%s1949_s7 + $0x88] sm:$0xff] }
  0x38   : > { %175 = vst [vmem:[%s1954_s3 + $0x40] sm:$0xff] %v174_v8  ;;  %v178_v10 = vld [vmem:[%s1949_s7 + $0xa0] sm:$0xff]  ;;  %v180_v11 = vld [vmem:[%s1949_s7 + $0xa8] sm:$0xff]  ;;  %177 = vst [vmem:[%s1954_s3 + $0x48] sm:$0xff] %v176_v9 }
  0x39   : > { %179 = vst [vmem:[%s1954_s3 + $0x50] sm:$0xff] %v178_v10  ;;  %181 = vst [vmem:[%s1954_s3 + $0x58] sm:$0xff] %v180_v11  ;;  %v182_v12 = vld [vmem:[%s1949_s7 + $0xc0] sm:$0xff]  ;;  %v184_v13 = vld [vmem:[%s1949_s7 + $0xc8] sm:$0xff] }
  0x3a   : > { %v186_v14 = vld [vmem:[%s1949_s7 + $0xe0] sm:$0xff]  ;;  %183 = vst [vmem:[%s1954_s3 + $0x60] sm:$0xff] %v182_v12  ;;  %185 = vst [vmem:[%s1954_s3 + $0x68] sm:$0xff] %v184_v13  ;;  %v188_v15 = vld [vmem:[%s1949_s7 + $0xe8] sm:$0xff] }
  0x3b   : > { %187 = vst [vmem:[%s1954_s3 + $0x70] sm:$0xff] %v186_v14  ;;  %v190_v16 = vld [vmem:[%s1949_s7 + $0x100] sm:$0xff]  ;;  %v192_v17 = vld [vmem:[%s1949_s7 + $0x108] sm:$0xff]  ;;  %189 = vst [vmem:[%s1954_s3 + $0x78] sm:$0xff] %v188_v15 }
  0x3c   : > { %191 = vst [vmem:[%s1954_s3 + $0x80] sm:$0xff] %v190_v16  ;;  %193 = vst [vmem:[%s1954_s3 + $0x88] sm:$0xff] %v192_v17  ;;  %v194_v18 = vld [vmem:[%s1949_s7 + $0x120] sm:$0xff]  ;;  %v196_v19 = vld [vmem:[%s1949_s7 + $0x128] sm:$0xff] }
  0x3d   : > { %v198_v20 = vld [vmem:[%s1949_s7 + $0x140] sm:$0xff]  ;;  %195 = vst [vmem:[%s1954_s3 + $0x90] sm:$0xff] %v194_v18  ;;  %197 = vst [vmem:[%s1954_s3 + $0x98] sm:$0xff] %v196_v19  ;;  %v200_v21 = vld [vmem:[%s1949_s7 + $0x148] sm:$0xff] }
  0x3e   : > { %199 = vst [vmem:[%s1954_s3 + $0xa0] sm:$0xff] %v198_v20  ;;  %v202_v22 = vld [vmem:[%s1949_s7 + $0x160] sm:$0xff]  ;;  %v204_v23 = vld [vmem:[%s1949_s7 + $0x168] sm:$0xff]  ;;  %201 = vst [vmem:[%s1954_s3 + $0xa8] sm:$0xff] %v200_v21 }
  0x3f   : > { %203 = vst [vmem:[%s1954_s3 + $0xb0] sm:$0xff] %v202_v22  ;;  %205 = vst [vmem:[%s1954_s3 + $0xb8] sm:$0xff] %v204_v23  ;;  %v206_v24 = vld [vmem:[%s1949_s7 + $0x180] sm:$0xff]  ;;  %v208_v25 = vld [vmem:[%s1949_s7 + $0x188] sm:$0xff] }
  0x40   : > { %v210_v26 = vld [vmem:[%s1949_s7 + $0x1a0] sm:$0xff]  ;;  %207 = vst [vmem:[%s1954_s3 + $0xc0] sm:$0xff] %v206_v24  ;;  %209 = vst [vmem:[%s1954_s3 + $0xc8] sm:$0xff] %v208_v25  ;;  %v212_v27 = vld [vmem:[%s1949_s7 + $0x1a8] sm:$0xff] }
  0x41   : > { %211 = vst [vmem:[%s1954_s3 + $0xd0] sm:$0xff] %v210_v26  ;;  %v214_v28 = vld [vmem:[%s1949_s7 + $0x1c0] sm:$0xff]  ;;  %v216_v29 = vld [vmem:[%s1949_s7 + $0x1c8] sm:$0xff]  ;;  %213 = vst [vmem:[%s1954_s3 + $0xd8] sm:$0xff] %v212_v27 }
  0x42   : > { %215 = vst [vmem:[%s1954_s3 + $0xe0] sm:$0xff] %v214_v28  ;;  %217 = vst [vmem:[%s1954_s3 + $0xe8] sm:$0xff] %v216_v29  ;;  %v218_v30 = vld [vmem:[%s1949_s7 + $0x1e0] sm:$0xff]  ;;  %v220_v31 = vld [vmem:[%s1949_s7 + $0x1e8] sm:$0xff] }
  0x43   : > { %v222_v32 = vld [vmem:[%s1949_s7 + $0x200] sm:$0xff]  ;;  %219 = vst [vmem:[%s1954_s3 + $0xf0] sm:$0xff] %v218_v30  ;;  %221 = vst [vmem:[%s1954_s3 + $0xf8] sm:$0xff] %v220_v31  ;;  %v224_v33 = vld [vmem:[%s1949_s7 + $0x208] sm:$0xff] }
  0x44   : > { %223 = vst [vmem:[%s1954_s3 + $0x100] sm:$0xff] %v222_v32  ;;  %v226_v34 = vld [vmem:[%s1949_s7 + $0x220] sm:$0xff]  ;;  %v228_v35 = vld [vmem:[%s1949_s7 + $0x228] sm:$0xff]  ;;  %225 = vst [vmem:[%s1954_s3 + $0x108] sm:$0xff] %v224_v33 }
  0x45   : > { %227 = vst [vmem:[%s1954_s3 + $0x110] sm:$0xff] %v226_v34  ;;  %229 = vst [vmem:[%s1954_s3 + $0x118] sm:$0xff] %v228_v35  ;;  %v230_v36 = vld [vmem:[%s1949_s7 + $0x240] sm:$0xff]  ;;  %v232_v37 = vld [vmem:[%s1949_s7 + $0x248] sm:$0xff] }
  0x46   : > { %v234_v38 = vld [vmem:[%s1949_s7 + $0x260] sm:$0xff]  ;;  %231 = vst [vmem:[%s1954_s3 + $0x120] sm:$0xff] %v230_v36  ;;  %233 = vst [vmem:[%s1954_s3 + $0x128] sm:$0xff] %v232_v37  ;;  %v236_v39 = vld [vmem:[%s1949_s7 + $0x268] sm:$0xff] }
  0x47   : > { %235 = vst [vmem:[%s1954_s3 + $0x130] sm:$0xff] %v234_v38  ;;  %v238_v40 = vld [vmem:[%s1949_s7 + $0x280] sm:$0xff]  ;;  %v240_v41 = vld [vmem:[%s1949_s7 + $0x288] sm:$0xff]  ;;  %237 = vst [vmem:[%s1954_s3 + $0x138] sm:$0xff] %v236_v39 }
  0x48   : > { %239 = vst [vmem:[%s1954_s3 + $0x140] sm:$0xff] %v238_v40  ;;  %241 = vst [vmem:[%s1954_s3 + $0x148] sm:$0xff] %v240_v41  ;;  %v242_v42 = vld [vmem:[%s1949_s7 + $0x2a0] sm:$0xff]  ;;  %v244_v43 = vld [vmem:[%s1949_s7 + $0x2a8] sm:$0xff] }
  0x49   : > { %v246_v44 = vld [vmem:[%s1949_s7 + $0x2c0] sm:$0xff]  ;;  %243 = vst [vmem:[%s1954_s3 + $0x150] sm:$0xff] %v242_v42  ;;  %245 = vst [vmem:[%s1954_s3 + $0x158] sm:$0xff] %v244_v43  ;;  %v248_v45 = vld [vmem:[%s1949_s7 + $0x2c8] sm:$0xff] }
  0x4a   : > { %247 = vst [vmem:[%s1954_s3 + $0x160] sm:$0xff] %v246_v44  ;;  %v250_v46 = vld [vmem:[%s1949_s7 + $0x2e0] sm:$0xff]  ;;  %v252_v47 = vld [vmem:[%s1949_s7 + $0x2e8] sm:$0xff]  ;;  %249 = vst [vmem:[%s1954_s3 + $0x168] sm:$0xff] %v248_v45 }
  0x4b   : > { %251 = vst [vmem:[%s1954_s3 + $0x170] sm:$0xff] %v250_v46  ;;  %253 = vst [vmem:[%s1954_s3 + $0x178] sm:$0xff] %v252_v47  ;;  %v254_v48 = vld [vmem:[%s1949_s7 + $0x300] sm:$0xff]  ;;  %v256_v49 = vld [vmem:[%s1949_s7 + $0x308] sm:$0xff] }
  0x4c   : > { %v258_v50 = vld [vmem:[%s1949_s7 + $0x320] sm:$0xff]  ;;  %255 = vst [vmem:[%s1954_s3 + $0x180] sm:$0xff] %v254_v48  ;;  %257 = vst [vmem:[%s1954_s3 + $0x188] sm:$0xff] %v256_v49  ;;  %v260_v51 = vld [vmem:[%s1949_s7 + $0x328] sm:$0xff] }
  0x4d   : > { %259 = vst [vmem:[%s1954_s3 + $0x190] sm:$0xff] %v258_v50  ;;  %v262_v52 = vld [vmem:[%s1949_s7 + $0x340] sm:$0xff]  ;;  %v264_v53 = vld [vmem:[%s1949_s7 + $0x348] sm:$0xff]  ;;  %261 = vst [vmem:[%s1954_s3 + $0x198] sm:$0xff] %v260_v51 }
  0x4e   : > { %263 = vst [vmem:[%s1954_s3 + $0x1a0] sm:$0xff] %v262_v52  ;;  %265 = vst [vmem:[%s1954_s3 + $0x1a8] sm:$0xff] %v264_v53  ;;  %v266_v54 = vld [vmem:[%s1949_s7 + $0x360] sm:$0xff]  ;;  %v268_v55 = vld [vmem:[%s1949_s7 + $0x368] sm:$0xff] }
  0x4f   : > { %v270_v56 = vld [vmem:[%s1949_s7 + $0x380] sm:$0xff]  ;;  %267 = vst [vmem:[%s1954_s3 + $0x1b0] sm:$0xff] %v266_v54  ;;  %269 = vst [vmem:[%s1954_s3 + $0x1b8] sm:$0xff] %v268_v55  ;;  %v272_v57 = vld [vmem:[%s1949_s7 + $0x388] sm:$0xff] }
  0x50   : > { %271 = vst [vmem:[%s1954_s3 + $0x1c0] sm:$0xff] %v270_v56  ;;  %v274_v58 = vld [vmem:[%s1949_s7 + $0x3a0] sm:$0xff]  ;;  %v276_v59 = vld [vmem:[%s1949_s7 + $0x3a8] sm:$0xff]  ;;  %273 = vst [vmem:[%s1954_s3 + $0x1c8] sm:$0xff] %v272_v57 }
  0x51   : > { %275 = vst [vmem:[%s1954_s3 + $0x1d0] sm:$0xff] %v274_v58  ;;  %277 = vst [vmem:[%s1954_s3 + $0x1d8] sm:$0xff] %v276_v59  ;;  %v278_v60 = vld [vmem:[%s1949_s7 + $0x3c0] sm:$0xff]  ;;  %v280_v61 = vld [vmem:[%s1949_s7 + $0x3c8] sm:$0xff] }
  0x52   : > { %v282_v62 = vld [vmem:[%s1949_s7 + $0x3e0] sm:$0xff]  ;;  %279 = vst [vmem:[%s1954_s3 + $0x1e0] sm:$0xff] %v278_v60  ;;  %281 = vst [vmem:[%s1954_s3 + $0x1e8] sm:$0xff] %v280_v61  ;;  %v284_v63 = vld [vmem:[%s1949_s7 + $0x3e8] sm:$0xff] }
  0x53   : > { %283 = vst [vmem:[%s1954_s3 + $0x1f0] sm:$0xff] %v282_v62  ;;  %285 = vst [vmem:[%s1954_s3 + $0x1f8] sm:$0xff] %v284_v63 }
  0x54 PF: > { %291 = sbr.rel (!%p1906_p6) target bundleno = 123 (0x7b), region = 43  ;;  %s293_s23 = sand.u32 (%p1906_p6), 1, %s1752_s13  }
  0x55   : > { %s1408_s24 = sshll.u32 (%p1906_p6), %s1780_s20, 1  ;;  %s1406_s25 = sshll.u32 (%p1906_p6), %s293_s23, 9 }
  0x56   : > { %s1425_s26 = sshll.u32 (%p1906_p6), %s1776_s19, 7  ;;  %s2094_s5 = scalar_lea.vmem (%p1906_p6), [#allocation4], %s1406_s25 }
  0x57   : > { %s299_s28 = sadd.s32 (%p1906_p6), %s1425_s26, %s1408_s24 }
  0x58   : > { %s1410_s29 = sshll.u32 (%p1906_p6), %s299_s28, 3 }
  0x59   : > { %s2089_s0 = scalar_lea.vmem (%p1906_p6), %s2581_s1, %s1410_s29 }
  0x5a   : > { %v314_v0 = vld [vmem:[%s2089_s0] sm:$0xff] (%p1906_p6)  ;;  %v316_v1 = vld [vmem:[%s2089_s0 + $0x8] sm:$0xff] (%p1906_p6) }
  0x5b   : > { %v318_v2 = vld [vmem:[%s2089_s0 + $0x20] sm:$0xff]  ;;  %315 = vst [vmem:[%s2094_s5] sm:$0xff] %v314_v0  ;;  %317 = vst [vmem:[%s2094_s5 + $0x8] sm:$0xff] %v316_v1  ;;  %v320_v3 = vld [vmem:[%s2089_s0 + $0x28] sm:$0xff] }
  0x5c   : > { %319 = vst [vmem:[%s2094_s5 + $0x10] sm:$0xff] %v318_v2  ;;  %v322_v4 = vld [vmem:[%s2089_s0 + $0x40] sm:$0xff]  ;;  %v324_v5 = vld [vmem:[%s2089_s0 + $0x48] sm:$0xff]  ;;  %321 = vst [vmem:[%s2094_s5 + $0x18] sm:$0xff] %v320_v3 }
  0x5d   : > { %323 = vst [vmem:[%s2094_s5 + $0x20] sm:$0xff] %v322_v4  ;;  %325 = vst [vmem:[%s2094_s5 + $0x28] sm:$0xff] %v324_v5  ;;  %v326_v6 = vld [vmem:[%s2089_s0 + $0x60] sm:$0xff]  ;;  %v328_v7 = vld [vmem:[%s2089_s0 + $0x68] sm:$0xff] }
  0x5e   : > { %v330_v8 = vld [vmem:[%s2089_s0 + $0x80] sm:$0xff]  ;;  %327 = vst [vmem:[%s2094_s5 + $0x30] sm:$0xff] %v326_v6  ;;  %329 = vst [vmem:[%s2094_s5 + $0x38] sm:$0xff] %v328_v7  ;;  %v332_v9 = vld [vmem:[%s2089_s0 + $0x88] sm:$0xff] }
  0x5f   : > { %331 = vst [vmem:[%s2094_s5 + $0x40] sm:$0xff] %v330_v8  ;;  %v334_v10 = vld [vmem:[%s2089_s0 + $0xa0] sm:$0xff]  ;;  %v336_v11 = vld [vmem:[%s2089_s0 + $0xa8] sm:$0xff]  ;;  %333 = vst [vmem:[%s2094_s5 + $0x48] sm:$0xff] %v332_v9 }
  0x60   : > { %335 = vst [vmem:[%s2094_s5 + $0x50] sm:$0xff] %v334_v10  ;;  %337 = vst [vmem:[%s2094_s5 + $0x58] sm:$0xff] %v336_v11  ;;  %v338_v12 = vld [vmem:[%s2089_s0 + $0xc0] sm:$0xff]  ;;  %v340_v13 = vld [vmem:[%s2089_s0 + $0xc8] sm:$0xff] }
  0x61   : > { %v342_v14 = vld [vmem:[%s2089_s0 + $0xe0] sm:$0xff]  ;;  %339 = vst [vmem:[%s2094_s5 + $0x60] sm:$0xff] %v338_v12  ;;  %341 = vst [vmem:[%s2094_s5 + $0x68] sm:$0xff] %v340_v13  ;;  %v344_v15 = vld [vmem:[%s2089_s0 + $0xe8] sm:$0xff] }
  0x62   : > { %343 = vst [vmem:[%s2094_s5 + $0x70] sm:$0xff] %v342_v14  ;;  %v346_v16 = vld [vmem:[%s2089_s0 + $0x100] sm:$0xff]  ;;  %v348_v17 = vld [vmem:[%s2089_s0 + $0x108] sm:$0xff]  ;;  %345 = vst [vmem:[%s2094_s5 + $0x78] sm:$0xff] %v344_v15 }
  0x63   : > { %347 = vst [vmem:[%s2094_s5 + $0x80] sm:$0xff] %v346_v16  ;;  %349 = vst [vmem:[%s2094_s5 + $0x88] sm:$0xff] %v348_v17  ;;  %v350_v18 = vld [vmem:[%s2089_s0 + $0x120] sm:$0xff]  ;;  %v352_v19 = vld [vmem:[%s2089_s0 + $0x128] sm:$0xff] }
  0x64   : > { %v354_v20 = vld [vmem:[%s2089_s0 + $0x140] sm:$0xff]  ;;  %351 = vst [vmem:[%s2094_s5 + $0x90] sm:$0xff] %v350_v18  ;;  %353 = vst [vmem:[%s2094_s5 + $0x98] sm:$0xff] %v352_v19  ;;  %v356_v21 = vld [vmem:[%s2089_s0 + $0x148] sm:$0xff] }
  0x65   : > { %355 = vst [vmem:[%s2094_s5 + $0xa0] sm:$0xff] %v354_v20  ;;  %v358_v22 = vld [vmem:[%s2089_s0 + $0x160] sm:$0xff]  ;;  %v360_v23 = vld [vmem:[%s2089_s0 + $0x168] sm:$0xff]  ;;  %357 = vst [vmem:[%s2094_s5 + $0xa8] sm:$0xff] %v356_v21 }
  0x66   : > { %359 = vst [vmem:[%s2094_s5 + $0xb0] sm:$0xff] %v358_v22  ;;  %361 = vst [vmem:[%s2094_s5 + $0xb8] sm:$0xff] %v360_v23  ;;  %v362_v24 = vld [vmem:[%s2089_s0 + $0x180] sm:$0xff]  ;;  %v364_v25 = vld [vmem:[%s2089_s0 + $0x188] sm:$0xff] }
  0x67   : > { %v366_v26 = vld [vmem:[%s2089_s0 + $0x1a0] sm:$0xff]  ;;  %363 = vst [vmem:[%s2094_s5 + $0xc0] sm:$0xff] %v362_v24  ;;  %365 = vst [vmem:[%s2094_s5 + $0xc8] sm:$0xff] %v364_v25  ;;  %v368_v27 = vld [vmem:[%s2089_s0 + $0x1a8] sm:$0xff] }
  0x68   : > { %367 = vst [vmem:[%s2094_s5 + $0xd0] sm:$0xff] %v366_v26  ;;  %v370_v28 = vld [vmem:[%s2089_s0 + $0x1c0] sm:$0xff]  ;;  %v372_v29 = vld [vmem:[%s2089_s0 + $0x1c8] sm:$0xff]  ;;  %369 = vst [vmem:[%s2094_s5 + $0xd8] sm:$0xff] %v368_v27 }
  0x69   : > { %371 = vst [vmem:[%s2094_s5 + $0xe0] sm:$0xff] %v370_v28  ;;  %373 = vst [vmem:[%s2094_s5 + $0xe8] sm:$0xff] %v372_v29  ;;  %v374_v30 = vld [vmem:[%s2089_s0 + $0x1e0] sm:$0xff]  ;;  %v376_v31 = vld [vmem:[%s2089_s0 + $0x1e8] sm:$0xff] }
  0x6a   : > { %v378_v32 = vld [vmem:[%s2089_s0 + $0x200] sm:$0xff]  ;;  %375 = vst [vmem:[%s2094_s5 + $0xf0] sm:$0xff] %v374_v30  ;;  %377 = vst [vmem:[%s2094_s5 + $0xf8] sm:$0xff] %v376_v31  ;;  %v380_v33 = vld [vmem:[%s2089_s0 + $0x208] sm:$0xff] }
  0x6b   : > { %379 = vst [vmem:[%s2094_s5 + $0x100] sm:$0xff] %v378_v32  ;;  %v382_v34 = vld [vmem:[%s2089_s0 + $0x220] sm:$0xff]  ;;  %v384_v35 = vld [vmem:[%s2089_s0 + $0x228] sm:$0xff]  ;;  %381 = vst [vmem:[%s2094_s5 + $0x108] sm:$0xff] %v380_v33 }
  0x6c   : > { %383 = vst [vmem:[%s2094_s5 + $0x110] sm:$0xff] %v382_v34  ;;  %385 = vst [vmem:[%s2094_s5 + $0x118] sm:$0xff] %v384_v35  ;;  %v386_v36 = vld [vmem:[%s2089_s0 + $0x240] sm:$0xff]  ;;  %v388_v37 = vld [vmem:[%s2089_s0 + $0x248] sm:$0xff] }
  0x6d   : > { %v390_v38 = vld [vmem:[%s2089_s0 + $0x260] sm:$0xff]  ;;  %387 = vst [vmem:[%s2094_s5 + $0x120] sm:$0xff] %v386_v36  ;;  %389 = vst [vmem:[%s2094_s5 + $0x128] sm:$0xff] %v388_v37  ;;  %v392_v39 = vld [vmem:[%s2089_s0 + $0x268] sm:$0xff] }
  0x6e   : > { %391 = vst [vmem:[%s2094_s5 + $0x130] sm:$0xff] %v390_v38  ;;  %v394_v40 = vld [vmem:[%s2089_s0 + $0x280] sm:$0xff]  ;;  %v396_v41 = vld [vmem:[%s2089_s0 + $0x288] sm:$0xff]  ;;  %393 = vst [vmem:[%s2094_s5 + $0x138] sm:$0xff] %v392_v39 }
  0x6f   : > { %395 = vst [vmem:[%s2094_s5 + $0x140] sm:$0xff] %v394_v40  ;;  %397 = vst [vmem:[%s2094_s5 + $0x148] sm:$0xff] %v396_v41  ;;  %v398_v42 = vld [vmem:[%s2089_s0 + $0x2a0] sm:$0xff]  ;;  %v400_v43 = vld [vmem:[%s2089_s0 + $0x2a8] sm:$0xff] }
  0x70   : > { %v402_v44 = vld [vmem:[%s2089_s0 + $0x2c0] sm:$0xff]  ;;  %399 = vst [vmem:[%s2094_s5 + $0x150] sm:$0xff] %v398_v42  ;;  %401 = vst [vmem:[%s2094_s5 + $0x158] sm:$0xff] %v400_v43  ;;  %v404_v45 = vld [vmem:[%s2089_s0 + $0x2c8] sm:$0xff] }
  0x71   : > { %403 = vst [vmem:[%s2094_s5 + $0x160] sm:$0xff] %v402_v44  ;;  %v406_v46 = vld [vmem:[%s2089_s0 + $0x2e0] sm:$0xff]  ;;  %v408_v47 = vld [vmem:[%s2089_s0 + $0x2e8] sm:$0xff]  ;;  %405 = vst [vmem:[%s2094_s5 + $0x168] sm:$0xff] %v404_v45 }
  0x72   : > { %407 = vst [vmem:[%s2094_s5 + $0x170] sm:$0xff] %v406_v46  ;;  %409 = vst [vmem:[%s2094_s5 + $0x178] sm:$0xff] %v408_v47  ;;  %v410_v48 = vld [vmem:[%s2089_s0 + $0x300] sm:$0xff]  ;;  %v412_v49 = vld [vmem:[%s2089_s0 + $0x308] sm:$0xff] }
  0x73   : > { %v414_v50 = vld [vmem:[%s2089_s0 + $0x320] sm:$0xff]  ;;  %411 = vst [vmem:[%s2094_s5 + $0x180] sm:$0xff] %v410_v48  ;;  %413 = vst [vmem:[%s2094_s5 + $0x188] sm:$0xff] %v412_v49  ;;  %v416_v51 = vld [vmem:[%s2089_s0 + $0x328] sm:$0xff] }
  0x74   : > { %415 = vst [vmem:[%s2094_s5 + $0x190] sm:$0xff] %v414_v50  ;;  %v418_v52 = vld [vmem:[%s2089_s0 + $0x340] sm:$0xff]  ;;  %v420_v53 = vld [vmem:[%s2089_s0 + $0x348] sm:$0xff]  ;;  %417 = vst [vmem:[%s2094_s5 + $0x198] sm:$0xff] %v416_v51 }
  0x75   : > { %419 = vst [vmem:[%s2094_s5 + $0x1a0] sm:$0xff] %v418_v52  ;;  %421 = vst [vmem:[%s2094_s5 + $0x1a8] sm:$0xff] %v420_v53  ;;  %v422_v54 = vld [vmem:[%s2089_s0 + $0x360] sm:$0xff]  ;;  %v424_v55 = vld [vmem:[%s2089_s0 + $0x368] sm:$0xff] }
  0x76   : > { %v426_v56 = vld [vmem:[%s2089_s0 + $0x380] sm:$0xff]  ;;  %423 = vst [vmem:[%s2094_s5 + $0x1b0] sm:$0xff] %v422_v54  ;;  %425 = vst [vmem:[%s2094_s5 + $0x1b8] sm:$0xff] %v424_v55  ;;  %v428_v57 = vld [vmem:[%s2089_s0 + $0x388] sm:$0xff] }
  0x77   : > { %427 = vst [vmem:[%s2094_s5 + $0x1c0] sm:$0xff] %v426_v56  ;;  %v430_v58 = vld [vmem:[%s2089_s0 + $0x3a0] sm:$0xff]  ;;  %v432_v59 = vld [vmem:[%s2089_s0 + $0x3a8] sm:$0xff]  ;;  %429 = vst [vmem:[%s2094_s5 + $0x1c8] sm:$0xff] %v428_v57 }
  0x78   : > { %431 = vst [vmem:[%s2094_s5 + $0x1d0] sm:$0xff] %v430_v58  ;;  %433 = vst [vmem:[%s2094_s5 + $0x1d8] sm:$0xff] %v432_v59  ;;  %v434_v60 = vld [vmem:[%s2089_s0 + $0x3c0] sm:$0xff]  ;;  %v436_v61 = vld [vmem:[%s2089_s0 + $0x3c8] sm:$0xff] }
  0x79   : > { %v438_v62 = vld [vmem:[%s2089_s0 + $0x3e0] sm:$0xff]  ;;  %435 = vst [vmem:[%s2094_s5 + $0x1e0] sm:$0xff] %v434_v60  ;;  %437 = vst [vmem:[%s2094_s5 + $0x1e8] sm:$0xff] %v436_v61  ;;  %v440_v63 = vld [vmem:[%s2089_s0 + $0x3e8] sm:$0xff] }
  0x7a   : > { %439 = vst [vmem:[%s2094_s5 + $0x1f0] sm:$0xff] %v438_v62  ;;  %441 = vst [vmem:[%s2094_s5 + $0x1f8] sm:$0xff] %v440_v63 }
  0x7b PF: > { %p1411_p4 = scmp.ge.s32.totalorder %s1788_s22, 1  ;;  %p446_p5 = scmp.lt.s32.totalorder %s1788_s22, 9 }
  0x7d   : > { %p447_p6 = pnand %p1411_p4, %p446_p5 }
  0x7e   : > { %s453_s7 = sand.u32 (!%p447_p6), 1, %s1756_s14   ;;  %s460_s3 = sand.u32 (!%p447_p6), 1, %s1748_s12  }
  0x7f   : > { %450 = sbr.rel (%p447_p6) target bundleno = 563 (0x233), region = 66  ;;  %s1412_s23 = sshll.u32 (!%p447_p6), %s453_s7, 9 }
  0x80   : > { %s1413_s24 = sshll.u32 (!%p447_p6), %s460_s3, 9  ;;  %s482_s25 = sand.u32 (!%p447_p6), 1, %s1740_s10  }
  0x81   : > { %s1414_s0 = sshll.u32 (!%p447_p6), %s482_s25, 9  ;;  %s2228_s26 = scalar_lea.vmem (!%p447_p6), [#allocation3], %s1412_s23 }
  0x82   : > { %s2230_s28 = scalar_lea.vmem (!%p447_p6), [#allocation4], %s1413_s24  ;;  %s2232_s29 = scalar_lea.vmem (!%p447_p6), [#allocation5], %s1414_s0 }
  0x83   : > { %p1415_p7 = scmp.ne.s32.totalorder (!%p447_p6), %s1764_s16, 0 }
  0x86   : > { %494 = sbr.rel (%p1415_p7) target bundleno = 167 (0xa7), region = 78  ;;  %v1790_v0 = vmov (!%p1415_p7), 0.0  }
  0x87   : > { %495 = vst [vmem:[#allocation2] sm:$0xff] (!%p1415_p7), %v1790_v0  ;;  %496 = vst [vmem:[#allocation2 + $0x8] sm:$0xff] (!%p1415_p7), %v1790_v0 }
  0x88   : > { %497 = vst [vmem:[#allocation2 + $0x10] sm:$0xff] (!%p1415_p7), %v1790_v0  ;;  %498 = vst [vmem:[#allocation2 + $0x18] sm:$0xff] (!%p1415_p7), %v1790_v0 }
  0x89   : > { %499 = vst [vmem:[#allocation2 + $0x20] sm:$0xff] (!%p1415_p7), %v1790_v0  ;;  %500 = vst [vmem:[#allocation2 + $0x28] sm:$0xff] (!%p1415_p7), %v1790_v0 }
  0x8a   : > { %501 = vst [vmem:[#allocation2 + $0x30] sm:$0xff] (!%p1415_p7), %v1790_v0  ;;  %502 = vst [vmem:[#allocation2 + $0x38] sm:$0xff] (!%p1415_p7), %v1790_v0 }
  0x8b   : > { %503 = vst [vmem:[#allocation2 + $0x40] sm:$0xff] (!%p1415_p7), %v1790_v0  ;;  %504 = vst [vmem:[#allocation2 + $0x48] sm:$0xff] (!%p1415_p7), %v1790_v0 }
  0x8c   : > { %505 = vst [vmem:[#allocation2 + $0x50] sm:$0xff] (!%p1415_p7), %v1790_v0  ;;  %506 = vst [vmem:[#allocation2 + $0x58] sm:$0xff] (!%p1415_p7), %v1790_v0 }
  0x8d   : > { %507 = vst [vmem:[#allocation2 + $0x60] sm:$0xff] %v1790_v0  ;;  %508 = vst [vmem:[#allocation2 + $0x68] sm:$0xff] %v1790_v0 }
  0x8e   : > { %509 = vst [vmem:[#allocation2 + $0x70] sm:$0xff] %v1790_v0  ;;  %510 = vst [vmem:[#allocation2 + $0x78] sm:$0xff] %v1790_v0 }
  0x8f   : > { %511 = vst [vmem:[#allocation2 + $0x80] sm:$0xff] %v1790_v0  ;;  %512 = vst [vmem:[#allocation2 + $0x88] sm:$0xff] %v1790_v0 }
  0x90   : > { %513 = vst [vmem:[#allocation2 + $0x90] sm:$0xff] %v1790_v0  ;;  %514 = vst [vmem:[#allocation2 + $0x98] sm:$0xff] %v1790_v0 }
  0x91   : > { %515 = vst [vmem:[#allocation2 + $0xa0] sm:$0xff] %v1790_v0  ;;  %516 = vst [vmem:[#allocation2 + $0xa8] sm:$0xff] %v1790_v0 }
  0x92   : > { %517 = vst [vmem:[#allocation2 + $0xb0] sm:$0xff] %v1790_v0  ;;  %518 = vst [vmem:[#allocation2 + $0xb8] sm:$0xff] %v1790_v0 }
  0x93   : > { %519 = vst [vmem:[#allocation2 + $0xc0] sm:$0xff] %v1790_v0  ;;  %520 = vst [vmem:[#allocation2 + $0xc8] sm:$0xff] %v1790_v0 }
  0x94   : > { %521 = vst [vmem:[#allocation2 + $0xd0] sm:$0xff] %v1790_v0  ;;  %522 = vst [vmem:[#allocation2 + $0xd8] sm:$0xff] %v1790_v0 }
  0x95   : > { %523 = vst [vmem:[#allocation2 + $0xe0] sm:$0xff] %v1790_v0  ;;  %524 = vst [vmem:[#allocation2 + $0xe8] sm:$0xff] %v1790_v0 }
  0x96   : > { %525 = vst [vmem:[#allocation2 + $0xf0] sm:$0xff] %v1790_v0  ;;  %526 = vst [vmem:[#allocation2 + $0xf8] sm:$0xff] %v1790_v0 }
  0x97   : > { %527 = vst [vmem:[#allocation2 + $0x100] sm:$0xff] %v1790_v0  ;;  %528 = vst [vmem:[#allocation2 + $0x108] sm:$0xff] %v1790_v0 }
  0x98   : > { %529 = vst [vmem:[#allocation2 + $0x110] sm:$0xff] %v1790_v0  ;;  %530 = vst [vmem:[#allocation2 + $0x118] sm:$0xff] %v1790_v0 }
  0x99   : > { %531 = vst [vmem:[#allocation2 + $0x120] sm:$0xff] %v1790_v0  ;;  %532 = vst [vmem:[#allocation2 + $0x128] sm:$0xff] %v1790_v0 }
  0x9a   : > { %533 = vst [vmem:[#allocation2 + $0x130] sm:$0xff] %v1790_v0  ;;  %534 = vst [vmem:[#allocation2 + $0x138] sm:$0xff] %v1790_v0 }
  0x9b   : > { %535 = vst [vmem:[#allocation2 + $0x140] sm:$0xff] %v1790_v0  ;;  %536 = vst [vmem:[#allocation2 + $0x148] sm:$0xff] %v1790_v0 }
  0x9c   : > { %537 = vst [vmem:[#allocation2 + $0x150] sm:$0xff] %v1790_v0  ;;  %538 = vst [vmem:[#allocation2 + $0x158] sm:$0xff] %v1790_v0 }
  0x9d   : > { %539 = vst [vmem:[#allocation2 + $0x160] sm:$0xff] %v1790_v0  ;;  %540 = vst [vmem:[#allocation2 + $0x168] sm:$0xff] %v1790_v0 }
  0x9e   : > { %541 = vst [vmem:[#allocation2 + $0x170] sm:$0xff] %v1790_v0  ;;  %542 = vst [vmem:[#allocation2 + $0x178] sm:$0xff] %v1790_v0 }
  0x9f   : > { %543 = vst [vmem:[#allocation2 + $0x180] sm:$0xff] %v1790_v0  ;;  %544 = vst [vmem:[#allocation2 + $0x188] sm:$0xff] %v1790_v0 }
  0xa0   : > { %545 = vst [vmem:[#allocation2 + $0x190] sm:$0xff] %v1790_v0  ;;  %546 = vst [vmem:[#allocation2 + $0x198] sm:$0xff] %v1790_v0 }
  0xa1   : > { %547 = vst [vmem:[#allocation2 + $0x1a0] sm:$0xff] %v1790_v0  ;;  %548 = vst [vmem:[#allocation2 + $0x1a8] sm:$0xff] %v1790_v0 }
  0xa2   : > { %549 = vst [vmem:[#allocation2 + $0x1b0] sm:$0xff] %v1790_v0  ;;  %550 = vst [vmem:[#allocation2 + $0x1b8] sm:$0xff] %v1790_v0 }
  0xa3   : > { %551 = vst [vmem:[#allocation2 + $0x1c0] sm:$0xff] %v1790_v0  ;;  %552 = vst [vmem:[#allocation2 + $0x1c8] sm:$0xff] %v1790_v0 }
  0xa4   : > { %553 = vst [vmem:[#allocation2 + $0x1d0] sm:$0xff] %v1790_v0  ;;  %554 = vst [vmem:[#allocation2 + $0x1d8] sm:$0xff] %v1790_v0 }
  0xa5   : > { %555 = vst [vmem:[#allocation2 + $0x1e0] sm:$0xff] %v1790_v0  ;;  %556 = vst [vmem:[#allocation2 + $0x1e8] sm:$0xff] %v1790_v0 }
  0xa6   : > { %557 = vst [vmem:[#allocation2 + $0x1f0] sm:$0xff] %v1790_v0  ;;  %558 = vst [vmem:[#allocation2 + $0x1f8] sm:$0xff] %v1790_v0 }
  0xa7 PF: > { %v688_v1 = vld [vmem:[%s2230_s28 + $0x8] sm:$0xff]  ;;  %v690_v2 = vld [vmem:[%s2230_s28 + $0x18] sm:$0xff]  ;;  %v687_v3 = vld [vmem:[%s2230_s28] sm:$0xff]  ;;  %p1416_p8 = scmp.ne.s32.totalorder %s1764_s16, 1 }
  0xa8   : > { %v1427_v4 = vpack.c.bf16 %v690_v2, %v688_v1  ;;  %v689_v5 = vld [vmem:[%s2230_s28 + $0x10] sm:$0xff]  ;;  %v692_v6 = vld [vmem:[%s2230_s28 + $0x28] sm:$0xff]  ;;  %v694_v7 = vld [vmem:[%s2230_s28 + $0x38] sm:$0xff] }
  0xa9   : > { %v1429_v8 = vpack.c.bf16 %v689_v5, %v687_v3  ;;  %v1431_v9 = vpack.c.bf16 %v694_v7, %v692_v6  ;;  %v691_v10 = vld [vmem:[%s2230_s28 + $0x20] sm:$0xff]  ;;  %v693_v11 = vld [vmem:[%s2230_s28 + $0x30] sm:$0xff]  ;;  %v696_v12 = vld [vmem:[%s2230_s28 + $0x48] sm:$0xff] }
  0xaa   : > { %1428 = vmatprep.subr.bf16.mxu0 %v1427_v4  ;;  %1491 = vmatprep.subr.bf16.mxu1 %v1427_v4  ;;  %v698_v13 = vld [vmem:[%s2230_s28 + $0x58] sm:$0xff]  ;;  %v1433_v14 = vpack.c.bf16 %v693_v11, %v691_v10  ;;  %v695_v16 = vld [vmem:[%s2230_s28 + $0x40] sm:$0xff]  ;;  %v697_v17 = vld [vmem:[%s2230_s28 + $0x50] sm:$0xff] }
  0xab   : > { %1430 = vmatpush1.bf16.msra.mxu0 %v1429_v8  ;;  %1507 = vmatpush1.bf16.msra.mxu1 %v1429_v8  ;;  %v1435_v15 = vpack.c.bf16 %v698_v13, %v696_v12  ;;  %v700_v18 = vld [vmem:[%s2230_s28 + $0x68] sm:$0xff]  ;;  %v702_v19 = vld [vmem:[%s2230_s28 + $0x78] sm:$0xff]  ;;  %v1437_v20 = vpack.c.bf16 %v697_v17, %v695_v16  ;;  %v699_v22 = vld [vmem:[%s2230_s28 + $0x60] sm:$0xff] }
  0xac   : > { %1432 = vmatprep.subr.bf16.mxu0 %v1431_v9  ;;  %1492 = vmatprep.subr.bf16.mxu1 %v1431_v9  ;;  %v1439_v21 = vpack.c.bf16 %v702_v19, %v700_v18  ;;  %v701_v23 = vld [vmem:[%s2230_s28 + $0x70] sm:$0xff]  ;;  %v704_v24 = vld [vmem:[%s2230_s28 + $0x88] sm:$0xff]  ;;  %v706_v25 = vld [vmem:[%s2230_s28 + $0x98] sm:$0xff] }
  0xad   : > { %v1441_v26 = vpack.c.bf16 %v701_v23, %v699_v22  ;;  %v1443_v27 = vpack.c.bf16 %v706_v25, %v704_v24  ;;  %v703_v28 = vld [vmem:[%s2230_s28 + $0x80] sm:$0xff]  ;;  %v705_v29 = vld [vmem:[%s2230_s28 + $0x90] sm:$0xff]  ;;  %v708_v30 = vld [vmem:[%s2230_s28 + $0xa8] sm:$0xff] }
  0xae   : > { %v710_v31 = vld [vmem:[%s2230_s28 + $0xb8] sm:$0xff]  ;;  %v1445_v32 = vpack.c.bf16 %v705_v29, %v703_v28  ;;  %v707_v34 = vld [vmem:[%s2230_s28 + $0xa0] sm:$0xff]  ;;  %v709_v35 = vld [vmem:[%s2230_s28 + $0xb0] sm:$0xff] }
  0xaf   : > { %1434 = vmatpush1.bf16.msra.mxu0 %v1433_v14  ;;  %1508 = vmatpush1.bf16.msra.mxu1 %v1433_v14  ;;  %v1447_v33 = vpack.c.bf16 %v710_v31, %v708_v30  ;;  %v712_v36 = vld [vmem:[%s2230_s28 + $0xc8] sm:$0xff]  ;;  %v714_v37 = vld [vmem:[%s2230_s28 + $0xd8] sm:$0xff]  ;;  %v1449_v38 = vpack.c.bf16 %v709_v35, %v707_v34  ;;  %v711_v39 = vld [vmem:[%s2230_s28 + $0xc0] sm:$0xff] }
  0xb0   : > { %1436 = vmatprep.subr.bf16.mxu0 %v1435_v15  ;;  %1493 = vmatprep.subr.bf16.mxu1 %v1435_v15  ;;  %v1451_v40 = vpack.c.bf16 %v714_v37, %v712_v36  ;;  %v713_v41 = vld [vmem:[%s2230_s28 + $0xd0] sm:$0xff]  ;;  %v624_v42 = vld [vmem:[%s2228_s26 + $0x8] sm:$0xff]  ;;  %v718_v45 = vld [vmem:[%s2230_s28 + $0xf8] sm:$0xff] }
  0xb1   : > { %v656_v43 = vld [vmem:[%s2228_s26 + $0x108] sm:$0xff]  ;;  %815 = vmatprep.mubr.f32.mxu0 %v624_v42  ;;  %v1453_v46 = vpack.c.bf16 %v713_v41, %v711_v39  ;;  %v715_v48 = vld [vmem:[%s2230_s28 + $0xe0] sm:$0xff]  ;;  %v717_v49 = vld [vmem:[%s2230_s28 + $0xf0] sm:$0xff] }
  0xb2   : > { %v716_v44 = vld [vmem:[%s2230_s28 + $0xe8] sm:$0xff]  ;;  %911 = vmatprep.mubr.f32.mxu1 %v656_v43  ;;  %v722_v51 = vld [vmem:[%s2230_s28 + $0x118] sm:$0xff]  ;;  %v1457_v52 = vpack.c.bf16 %v717_v49, %v715_v48  ;;  %v719_v54 = vld [vmem:[%s2230_s28 + $0x100] sm:$0xff] }
  0xb3   : > { %1438 = vmatpush1.bf16.msra.mxu0 %v1437_v20  ;;  %1509 = vmatpush1.bf16.msra.mxu1 %v1437_v20  ;;  %v1455_v47 = vpack.c.bf16 %v718_v45, %v716_v44  ;;  %v720_v50 = vld [vmem:[%s2230_s28 + $0x108] sm:$0xff]  ;;  %v721_v55 = vld [vmem:[%s2230_s28 + $0x110] sm:$0xff]  ;;  %v726_v57 = vld [vmem:[%s2230_s28 + $0x138] sm:$0xff] }
  0xb4   : > { %1440 = vmatprep.subr.bf16.mxu0 %v1439_v21  ;;  %1494 = vmatprep.subr.bf16.mxu1 %v1439_v21  ;;  %v1459_v53 = vpack.c.bf16 %v722_v51, %v720_v50  ;;  %v724_v56 = vld [vmem:[%s2230_s28 + $0x128] sm:$0xff]  ;;  %v1461_v58 = vpack.c.bf16 %v721_v55, %v719_v54  ;;  %v723_v60 = vld [vmem:[%s2230_s28 + $0x120] sm:$0xff]  ;;  %v725_v61 = vld [vmem:[%s2230_s28 + $0x130] sm:$0xff] }
  0xb5   : > { %v1463_v59 = vpack.c.bf16 %v726_v57, %v724_v56  ;;  %v728_v62 = vld [vmem:[%s2230_s28 + $0x148] sm:$0xff]  ;;  %v730_v63 = vld [vmem:[%s2230_s28 + $0x158] sm:$0xff]  ;;  %v1465_v0 = vpack.c.bf16 %v725_v61, %v723_v60  ;;  %v727_v2 = vld [vmem:[%s2230_s28 + $0x140] sm:$0xff] }
  0xb6   : > { %v1467_v1 = vpack.c.bf16 %v730_v63, %v728_v62  ;;  %v729_v3 = vld [vmem:[%s2230_s28 + $0x150] sm:$0xff]  ;;  %v732_v4 = vld [vmem:[%s2230_s28 + $0x168] sm:$0xff]  ;;  %v734_v5 = vld [vmem:[%s2230_s28 + $0x178] sm:$0xff] }
  0xb7   : > { %1442 = vmatpush1.bf16.msra.mxu0 %v1441_v26  ;;  %1510 = vmatpush1.bf16.msra.mxu1 %v1441_v26  ;;  %v1469_v6 = vpack.c.bf16 %v729_v3, %v727_v2  ;;  %v1471_v7 = vpack.c.bf16 %v734_v5, %v732_v4  ;;  %v731_v8 = vld [vmem:[%s2230_s28 + $0x160] sm:$0xff]  ;;  %v733_v9 = vld [vmem:[%s2230_s28 + $0x170] sm:$0xff]  ;;  %v736_v10 = vld [vmem:[%s2230_s28 + $0x188] sm:$0xff] }
  0xb8   : > { %1444 = vmatprep.subr.bf16.mxu0 %v1443_v27  ;;  %1495 = vmatprep.subr.bf16.mxu1 %v1443_v27  ;;  %v738_v11 = vld [vmem:[%s2230_s28 + $0x198] sm:$0xff]  ;;  %v1473_v12 = vpack.c.bf16 %v733_v9, %v731_v8  ;;  %v735_v14 = vld [vmem:[%s2230_s28 + $0x180] sm:$0xff]  ;;  %v737_v15 = vld [vmem:[%s2230_s28 + $0x190] sm:$0xff] }
  0xb9   : > { %v1475_v13 = vpack.c.bf16 %v738_v11, %v736_v10  ;;  %v740_v16 = vld [vmem:[%s2230_s28 + $0x1a8] sm:$0xff]  ;;  %v742_v17 = vld [vmem:[%s2230_s28 + $0x1b8] sm:$0xff]  ;;  %v1477_v18 = vpack.c.bf16 %v737_v15, %v735_v14  ;;  %v739_v20 = vld [vmem:[%s2230_s28 + $0x1a0] sm:$0xff] }
  0xba   : > { %v1479_v19 = vpack.c.bf16 %v742_v17, %v740_v16  ;;  %v741_v21 = vld [vmem:[%s2230_s28 + $0x1b0] sm:$0xff]  ;;  %v744_v22 = vld [vmem:[%s2230_s28 + $0x1c8] sm:$0xff]  ;;  %v746_v23 = vld [vmem:[%s2230_s28 + $0x1d8] sm:$0xff] }
  0xbb   : > { %1446 = vmatpush1.bf16.msra.mxu0 %v1445_v32  ;;  %1511 = vmatpush1.bf16.msra.mxu1 %v1445_v32  ;;  %v1481_v24 = vpack.c.bf16 %v741_v21, %v739_v20  ;;  %v1483_v25 = vpack.c.bf16 %v746_v23, %v744_v22  ;;  %v743_v26 = vld [vmem:[%s2230_s28 + $0x1c0] sm:$0xff]  ;;  %v745_v27 = vld [vmem:[%s2230_s28 + $0x1d0] sm:$0xff]  ;;  %v748_v28 = vld [vmem:[%s2230_s28 + $0x1e8] sm:$0xff] }
  0xbc   : > { %1448 = vmatprep.subr.bf16.mxu0 %v1447_v33  ;;  %1496 = vmatprep.subr.bf16.mxu1 %v1447_v33  ;;  %v750_v29 = vld [vmem:[%s2230_s28 + $0x1f8] sm:$0xff]  ;;  %v1485_v30 = vpack.c.bf16 %v745_v27, %v743_v26  ;;  %v747_v32 = vld [vmem:[%s2230_s28 + $0x1e0] sm:$0xff]  ;;  %v749_v33 = vld [vmem:[%s2230_s28 + $0x1f0] sm:$0xff] }
  0xbd   : > { %v1487_v31 = vpack.c.bf16 %v750_v29, %v748_v28  ;;  %v1489_v34 = vpack.c.bf16 %v749_v33, %v747_v32  ;;  %v623_v35 = vld [vmem:[%s2228_s26] sm:$0xff]  ;;  %v626_v37 = vld [vmem:[%s2228_s26 + $0x18] sm:$0xff]  ;;  %v625_v39 = vld [vmem:[%s2228_s26 + $0x10] sm:$0xff] }
  0xbe   : > { %v655_v36 = vld [vmem:[%s2228_s26 + $0x100] sm:$0xff]  ;;  %v628_v41 = vld [vmem:[%s2228_s26 + $0x28] sm:$0xff]  ;;  %v630_v45 = vld [vmem:[%s2228_s26 + $0x38] sm:$0xff] }
  0xbf   : > { %1450 = vmatpush1.bf16.msra.mxu0 %v1449_v38  ;;  %1512 = vmatpush1.bf16.msra.mxu1 %v1449_v38  ;;  %v658_v38 = vld [vmem:[%s2228_s26 + $0x118] sm:$0xff]  ;;  %v660_v42 = vld [vmem:[%s2228_s26 + $0x128] sm:$0xff]  ;;  %v627_v43 = vld [vmem:[%s2228_s26 + $0x20] sm:$0xff] }
  0xc0   : > { %1452 = vmatprep.subr.bf16.mxu0 %v1451_v40  ;;  %1497 = vmatprep.subr.bf16.mxu1 %v1451_v40  ;;  %v657_v40 = vld [vmem:[%s2228_s26 + $0x110] sm:$0xff]  ;;  %v659_v44 = vld [vmem:[%s2228_s26 + $0x120] sm:$0xff]  ;;  %v632_v49 = vld [vmem:[%s2228_s26 + $0x48] sm:$0xff] }
  0xc1   : > { %v661_v48 = vld [vmem:[%s2228_s26 + $0x130] sm:$0xff]  ;;  %v664_v50 = vld [vmem:[%s2228_s26 + $0x148] sm:$0xff]  ;;  %v631_v51 = vld [vmem:[%s2228_s26 + $0x40] sm:$0xff] }
  0xc2   : > { %v666_v54 = vld [vmem:[%s2228_s26 + $0x158] sm:$0xff]  ;;  %v633_v55 = vld [vmem:[%s2228_s26 + $0x50] sm:$0xff]  ;;  %v636_v57 = vld [vmem:[%s2228_s26 + $0x68] sm:$0xff] }
  0xc3   : > { %1454 = vmatpush1.bf16.msra.mxu0 %v1453_v46  ;;  %1513 = vmatpush1.bf16.msra.mxu1 %v1453_v46  ;;  %v662_v46 = vld [vmem:[%s2228_s26 + $0x138] sm:$0xff]  ;;  %v665_v56 = vld [vmem:[%s2228_s26 + $0x150] sm:$0xff]  ;;  %v667_v60 = vld [vmem:[%s2228_s26 + $0x160] sm:$0xff] }
  0xc4   : > { %1456 = vmatprep.subr.bf16.mxu0 %v1455_v47  ;;  %1498 = vmatprep.subr.bf16.mxu1 %v1455_v47  ;;  %v629_v47 = vld [vmem:[%s2228_s26 + $0x30] sm:$0xff]  ;;  %v638_v61 = vld [vmem:[%s2228_s26 + $0x78] sm:$0xff]  ;;  %v672_v2 = vld [vmem:[%s2228_s26 + $0x188] sm:$0xff] }
  0xc5   : > { %v670_v62 = vld [vmem:[%s2228_s26 + $0x178] sm:$0xff]  ;;  %v637_v63 = vld [vmem:[%s2228_s26 + $0x70] sm:$0xff]  ;;  %v639_v3 = vld [vmem:[%s2228_s26 + $0x80] sm:$0xff] }
  0xc6   : > { %v671_v4 = vld [vmem:[%s2228_s26 + $0x180] sm:$0xff]  ;;  %v642_v5 = vld [vmem:[%s2228_s26 + $0x98] sm:$0xff]  ;;  %v673_v8 = vld [vmem:[%s2228_s26 + $0x190] sm:$0xff] }
  0xc7   : > { %1458 = vmatpush1.bf16.msra.mxu0 %v1457_v52  ;;  %1514 = vmatpush1.bf16.msra.mxu1 %v1457_v52  ;;  %v663_v52 = vld [vmem:[%s2228_s26 + $0x140] sm:$0xff]  ;;  %v644_v9 = vld [vmem:[%s2228_s26 + $0xa8] sm:$0xff]  ;;  %v678_v14 = vld [vmem:[%s2228_s26 + $0x1b8] sm:$0xff] }
  0xc8   : > { %1460 = vmatprep.subr.bf16.mxu0 %v1459_v53  ;;  %1499 = vmatprep.subr.bf16.mxu1 %v1459_v53  ;;  %v634_v53 = vld [vmem:[%s2228_s26 + $0x58] sm:$0xff]  ;;  %v676_v10 = vld [vmem:[%s2228_s26 + $0x1a8] sm:$0xff]  ;;  %v643_v11 = vld [vmem:[%s2228_s26 + $0xa0] sm:$0xff] }
  0xc9   : > { %v645_v15 = vld [vmem:[%s2228_s26 + $0xb0] sm:$0xff]  ;;  %v648_v17 = vld [vmem:[%s2228_s26 + $0xc8] sm:$0xff]  ;;  %v679_v20 = vld [vmem:[%s2228_s26 + $0x1c0] sm:$0xff] }
  0xca   : > { %v677_v16 = vld [vmem:[%s2228_s26 + $0x1b0] sm:$0xff]  ;;  %v650_v21 = vld [vmem:[%s2228_s26 + $0xd8] sm:$0xff]  ;;  %v684_v26 = vld [vmem:[%s2228_s26 + $0x1e8] sm:$0xff] }
  0xcb   : > { %1462 = vmatpush1.bf16.msra.mxu0 %v1461_v58  ;;  %1515 = vmatpush1.bf16.msra.mxu1 %v1461_v58  ;;  %v668_v58 = vld [vmem:[%s2228_s26 + $0x168] sm:$0xff]  ;;  %v682_v22 = vld [vmem:[%s2228_s26 + $0x1d8] sm:$0xff]  ;;  %v649_v23 = vld [vmem:[%s2228_s26 + $0xd0] sm:$0xff] }
  0xcc   : > { %1464 = vmatprep.subr.bf16.mxu0 %v1463_v59  ;;  %1500 = vmatprep.subr.bf16.mxu1 %v1463_v59  ;;  %v635_v59 = vld [vmem:[%s2228_s26 + $0x60] sm:$0xff]  ;;  %v654_v29 = vld [vmem:[%s2228_s26 + $0xf8] sm:$0xff]  ;;  %v685_v32 = vld [vmem:[%s2228_s26 + $0x1f0] sm:$0xff] }
  0xcd   : > { %v651_v27 = vld [vmem:[%s2228_s26 + $0xe0] sm:$0xff] }
  0xce   : > { %v683_v28 = vld [vmem:[%s2228_s26 + $0x1e0] sm:$0xff] }
  0xcf   : > { %1466 = vmatpush1.bf16.msra.mxu0 %v1465_v0  ;;  %1516 = vmatpush1.bf16.msra.mxu1 %v1465_v0  ;;  %v669_v0 = vld [vmem:[%s2228_s26 + $0x170] sm:$0xff]  ;;  %v559_v33 = vld [vmem:[#allocation2] sm:$0xff] }
  0xd0   : > { %1468 = vmatprep.subr.bf16.mxu0 %v1467_v1  ;;  %1501 = vmatprep.subr.bf16.mxu1 %v1467_v1  ;;  %v640_v1 = vld [vmem:[%s2228_s26 + $0x88] sm:$0xff] }
  0xd3   : > { %1470 = vmatpush1.bf16.msra.mxu0 %v1469_v6  ;;  %1517 = vmatpush1.bf16.msra.mxu1 %v1469_v6  ;;  %v674_v6 = vld [vmem:[%s2228_s26 + $0x198] sm:$0xff] }
  0xd4   : > { %1472 = vmatprep.subr.bf16.mxu0 %v1471_v7  ;;  %1502 = vmatprep.subr.bf16.mxu1 %v1471_v7  ;;  %v641_v7 = vld [vmem:[%s2228_s26 + $0x90] sm:$0xff] }
  0xd7   : > { %1474 = vmatpush1.bf16.msra.mxu0 %v1473_v12  ;;  %1518 = vmatpush1.bf16.msra.mxu1 %v1473_v12  ;;  %v675_v12 = vld [vmem:[%s2228_s26 + $0x1a0] sm:$0xff] }
  0xd8   : > { %1476 = vmatprep.subr.bf16.mxu0 %v1475_v13  ;;  %1503 = vmatprep.subr.bf16.mxu1 %v1475_v13  ;;  %v646_v13 = vld [vmem:[%s2228_s26 + $0xb8] sm:$0xff] }
  0xdb   : > { %1478 = vmatpush1.bf16.msra.mxu0 %v1477_v18  ;;  %1519 = vmatpush1.bf16.msra.mxu1 %v1477_v18  ;;  %v680_v18 = vld [vmem:[%s2228_s26 + $0x1c8] sm:$0xff] }
  0xdc   : > { %1480 = vmatprep.subr.bf16.mxu0 %v1479_v19  ;;  %1504 = vmatprep.subr.bf16.mxu1 %v1479_v19  ;;  %v647_v19 = vld [vmem:[%s2228_s26 + $0xc0] sm:$0xff] }
  0xdf   : > { %1482 = vmatpush1.bf16.msra.mxu0 %v1481_v24  ;;  %1520 = vmatpush1.bf16.msra.mxu1 %v1481_v24  ;;  %v681_v24 = vld [vmem:[%s2228_s26 + $0x1d0] sm:$0xff] }
  0xe0   : > { %1484 = vmatprep.subr.bf16.mxu0 %v1483_v25  ;;  %1505 = vmatprep.subr.bf16.mxu1 %v1483_v25  ;;  %v652_v25 = vld [vmem:[%s2228_s26 + $0xe8] sm:$0xff] }
  0xe3   : > { %1486 = vmatpush1.bf16.msra.mxu0 %v1485_v30  ;;  %1521 = vmatpush1.bf16.msra.mxu1 %v1485_v30  ;;  %v686_v30 = vld [vmem:[%s2228_s26 + $0x1f8] sm:$0xff] }
  0xe4   : > { %1488 = vmatprep.subr.bf16.mxu0 %v1487_v31  ;;  %1506 = vmatprep.subr.bf16.mxu1 %v1487_v31  ;;  %v653_v31 = vld [vmem:[%s2228_s26 + $0xf0] sm:$0xff] }
  0xe7   : > { %1490 = vmatpush1.bf16.msra.mxu0 %v1489_v34  ;;  %1522 = vmatpush1.bf16.msra.mxu1 %v1489_v34  ;;  %v591_v34 = vld [vmem:[#allocation2 + $0x100] sm:$0xff] }
  0xea   : > { %816 = vmatmul.mubr.f32.vlgmr.msra.gmra.mrb[0].mxu0 %v623_v35  ;;  %912 = vmatmul.mubr.f32.vlgmr.msra.gmra.mrb[0].mxu1 %v655_v36  ;;  %v560_v35 = vld [vmem:[#allocation2 + $0x8] sm:$0xff] }
  0xeb   : > { %821 = vmatprep.mubr.f32.mxu0 %v626_v37  ;;  %917 = vmatprep.mubr.f32.mxu1 %v658_v38  ;;  %v592_v36 = vld [vmem:[#allocation2 + $0x108] sm:$0xff] }
  0xee   : > { %822 = vmatmul.mubr.f32.gmra.mrb[2].mxu0 %v625_v39  ;;  %918 = vmatmul.mubr.f32.gmra.mrb[2].mxu1 %v657_v40 }
  0xef   : > { %827 = vmatprep.mubr.f32.mxu0 %v628_v41  ;;  %923 = vmatprep.mubr.f32.mxu1 %v660_v42 }
  0xf2   : > { %828 = vmatmul.mubr.f32.gmra.mrb[4].mxu0 %v627_v43  ;;  %924 = vmatmul.mubr.f32.gmra.mrb[4].mxu1 %v659_v44 }
  0xf3   : > { %833 = vmatprep.mubr.f32.mxu0 %v630_v45  ;;  %929 = vmatprep.mubr.f32.mxu1 %v662_v46  ;;  %v561_v45 = vld [vmem:[#allocation2 + $0x10] sm:$0xff] }
  0xf4   : > { %v593_v46 = vld [vmem:[#allocation2 + $0x110] sm:$0xff] }
  0xf6   : > { %834 = vmatmul.mubr.f32.gmra.mrb[6].mxu0 %v629_v47  ;;  %930 = vmatmul.mubr.f32.gmra.mrb[6].mxu1 %v661_v48  ;;  %v562_v47 = vld [vmem:[#allocation2 + $0x18] sm:$0xff] }
  0xf7   : > { %839 = vmatprep.mubr.f32.mxu0 %v632_v49  ;;  %935 = vmatprep.mubr.f32.mxu1 %v664_v50  ;;  %v594_v48 = vld [vmem:[#allocation2 + $0x118] sm:$0xff] }
  0xfa   : > { %840 = vmatmul.mubr.f32.gmra.mrb[8].mxu0 %v631_v51  ;;  %936 = vmatmul.mubr.f32.gmra.mrb[8].mxu1 %v663_v52 }
  0xfb   : > { %845 = vmatprep.mubr.f32.mxu0 %v634_v53  ;;  %941 = vmatprep.mubr.f32.mxu1 %v666_v54 }
  0xfe   : > { %846 = vmatmul.mubr.f32.gmra.mrb[10].mxu0 %v633_v55  ;;  %942 = vmatmul.mubr.f32.gmra.mrb[10].mxu1 %v665_v56 }
  0xff   : > { %851 = vmatprep.mubr.f32.mxu0 %v636_v57  ;;  %947 = vmatprep.mubr.f32.mxu1 %v668_v58  ;;  %v563_v57 = vld [vmem:[#allocation2 + $0x20] sm:$0xff] }
 0x100   : > { %v595_v58 = vld [vmem:[#allocation2 + $0x120] sm:$0xff] }
 0x102   : > { %852 = vmatmul.mubr.f32.gmra.mrb[12].mxu0 %v635_v59  ;;  %948 = vmatmul.mubr.f32.gmra.mrb[12].mxu1 %v667_v60  ;;  %v564_v59 = vld [vmem:[#allocation2 + $0x28] sm:$0xff] }
 0x103   : > { %857 = vmatprep.mubr.f32.mxu0 %v638_v61  ;;  %953 = vmatprep.mubr.f32.mxu1 %v670_v62  ;;  %v596_v60 = vld [vmem:[#allocation2 + $0x128] sm:$0xff] }
 0x106   : > { %858 = vmatmul.mubr.f32.gmra.mrb[14].mxu0 %v637_v63  ;;  %954 = vmatmul.mubr.f32.gmra.mrb[14].mxu1 %v669_v0 }
 0x107   : > { %863 = vmatprep.mubr.f32.mxu0 %v640_v1  ;;  %959 = vmatprep.mubr.f32.mxu1 %v672_v2 }
 0x10a   : > { %864 = vmatmul.mubr.f32.gmra.mrb[16].mxu0 %v639_v3  ;;  %960 = vmatmul.mubr.f32.gmra.mrb[16].mxu1 %v671_v4 }
 0x10b   : > { %869 = vmatprep.mubr.f32.mxu0 %v642_v5  ;;  %965 = vmatprep.mubr.f32.mxu1 %v674_v6  ;;  %v565_v5 = vld [vmem:[#allocation2 + $0x30] sm:$0xff] }
 0x10c   : > { %v597_v6 = vld [vmem:[#allocation2 + $0x130] sm:$0xff] }
 0x10e   : > { %870 = vmatmul.mubr.f32.gmra.mrb[18].mxu0 %v641_v7  ;;  %966 = vmatmul.mubr.f32.gmra.mrb[18].mxu1 %v673_v8  ;;  %v566_v7 = vld [vmem:[#allocation2 + $0x38] sm:$0xff] }
 0x10f   : > { %875 = vmatprep.mubr.f32.mxu0 %v644_v9  ;;  %971 = vmatprep.mubr.f32.mxu1 %v676_v10  ;;  %v598_v8 = vld [vmem:[#allocation2 + $0x138] sm:$0xff] }
 0x112   : > { %876 = vmatmul.mubr.f32.gmra.mrb[20].mxu0 %v643_v11  ;;  %972 = vmatmul.mubr.f32.gmra.mrb[20].mxu1 %v675_v12 }
 0x113   : > { %881 = vmatprep.mubr.f32.mxu0 %v646_v13  ;;  %977 = vmatprep.mubr.f32.mxu1 %v678_v14 }
 0x116   : > { %882 = vmatmul.mubr.f32.gmra.mrb[22].mxu0 %v645_v15  ;;  %978 = vmatmul.mubr.f32.gmra.mrb[22].mxu1 %v677_v16 }
 0x117   : > { %887 = vmatprep.mubr.f32.mxu0 %v648_v17  ;;  %983 = vmatprep.mubr.f32.mxu1 %v680_v18  ;;  %v567_v17 = vld [vmem:[#allocation2 + $0x40] sm:$0xff] }
 0x118   : > { %v599_v18 = vld [vmem:[#allocation2 + $0x140] sm:$0xff] }
 0x11a   : > { %888 = vmatmul.mubr.f32.gmra.mrb[24].mxu0 %v647_v19  ;;  %984 = vmatmul.mubr.f32.gmra.mrb[24].mxu1 %v679_v20  ;;  %v568_v19 = vld [vmem:[#allocation2 + $0x48] sm:$0xff] }
 0x11b   : > { %893 = vmatprep.mubr.f32.mxu0 %v650_v21  ;;  %989 = vmatprep.mubr.f32.mxu1 %v682_v22  ;;  %v600_v20 = vld [vmem:[#allocation2 + $0x148] sm:$0xff] }
 0x11e   : > { %894 = vmatmul.mubr.f32.gmra.mrb[26].mxu0 %v649_v23  ;;  %990 = vmatmul.mubr.f32.gmra.mrb[26].mxu1 %v681_v24 }
 0x11f   : > { %899 = vmatprep.mubr.f32.mxu0 %v652_v25  ;;  %995 = vmatprep.mubr.f32.mxu1 %v684_v26 }
 0x122   : > { %900 = vmatmul.mubr.f32.gmra.mrb[28].mxu0 %v651_v27  ;;  %996 = vmatmul.mubr.f32.gmra.mrb[28].mxu1 %v683_v28 }
 0x123   : > { %905 = vmatprep.mubr.f32.mxu0 %v654_v29  ;;  %1001 = vmatprep.mubr.f32.mxu1 %v686_v30  ;;  %v569_v29 = vld [vmem:[#allocation2 + $0x50] sm:$0xff] }
 0x124   : > { %v601_v30 = vld [vmem:[#allocation2 + $0x150] sm:$0xff] }
 0x126   : > { %906 = vmatmul.mubr.f32.gmra.mrb[30].mxu0 %v653_v31  ;;  %1002 = vmatmul.mubr.f32.gmra.mrb[30].mxu1 %v685_v32  ;;  %v570_v31 = vld [vmem:[#allocation2 + $0x58] sm:$0xff] }
 0x127   : > { %v602_v32 = vld [vmem:[#allocation2 + $0x158] sm:$0xff] }
 0x1bd   : > { %v817_v37 = vpop.f32.mrb[0].mxu0  ;;  %v913_v38 = vpop.f32.mrb[0].mxu1 }
 0x1be   : > { %v1008_v39 = vadd.f32 %v817_v37, %v559_v33  ;;  %v1040_v40 = vadd.f32 %v913_v38, %v591_v34  ;;  %v819_v41 = vpop.f32.mrb[1].mxu0  ;;  %v915_v42 = vpop.f32.mrb[1].mxu1 }
 0x1bf   : > { %v1009_v43 = vadd.f32 %v819_v41, %v560_v35  ;;  %v1041_v44 = vadd.f32 %v915_v42, %v592_v36  ;;  %v571_v41 = vld [vmem:[#allocation2 + $0x60] sm:$0xff] }
 0x1c0   : > { %1072 = vst [vmem:[#allocation2] sm:$0xff] %v1008_v39  ;;  %1104 = vst [vmem:[#allocation2 + $0x100] sm:$0xff] %v1040_v40  ;;  %v603_v42 = vld [vmem:[#allocation2 + $0x160] sm:$0xff] }
 0x1c1   : > { %1073 = vst [vmem:[#allocation2 + $0x8] sm:$0xff] %v1009_v43  ;;  %1105 = vst [vmem:[#allocation2 + $0x108] sm:$0xff] %v1041_v44  ;;  %v823_v49 = vpop.f32.mrb[2].mxu0  ;;  %v919_v50 = vpop.f32.mrb[2].mxu1  ;;  %v572_v43 = vld [vmem:[#allocation2 + $0x68] sm:$0xff] }
 0x1c2   : > { %v1010_v51 = vadd.f32 %v823_v49, %v561_v45  ;;  %v1042_v52 = vadd.f32 %v919_v50, %v593_v46  ;;  %v825_v53 = vpop.f32.mrb[3].mxu0  ;;  %v921_v54 = vpop.f32.mrb[3].mxu1  ;;  %v604_v44 = vld [vmem:[#allocation2 + $0x168] sm:$0xff] }
 0x1c3   : > { %v1011_v55 = vadd.f32 %v825_v53, %v562_v47  ;;  %v1043_v56 = vadd.f32 %v921_v54, %v594_v48  ;;  %v573_v53 = vld [vmem:[#allocation2 + $0x70] sm:$0xff] }
 0x1c4   : > { %1074 = vst [vmem:[#allocation2 + $0x10] sm:$0xff] %v1010_v51  ;;  %1106 = vst [vmem:[#allocation2 + $0x110] sm:$0xff] %v1042_v52  ;;  %v605_v54 = vld [vmem:[#allocation2 + $0x170] sm:$0xff] }
 0x1c5   : > { %1075 = vst [vmem:[#allocation2 + $0x18] sm:$0xff] %v1011_v55  ;;  %1107 = vst [vmem:[#allocation2 + $0x118] sm:$0xff] %v1043_v56  ;;  %v829_v61 = vpop.f32.mrb[4].mxu0  ;;  %v925_v62 = vpop.f32.mrb[4].mxu1  ;;  %v574_v55 = vld [vmem:[#allocation2 + $0x78] sm:$0xff] }
 0x1c6   : > { %v1012_v63 = vadd.f32 %v829_v61, %v563_v57  ;;  %v1044_v0 = vadd.f32 %v925_v62, %v595_v58  ;;  %v831_v1 = vpop.f32.mrb[5].mxu0  ;;  %v927_v2 = vpop.f32.mrb[5].mxu1  ;;  %v606_v56 = vld [vmem:[#allocation2 + $0x178] sm:$0xff] }
 0x1c7   : > { %v1013_v3 = vadd.f32 %v831_v1, %v564_v59  ;;  %v1045_v4 = vadd.f32 %v927_v2, %v596_v60  ;;  %v575_v1 = vld [vmem:[#allocation2 + $0x80] sm:$0xff] }
 0x1c8   : > { %1076 = vst [vmem:[#allocation2 + $0x20] sm:$0xff] %v1012_v63  ;;  %1108 = vst [vmem:[#allocation2 + $0x120] sm:$0xff] %v1044_v0  ;;  %v607_v2 = vld [vmem:[#allocation2 + $0x180] sm:$0xff] }
 0x1c9   : > { %1077 = vst [vmem:[#allocation2 + $0x28] sm:$0xff] %v1013_v3  ;;  %1109 = vst [vmem:[#allocation2 + $0x128] sm:$0xff] %v1045_v4  ;;  %v835_v9 = vpop.f32.mrb[6].mxu0  ;;  %v931_v10 = vpop.f32.mrb[6].mxu1  ;;  %v576_v3 = vld [vmem:[#allocation2 + $0x88] sm:$0xff] }
 0x1ca   : > { %v1014_v11 = vadd.f32 %v835_v9, %v565_v5  ;;  %v1046_v12 = vadd.f32 %v931_v10, %v597_v6  ;;  %v837_v13 = vpop.f32.mrb[7].mxu0  ;;  %v933_v14 = vpop.f32.mrb[7].mxu1  ;;  %v608_v4 = vld [vmem:[#allocation2 + $0x188] sm:$0xff] }
 0x1cb   : > { %v1015_v15 = vadd.f32 %v837_v13, %v566_v7  ;;  %v1047_v16 = vadd.f32 %v933_v14, %v598_v8  ;;  %v577_v13 = vld [vmem:[#allocation2 + $0x90] sm:$0xff] }
 0x1cc   : > { %1078 = vst [vmem:[#allocation2 + $0x30] sm:$0xff] %v1014_v11  ;;  %1110 = vst [vmem:[#allocation2 + $0x130] sm:$0xff] %v1046_v12  ;;  %v609_v14 = vld [vmem:[#allocation2 + $0x190] sm:$0xff] }
 0x1cd   : > { %1079 = vst [vmem:[#allocation2 + $0x38] sm:$0xff] %v1015_v15  ;;  %1111 = vst [vmem:[#allocation2 + $0x138] sm:$0xff] %v1047_v16  ;;  %v841_v21 = vpop.f32.mrb[8].mxu0  ;;  %v937_v22 = vpop.f32.mrb[8].mxu1  ;;  %v578_v15 = vld [vmem:[#allocation2 + $0x98] sm:$0xff] }
 0x1ce   : > { %v1016_v23 = vadd.f32 %v841_v21, %v567_v17  ;;  %v1048_v24 = vadd.f32 %v937_v22, %v599_v18  ;;  %v843_v25 = vpop.f32.mrb[9].mxu0  ;;  %v939_v26 = vpop.f32.mrb[9].mxu1  ;;  %v610_v16 = vld [vmem:[#allocation2 + $0x198] sm:$0xff] }
 0x1cf   : > { %v1017_v27 = vadd.f32 %v843_v25, %v568_v19  ;;  %v1049_v28 = vadd.f32 %v939_v26, %v600_v20  ;;  %v579_v25 = vld [vmem:[#allocation2 + $0xa0] sm:$0xff] }
 0x1d0   : > { %1080 = vst [vmem:[#allocation2 + $0x40] sm:$0xff] %v1016_v23  ;;  %1112 = vst [vmem:[#allocation2 + $0x140] sm:$0xff] %v1048_v24  ;;  %v611_v26 = vld [vmem:[#allocation2 + $0x1a0] sm:$0xff] }
 0x1d1   : > { %1081 = vst [vmem:[#allocation2 + $0x48] sm:$0xff] %v1017_v27  ;;  %1113 = vst [vmem:[#allocation2 + $0x148] sm:$0xff] %v1049_v28  ;;  %v847_v33 = vpop.f32.mrb[10].mxu0  ;;  %v943_v34 = vpop.f32.mrb[10].mxu1  ;;  %v580_v27 = vld [vmem:[#allocation2 + $0xa8] sm:$0xff] }
 0x1d2   : > { %v1018_v35 = vadd.f32 %v847_v33, %v569_v29  ;;  %v1050_v36 = vadd.f32 %v943_v34, %v601_v30  ;;  %v849_v37 = vpop.f32.mrb[11].mxu0  ;;  %v945_v38 = vpop.f32.mrb[11].mxu1  ;;  %v612_v28 = vld [vmem:[#allocation2 + $0x1a8] sm:$0xff] }
 0x1d3   : > { %v1019_v39 = vadd.f32 %v849_v37, %v570_v31  ;;  %v1051_v40 = vadd.f32 %v945_v38, %v602_v32  ;;  %v581_v37 = vld [vmem:[#allocation2 + $0xb0] sm:$0xff] }
 0x1d4   : > { %1082 = vst [vmem:[#allocation2 + $0x50] sm:$0xff] %v1018_v35  ;;  %1114 = vst [vmem:[#allocation2 + $0x150] sm:$0xff] %v1050_v36  ;;  %v613_v38 = vld [vmem:[#allocation2 + $0x1b0] sm:$0xff] }
 0x1d5   : > { %1083 = vst [vmem:[#allocation2 + $0x58] sm:$0xff] %v1019_v39  ;;  %1115 = vst [vmem:[#allocation2 + $0x158] sm:$0xff] %v1051_v40  ;;  %v853_v45 = vpop.f32.mrb[12].mxu0  ;;  %v949_v46 = vpop.f32.mrb[12].mxu1  ;;  %v582_v39 = vld [vmem:[#allocation2 + $0xb8] sm:$0xff] }
 0x1d6   : > { %v1020_v47 = vadd.f32 %v853_v45, %v571_v41  ;;  %v1052_v48 = vadd.f32 %v949_v46, %v603_v42  ;;  %v855_v49 = vpop.f32.mrb[13].mxu0  ;;  %v951_v50 = vpop.f32.mrb[13].mxu1  ;;  %v614_v40 = vld [vmem:[#allocation2 + $0x1b8] sm:$0xff] }
 0x1d7   : > { %v1021_v51 = vadd.f32 %v855_v49, %v572_v43  ;;  %v1053_v52 = vadd.f32 %v951_v50, %v604_v44  ;;  %v583_v49 = vld [vmem:[#allocation2 + $0xc0] sm:$0xff] }
 0x1d8   : > { %1084 = vst [vmem:[#allocation2 + $0x60] sm:$0xff] %v1020_v47  ;;  %1116 = vst [vmem:[#allocation2 + $0x160] sm:$0xff] %v1052_v48  ;;  %v615_v50 = vld [vmem:[#allocation2 + $0x1c0] sm:$0xff] }
 0x1d9   : > { %1085 = vst [vmem:[#allocation2 + $0x68] sm:$0xff] %v1021_v51  ;;  %1117 = vst [vmem:[#allocation2 + $0x168] sm:$0xff] %v1053_v52  ;;  %v859_v57 = vpop.f32.mrb[14].mxu0  ;;  %v955_v58 = vpop.f32.mrb[14].mxu1  ;;  %v584_v51 = vld [vmem:[#allocation2 + $0xc8] sm:$0xff] }
 0x1da   : > { %v1022_v59 = vadd.f32 %v859_v57, %v573_v53  ;;  %v1054_v60 = vadd.f32 %v955_v58, %v605_v54  ;;  %v861_v61 = vpop.f32.mrb[15].mxu0  ;;  %v957_v62 = vpop.f32.mrb[15].mxu1  ;;  %v616_v52 = vld [vmem:[#allocation2 + $0x1c8] sm:$0xff] }
 0x1db   : > { %v1023_v63 = vadd.f32 %v861_v61, %v574_v55  ;;  %v1055_v0 = vadd.f32 %v957_v62, %v606_v56  ;;  %v585_v61 = vld [vmem:[#allocation2 + $0xd0] sm:$0xff] }
 0x1dc   : > { %1086 = vst [vmem:[#allocation2 + $0x70] sm:$0xff] %v1022_v59  ;;  %1118 = vst [vmem:[#allocation2 + $0x170] sm:$0xff] %v1054_v60  ;;  %v617_v62 = vld [vmem:[#allocation2 + $0x1d0] sm:$0xff] }
 0x1dd   : > { %1087 = vst [vmem:[#allocation2 + $0x78] sm:$0xff] %v1023_v63  ;;  %1119 = vst [vmem:[#allocation2 + $0x178] sm:$0xff] %v1055_v0  ;;  %v865_v5 = vpop.f32.mrb[16].mxu0  ;;  %v961_v6 = vpop.f32.mrb[16].mxu1  ;;  %v586_v63 = vld [vmem:[#allocation2 + $0xd8] sm:$0xff] }
 0x1de   : > { %v1024_v7 = vadd.f32 %v865_v5, %v575_v1  ;;  %v1056_v8 = vadd.f32 %v961_v6, %v607_v2  ;;  %v867_v9 = vpop.f32.mrb[17].mxu0  ;;  %v963_v10 = vpop.f32.mrb[17].mxu1  ;;  %v618_v0 = vld [vmem:[#allocation2 + $0x1d8] sm:$0xff] }
 0x1df   : > { %v1025_v11 = vadd.f32 %v867_v9, %v576_v3  ;;  %v1057_v12 = vadd.f32 %v963_v10, %v608_v4  ;;  %v587_v9 = vld [vmem:[#allocation2 + $0xe0] sm:$0xff] }
 0x1e0   : > { %1088 = vst [vmem:[#allocation2 + $0x80] sm:$0xff] %v1024_v7  ;;  %1120 = vst [vmem:[#allocation2 + $0x180] sm:$0xff] %v1056_v8  ;;  %v619_v10 = vld [vmem:[#allocation2 + $0x1e0] sm:$0xff] }
 0x1e1   : > { %1089 = vst [vmem:[#allocation2 + $0x88] sm:$0xff] %v1025_v11  ;;  %1121 = vst [vmem:[#allocation2 + $0x188] sm:$0xff] %v1057_v12  ;;  %v871_v17 = vpop.f32.mrb[18].mxu0  ;;  %v967_v18 = vpop.f32.mrb[18].mxu1  ;;  %v588_v11 = vld [vmem:[#allocation2 + $0xe8] sm:$0xff] }
 0x1e2   : > { %v1026_v19 = vadd.f32 %v871_v17, %v577_v13  ;;  %v1058_v20 = vadd.f32 %v967_v18, %v609_v14  ;;  %v873_v21 = vpop.f32.mrb[19].mxu0  ;;  %v969_v22 = vpop.f32.mrb[19].mxu1  ;;  %v620_v12 = vld [vmem:[#allocation2 + $0x1e8] sm:$0xff] }
 0x1e3   : > { %v1027_v23 = vadd.f32 %v873_v21, %v578_v15  ;;  %v1059_v24 = vadd.f32 %v969_v22, %v610_v16  ;;  %v589_v21 = vld [vmem:[#allocation2 + $0xf0] sm:$0xff] }
 0x1e4   : > { %1090 = vst [vmem:[#allocation2 + $0x90] sm:$0xff] %v1026_v19  ;;  %1122 = vst [vmem:[#allocation2 + $0x190] sm:$0xff] %v1058_v20  ;;  %v621_v22 = vld [vmem:[#allocation2 + $0x1f0] sm:$0xff] }
 0x1e5   : > { %1091 = vst [vmem:[#allocation2 + $0x98] sm:$0xff] %v1027_v23  ;;  %1123 = vst [vmem:[#allocation2 + $0x198] sm:$0xff] %v1059_v24  ;;  %v877_v29 = vpop.f32.mrb[20].mxu0  ;;  %v973_v30 = vpop.f32.mrb[20].mxu1  ;;  %v590_v23 = vld [vmem:[#allocation2 + $0xf8] sm:$0xff] }
 0x1e6   : > { %v1028_v31 = vadd.f32 %v877_v29, %v579_v25  ;;  %v1060_v32 = vadd.f32 %v973_v30, %v611_v26  ;;  %v879_v33 = vpop.f32.mrb[21].mxu0  ;;  %v975_v34 = vpop.f32.mrb[21].mxu1  ;;  %v622_v24 = vld [vmem:[#allocation2 + $0x1f8] sm:$0xff] }
 0x1e7   : > { %v1029_v35 = vadd.f32 %v879_v33, %v580_v27  ;;  %v1061_v36 = vadd.f32 %v975_v34, %v612_v28  ;;  %v1140_v33 = vld [vmem:[#allocation2] sm:$0xff] (!%p1416_p8)  ;;  %v1141_v34 = vld [vmem:[#allocation2 + $0x8] sm:$0xff] (!%p1416_p8) }
 0x1e8   : > { %1092 = vst [vmem:[#allocation2 + $0xa0] sm:$0xff] %v1028_v31  ;;  %1124 = vst [vmem:[#allocation2 + $0x1a0] sm:$0xff] %v1060_v32 }
 0x1e9   : > { %1093 = vst [vmem:[#allocation2 + $0xa8] sm:$0xff] %v1029_v35  ;;  %1125 = vst [vmem:[#allocation2 + $0x1a8] sm:$0xff] %v1061_v36  ;;  %v883_v41 = vpop.f32.mrb[22].mxu0  ;;  %v979_v42 = vpop.f32.mrb[22].mxu1  ;;  %v1142_v35 = vld [vmem:[#allocation2 + $0x10] sm:$0xff] (!%p1416_p8)  ;;  %v1143_v36 = vld [vmem:[#allocation2 + $0x18] sm:$0xff] (!%p1416_p8) }
 0x1ea   : > { %v1030_v43 = vadd.f32 %v883_v41, %v581_v37  ;;  %v1062_v44 = vadd.f32 %v979_v42, %v613_v38  ;;  %v885_v45 = vpop.f32.mrb[23].mxu0  ;;  %v981_v46 = vpop.f32.mrb[23].mxu1  ;;  %1204 = vst [vmem:[%s2232_s29] sm:$0xff] (!%p1416_p8), %v1140_v33  ;;  %1205 = vst [vmem:[%s2232_s29 + $0x8] sm:$0xff] (!%p1416_p8), %v1141_v34  ;;  %v1144_v37 = vld [vmem:[#allocation2 + $0x20] sm:$0xff] (!%p1416_p8)  ;;  %v1145_v38 = vld [vmem:[#allocation2 + $0x28] sm:$0xff] (!%p1416_p8) }
 0x1eb   : > { %v1031_v47 = vadd.f32 %v885_v45, %v582_v39  ;;  %v1063_v48 = vadd.f32 %v981_v46, %v614_v40  ;;  %1206 = vst [vmem:[%s2232_s29 + $0x10] sm:$0xff] (!%p1416_p8), %v1142_v35  ;;  %1207 = vst [vmem:[%s2232_s29 + $0x18] sm:$0xff] (!%p1416_p8), %v1143_v36  ;;  %v1146_v39 = vld [vmem:[#allocation2 + $0x30] sm:$0xff] (!%p1416_p8)  ;;  %v1147_v40 = vld [vmem:[#allocation2 + $0x38] sm:$0xff] (!%p1416_p8) }
 0x1ec   : > { %1094 = vst [vmem:[#allocation2 + $0xb0] sm:$0xff] %v1030_v43  ;;  %1126 = vst [vmem:[#allocation2 + $0x1b0] sm:$0xff] %v1062_v44  ;;  %v1148_v41 = vld [vmem:[#allocation2 + $0x40] sm:$0xff] (!%p1416_p8)  ;;  %v1149_v42 = vld [vmem:[#allocation2 + $0x48] sm:$0xff] (!%p1416_p8) }
 0x1ed   : > { %1095 = vst [vmem:[#allocation2 + $0xb8] sm:$0xff] %v1031_v47  ;;  %1127 = vst [vmem:[#allocation2 + $0x1b8] sm:$0xff] %v1063_v48  ;;  %v889_v53 = vpop.f32.mrb[24].mxu0  ;;  %v985_v54 = vpop.f32.mrb[24].mxu1  ;;  %v1150_v43 = vld [vmem:[#allocation2 + $0x50] sm:$0xff] (!%p1416_p8)  ;;  %v1151_v44 = vld [vmem:[#allocation2 + $0x58] sm:$0xff] (!%p1416_p8) }
 0x1ee   : > { %v1032_v55 = vadd.f32 %v889_v53, %v583_v49  ;;  %v1064_v56 = vadd.f32 %v985_v54, %v615_v50  ;;  %v891_v57 = vpop.f32.mrb[25].mxu0  ;;  %v987_v58 = vpop.f32.mrb[25].mxu1  ;;  %1208 = vst [vmem:[%s2232_s29 + $0x20] sm:$0xff] (!%p1416_p8), %v1144_v37  ;;  %1209 = vst [vmem:[%s2232_s29 + $0x28] sm:$0xff] (!%p1416_p8), %v1145_v38  ;;  %v1152_v45 = vld [vmem:[#allocation2 + $0x60] sm:$0xff] (!%p1416_p8)  ;;  %v1153_v46 = vld [vmem:[#allocation2 + $0x68] sm:$0xff] (!%p1416_p8) }
 0x1ef   : > { %v1033_v59 = vadd.f32 %v891_v57, %v584_v51  ;;  %v1065_v60 = vadd.f32 %v987_v58, %v616_v52  ;;  %1210 = vst [vmem:[%s2232_s29 + $0x30] sm:$0xff] (!%p1416_p8), %v1146_v39  ;;  %1211 = vst [vmem:[%s2232_s29 + $0x38] sm:$0xff] (!%p1416_p8), %v1147_v40  ;;  %v1154_v47 = vld [vmem:[#allocation2 + $0x70] sm:$0xff] (!%p1416_p8)  ;;  %v1155_v48 = vld [vmem:[#allocation2 + $0x78] sm:$0xff] (!%p1416_p8) }
 0x1f0   : > { %1096 = vst [vmem:[#allocation2 + $0xc0] sm:$0xff] %v1032_v55  ;;  %1128 = vst [vmem:[#allocation2 + $0x1c0] sm:$0xff] %v1064_v56  ;;  %v1156_v49 = vld [vmem:[#allocation2 + $0x80] sm:$0xff] (!%p1416_p8)  ;;  %v1157_v50 = vld [vmem:[#allocation2 + $0x88] sm:$0xff] (!%p1416_p8) }
 0x1f1   : > { %1097 = vst [vmem:[#allocation2 + $0xc8] sm:$0xff] %v1033_v59  ;;  %1129 = vst [vmem:[#allocation2 + $0x1c8] sm:$0xff] %v1065_v60  ;;  %v895_v1 = vpop.f32.mrb[26].mxu0  ;;  %v991_v2 = vpop.f32.mrb[26].mxu1  ;;  %v1158_v51 = vld [vmem:[#allocation2 + $0x90] sm:$0xff] (!%p1416_p8)  ;;  %v1159_v52 = vld [vmem:[#allocation2 + $0x98] sm:$0xff] (!%p1416_p8) }
 0x1f2   : > { %v1034_v3 = vadd.f32 %v895_v1, %v585_v61  ;;  %v1066_v4 = vadd.f32 %v991_v2, %v617_v62  ;;  %v897_v5 = vpop.f32.mrb[27].mxu0  ;;  %v993_v6 = vpop.f32.mrb[27].mxu1  ;;  %1212 = vst [vmem:[%s2232_s29 + $0x40] sm:$0xff] (!%p1416_p8), %v1148_v41  ;;  %1213 = vst [vmem:[%s2232_s29 + $0x48] sm:$0xff] (!%p1416_p8), %v1149_v42  ;;  %v1160_v53 = vld [vmem:[#allocation2 + $0xa0] sm:$0xff] (!%p1416_p8)  ;;  %v1161_v54 = vld [vmem:[#allocation2 + $0xa8] sm:$0xff] (!%p1416_p8) }
 0x1f3   : > { %v1035_v7 = vadd.f32 %v897_v5, %v586_v63  ;;  %v1067_v8 = vadd.f32 %v993_v6, %v618_v0  ;;  %1214 = vst [vmem:[%s2232_s29 + $0x50] sm:$0xff] (!%p1416_p8), %v1150_v43  ;;  %1215 = vst [vmem:[%s2232_s29 + $0x58] sm:$0xff] (!%p1416_p8), %v1151_v44  ;;  %v1162_v55 = vld [vmem:[#allocation2 + $0xb0] sm:$0xff] (!%p1416_p8)  ;;  %v1172_v1 = vld [vmem:[#allocation2 + $0x100] sm:$0xff] (!%p1416_p8) }
 0x1f4   : > { %1098 = vst [vmem:[#allocation2 + $0xd0] sm:$0xff] %v1034_v3  ;;  %1130 = vst [vmem:[#allocation2 + $0x1d0] sm:$0xff] %v1066_v4  ;;  %v1163_v56 = vld [vmem:[#allocation2 + $0xb8] sm:$0xff] (!%p1416_p8)  ;;  %v1173_v2 = vld [vmem:[#allocation2 + $0x108] sm:$0xff] (!%p1416_p8) }
 0x1f5   : > { %1099 = vst [vmem:[#allocation2 + $0xd8] sm:$0xff] %v1035_v7  ;;  %1131 = vst [vmem:[#allocation2 + $0x1d8] sm:$0xff] %v1067_v8  ;;  %v901_v13 = vpop.f32.mrb[28].mxu0  ;;  %v997_v14 = vpop.f32.mrb[28].mxu1  ;;  %v1174_v3 = vld [vmem:[#allocation2 + $0x110] sm:$0xff] (!%p1416_p8)  ;;  %v1175_v4 = vld [vmem:[#allocation2 + $0x118] sm:$0xff] (!%p1416_p8) }
 0x1f6   : > { %v1036_v15 = vadd.f32 %v901_v13, %v587_v9  ;;  %v1068_v16 = vadd.f32 %v997_v14, %v619_v10  ;;  %v903_v17 = vpop.f32.mrb[29].mxu0  ;;  %v999_v18 = vpop.f32.mrb[29].mxu1  ;;  %1216 = vst [vmem:[%s2232_s29 + $0x60] sm:$0xff] (!%p1416_p8), %v1152_v45  ;;  %1217 = vst [vmem:[%s2232_s29 + $0x68] sm:$0xff] (!%p1416_p8), %v1153_v46  ;;  %v1176_v5 = vld [vmem:[#allocation2 + $0x120] sm:$0xff] (!%p1416_p8)  ;;  %v1177_v6 = vld [vmem:[#allocation2 + $0x128] sm:$0xff] (!%p1416_p8) }
 0x1f7   : > { %v1037_v19 = vadd.f32 %v903_v17, %v588_v11  ;;  %v1069_v20 = vadd.f32 %v999_v18, %v620_v12  ;;  %1139 = sbr.rel (%p1416_p8) target bundleno = 532 (0x214), region = 82  ;;  %1218 = vst [vmem:[%s2232_s29 + $0x70] sm:$0xff] (!%p1416_p8), %v1154_v47  ;;  %1219 = vst [vmem:[%s2232_s29 + $0x78] sm:$0xff] (!%p1416_p8), %v1155_v48  ;;  %v1164_v57 = vld [vmem:[#allocation2 + $0xc0] sm:$0xff] (!%p1416_p8)  ;;  %v1178_v7 = vld [vmem:[#allocation2 + $0x130] sm:$0xff] (!%p1416_p8) }
 0x1f8   : > { %1100 = vst [vmem:[#allocation2 + $0xe0] sm:$0xff] %v1036_v15  ;;  %1132 = vst [vmem:[#allocation2 + $0x1e0] sm:$0xff] %v1068_v16  ;;  %v1165_v58 = vld [vmem:[#allocation2 + $0xc8] sm:$0xff] (!%p1416_p8)  ;;  %v1179_v8 = vld [vmem:[#allocation2 + $0x138] sm:$0xff] (!%p1416_p8) }
 0x1f9   : > { %1101 = vst [vmem:[#allocation2 + $0xe8] sm:$0xff] %v1037_v19  ;;  %1133 = vst [vmem:[#allocation2 + $0x1e8] sm:$0xff] %v1069_v20  ;;  %v907_v25 = vpop.f32.mrb[30].mxu0  ;;  %v1003_v26 = vpop.f32.mrb[30].mxu1  ;;  %v1180_v9 = vld [vmem:[#allocation2 + $0x140] sm:$0xff] (!%p1416_p8)  ;;  %v1181_v10 = vld [vmem:[#allocation2 + $0x148] sm:$0xff] (!%p1416_p8) }
 0x1fa   : > { %v1038_v27 = vadd.f32 %v907_v25, %v589_v21  ;;  %v1070_v28 = vadd.f32 %v1003_v26, %v621_v22  ;;  %v909_v29 = vpop.f32.mrb[31].mxu0  ;;  %v1005_v30 = vpop.f32.mrb[31].mxu1  ;;  %1220 = vst [vmem:[%s2232_s29 + $0x80] sm:$0xff] (!%p1416_p8), %v1156_v49  ;;  %1221 = vst [vmem:[%s2232_s29 + $0x88] sm:$0xff] (!%p1416_p8), %v1157_v50  ;;  %v1182_v11 = vld [vmem:[#allocation2 + $0x150] sm:$0xff] (!%p1416_p8)  ;;  %v1183_v12 = vld [vmem:[#allocation2 + $0x158] sm:$0xff] (!%p1416_p8) }
 0x1fb   : > { %v1039_v31 = vadd.f32 %v909_v29, %v590_v23  ;;  %v1071_v32 = vadd.f32 %v1005_v30, %v622_v24  ;;  %1222 = vst [vmem:[%s2232_s29 + $0x90] sm:$0xff] (!%p1416_p8), %v1158_v51  ;;  %1223 = vst [vmem:[%s2232_s29 + $0x98] sm:$0xff] (!%p1416_p8), %v1159_v52  ;;  %v1166_v59 = vld [vmem:[#allocation2 + $0xd0] sm:$0xff] (!%p1416_p8)  ;;  %v1184_v13 = vld [vmem:[#allocation2 + $0x160] sm:$0xff] (!%p1416_p8) }
 0x1fc   : > { %1102 = vst [vmem:[#allocation2 + $0xf0] sm:$0xff] %v1038_v27  ;;  %1134 = vst [vmem:[#allocation2 + $0x1f0] sm:$0xff] %v1070_v28  ;;  %v1167_v60 = vld [vmem:[#allocation2 + $0xd8] sm:$0xff] (!%p1416_p8)  ;;  %v1185_v14 = vld [vmem:[#allocation2 + $0x168] sm:$0xff] (!%p1416_p8) }
 0x1fd   : > { %1103 = vst [vmem:[#allocation2 + $0xf8] sm:$0xff] %v1039_v31  ;;  %1135 = vst [vmem:[#allocation2 + $0x1f8] sm:$0xff] %v1071_v32  ;;  %v1186_v15 = vld [vmem:[#allocation2 + $0x170] sm:$0xff] (!%p1416_p8)  ;;  %v1187_v16 = vld [vmem:[#allocation2 + $0x178] sm:$0xff] (!%p1416_p8) }
 0x1fe   : > { %1224 = vst [vmem:[%s2232_s29 + $0xa0] sm:$0xff] %v1160_v53  ;;  %1225 = vst [vmem:[%s2232_s29 + $0xa8] sm:$0xff] %v1161_v54  ;;  %v1188_v17 = vld [vmem:[#allocation2 + $0x180] sm:$0xff]  ;;  %v1189_v18 = vld [vmem:[#allocation2 + $0x188] sm:$0xff] }
 0x1ff   : > { %1226 = vst [vmem:[%s2232_s29 + $0xb0] sm:$0xff] %v1162_v55  ;;  %1227 = vst [vmem:[%s2232_s29 + $0xb8] sm:$0xff] %v1163_v56  ;;  %v1168_v61 = vld [vmem:[#allocation2 + $0xe0] sm:$0xff]  ;;  %v1190_v19 = vld [vmem:[#allocation2 + $0x190] sm:$0xff] }
 0x200   : > { %1228 = vst [vmem:[%s2232_s29 + $0xc0] sm:$0xff] %v1164_v57  ;;  %1229 = vst [vmem:[%s2232_s29 + $0xc8] sm:$0xff] %v1165_v58  ;;  %v1169_v62 = vld [vmem:[#allocation2 + $0xe8] sm:$0xff]  ;;  %v1191_v20 = vld [vmem:[#allocation2 + $0x198] sm:$0xff] }
 0x201   : > { %1230 = vst [vmem:[%s2232_s29 + $0xd0] sm:$0xff] %v1166_v59  ;;  %1231 = vst [vmem:[%s2232_s29 + $0xd8] sm:$0xff] %v1167_v60  ;;  %v1192_v21 = vld [vmem:[#allocation2 + $0x1a0] sm:$0xff]  ;;  %v1193_v22 = vld [vmem:[#allocation2 + $0x1a8] sm:$0xff] }
 0x202   : > { %1232 = vst [vmem:[%s2232_s29 + $0xe0] sm:$0xff] %v1168_v61  ;;  %1233 = vst [vmem:[%s2232_s29 + $0xe8] sm:$0xff] %v1169_v62  ;;  %v1194_v23 = vld [vmem:[#allocation2 + $0x1b0] sm:$0xff]  ;;  %v1195_v24 = vld [vmem:[#allocation2 + $0x1b8] sm:$0xff] }
 0x203   : > { %v1170_v63 = vld [vmem:[#allocation2 + $0xf0] sm:$0xff]  ;;  %1236 = vst [vmem:[%s2232_s29 + $0x100] sm:$0xff] %v1172_v1  ;;  %1237 = vst [vmem:[%s2232_s29 + $0x108] sm:$0xff] %v1173_v2  ;;  %v1196_v25 = vld [vmem:[#allocation2 + $0x1c0] sm:$0xff] }
 0x204   : > { %v1171_v0 = vld [vmem:[#allocation2 + $0xf8] sm:$0xff]  ;;  %1234 = vst [vmem:[%s2232_s29 + $0xf0] sm:$0xff] %v1170_v63  ;;  %1238 = vst [vmem:[%s2232_s29 + $0x110] sm:$0xff] %v1174_v3  ;;  %v1197_v26 = vld [vmem:[#allocation2 + $0x1c8] sm:$0xff] }
 0x205   : > { %1235 = vst [vmem:[%s2232_s29 + $0xf8] sm:$0xff] %v1171_v0  ;;  %1239 = vst [vmem:[%s2232_s29 + $0x118] sm:$0xff] %v1175_v4  ;;  %v1198_v27 = vld [vmem:[#allocation2 + $0x1d0] sm:$0xff]  ;;  %v1199_v28 = vld [vmem:[#allocation2 + $0x1d8] sm:$0xff] }
 0x206   : > { %1240 = vst [vmem:[%s2232_s29 + $0x120] sm:$0xff] %v1176_v5  ;;  %1241 = vst [vmem:[%s2232_s29 + $0x128] sm:$0xff] %v1177_v6  ;;  %v1200_v29 = vld [vmem:[#allocation2 + $0x1e0] sm:$0xff]  ;;  %v1201_v30 = vld [vmem:[#allocation2 + $0x1e8] sm:$0xff] }
 0x207   : > { %1242 = vst [vmem:[%s2232_s29 + $0x130] sm:$0xff] %v1178_v7  ;;  %1243 = vst [vmem:[%s2232_s29 + $0x138] sm:$0xff] %v1179_v8  ;;  %v1202_v31 = vld [vmem:[#allocation2 + $0x1f0] sm:$0xff]  ;;  %v1203_v32 = vld [vmem:[#allocation2 + $0x1f8] sm:$0xff] }
 0x208   : > { %1244 = vst [vmem:[%s2232_s29 + $0x140] sm:$0xff] %v1180_v9  ;;  %1245 = vst [vmem:[%s2232_s29 + $0x148] sm:$0xff] %v1181_v10 }
 0x209   : > { %1246 = vst [vmem:[%s2232_s29 + $0x150] sm:$0xff] %v1182_v11  ;;  %1247 = vst [vmem:[%s2232_s29 + $0x158] sm:$0xff] %v1183_v12 }
 0x20a   : > { %1248 = vst [vmem:[%s2232_s29 + $0x160] sm:$0xff] %v1184_v13  ;;  %1249 = vst [vmem:[%s2232_s29 + $0x168] sm:$0xff] %v1185_v14 }
 0x20b   : > { %1250 = vst [vmem:[%s2232_s29 + $0x170] sm:$0xff] %v1186_v15  ;;  %1251 = vst [vmem:[%s2232_s29 + $0x178] sm:$0xff] %v1187_v16 }
 0x20c   : > { %1252 = vst [vmem:[%s2232_s29 + $0x180] sm:$0xff] %v1188_v17  ;;  %1253 = vst [vmem:[%s2232_s29 + $0x188] sm:$0xff] %v1189_v18 }
 0x20d   : > { %1254 = vst [vmem:[%s2232_s29 + $0x190] sm:$0xff] %v1190_v19  ;;  %1255 = vst [vmem:[%s2232_s29 + $0x198] sm:$0xff] %v1191_v20 }
 0x20e   : > { %1256 = vst [vmem:[%s2232_s29 + $0x1a0] sm:$0xff] %v1192_v21  ;;  %1257 = vst [vmem:[%s2232_s29 + $0x1a8] sm:$0xff] %v1193_v22 }
 0x20f   : > { %1258 = vst [vmem:[%s2232_s29 + $0x1b0] sm:$0xff] %v1194_v23  ;;  %1259 = vst [vmem:[%s2232_s29 + $0x1b8] sm:$0xff] %v1195_v24 }
 0x210   : > { %1260 = vst [vmem:[%s2232_s29 + $0x1c0] sm:$0xff] %v1196_v25  ;;  %1261 = vst [vmem:[%s2232_s29 + $0x1c8] sm:$0xff] %v1197_v26 }
 0x211   : > { %1262 = vst [vmem:[%s2232_s29 + $0x1d0] sm:$0xff] %v1198_v27  ;;  %1263 = vst [vmem:[%s2232_s29 + $0x1d8] sm:$0xff] %v1199_v28 }
 0x212   : > { %1264 = vst [vmem:[%s2232_s29 + $0x1e0] sm:$0xff] %v1200_v29  ;;  %1265 = vst [vmem:[%s2232_s29 + $0x1e8] sm:$0xff] %v1201_v30 }
 0x213   : > { %1266 = vst [vmem:[%s2232_s29 + $0x1f0] sm:$0xff] %v1202_v31  ;;  %1267 = vst [vmem:[%s2232_s29 + $0x1f8] sm:$0xff] %v1203_v32 }
 0x214 PF: > { %s2599_s12 = sld [smem:[#allocation8_spill]]  ;;  %s2600_s14 = sld [smem:[#allocation9_spill]] }
 0x215   : > { %s1285_s4 = sshll.u32 %s2232_s29, 4  ;;  %s2601_s24 = sld [smem:[#allocation13_spill]]  ;;  %s2495_s4 = int_to_ptr.vmem [resolvable:$true] %s1285_s4 }
 0x216   : > { %s2504_s26 = scalar_lea.sflag [#allocation6], %s482_s25  ;;  %s1646_s28 = scalar_lea.vmem %s2495_s4, 8192 }
 0x217   : > { %p1647_p9 = scmp.ne.s32.totalorder %s2495_s4, %s1646_s28  ;;  %s1791_s29 = smov [#allocation5]  }
 0x219   : > { %p1648_p10 = pnand %p1647_p9, %p1930_p0 }
 0x21a   : > { %s1419_s16 = sshll.u32 %s2599_s12, 1  ;;  %s1426_s17 = sshll.u32 %s2600_s14, 7 }
 0x21b   : > { %s1282_s5 = sadd.s32 %s1426_s17, %s1419_s16  ;;  %p1649_p11 = pneg %p1648_p10 }
 0x21c   : > { %s1421_s7 = sshll.u32 %s1282_s5, 7  ;;  %s1650_s12 = sshll.u32 %s1791_s29, 4  ;;  %s1651_s12 = int_to_ptr.vmem [resolvable:$false] %s1650_s12 }
 0x21d   : > { %s2500_s0 = scalar_lea.hbm %s2601_s24, %s1421_s7  ;;  %s1652_s14 = scalar_lea.vmem %s1651_s12, 16384 }
 0x21e   : > { %p1653_p12 = scmp.lt.s32.totalorder %s2495_s4, %s1651_s12  ;;  %p1654_p13 = scmp.lt.s32.totalorder %s1652_s14, %s1646_s28 }
 0x220   : > { %p1655_p1 = por %p1654_p13, %p1653_p12 }
 0x222   : > { %p1656_p3 = pnand %p1655_p1, %p1649_p11 }
 0x224   : > { %1659 = shalt.err (!%p1656_p3)
}
 0x225   : > { %s1660_s25 = scalar_lea.hbm %s2500_s0, 8192  ;;  %s1664_s5 = scalar_lea.hbm %s2601_s24, 32768 }
 0x226   : > { %p1661_p4 = scmp.ne.s32.totalorder %s2500_s0, %s1660_s25  ;;  %p1665_p7 = scmp.lt.u32.totalorder %s2500_s0, %s2601_s24 }
 0x227   : > { %p1666_p8 = scmp.lt.u32.totalorder %s1664_s5, %s1660_s25  ;;  %p1668_p10 = scmp.lt.u32.totalorder %s1660_s25, %s2500_s0 }
 0x228   : > { %p1662_p5 = pnand %p1661_p4, %p1930_p0 }
 0x229   : > { %p1667_p9 = por %p1666_p8, %p1665_p7 }
 0x22a   : > { %p1663_p6 = pneg %p1662_p5 }
 0x22b   : > { %p1669_p11 = por %p1668_p10, %p1667_p9 }
 0x22d   : > { %p1670_p12 = pnand %p1669_p11, %p1663_p6 }
 0x22f   : > { %1673 = shalt.err (!%p1670_p12)
}
 0x230   : > { %s1792_s23 = smov 256   ;;  %s1793_s28 = smov 512  }
 0x231   : > { %s1794_s29 = smov 16  }
 0x232   : > { %1523 = dma.vmem_to_hbm [thread:$0]  (%p1930_p0), %s2495_s4, 8192, %s2500_s0, %s2504_s26, %s1792_s23, %s1793_s28, %s1794_s29  }
 0x233 PF: > { %p1529_p13 = scmp.ge.s32.totalorder %s1788_s22, 2  ;;  %s1300_s12 = sand.u32 1, %s1736_s9  }
 0x234   : > { %s1301_s14 = scalar_lea.sflag [#allocation6], %s1300_s12 }
 0x235   : > { %p1526_p1 = pnand %p1529_p13, %p1936_p2 }
 0x237   : > { %1731 = dma.done.wait (!%p1526_p1), %s1301_s14, 8192  }
 0x238   : > { %1733 = vsyncadd (!%p1526_p1), %s1301_s14, 4294959104  ;;  %s15_s22 = sadd.s32 1, %s1788_s22   ;;  %s2603_s6 = sld [smem:[#allocation10_spill]] }
 0x239   : > { %p2533_p3 = scmp.ge.s32.totalorder %s15_s22, 10   ;;  %s2604_s30 = sld [smem:[#allocation11_spill]] }
 0x23a   : > { %s2605_s9 = smov %s1740_s10  ;;  %s2606_s10 = smov %s1744_s11 }
 0x23b   : > { %s2607_s11 = smov %s1928_s18  ;;  %s2608_s12 = smov %s1752_s13 }
 0x23c   : > { %s2609_s13 = smov %s1914_s8  ;;  %s2610_s14 = smov %s1760_s15 }
 0x23d   : > { %s2611_s15 = smov %s1925_s2  ;;  %s2612_s16 = smov %s1776_s19 }
 0x23e   : > { %s2613_s17 = smov %s1780_s20  ;;  %s2614_s18 = smov %s1784_s21 }
 0x23f   : > { %s2615_s19 = smov %s2603_s6  ;;  %s2616_s20 = smov %s2604_s30 }
 0x240   : > { %s2617_s21 = smov %s2627_s27  ;;  %14 = sbr.rel (!%p2533_p3) target bundleno = 11 (0xb), region = 130 }
 0x247   :  { %1306 = vsyncpa [#allocation6], 1 }
 0x248   :  { %1308 = vsyncpa [#allocation6 + $0x1], 1 }

// kernel: attention_forward.4
= control target key start
LH: loop header
LB: loop body
LE: loop exit
PB: predicated region body
PF: predicated region fallthrough
CT: control target
= control target key end

     0   :  { %s6861_s0 = inlined_call_operand.vmem [shape: f32[2,256,1024], index: 0, kind: input, shape index: {}, may-alias: {0,1,2}]   ;;  %s6862_s1 = inlined_call_operand.vmem [shape: f32[2,256,1024], index: 1, kind: input, shape index: {}, may-alias: {0,1,2}]   ;;  %s6863_s2 = inlined_call_operand.vmem [shape: f32[2,256,1024], index: 2, kind: input, shape index: {}, may-alias: {0,1,2}]   ;;  %s6864_s3 = inlined_call_operand.vmem [shape: f32[256,128], index: 3, kind: input, shape index: {}, may-alias: {3,5}]   ;;  %s6865_s4 = inlined_call_operand.vmem [shape: f32[256,128], index: 4, kind: input, shape index: {}, may-alias: {4,6}]   ;;  %s6866_s5 = inlined_call_operand.vmem [shape: f32[256,128], index: 5, kind: input, shape index: {}, may-alias: {3,5}]   ;;  %s6867_s6 = inlined_call_operand.vmem [shape: f32[256,128], index: 6, kind: input, shape index: {}, may-alias: {4,6}]   ;;  %s6868_s7 = inlined_call_operand.vmem [shape: f32[2,256,512], index: 7, kind: output, shape index: {}]  }
   0x1   :  { %6954 = sst [smem:[#allocation86_spill]] %s6861_s0 }
   0x2   :  { %6955 = sst [smem:[#allocation87_spill]] %s6862_s1 }
   0x3   :  { %6956 = sst [smem:[#allocation88_spill]] %s6863_s2 }
   0x4   :  { %6957 = sst [smem:[#allocation89_spill]] %s6864_s3 }
   0x5   :  { %6958 = sst [smem:[#allocation90_spill]] %s6865_s4 }
   0x6   :  { %6959 = sst [smem:[#allocation91_spill]] %s6866_s5 }
   0x7   :  { %6960 = sst [smem:[#allocation92_spill]] %s6867_s6 }
   0x8   :  { %6961 = sst [smem:[#allocation93_spill]] %s6868_s7 }
   0x9   :  { %s4636_s24 = smov 0   ;;  %s4638_s25 = smov 0  }
   0xa   :  { %s4640_s26 = smov 0   ;;  %s4642_s27 = smov 0  }
   0xb   :  { %s4644_s28 = smov 0   ;;  %s4646_s29 = smov 0  }
   0xc   :  { %s4648_s30 = smov 0   ;;  %s4650_s8 = smov 0  }
   0xd   :  { %s4652_s9 = smov 0   ;;  %s4654_s10 = smov 0  }
   0xe   :  { %s4656_s11 = smov 0   ;;  %s4658_s12 = smov 0  }
   0xf   :  { %s4660_s13 = smov 0   ;;  %s4662_s14 = smov 0  }
  0x10   :  { %s4664_s15 = smov 0  }
  0x11 LB: > { %6962 = sst [smem:[#allocation9_spill]] %s4557_s30  ;;  %s32_s17 = sadd.s32 1, %s4573_s11  ;;  %s4589_s15 = sphi %s4664_s15, %s17_s15   ;;  %s4585_s14 = sphi %s4662_s14, %s7215_s14   ;;  %s4581_s13 = sphi %s4660_s13, %s7214_s13   ;;  %s4577_s12 = sphi %s4658_s12, %s7223_s12   ;;  %s4573_s11 = sphi %s4656_s11, %s7212_s11   ;;  %s4569_s10 = sphi %s4654_s10, %s7211_s10   ;;  %s4565_s9 = sphi %s4652_s9, %s7210_s9   ;;  %s4561_s8 = sphi %s4650_s8, %s7222_s8   ;;  %s4557_s30 = sphi %s4648_s30, %s7209_s30   ;;  %s4553_s29 = sphi %s4646_s29, %s7221_s29   ;;  %s4549_s28 = sphi %s4644_s28, %s7220_s28   ;;  %s4545_s27 = sphi %s4642_s27, %s7219_s27   ;;  %s4541_s26 = sphi %s4640_s26, %s7218_s26   ;;  %s4537_s25 = sphi %s4638_s25, %s7217_s25   ;;  %s4533_s24 = sphi %s4636_s24, %s7216_s24  }
  0x12   : > { %6963 = sst [smem:[#allocation10_spill]] %s4561_s8  ;;  %p33_p0 = scmp.ge.s32.totalorder %s32_s17, 2 }
  0x13   : > { %6964 = sst [smem:[#allocation11_spill]] %s4565_s9  ;;  %s35_s18 = sadd.s32 1, %s4577_s12 }
  0x14   : > { %6965 = sst [smem:[#allocation12_spill]] %s4569_s10  ;;  %s39_s19 = sadd.s32 1, %s4581_s13 }
  0x15   : > { %6966 = sst [smem:[#allocation13_spill]] %s4573_s11  ;;  %s43_s20 = sadd.s32 1, %s4585_s14 }
  0x16   : > { %6967 = sst [smem:[#allocation14_spill]] %s4581_s13  ;;  %s7225_s17 = smov (%p33_p0, %s32_s17), 0 }
  0x17   : > { %6968 = sst [smem:[#allocation15_spill]] %s4585_s14  ;;  %s7227_s18 = smov (!%p33_p0, %s35_s18), %s4577_s12 }
  0x18   : > { %6969 = sst [smem:[#allocation16_spill]] %s7225_s17  ;;  %p61_p1 = scmp.ne.s32.totalorder %s4553_s29, %s4549_s28 }
  0x19   : > { %p37_p2 = scmp.ge.s32.totalorder %s7227_s18, 2  ;;  %p62_p3 = scmp.eq.s32.totalorder %s4589_s15, 0 }
  0x1a   : > { %p77_p4 = scmp.lt.s32.totalorder %s4573_s11, %s4577_s12  ;;  %s79_s22 = sadd.s32 4, %s4581_s13 }
  0x1b   : > { %s7229_s18 = smov (%p37_p2, %s7227_s18), 0  ;;  %s7231_s19 = smov (!%p37_p2, %s39_s19), %s4581_s13 }
  0x1c   : > { %6970 = sst [smem:[#allocation17_spill]] %s7229_s18  ;;  %s48_s23 = ssub.s32 %s4577_s12, %s7229_s18 }
  0x1d   : > { %p4736_p5 = por %p62_p3, %p61_p1  ;;  %p41_p6 = scmp.ge.s32.totalorder %s7231_s19, 2 }
  0x1e   : > { %p80_p7 = scmp.lt.s32.totalorder %s7225_s17, %s7229_s18  ;;  %s90_s5 = sadd.s32 1, %s4545_s27 }
  0x1f   : > { %s4744_s21 = scalar_select %p77_p4, %s4573_s11, %s4577_s12 }
  0x20   : > { %s7233_s19 = smov (%p41_p6, %s7231_s19), 0  ;;  %s7235_s20 = smov (!%p41_p6, %s43_s20), %s4585_s14 }
  0x21   : > { %6972 = sst [smem:[#allocation18_spill]] %s7233_s19  ;;  %s50_s7 = ssub.s32 %s4581_s13, %s7233_s19 }
  0x22   : > { %s82_s10 = sadd.s32 4, %s7233_s19  ;;  %p45_p8 = scmp.ge.s32.totalorder %s7235_s20, 2 }
  0x23   : > { %s86_s9 = ssub.s32 %s79_s22, %s82_s10  ;;  %p97_p9 = scmp.ne.s32.totalorder %s4545_s27, %s4541_s26 }
  0x24   : > { %s81_s6 = scalar_select %p80_p7, %s7225_s17, %s7229_s18 }
  0x25   : > { %s7237_s20 = smov (%p45_p8, %s7235_s20), 0  ;;  %p4764_p12 = por %p97_p9, %p62_p3 }
  0x26   : > { %6973 = sst [smem:[#allocation19_spill]] %s7237_s20  ;;  %s84_s11 = ssub.s32 %s4744_s21, %s81_s6 }
  0x27   : > { %s47_s4 = ssub.s32 %s4585_s14, %s7237_s20  ;;  %s115_s6 = sadd.s32 6, %s4581_s13 }
  0x28   : > { %s49_s3 = sor.u32 %s48_s23, %s47_s4  ;;  %s85_s30 = sor.u32 %s84_s11, %s47_s4 }
  0x29   : > { %s51_s8 = sor.u32 %s50_s7, %s49_s3  ;;  %s87_s10 = sor.u32 %s86_s9, %s85_s30 }
  0x2a   : > { %p52_p10 = scmp.eq.s32.totalorder %s51_s8, 0  ;;  %p88_p11 = scmp.eq.s32.totalorder %s87_s10, 0 }
  0x2b   : > { %s6975_s18 = sadd.s32 1, %s4553_s29  ;;  %s118_s4 = sadd.s32 6, %s7233_s19 }
  0x2c   : > { %s4772_s20 = scalar_select %p52_p10, %s4553_s29, %s6975_s18  }
  0x2d   : > { %s4775_s17 = scalar_select %p88_p11, %s4545_s27, %s90_s5  }
  0x2e   : > { %6976 = sst [smem:[#allocation20_spill]] %s4772_s20  ;;  %s126_s11 = sadd.s32 1, %s4537_s25 }
  0x2f   : > { %s122_s3 = ssub.s32 %s115_s6, %s118_s4  ;;  %p133_p13 = scmp.ne.s32.totalorder %s4537_s25, %s4533_s24 }
  0x30   : > { %s123_s7 = sor.u32 %s122_s3, %s85_s30  ;;  %s6977_s9 = sadd.s32 4294967295, %s4589_s15  }
  0x31   : > { %p279_p0 = scmp.eq.s32.totalorder %s6977_s9, 15  ;;  %p124_p2 = scmp.eq.s32.totalorder %s123_s7, 0 }
  0x32   : > { %p4785_p4 = por %p133_p13, %p62_p3  ;;  %p3595_p7 = scmp.ge.s32.totalorder %s4589_s15, 16 }
  0x33   : > { %p4792_p6 = por %p279_p0, %p61_p1 }
  0x34   : > { %s4797_s5 = scalar_select %p124_p2, %s4537_s25, %s126_s11  }
  0x35   : > { %301 = sbr.rel (%p3595_p7) target bundleno = 141 (0x8d), region = 16 }
  0x3c   : > { %304 = sbr.rel (!%p4736_p5) target bundleno = 87 (0x57), region = 20  ;;  %s306_s30 = sand.u32 (%p4736_p5), 1, %s4553_s29  }
  0x3d   : > { %s3598_s18 = sshll.u32 (%p4736_p5), %s4581_s13, 1  ;;  %s3668_s10 = sshll.u32 (%p4736_p5), %s4577_s12, 7 }
  0x3e   : > { %s3596_s6 = sshll.u32 (%p4736_p5), %s306_s30, 8  ;;  %s312_s4 = sadd.s32 (%p4736_p5), %s3668_s10, %s3598_s18 }
  0x3f   : > { %s3600_s3 = sshll.u32 (%p4736_p5), %s4585_s14, 8  ;;  %s6980_s0 = sld [smem:[#allocation86_spill]] (%p4736_p5) }
  0x40   : > { %s314_s7 = sadd.s32 (%p4736_p5), %s3600_s3, %s312_s4  ;;  %s4814_s16 = scalar_lea.vmem (%p4736_p5), [#allocation5], %s3596_s6 }
  0x41   : > { %s3601_s9 = sshll.u32 (%p4736_p5), %s314_s7, 3 }
  0x45   : > { %s4809_s20 = scalar_lea.vmem %s6980_s0, %s3601_s9 }
  0x46   : > { %v329_v0 = vld [vmem:[%s4809_s20] sm:$0xff]  ;;  %v331_v1 = vld [vmem:[%s4809_s20 + $0x8] sm:$0xff] }
  0x47   : > { %v333_v2 = vld [vmem:[%s4809_s20 + $0x40] sm:$0xff]  ;;  %330 = vst [vmem:[%s4814_s16] sm:$0xff] %v329_v0  ;;  %332 = vst [vmem:[%s4814_s16 + $0x8] sm:$0xff] %v331_v1  ;;  %v335_v3 = vld [vmem:[%s4809_s20 + $0x48] sm:$0xff] }
  0x48   : > { %334 = vst [vmem:[%s4814_s16 + $0x10] sm:$0xff] %v333_v2  ;;  %v337_v4 = vld [vmem:[%s4809_s20 + $0x80] sm:$0xff]  ;;  %v339_v5 = vld [vmem:[%s4809_s20 + $0x88] sm:$0xff]  ;;  %336 = vst [vmem:[%s4814_s16 + $0x18] sm:$0xff] %v335_v3 }
  0x49   : > { %338 = vst [vmem:[%s4814_s16 + $0x20] sm:$0xff] %v337_v4  ;;  %340 = vst [vmem:[%s4814_s16 + $0x28] sm:$0xff] %v339_v5  ;;  %v341_v6 = vld [vmem:[%s4809_s20 + $0xc0] sm:$0xff]  ;;  %v343_v7 = vld [vmem:[%s4809_s20 + $0xc8] sm:$0xff] }
  0x4a   : > { %v345_v8 = vld [vmem:[%s4809_s20 + $0x100] sm:$0xff]  ;;  %342 = vst [vmem:[%s4814_s16 + $0x30] sm:$0xff] %v341_v6  ;;  %344 = vst [vmem:[%s4814_s16 + $0x38] sm:$0xff] %v343_v7  ;;  %v347_v9 = vld [vmem:[%s4809_s20 + $0x108] sm:$0xff] }
  0x4b   : > { %346 = vst [vmem:[%s4814_s16 + $0x40] sm:$0xff] %v345_v8  ;;  %v349_v10 = vld [vmem:[%s4809_s20 + $0x140] sm:$0xff]  ;;  %v351_v11 = vld [vmem:[%s4809_s20 + $0x148] sm:$0xff]  ;;  %348 = vst [vmem:[%s4814_s16 + $0x48] sm:$0xff] %v347_v9 }
  0x4c   : > { %350 = vst [vmem:[%s4814_s16 + $0x50] sm:$0xff] %v349_v10  ;;  %352 = vst [vmem:[%s4814_s16 + $0x58] sm:$0xff] %v351_v11  ;;  %v353_v12 = vld [vmem:[%s4809_s20 + $0x180] sm:$0xff]  ;;  %v355_v13 = vld [vmem:[%s4809_s20 + $0x188] sm:$0xff] }
  0x4d   : > { %v357_v14 = vld [vmem:[%s4809_s20 + $0x1c0] sm:$0xff]  ;;  %354 = vst [vmem:[%s4814_s16 + $0x60] sm:$0xff] %v353_v12  ;;  %356 = vst [vmem:[%s4814_s16 + $0x68] sm:$0xff] %v355_v13  ;;  %v359_v15 = vld [vmem:[%s4809_s20 + $0x1c8] sm:$0xff] }
  0x4e   : > { %358 = vst [vmem:[%s4814_s16 + $0x70] sm:$0xff] %v357_v14  ;;  %v361_v16 = vld [vmem:[%s4809_s20 + $0x200] sm:$0xff]  ;;  %v363_v17 = vld [vmem:[%s4809_s20 + $0x208] sm:$0xff]  ;;  %360 = vst [vmem:[%s4814_s16 + $0x78] sm:$0xff] %v359_v15 }
  0x4f   : > { %362 = vst [vmem:[%s4814_s16 + $0x80] sm:$0xff] %v361_v16  ;;  %364 = vst [vmem:[%s4814_s16 + $0x88] sm:$0xff] %v363_v17  ;;  %v365_v18 = vld [vmem:[%s4809_s20 + $0x240] sm:$0xff]  ;;  %v367_v19 = vld [vmem:[%s4809_s20 + $0x248] sm:$0xff] }
  0x50   : > { %v369_v20 = vld [vmem:[%s4809_s20 + $0x280] sm:$0xff]  ;;  %366 = vst [vmem:[%s4814_s16 + $0x90] sm:$0xff] %v365_v18  ;;  %368 = vst [vmem:[%s4814_s16 + $0x98] sm:$0xff] %v367_v19  ;;  %v371_v21 = vld [vmem:[%s4809_s20 + $0x288] sm:$0xff] }
  0x51   : > { %370 = vst [vmem:[%s4814_s16 + $0xa0] sm:$0xff] %v369_v20  ;;  %v373_v22 = vld [vmem:[%s4809_s20 + $0x2c0] sm:$0xff]  ;;  %v375_v23 = vld [vmem:[%s4809_s20 + $0x2c8] sm:$0xff]  ;;  %372 = vst [vmem:[%s4814_s16 + $0xa8] sm:$0xff] %v371_v21 }
  0x52   : > { %374 = vst [vmem:[%s4814_s16 + $0xb0] sm:$0xff] %v373_v22  ;;  %376 = vst [vmem:[%s4814_s16 + $0xb8] sm:$0xff] %v375_v23  ;;  %v377_v24 = vld [vmem:[%s4809_s20 + $0x300] sm:$0xff]  ;;  %v379_v25 = vld [vmem:[%s4809_s20 + $0x308] sm:$0xff] }
  0x53   : > { %v381_v26 = vld [vmem:[%s4809_s20 + $0x340] sm:$0xff]  ;;  %378 = vst [vmem:[%s4814_s16 + $0xc0] sm:$0xff] %v377_v24  ;;  %380 = vst [vmem:[%s4814_s16 + $0xc8] sm:$0xff] %v379_v25  ;;  %v383_v27 = vld [vmem:[%s4809_s20 + $0x348] sm:$0xff] }
  0x54   : > { %382 = vst [vmem:[%s4814_s16 + $0xd0] sm:$0xff] %v381_v26  ;;  %v385_v28 = vld [vmem:[%s4809_s20 + $0x380] sm:$0xff]  ;;  %v387_v29 = vld [vmem:[%s4809_s20 + $0x388] sm:$0xff]  ;;  %384 = vst [vmem:[%s4814_s16 + $0xd8] sm:$0xff] %v383_v27 }
  0x55   : > { %386 = vst [vmem:[%s4814_s16 + $0xe0] sm:$0xff] %v385_v28  ;;  %388 = vst [vmem:[%s4814_s16 + $0xe8] sm:$0xff] %v387_v29  ;;  %v389_v30 = vld [vmem:[%s4809_s20 + $0x3c0] sm:$0xff]  ;;  %v391_v31 = vld [vmem:[%s4809_s20 + $0x3c8] sm:$0xff] }
  0x56   : > { %390 = vst [vmem:[%s4814_s16 + $0xf0] sm:$0xff] %v389_v30  ;;  %392 = vst [vmem:[%s4814_s16 + $0xf8] sm:$0xff] %v391_v31 }
  0x57 PF: > { %398 = sbr.rel (!%p4764_p12) target bundleno = 114 (0x72), region = 43  ;;  %s400_s19 = sand.u32 (%p4764_p12), 1, %s4545_s27  }
  0x58   : > { %s3603_s30 = sshll.u32 (%p4764_p12), %s4744_s21, 7  ;;  %s3602_s18 = sshll.u32 (%p4764_p12), %s400_s19, 7 }
  0x59   : > { %s3432_s10 = sadd.s32 (%p4764_p12), %s4581_s13, %s3603_s30  ;;  %s3604_s6 = sshll.u32 (%p4764_p12), %s4585_s14, 8 }
  0x5a   : > { %s3434_s4 = sadd.s32 (%p4764_p12), %s3604_s6, %s3432_s10  ;;  %s6981_s1 = sld [smem:[#allocation87_spill]] (%p4764_p12) }
  0x5b   : > { %s3605_s3 = sshll.u32 (%p4764_p12), %s3434_s4, 3  ;;  %s402_s22 = scalar_lea.vmem (%p4764_p12), [#allocation6], %s3602_s18 }
  0x60   : > { %s4886_s20 = scalar_lea.vmem %s6981_s1, %s3605_s3 }
  0x61   : > { %v3606_v32 = vld [vmem:[%s4886_s20 + $0x20] sm:$0xff] }
  0x62   : > { %v3607_v33 = vld [vmem:[%s4886_s20 + $0x60] sm:$0xff]  ;;  %471 = vst [vmem:[%s402_s22] sm:$0xff] %v3606_v32 }
  0x63   : > { %v3608_v34 = vld [vmem:[%s4886_s20 + $0xa0] sm:$0xff]  ;;  %473 = vst [vmem:[%s402_s22 + $0x8] sm:$0xff] %v3607_v33 }
  0x64   : > { %475 = vst [vmem:[%s402_s22 + $0x10] sm:$0xff] %v3608_v34  ;;  %v3609_v35 = vld [vmem:[%s4886_s20 + $0xe0] sm:$0xff] }
  0x65   : > { %v3610_v36 = vld [vmem:[%s4886_s20 + $0x120] sm:$0xff]  ;;  %477 = vst [vmem:[%s402_s22 + $0x18] sm:$0xff] %v3609_v35 }
  0x66   : > { %v3611_v37 = vld [vmem:[%s4886_s20 + $0x160] sm:$0xff]  ;;  %479 = vst [vmem:[%s402_s22 + $0x20] sm:$0xff] %v3610_v36 }
  0x67   : > { %481 = vst [vmem:[%s402_s22 + $0x28] sm:$0xff] %v3611_v37  ;;  %v3612_v38 = vld [vmem:[%s4886_s20 + $0x1a0] sm:$0xff] }
  0x68   : > { %v3613_v39 = vld [vmem:[%s4886_s20 + $0x1e0] sm:$0xff]  ;;  %483 = vst [vmem:[%s402_s22 + $0x30] sm:$0xff] %v3612_v38 }
  0x69   : > { %v3614_v40 = vld [vmem:[%s4886_s20 + $0x220] sm:$0xff]  ;;  %485 = vst [vmem:[%s402_s22 + $0x38] sm:$0xff] %v3613_v39 }
  0x6a   : > { %487 = vst [vmem:[%s402_s22 + $0x40] sm:$0xff] %v3614_v40  ;;  %v3615_v41 = vld [vmem:[%s4886_s20 + $0x260] sm:$0xff] }
  0x6b   : > { %v3616_v42 = vld [vmem:[%s4886_s20 + $0x2a0] sm:$0xff]  ;;  %489 = vst [vmem:[%s402_s22 + $0x48] sm:$0xff] %v3615_v41 }
  0x6c   : > { %v3617_v43 = vld [vmem:[%s4886_s20 + $0x2e0] sm:$0xff]  ;;  %491 = vst [vmem:[%s402_s22 + $0x50] sm:$0xff] %v3616_v42 }
  0x6d   : > { %493 = vst [vmem:[%s402_s22 + $0x58] sm:$0xff] %v3617_v43  ;;  %v3618_v44 = vld [vmem:[%s4886_s20 + $0x320] sm:$0xff] }
  0x6e   : > { %v3619_v45 = vld [vmem:[%s4886_s20 + $0x360] sm:$0xff]  ;;  %495 = vst [vmem:[%s402_s22 + $0x60] sm:$0xff] %v3618_v44 }
  0x6f   : > { %v3620_v46 = vld [vmem:[%s4886_s20 + $0x3a0] sm:$0xff]  ;;  %497 = vst [vmem:[%s402_s22 + $0x68] sm:$0xff] %v3619_v45 }
  0x70   : > { %499 = vst [vmem:[%s402_s22 + $0x70] sm:$0xff] %v3620_v46  ;;  %v3621_v47 = vld [vmem:[%s4886_s20 + $0x3e0] sm:$0xff] }
  0x71   : > { %501 = vst [vmem:[%s402_s22 + $0x78] sm:$0xff] %v3621_v47 }
  0x72 PF: > { %507 = sbr.rel (!%p4785_p4) target bundleno = 141 (0x8d), region = 81  ;;  %s509_s11 = sand.u32 (%p4785_p4), 1, %s4537_s25  }
  0x73   : > { %s3623_s16 = sshll.u32 (%p4785_p4), %s4744_s21, 7  ;;  %s3622_s19 = sshll.u32 (%p4785_p4), %s509_s11, 7 }
  0x74   : > { %s3441_s30 = sadd.s32 (%p4785_p4), %s4581_s13, %s3623_s16  ;;  %s3624_s18 = sshll.u32 (%p4785_p4), %s4585_s14, 8 }
  0x75   : > { %s3443_s10 = sadd.s32 (%p4785_p4), %s3624_s18, %s3441_s30  ;;  %s6982_s2 = sld [smem:[#allocation88_spill]] (%p4785_p4) }
  0x76   : > { %s3625_s6 = sshll.u32 (%p4785_p4), %s3443_s10, 3  ;;  %s511_s21 = scalar_lea.vmem (%p4785_p4), [#allocation7], %s3622_s19 }
  0x7b   : > { %s4913_s7 = scalar_lea.vmem %s6982_s2, %s3625_s6 }
  0x7c   : > { %v3626_v48 = vld [vmem:[%s4913_s7 + $0x30] sm:$0xff] }
  0x7d   : > { %v3627_v49 = vld [vmem:[%s4913_s7 + $0x70] sm:$0xff]  ;;  %580 = vst [vmem:[%s511_s21] sm:$0xff] %v3626_v48 }
  0x7e   : > { %v3628_v50 = vld [vmem:[%s4913_s7 + $0xb0] sm:$0xff]  ;;  %582 = vst [vmem:[%s511_s21 + $0x8] sm:$0xff] %v3627_v49 }
  0x7f   : > { %584 = vst [vmem:[%s511_s21 + $0x10] sm:$0xff] %v3628_v50  ;;  %v3629_v51 = vld [vmem:[%s4913_s7 + $0xf0] sm:$0xff] }
  0x80   : > { %v3630_v52 = vld [vmem:[%s4913_s7 + $0x130] sm:$0xff]  ;;  %586 = vst [vmem:[%s511_s21 + $0x18] sm:$0xff] %v3629_v51 }
  0x81   : > { %v3631_v53 = vld [vmem:[%s4913_s7 + $0x170] sm:$0xff]  ;;  %588 = vst [vmem:[%s511_s21 + $0x20] sm:$0xff] %v3630_v52 }
  0x82   : > { %590 = vst [vmem:[%s511_s21 + $0x28] sm:$0xff] %v3631_v53  ;;  %v3632_v54 = vld [vmem:[%s4913_s7 + $0x1b0] sm:$0xff] }
  0x83   : > { %v3633_v55 = vld [vmem:[%s4913_s7 + $0x1f0] sm:$0xff]  ;;  %592 = vst [vmem:[%s511_s21 + $0x30] sm:$0xff] %v3632_v54 }
  0x84   : > { %v3634_v56 = vld [vmem:[%s4913_s7 + $0x230] sm:$0xff]  ;;  %594 = vst [vmem:[%s511_s21 + $0x38] sm:$0xff] %v3633_v55 }
  0x85   : > { %596 = vst [vmem:[%s511_s21 + $0x40] sm:$0xff] %v3634_v56  ;;  %v3635_v57 = vld [vmem:[%s4913_s7 + $0x270] sm:$0xff] }
  0x86   : > { %v3636_v58 = vld [vmem:[%s4913_s7 + $0x2b0] sm:$0xff]  ;;  %598 = vst [vmem:[%s511_s21 + $0x48] sm:$0xff] %v3635_v57 }
  0x87   : > { %v3637_v59 = vld [vmem:[%s4913_s7 + $0x2f0] sm:$0xff]  ;;  %600 = vst [vmem:[%s511_s21 + $0x50] sm:$0xff] %v3636_v58 }
  0x88   : > { %602 = vst [vmem:[%s511_s21 + $0x58] sm:$0xff] %v3637_v59  ;;  %v3638_v60 = vld [vmem:[%s4913_s7 + $0x330] sm:$0xff] }
  0x89   : > { %v3639_v61 = vld [vmem:[%s4913_s7 + $0x370] sm:$0xff]  ;;  %604 = vst [vmem:[%s511_s21 + $0x60] sm:$0xff] %v3638_v60 }
  0x8a   : > { %v3640_v62 = vld [vmem:[%s4913_s7 + $0x3b0] sm:$0xff]  ;;  %606 = vst [vmem:[%s511_s21 + $0x68] sm:$0xff] %v3639_v61 }
  0x8b   : > { %608 = vst [vmem:[%s511_s21 + $0x70] sm:$0xff] %v3640_v62  ;;  %v3641_v63 = vld [vmem:[%s4913_s7 + $0x3f0] sm:$0xff] }
  0x8c   : > { %610 = vst [vmem:[%s511_s21 + $0x78] sm:$0xff] %v3641_v63 }
  0x8d PF: > { %p3642_p1 = scmp.ge.s32.totalorder %s4589_s15, 1  ;;  %p659_p3 = scmp.lt.s32.totalorder %s4589_s15, 17 }
  0x8f   : > { %p660_p5 = pnand %p3642_p1, %p659_p3 }
  0x90   : > { %s6983_s8 = sld [smem:[#allocation10_spill]] (!%p660_p5)  ;;  %s6984_s9 = sld [smem:[#allocation9_spill]] (!%p660_p5) }
  0x91   : > { %663 = sbr.rel (%p660_p5) target bundleno = 1975 (0x7b7), region = 135  ;;  %s666_s20 = sand.u32 (!%p660_p5), 1, %s4549_s28  }
  0x92   : > { %s673_s22 = sand.u32 (!%p660_p5), 1, %s4541_s26   ;;  %s3643_s11 = sshll.u32 (!%p660_p5), %s666_s20, 8 }
  0x93   : > { %s3644_s16 = sshll.u32 (!%p660_p5), %s673_s22, 7  ;;  %s680_s19 = sand.u32 (!%p660_p5), 1, %s4533_s24  }
  0x94   : > { %s3645_s30 = sshll.u32 (!%p660_p5), %s680_s19, 7  ;;  %s6985_s7 = sld [smem:[#allocation89_spill]] (!%p660_p5) }
  0x95   : > { %s6986_s2 = sld [smem:[#allocation90_spill]] (!%p660_p5)  ;;  %s6987_s19 = sld [smem:[#allocation91_spill]] (!%p660_p5) }
  0x96   : > { %s3647_s18 = sshll.u32 (!%p660_p5), %s6983_s8, 4  ;;  %p764_p9 = scmp.lt.s32.totalorder (!%p660_p5), %s6984_s9, %s6983_s8 }
  0x97   : > { %p753_p8 = scmp.lt.s32.totalorder (!%p660_p5), %s3647_s18, 31  ;;  %s6988_s13 = sld [smem:[#allocation92_spill]] (!%p660_p5) }
  0x98   : > { %s765_s10 = scalar_select %p764_p9, %s6984_s9, %s6983_s8 }
  0x99   : > { %s7239_s18 = smov (!%p753_p8, %s3647_s18), 31  ;;  %s4961_s3 = scalar_lea.vmem [#allocation5], %s3643_s11 }
  0x9a   : > { %s3648_s6 = sshll.u32 %s7239_s18, 3  ;;  %s3651_s26 = sshll.u32 %s765_s10, 4 }
  0x9b   : > { %s4944_s21 = scalar_lea.vmem %s6985_s7, %s3648_s6  ;;  %s4949_s28 = scalar_lea.vmem %s6986_s2, %s3648_s6 }
  0x9c   : > { %p767_p10 = scmp.lt.s32.totalorder %s3651_s26, 31  ;;  %s4963_s7 = scalar_lea.vmem [#allocation6], %s3644_s16 }
  0x9d   : > { %s4965_s0 = scalar_lea.vmem [#allocation7], %s3645_s30  ;;  %s4967_s1 = scalar_lea.vmem [#allocation8], %s3643_s11 }
  0x9e   : > { %s7241_s26 = smov (!%p767_p10, %s3651_s26), 31  ;;  %p3655_p11 = scmp.ne.s32.totalorder %s6984_s9, 0 }
  0x9f   : > { %s3652_s24 = sshll.u32 %s7241_s26, 3  ;;  %vm790_vm0 = vcmask (!%p3655_p11), 7168   ;;  %v4591_v0 = vmov (!%p3655_p11), -inf   ;;  %v4592_v1 = vmov (!%p3655_p11), 0.0  }
  0xa0   : > { %s4954_s14 = scalar_lea.vmem %s6987_s19, %s3652_s24  ;;  %s4959_s4 = scalar_lea.vmem %s6988_s13, %s3652_s24  ;;  %791 = vst.msk [vmem:[#allocation2] sm:$0xff] (!%p3655_p11), %vm790_vm0, %v4591_v0  ;;  %792 = vst.msk [vmem:[#allocation2 + $0x8] sm:$0xff] (!%p3655_p11), %vm790_vm0, %v4591_v0 }
  0xa1   : > { %789 = sbr.rel (%p3655_p11) target bundleno = 208 (0xd0), region = 151  ;;  %793 = vst.msk [vmem:[#allocation2 + $0x10] sm:$0xff] (!%p3655_p11), %vm790_vm0, %v4591_v0  ;;  %794 = vst.msk [vmem:[#allocation2 + $0x18] sm:$0xff] (!%p3655_p11), %vm790_vm0, %v4591_v0 }
  0xa2   : > { %795 = vst.msk [vmem:[#allocation2 + $0x20] sm:$0xff] (!%p3655_p11), %vm790_vm0, %v4591_v0  ;;  %796 = vst.msk [vmem:[#allocation2 + $0x28] sm:$0xff] (!%p3655_p11), %vm790_vm0, %v4591_v0 }
  0xa3   : > { %797 = vst.msk [vmem:[#allocation2 + $0x30] sm:$0xff] (!%p3655_p11), %vm790_vm0, %v4591_v0  ;;  %798 = vst.msk [vmem:[#allocation2 + $0x38] sm:$0xff] (!%p3655_p11), %vm790_vm0, %v4591_v0 }
  0xa4   : > { %799 = vst.msk [vmem:[#allocation2 + $0x40] sm:$0xff] (!%p3655_p11), %vm790_vm0, %v4591_v0  ;;  %800 = vst.msk [vmem:[#allocation2 + $0x48] sm:$0xff] (!%p3655_p11), %vm790_vm0, %v4591_v0 }
  0xa5   : > { %801 = vst.msk [vmem:[#allocation2 + $0x50] sm:$0xff] (!%p3655_p11), %vm790_vm0, %v4591_v0  ;;  %802 = vst.msk [vmem:[#allocation2 + $0x58] sm:$0xff] (!%p3655_p11), %vm790_vm0, %v4591_v0 }
  0xa6   : > { %803 = vst.msk [vmem:[#allocation2 + $0x60] sm:$0xff] (!%p3655_p11), %vm790_vm0, %v4591_v0  ;;  %804 = vst.msk [vmem:[#allocation2 + $0x68] sm:$0xff] (!%p3655_p11), %vm790_vm0, %v4591_v0 }
  0xa7   : > { %805 = vst.msk [vmem:[#allocation2 + $0x70] sm:$0xff] (!%p3655_p11), %vm790_vm0, %v4591_v0  ;;  %806 = vst.msk [vmem:[#allocation2 + $0x78] sm:$0xff] (!%p3655_p11), %vm790_vm0, %v4591_v0 }
  0xa8   : > { %807 = vst.msk [vmem:[#allocation2 + $0x80] sm:$0xff] %vm790_vm0, %v4591_v0  ;;  %808 = vst.msk [vmem:[#allocation2 + $0x88] sm:$0xff] %vm790_vm0, %v4591_v0 }
  0xa9   : > { %809 = vst.msk [vmem:[#allocation2 + $0x90] sm:$0xff] %vm790_vm0, %v4591_v0  ;;  %810 = vst.msk [vmem:[#allocation2 + $0x98] sm:$0xff] %vm790_vm0, %v4591_v0 }
  0xaa   : > { %811 = vst.msk [vmem:[#allocation2 + $0xa0] sm:$0xff] %vm790_vm0, %v4591_v0  ;;  %812 = vst.msk [vmem:[#allocation2 + $0xa8] sm:$0xff] %vm790_vm0, %v4591_v0 }
  0xab   : > { %813 = vst.msk [vmem:[#allocation2 + $0xb0] sm:$0xff] %vm790_vm0, %v4591_v0  ;;  %814 = vst.msk [vmem:[#allocation2 + $0xb8] sm:$0xff] %vm790_vm0, %v4591_v0 }
  0xac   : > { %815 = vst.msk [vmem:[#allocation2 + $0xc0] sm:$0xff] %vm790_vm0, %v4591_v0  ;;  %816 = vst.msk [vmem:[#allocation2 + $0xc8] sm:$0xff] %vm790_vm0, %v4591_v0 }
  0xad   : > { %817 = vst.msk [vmem:[#allocation2 + $0xd0] sm:$0xff] %vm790_vm0, %v4591_v0  ;;  %818 = vst.msk [vmem:[#allocation2 + $0xd8] sm:$0xff] %vm790_vm0, %v4591_v0 }
  0xae   : > { %819 = vst.msk [vmem:[#allocation2 + $0xe0] sm:$0xff] %vm790_vm0, %v4591_v0  ;;  %820 = vst.msk [vmem:[#allocation2 + $0xe8] sm:$0xff] %vm790_vm0, %v4591_v0 }
  0xaf   : > { %821 = vst.msk [vmem:[#allocation2 + $0xf0] sm:$0xff] %vm790_vm0, %v4591_v0  ;;  %822 = vst.msk [vmem:[#allocation2 + $0xf8] sm:$0xff] %vm790_vm0, %v4591_v0 }
  0xb0   : > { %823 = vst.msk [vmem:[#allocation3] sm:$0xff] %vm790_vm0, %v4592_v1  ;;  %824 = vst.msk [vmem:[#allocation3 + $0x8] sm:$0xff] %vm790_vm0, %v4592_v1 }
  0xb1   : > { %825 = vst.msk [vmem:[#allocation3 + $0x10] sm:$0xff] %vm790_vm0, %v4592_v1  ;;  %826 = vst.msk [vmem:[#allocation3 + $0x18] sm:$0xff] %vm790_vm0, %v4592_v1 }
  0xb2   : > { %827 = vst.msk [vmem:[#allocation3 + $0x20] sm:$0xff] %vm790_vm0, %v4592_v1  ;;  %828 = vst.msk [vmem:[#allocation3 + $0x28] sm:$0xff] %vm790_vm0, %v4592_v1 }
  0xb3   : > { %829 = vst.msk [vmem:[#allocation3 + $0x30] sm:$0xff] %vm790_vm0, %v4592_v1  ;;  %830 = vst.msk [vmem:[#allocation3 + $0x38] sm:$0xff] %vm790_vm0, %v4592_v1 }
  0xb4   : > { %831 = vst.msk [vmem:[#allocation3 + $0x40] sm:$0xff] %vm790_vm0, %v4592_v1  ;;  %832 = vst.msk [vmem:[#allocation3 + $0x48] sm:$0xff] %vm790_vm0, %v4592_v1 }
  0xb5   : > { %833 = vst.msk [vmem:[#allocation3 + $0x50] sm:$0xff] %vm790_vm0, %v4592_v1  ;;  %834 = vst.msk [vmem:[#allocation3 + $0x58] sm:$0xff] %vm790_vm0, %v4592_v1 }
  0xb6   : > { %835 = vst.msk [vmem:[#allocation3 + $0x60] sm:$0xff] %vm790_vm0, %v4592_v1  ;;  %836 = vst.msk [vmem:[#allocation3 + $0x68] sm:$0xff] %vm790_vm0, %v4592_v1 }
  0xb7   : > { %837 = vst.msk [vmem:[#allocation3 + $0x70] sm:$0xff] %vm790_vm0, %v4592_v1  ;;  %838 = vst.msk [vmem:[#allocation3 + $0x78] sm:$0xff] %vm790_vm0, %v4592_v1 }
  0xb8   : > { %839 = vst.msk [vmem:[#allocation3 + $0x80] sm:$0xff] %vm790_vm0, %v4592_v1  ;;  %840 = vst.msk [vmem:[#allocation3 + $0x88] sm:$0xff] %vm790_vm0, %v4592_v1 }
  0xb9   : > { %841 = vst.msk [vmem:[#allocation3 + $0x90] sm:$0xff] %vm790_vm0, %v4592_v1  ;;  %842 = vst.msk [vmem:[#allocation3 + $0x98] sm:$0xff] %vm790_vm0, %v4592_v1 }
  0xba   : > { %843 = vst.msk [vmem:[#allocation3 + $0xa0] sm:$0xff] %vm790_vm0, %v4592_v1  ;;  %844 = vst.msk [vmem:[#allocation3 + $0xa8] sm:$0xff] %vm790_vm0, %v4592_v1 }
  0xbb   : > { %845 = vst.msk [vmem:[#allocation3 + $0xb0] sm:$0xff] %vm790_vm0, %v4592_v1  ;;  %846 = vst.msk [vmem:[#allocation3 + $0xb8] sm:$0xff] %vm790_vm0, %v4592_v1 }
  0xbc   : > { %847 = vst.msk [vmem:[#allocation3 + $0xc0] sm:$0xff] %vm790_vm0, %v4592_v1  ;;  %848 = vst.msk [vmem:[#allocation3 + $0xc8] sm:$0xff] %vm790_vm0, %v4592_v1 }
  0xbd   : > { %849 = vst.msk [vmem:[#allocation3 + $0xd0] sm:$0xff] %vm790_vm0, %v4592_v1  ;;  %850 = vst.msk [vmem:[#allocation3 + $0xd8] sm:$0xff] %vm790_vm0, %v4592_v1 }
  0xbe   : > { %851 = vst.msk [vmem:[#allocation3 + $0xe0] sm:$0xff] %vm790_vm0, %v4592_v1  ;;  %852 = vst.msk [vmem:[#allocation3 + $0xe8] sm:$0xff] %vm790_vm0, %v4592_v1 }
  0xbf   : > { %853 = vst.msk [vmem:[#allocation3 + $0xf0] sm:$0xff] %vm790_vm0, %v4592_v1  ;;  %854 = vst.msk [vmem:[#allocation3 + $0xf8] sm:$0xff] %vm790_vm0, %v4592_v1 }
  0xc0   : > { %855 = vst [vmem:[#allocation4] sm:$0xff] %v4592_v1  ;;  %856 = vst [vmem:[#allocation4 + $0x8] sm:$0xff] %v4592_v1 }
  0xc1   : > { %857 = vst [vmem:[#allocation4 + $0x10] sm:$0xff] %v4592_v1  ;;  %858 = vst [vmem:[#allocation4 + $0x18] sm:$0xff] %v4592_v1 }
  0xc2   : > { %859 = vst [vmem:[#allocation4 + $0x20] sm:$0xff] %v4592_v1  ;;  %860 = vst [vmem:[#allocation4 + $0x28] sm:$0xff] %v4592_v1 }
  0xc3   : > { %861 = vst [vmem:[#allocation4 + $0x30] sm:$0xff] %v4592_v1  ;;  %862 = vst [vmem:[#allocation4 + $0x38] sm:$0xff] %v4592_v1 }
  0xc4   : > { %863 = vst [vmem:[#allocation4 + $0x40] sm:$0xff] %v4592_v1  ;;  %864 = vst [vmem:[#allocation4 + $0x48] sm:$0xff] %v4592_v1 }
  0xc5   : > { %865 = vst [vmem:[#allocation4 + $0x50] sm:$0xff] %v4592_v1  ;;  %866 = vst [vmem:[#allocation4 + $0x58] sm:$0xff] %v4592_v1 }
  0xc6   : > { %867 = vst [vmem:[#allocation4 + $0x60] sm:$0xff] %v4592_v1  ;;  %868 = vst [vmem:[#allocation4 + $0x68] sm:$0xff] %v4592_v1 }
  0xc7   : > { %869 = vst [vmem:[#allocation4 + $0x70] sm:$0xff] %v4592_v1  ;;  %870 = vst [vmem:[#allocation4 + $0x78] sm:$0xff] %v4592_v1 }
  0xc8   : > { %871 = vst [vmem:[#allocation4 + $0x80] sm:$0xff] %v4592_v1  ;;  %872 = vst [vmem:[#allocation4 + $0x88] sm:$0xff] %v4592_v1 }
  0xc9   : > { %873 = vst [vmem:[#allocation4 + $0x90] sm:$0xff] %v4592_v1  ;;  %874 = vst [vmem:[#allocation4 + $0x98] sm:$0xff] %v4592_v1 }
  0xca   : > { %875 = vst [vmem:[#allocation4 + $0xa0] sm:$0xff] %v4592_v1  ;;  %876 = vst [vmem:[#allocation4 + $0xa8] sm:$0xff] %v4592_v1 }
  0xcb   : > { %877 = vst [vmem:[#allocation4 + $0xb0] sm:$0xff] %v4592_v1  ;;  %878 = vst [vmem:[#allocation4 + $0xb8] sm:$0xff] %v4592_v1 }
  0xcc   : > { %879 = vst [vmem:[#allocation4 + $0xc0] sm:$0xff] %v4592_v1  ;;  %880 = vst [vmem:[#allocation4 + $0xc8] sm:$0xff] %v4592_v1 }
  0xcd   : > { %881 = vst [vmem:[#allocation4 + $0xd0] sm:$0xff] %v4592_v1  ;;  %882 = vst [vmem:[#allocation4 + $0xd8] sm:$0xff] %v4592_v1 }
  0xce   : > { %883 = vst [vmem:[#allocation4 + $0xe0] sm:$0xff] %v4592_v1  ;;  %884 = vst [vmem:[#allocation4 + $0xe8] sm:$0xff] %v4592_v1 }
  0xcf   : > { %885 = vst [vmem:[#allocation4 + $0xf0] sm:$0xff] %v4592_v1  ;;  %886 = vst [vmem:[#allocation4 + $0xf8] sm:$0xff] %v4592_v1 }
  0xd0 PF: > { %s6989_s2 = sld [smem:[#allocation10_spill]]  ;;  %s6990_s13 = sld [smem:[#allocation9_spill]] }
  0xd6   : > { %s3656_s9 = sshll.u32 %s6989_s2, 7  ;;  %s3657_s11 = sshll.u32 %s6990_s13, 7 }
  0xd7   : > { %s889_s16 = sadd.s32 127, %s3656_s9 }
  0xd8   : > { %p3658_p12 = scmp.gt.s32.totalorder %s3657_s11, %s889_s16 }
  0xda   : > { %893 = sbr.rel (%p3658_p12) target bundleno = 1736 (0x6c8), region = 155 }
  0xe1   : > { %v5105_v2 = vld [vmem:[%s4963_s7] sm:$0xff]  ;;  %v5108_v3 = vld [vmem:[%s4963_s7 + $0x10] sm:$0xff]  ;;  %s4593_s30 = smov 64   ;;  %v5115_v4 = vld [vmem:[%s4963_s7 + $0x8] sm:$0xff] }
  0xe2   : > { %958 = vrot.lane.b32.xlu0 %v5105_v2, %s4593_s30  ;;  %962 = vrot.lane.b32.xlu1 %v5108_v3, %s4593_s30  ;;  %v5118_v5 = vld [vmem:[%s4963_s7 + $0x18] sm:$0xff]  ;;  %v5125_v6 = vld [vmem:[%s4963_s7 + $0x28] sm:$0xff] }
  0xe3   : > { %v5128_v7 = vld [vmem:[%s4963_s7 + $0x20] sm:$0xff]  ;;  %v5135_v8 = vld [vmem:[%s4963_s7 + $0x38] sm:$0xff]  ;;  %v5138_v9 = vld [vmem:[%s4963_s7 + $0x30] sm:$0xff] }
  0xe4   : > { %v5145_v10 = vld [vmem:[%s4963_s7 + $0x48] sm:$0xff]  ;;  %v5148_v11 = vld [vmem:[%s4963_s7 + $0x40] sm:$0xff]  ;;  %v5155_v12 = vld [vmem:[%s4963_s7 + $0x58] sm:$0xff] }
  0xe5   : > { %v5158_v13 = vld [vmem:[%s4963_s7 + $0x50] sm:$0xff]  ;;  %v910_v14 = vld [vmem:[%s4965_s0] sm:$0xff]  ;;  %v5166_v15 = vld [vmem:[%s4963_s7 + $0x68] sm:$0xff] }
  0xe6   : > { %960 = vrot.lane.b32.xlu0 %v5115_v4, %s4593_s30  ;;  %964 = vrot.lane.b32.xlu1 %v5118_v5, %s4593_s30  ;;  %v5169_v16 = vld [vmem:[%s4963_s7 + $0x60] sm:$0xff]  ;;  %v911_v17 = vld [vmem:[%s4965_s0 + $0x8] sm:$0xff] }
  0xe7   : > { %v5172_v18 = vpack.c.bf16 %v911_v17, %v910_v14  ;;  %v912_v19 = vld [vmem:[%s4965_s0 + $0x10] sm:$0xff]  ;;  %v913_v20 = vld [vmem:[%s4965_s0 + $0x18] sm:$0xff]  ;;  %v914_v22 = vld [vmem:[%s4965_s0 + $0x20] sm:$0xff] }
  0xe8   : > { %v5180_v21 = vpack.c.bf16 %v913_v20, %v912_v19  ;;  %v915_v23 = vld [vmem:[%s4965_s0 + $0x28] sm:$0xff]  ;;  %v5185_v24 = vld [vmem:[%s4963_s7 + $0x78] sm:$0xff]  ;;  %v5188_v25 = vld [vmem:[%s4963_s7 + $0x70] sm:$0xff] }
  0xe9   : > { %4055 = vmatprep.subr.bf16.mxu1 %v5172_v18  ;;  %v5193_v26 = vpack.c.bf16 %v915_v23, %v914_v22  ;;  %v916_v27 = vld [vmem:[%s4965_s0 + $0x30] sm:$0xff]  ;;  %v917_v28 = vld [vmem:[%s4965_s0 + $0x38] sm:$0xff]  ;;  %v5202_v29 = vld [vmem:[%s4961_s3] sm:$0xff] }
  0xea   : > { %968 = vrot.lane.b32.xlu1 %v5125_v6, %s4593_s30  ;;  %966 = vrot.lane.b32.xlu0 %v5128_v7, %s4593_s30  ;;  %v5205_v30 = vld [vmem:[%s4961_s3 + $0x10] sm:$0xff]  ;;  %v5209_v31 = vpack.c.bf16 %v917_v28, %v916_v27  ;;  %v918_v32 = vld [vmem:[%s4965_s0 + $0x40] sm:$0xff] }
  0xeb   : > { %4057 = vmatpush3.bf16.msra.mxu1 %v5172_v18  ;;  %v919_v33 = vld [vmem:[%s4965_s0 + $0x48] sm:$0xff]  ;;  %v5218_v34 = vld [vmem:[%s4961_s3 + $0x20] sm:$0xff]  ;;  %v5221_v35 = vld [vmem:[%s4961_s3 + $0x30] sm:$0xff] }
  0xec   : > { %4059 = vmatprep.subr.bf16.mxu1 %v5180_v21  ;;  %v5225_v36 = vpack.c.bf16 %v919_v33, %v918_v32  ;;  %v920_v37 = vld [vmem:[%s4965_s0 + $0x50] sm:$0xff]  ;;  %v921_v38 = vld [vmem:[%s4965_s0 + $0x58] sm:$0xff]  ;;  %v5234_v39 = vld [vmem:[%s4961_s3 + $0x40] sm:$0xff] }
  0xed   : > { %v5237_v40 = vld [vmem:[%s4961_s3 + $0x50] sm:$0xff]  ;;  %v5241_v41 = vpack.c.bf16 %v921_v38, %v920_v37  ;;  %v922_v42 = vld [vmem:[%s4965_s0 + $0x60] sm:$0xff]  ;;  %v923_v43 = vld [vmem:[%s4965_s0 + $0x68] sm:$0xff] }
  0xee   : > { %972 = vrot.lane.b32.xlu1 %v5135_v8, %s4593_s30  ;;  %970 = vrot.lane.b32.xlu0 %v5138_v9, %s4593_s30  ;;  %v5250_v44 = vld [vmem:[%s4961_s3 + $0x60] sm:$0xff]  ;;  %v5253_v45 = vld [vmem:[%s4961_s3 + $0x70] sm:$0xff]  ;;  %v5257_v46 = vpack.c.bf16 %v923_v43, %v922_v42 }
  0xef   : > { %4061 = vmatpush3.bf16.msra.mxu1 %v5180_v21  ;;  %v924_v47 = vld [vmem:[%s4965_s0 + $0x70] sm:$0xff]  ;;  %v925_v48 = vld [vmem:[%s4965_s0 + $0x78] sm:$0xff]  ;;  %v5266_v49 = vld [vmem:[%s4961_s3 + $0x80] sm:$0xff] }
  0xf0   : > { %4063 = vmatprep.subr.bf16.mxu1 %v5193_v26  ;;  %v5269_v50 = vld [vmem:[%s4961_s3 + $0x90] sm:$0xff]  ;;  %v5273_v51 = vpack.c.bf16 %v925_v48, %v924_v47  ;;  %v5280_v52 = vld [vmem:[%s4961_s3 + $0xa0] sm:$0xff]  ;;  %v927_v61 = vld [vmem:[%s4954_s14 + $0x8] sm:$0xff] }
  0xf1   : > { %v5283_v53 = vld [vmem:[%s4961_s3 + $0xb0] sm:$0xff]  ;;  %v5292_v54 = vld [vmem:[%s4961_s3 + $0xc0] sm:$0xff]  ;;  %v929_v62 = vld [vmem:[%s4954_s14 + $0x18] sm:$0xff]  ;;  %v991_v23 = vmul.f32 %v927_v61, %v5115_v4 }
  0xf2   : > { %976 = vrot.lane.b32.xlu1 %v5145_v10, %s4593_s30  ;;  %974 = vrot.lane.b32.xlu0 %v5148_v11, %s4593_s30  ;;  %v5295_v55 = vld [vmem:[%s4961_s3 + $0xd0] sm:$0xff]  ;;  %v5303_v56 = vld [vmem:[%s4961_s3 + $0xe0] sm:$0xff]  ;;  %v993_v27 = vmul.f32 %v929_v62, %v5118_v5 }
  0xf3   : > { %4065 = vmatpush3.bf16.msra.mxu1 %v5193_v26  ;;  %v5306_v57 = vld [vmem:[%s4961_s3 + $0xf0] sm:$0xff]  ;;  %v926_v60 = vld [vmem:[%s4954_s14] sm:$0xff]  ;;  %v943_v19 = vld [vmem:[%s4959_s4 + $0x8] sm:$0xff] }
  0xf4   : > { %4067 = vmatprep.subr.bf16.mxu1 %v5209_v31  ;;  %v928_v58 = vld [vmem:[%s4954_s14 + $0x10] sm:$0xff]  ;;  %v942_v63 = vld [vmem:[%s4959_s4] sm:$0xff]  ;;  %v945_v20 = vld [vmem:[%s4959_s4 + $0x18] sm:$0xff]  ;;  %v990_v22 = vmul.f32 %v926_v60, %v5105_v2 }
  0xf5   : > { %v944_v59 = vld [vmem:[%s4959_s4 + $0x10] sm:$0xff]  ;;  %v992_v14 = vmul.f32 %v928_v58, %v5108_v3  ;;  %v931_v28 = vld [vmem:[%s4954_s14 + $0x28] sm:$0xff]  ;;  %v930_v33 = vld [vmem:[%s4954_s14 + $0x20] sm:$0xff] }
  0xf6   : > { %980 = vrot.lane.b32.xlu1 %v5155_v12, %s4593_s30  ;;  %978 = vrot.lane.b32.xlu0 %v5158_v13, %s4593_s30  ;;  %v995_v47 = vmul.f32 %v931_v28, %v5125_v6  ;;  %v947_v48 = vld [vmem:[%s4959_s4 + $0x28] sm:$0xff]  ;;  %v946_v58 = vld [vmem:[%s4959_s4 + $0x20] sm:$0xff]  ;;  %v994_v2 = vmul.f32 %v930_v33, %v5128_v7 }
  0xf7   : > { %4069 = vmatpush3.bf16.msra.mxu1 %v5209_v31  ;;  %v933_v4 = vld [vmem:[%s4954_s14 + $0x38] sm:$0xff]  ;;  %v932_v61 = vld [vmem:[%s4954_s14 + $0x30] sm:$0xff]  ;;  %v934_v28 = vld [vmem:[%s4954_s14 + $0x40] sm:$0xff] }
  0xf8   : > { %4071 = vmatprep.subr.bf16.mxu1 %v5225_v36  ;;  %v948_v7 = vld [vmem:[%s4959_s4 + $0x30] sm:$0xff] }
  0xfa   : > { %984 = vrot.lane.b32.xlu1 %v5166_v15, %s4593_s30  ;;  %982 = vrot.lane.b32.xlu0 %v5169_v16, %s4593_s30 }
  0xfb   : > { %4073 = vmatpush3.bf16.msra.mxu1 %v5225_v36 }
  0xfc   : > { %4075 = vmatprep.subr.bf16.mxu1 %v5241_v41 }
  0xfe   : > { %988 = vrot.lane.b32.xlu1 %v5185_v24, %s4593_s30  ;;  %986 = vrot.lane.b32.xlu0 %v5188_v25, %s4593_s30 }
  0xff   : > { %4077 = vmatpush3.bf16.msra.mxu1 %v5241_v41 }
 0x100   : > { %4079 = vmatprep.subr.bf16.mxu1 %v5257_v46 }
 0x102   : > { %1140 = vrot.lane.b32.xlu0 %v5202_v29, %s4593_s30  ;;  %1142 = vrot.lane.b32.xlu1 %v5205_v30, %s4593_s30 }
 0x103   : > { %4081 = vmatpush3.bf16.msra.mxu1 %v5257_v46 }
 0x104   : > { %4083 = vmatprep.subr.bf16.mxu1 %v5273_v51 }
 0x106   : > { %1144 = vrot.lane.b32.xlu0 %v5218_v34, %s4593_s30  ;;  %1146 = vrot.lane.b32.xlu1 %v5221_v35, %s4593_s30 }
 0x107   : > { %4085 = vmatpush3.bf16.msra.mxu1 %v5273_v51 }
 0x10a   : > { %1148 = vrot.lane.b32.xlu0 %v5234_v39, %s4593_s30  ;;  %1150 = vrot.lane.b32.xlu1 %v5237_v40, %s4593_s30 }
 0x10e   : > { %1152 = vrot.lane.b32.xlu0 %v5250_v44, %s4593_s30  ;;  %1154 = vrot.lane.b32.xlu1 %v5253_v45, %s4593_s30 }
 0x112   : > { %1156 = vrot.lane.b32.xlu0 %v5266_v49, %s4593_s30  ;;  %1158 = vrot.lane.b32.xlu1 %v5269_v50, %s4593_s30 }
 0x116   : > { %1160 = vrot.lane.b32.xlu0 %v5280_v52, %s4593_s30  ;;  %1162 = vrot.lane.b32.xlu1 %v5283_v53, %s4593_s30 }
 0x11a   : > { %1164 = vrot.lane.b32.xlu0 %v5292_v54, %s4593_s30  ;;  %1166 = vrot.lane.b32.xlu1 %v5295_v55, %s4593_s30 }
 0x11e   : > { %1168 = vrot.lane.b32.xlu0 %v5303_v56, %s4593_s30  ;;  %1170 = vrot.lane.b32.xlu1 %v5306_v57, %s4593_s30 }
 0x154   : > { %v959_v0 = vpop.permute.xlu0 %958  ;;  %v963_v1 = vpop.permute.xlu1 %962 }
 0x155   : > { %v1008_v17 = vmul.f32 %v963_v1, %v944_v59  ;;  %v1006_v32 = vmul.f32 %v959_v0, %v942_v63 }
 0x157   : > { %v1024_v42 = vadd.f32 %v1008_v17, %v992_v14  ;;  %v1022_v59 = vadd.f32 %v1006_v32, %v990_v22  ;;  %v997_v17 = vmul.f32 %v933_v4, %v5135_v8 }
 0x158   : > { %v961_v37 = vpop.permute.xlu0 %960  ;;  %v965_v38 = vpop.permute.xlu1 %964 }
 0x159   : > { %v1007_v3 = vmul.f32 %v961_v37, %v943_v19  ;;  %v1009_v43 = vmul.f32 %v965_v38, %v945_v20  ;;  %v949_v19 = vld [vmem:[%s4959_s4 + $0x38] sm:$0xff]  ;;  %v996_v20 = vmul.f32 %v932_v61, %v5138_v9  ;;  %v951_v38 = vld [vmem:[%s4959_s4 + $0x48] sm:$0xff] }
 0x15b   : > { %v1023_v5 = vadd.f32 %v1007_v3, %v991_v23  ;;  %v1025_v60 = vadd.f32 %v1009_v43, %v993_v27  ;;  %v935_v27 = vld [vmem:[%s4954_s14 + $0x48] sm:$0xff]  ;;  %v998_v43 = vmul.f32 %v934_v28, %v5148_v11 }
 0x15c   : > { %v969_v62 = vpop.permute.xlu1 %968  ;;  %v967_v63 = vpop.permute.xlu0 %966  ;;  %v999_v3 = vmul.f32 %v935_v27, %v5145_v10  ;;  %v955_v27 = vld [vmem:[%s4959_s4 + $0x68] sm:$0xff] }
 0x15d   : > { %v5332_v0 = vpack.c.bf16 %v1023_v5, %v1022_v59  ;;  %v5334_v1 = vpack.c.bf16 %v1025_v60, %v1024_v42  ;;  %v1011_v6 = vmul.f32 %v969_v62, %v947_v48  ;;  %v1010_v14 = vmul.f32 %v967_v63, %v946_v58  ;;  %v950_v42 = vld [vmem:[%s4959_s4 + $0x40] sm:$0xff]  ;;  %v937_v58 = vld [vmem:[%s4954_s14 + $0x58] sm:$0xff]  ;;  %v952_v63 = vld [vmem:[%s4959_s4 + $0x50] sm:$0xff] }
 0x15e   : > { %v953_v62 = vld [vmem:[%s4959_s4 + $0x58] sm:$0xff]  ;;  %v1001_v10 = vmul.f32 %v937_v58, %v5155_v12 }
 0x15f   : > { %4023 = vmatprep.subr.bf16.mxu0 %v5332_v0  ;;  %4087 = vmatprep.subr.bf16.mxu1 %v5332_v0  ;;  %v1027_v22 = vadd.f32 %v1011_v6, %v995_v47  ;;  %v1026_v23 = vadd.f32 %v1010_v14, %v994_v2  ;;  %v936_v2 = vld [vmem:[%s4954_s14 + $0x50] sm:$0xff]  ;;  %v957_v58 = vld [vmem:[%s4959_s4 + $0x78] sm:$0xff] }
 0x160   : > { %4025 = vmatpush3.bf16.xpose.msra.mxu0 %v5332_v0  ;;  %v973_v32 = vpop.permute.xlu1 %972  ;;  %v971_v8 = vpop.permute.xlu0 %970  ;;  %v1000_v11 = vmul.f32 %v936_v2, %v5158_v13  ;;  %v954_v13 = vld [vmem:[%s4959_s4 + $0x60] sm:$0xff]  ;;  %v956_v2 = vld [vmem:[%s4959_s4 + $0x70] sm:$0xff] }
 0x161   : > { %4027 = vmatprep.subr.bf16.mxu0 %v5334_v1  ;;  %v5346_v33 = vpack.c.bf16 %v1027_v22, %v1026_v23  ;;  %v1013_v9 = vmul.f32 %v973_v32, %v949_v19  ;;  %v1012_v37 = vmul.f32 %v971_v8, %v948_v7  ;;  %v938_v19 = vld [vmem:[%s4954_s14 + $0x60] sm:$0xff] }
 0x162   : > { %v1002_v32 = vmul.f32 %v938_v19, %v5169_v16 }
 0x163   : > { %v1029_v47 = vadd.f32 %v1013_v9, %v997_v17  ;;  %v1028_v48 = vadd.f32 %v1012_v37, %v996_v20  ;;  %v939_v17 = vld [vmem:[%s4954_s14 + $0x68] sm:$0xff]  ;;  %v941_v37 = vld [vmem:[%s4954_s14 + $0x78] sm:$0xff] }
 0x164   : > { %v977_v4 = vpop.permute.xlu1 %976  ;;  %v975_v59 = vpop.permute.xlu0 %974  ;;  %v1003_v28 = vmul.f32 %v939_v17, %v5166_v15 }
 0x165   : > { %v5354_v5 = vpack.c.bf16 %v1029_v47, %v1028_v48  ;;  %v1015_v60 = vmul.f32 %v977_v4, %v951_v38  ;;  %v1014_v61 = vmul.f32 %v975_v59, %v950_v42  ;;  %v940_v38 = vld [vmem:[%s4954_s14 + $0x70] sm:$0xff]  ;;  %v1005_v4 = vmul.f32 %v941_v37, %v5185_v24 }
 0x166   : > { %v1004_v15 = vmul.f32 %v940_v38, %v5188_v25 }
 0x167   : > { %v1031_v6 = vadd.f32 %v1015_v60, %v999_v3  ;;  %v1030_v14 = vadd.f32 %v1014_v61, %v998_v43 }
 0x168   : > { %4029 = vmatpush3.bf16.xpose.msra.mxu0 %v5334_v1  ;;  %v981_v7 = vpop.permute.xlu1 %980  ;;  %v979_v20 = vpop.permute.xlu0 %978 }
 0x169   : > { %4031 = vmatprep.subr.bf16.mxu0 %v5346_v33  ;;  %v5364_v22 = vpack.c.bf16 %v1031_v6, %v1030_v14  ;;  %v1017_v23 = vmul.f32 %v981_v7, %v953_v62  ;;  %v1016_v12 = vmul.f32 %v979_v20, %v952_v63  ;;  %v5380_v62 = vld [vmem:[%s4944_s21] sm:$0xff] }
 0x16a   : > { %v5386_v6 = vld [vmem:[%s4949_s28] sm:$0xff]  ;;  %v1172_v25 = vmul.f32 %v5380_v62, %v5202_v29 }
 0x16b   : > { %v1033_v8 = vadd.f32 %v1017_v23, %v1001_v10  ;;  %v1032_v9 = vadd.f32 %v1016_v12, %v1000_v11 }
 0x16c   : > { %v985_v42 = vpop.permute.xlu1 %984  ;;  %v983_v3 = vpop.permute.xlu0 %982 }
 0x16d   : > { %v5372_v43 = vpack.c.bf16 %v1033_v8, %v1032_v9  ;;  %v1019_v47 = vmul.f32 %v985_v42, %v955_v27  ;;  %v1018_v48 = vmul.f32 %v983_v3, %v954_v13  ;;  %v1110_v8 = vld [vmem:[%s4944_s21 + $0x10] sm:$0xff] }
 0x16e   : > { %v5407_v9 = vld [vmem:[%s4949_s28 + $0x10] sm:$0xff]  ;;  %v1174_v3 = vmul.f32 %v1110_v8, %v5218_v34 }
 0x16f   : > { %v1035_v59 = vadd.f32 %v1019_v47, %v1003_v28  ;;  %v1034_v16 = vadd.f32 %v1018_v48, %v1002_v32  ;;  %v1109_v28 = vld [vmem:[%s4944_s21 + $0x8] sm:$0xff]  ;;  %v1111_v47 = vld [vmem:[%s4944_s21 + $0x18] sm:$0xff] }
 0x170   : > { %4033 = vmatpush3.bf16.xpose.msra.mxu0 %v5346_v33  ;;  %v989_v60 = vpop.permute.xlu1 %988  ;;  %v987_v61 = vpop.permute.xlu0 %986  ;;  %v5403_v32 = vld [vmem:[%s4949_s28 + $0x8] sm:$0xff]  ;;  %v1173_v38 = vmul.f32 %v1109_v28, %v5205_v30  ;;  %v1175_v30 = vmul.f32 %v1111_v47, %v5221_v35  ;;  %v1116_v28 = vld [vmem:[%s4944_s21 + $0x40] sm:$0xff] }
 0x171   : > { %4035 = vmatprep.subr.bf16.mxu0 %v5354_v5  ;;  %v5383_v63 = vpack.c.bf16 %v1035_v59, %v1034_v16  ;;  %v1021_v10 = vmul.f32 %v989_v60, %v957_v58  ;;  %v1020_v11 = vmul.f32 %v987_v61, %v956_v2  ;;  %v5416_v58 = vld [vmem:[%s4949_s28 + $0x18] sm:$0xff]  ;;  %v1113_v61 = vld [vmem:[%s4944_s21 + $0x28] sm:$0xff] }
 0x172   : > { %v5455_v47 = vld [vmem:[%s4949_s28 + $0x48] sm:$0xff] }
 0x173   : > { %v1037_v14 = vadd.f32 %v1021_v10, %v1005_v4  ;;  %v1036_v24 = vadd.f32 %v1020_v11, %v1004_v15  ;;  %v1112_v4 = vld [vmem:[%s4944_s21 + $0x20] sm:$0xff] }
 0x174   : > { %v1141_v17 = vpop.permute.xlu0 %1140  ;;  %v1143_v29 = vpop.permute.xlu1 %1142  ;;  %v5420_v15 = vld [vmem:[%s4949_s28 + $0x20] sm:$0xff]  ;;  %v1176_v60 = vmul.f32 %v1112_v4, %v5234_v39  ;;  %v5460_v4 = vld [vmem:[%s4949_s28 + $0x50] sm:$0xff] }
 0x175   : > { %v5390_v19 = vpack.c.bf16 %v1037_v14, %v1036_v24  ;;  %v1188_v7 = vmul.f32 %v1141_v17, %v5386_v6  ;;  %v1189_v42 = vmul.f32 %v1143_v29, %v5403_v32  ;;  %v5429_v14 = vld [vmem:[%s4949_s28 + $0x28] sm:$0xff]  ;;  %v1114_v24 = vld [vmem:[%s4944_s21 + $0x30] sm:$0xff]  ;;  %v1177_v17 = vmul.f32 %v1113_v61, %v5237_v40  ;;  %v1115_v29 = vld [vmem:[%s4944_s21 + $0x38] sm:$0xff] }
 0x176   : > { %v1178_v39 = vmul.f32 %v1114_v24, %v5250_v44  ;;  %v5446_v40 = vld [vmem:[%s4949_s28 + $0x40] sm:$0xff]  ;;  %v1179_v44 = vmul.f32 %v1115_v29, %v5253_v45  ;;  %v1118_v45 = vld [vmem:[%s4944_s21 + $0x50] sm:$0xff]  ;;  %v5469_v61 = vld [vmem:[%s4949_s28 + $0x58] sm:$0xff] }
 0x177   : > { %v1204_v20 = vadd.f32 %v1188_v7, %v1172_v25  ;;  %v1205_v59 = vadd.f32 %v1189_v42, %v1173_v38  ;;  %v5433_v25 = vld [vmem:[%s4949_s28 + $0x30] sm:$0xff]  ;;  %v1117_v42 = vld [vmem:[%s4944_s21 + $0x48] sm:$0xff] }
 0x178   : > { %4037 = vmatpush3.bf16.xpose.msra.mxu0 %v5354_v5  ;;  %v1145_v23 = vpop.permute.xlu0 %1144  ;;  %v1147_v12 = vpop.permute.xlu1 %1146  ;;  %v1122_v29 = vld [vmem:[%s4944_s21 + $0x70] sm:$0xff] }
 0x179   : > { %4039 = vmatprep.subr.bf16.mxu0 %v5364_v22  ;;  %3830 = vmatprep.mubr.f32.mxu0 %v1204_v20  ;;  %v1190_v48 = vmul.f32 %v1145_v23, %v5407_v9  ;;  %v1191_v34 = vmul.f32 %v1147_v12, %v5416_v58 }
 0x17b   : > { %v1206_v10 = vadd.f32 %v1190_v48, %v1174_v3  ;;  %v1207_v7 = vadd.f32 %v1191_v34, %v1175_v30  ;;  %v1182_v34 = vmul.f32 %v1118_v45, %v5280_v52 }
 0x17c   : > { %v1149_v27 = vpop.permute.xlu0 %1148  ;;  %v1151_v13 = vpop.permute.xlu1 %1150 }
 0x17d   : > { %v1192_v11 = vmul.f32 %v1149_v27, %v5420_v15  ;;  %v1193_v20 = vmul.f32 %v1151_v13, %v5429_v14  ;;  %v5441_v27 = vld [vmem:[%s4949_s28 + $0x38] sm:$0xff] }
 0x17f   : > { %v1208_v23 = vadd.f32 %v1192_v11, %v1176_v60  ;;  %v1209_v13 = vadd.f32 %v1193_v20, %v1177_v17 }
 0x180   : > { %4041 = vmatpush3.bf16.xpose.msra.mxu0 %v5364_v22  ;;  %v1153_v37 = vpop.permute.xlu0 %1152  ;;  %v1155_v2 = vpop.permute.xlu1 %1154 }
 0x181   : > { %4043 = vmatprep.subr.bf16.mxu0 %v5372_v43  ;;  %v1194_v12 = vmul.f32 %v1153_v37, %v5433_v25  ;;  %v1195_v38 = vmul.f32 %v1155_v2, %v5441_v27  ;;  %v1180_v37 = vmul.f32 %v1116_v28, %v5266_v49  ;;  %v1181_v49 = vmul.f32 %v1117_v42, %v5269_v50  ;;  %v1120_v50 = vld [vmem:[%s4944_s21 + $0x60] sm:$0xff] }
 0x182   : > { %v1184_v17 = vmul.f32 %v1120_v50, %v5292_v54 }
 0x183   : > { %v1210_v3 = vadd.f32 %v1194_v12, %v1178_v39  ;;  %v1211_v2 = vadd.f32 %v1195_v38, %v1179_v44  ;;  %v5483_v39 = vld [vmem:[%s4949_s28 + $0x68] sm:$0xff]  ;;  %v1123_v44 = vld [vmem:[%s4944_s21 + $0x78] sm:$0xff] }
 0x184   : > { %v1157_v16 = vpop.permute.xlu0 %1156  ;;  %v1159_v35 = vpop.permute.xlu1 %1158  ;;  %6992 = vst [vmem:[#allocation22_spill] sm:$0xff] %v5483_v39 }
 0x185   : > { %v1197_v30 = vmul.f32 %v1159_v35, %v5455_v47 }
 0x187   : > { %v1213_v24 = vadd.f32 %v1197_v30, %v1181_v49  ;;  %v1074_v49 = vstv %s3657_s11 }
 0x188   : > { %4045 = vmatpush3.bf16.xpose.msra.mxu0 %v5372_v43  ;;  %v1161_v8 = vpop.permute.xlu0 %1160  ;;  %v1163_v48 = vpop.permute.xlu1 %1162 }
 0x189   : > { %4047 = vmatprep.subr.bf16.mxu0 %v5383_v63  ;;  %v1199_v35 = vmul.f32 %v1163_v48, %v5469_v61 }
 0x18c   : > { %v1167_v11 = vpop.permute.xlu1 %1166 }
 0x18d   : > { %v1201_v28 = vmul.f32 %v1167_v11, %v5483_v39 }
 0x190   : > { %4049 = vmatpush3.bf16.xpose.msra.mxu0 %v5383_v63 }
 0x191   : > { %4051 = vmatprep.subr.bf16.mxu0 %v5390_v19 }
 0x198   : > { %4053 = vmatpush3.bf16.xpose.msra.mxu0 %v5390_v19 }
 0x199   : > { %4119 = vmatprep.subr.bf16.mxu0 %v5172_v18 }
 0x19f   : > { %3831 = vmatmul.mubr.f32.vlgmr.msra.gmra.mrb[0].mxu0 %v1205_v59  ;;  %v1165_v59 = vpop.permute.xlu0 %1164 }
 0x1a0   : > { %3833 = vmatprep.mubr.f32.mxu0 %v1206_v10  ;;  %4121 = vmatpush3.bf16.msra.mxu0 %v5172_v18  ;;  %v1196_v18 = vmul.f32 %v1157_v16, %v5446_v40  ;;  %v1119_v16 = vld [vmem:[%s4944_s21 + $0x58] sm:$0xff]  ;;  %v5474_v10 = vld [vmem:[%s4949_s28 + $0x60] sm:$0xff] }
 0x1a1   : > { %4123 = vmatprep.subr.bf16.mxu0 %v5180_v21  ;;  %6991 = vst [vmem:[#allocation21_spill] sm:$0xff] %v5474_v10  ;;  %v1183_v52 = vmul.f32 %v1119_v16, %v5283_v53 }
 0x1a2   : > { %v1212_v60 = vadd.f32 %v1196_v18, %v1180_v37  ;;  %v1171_v37 = vpop.permute.xlu1 %1170 }
 0x1a3   : > { %3834 = vmatmul.mubr.f32.gmra.mrb[2].mxu0 %v1207_v7  ;;  %v1121_v7 = vld [vmem:[%s4944_s21 + $0x68] sm:$0xff]  ;;  %v1169_v53 = vpop.permute.xlu0 %1168  ;;  %v1215_v54 = vadd.f32 %v1199_v35, %v1183_v52 }
 0x1a4   : > { %3836 = vmatprep.mubr.f32.mxu0 %v1208_v23  ;;  %4125 = vmatpush3.bf16.msra.mxu0 %v5180_v21  ;;  %v1198_v21 = vmul.f32 %v1161_v8, %v5460_v4  ;;  %v5488_v23 = vld [vmem:[%s4949_s28 + $0x70] sm:$0xff]  ;;  %v1185_v12 = vmul.f32 %v1121_v7, %v5295_v55  ;;  %v1186_v8 = vmul.f32 %v1122_v29, %v5303_v56 }
 0x1a5   : > { %4127 = vmatprep.subr.bf16.mxu0 %v5193_v26  ;;  %6993 = vst [vmem:[#allocation23_spill] sm:$0xff] %v5488_v23  ;;  %v1202_v38 = vmul.f32 %v1169_v53, %v5488_v23  ;;  %v1187_v55 = vmul.f32 %v1123_v44, %v5306_v57 }
 0x1a6   : > { %v1214_v20 = vadd.f32 %v1198_v21, %v1182_v34  ;;  %v1217_v42 = vadd.f32 %v1201_v28, %v1185_v12 }
 0x1a7   : > { %3837 = vmatmul.mubr.f32.gmra.mrb[4].mxu0 %v1209_v13  ;;  %v1218_v56 = vadd.f32 %v1202_v38, %v1186_v8 }
 0x1a8   : > { %3839 = vmatprep.mubr.f32.mxu0 %v1210_v3  ;;  %4129 = vmatpush3.bf16.msra.mxu0 %v5193_v26  ;;  %v1200_v26 = vmul.f32 %v1165_v59, %v5474_v10 }
 0x1a9   : > { %4131 = vmatprep.subr.bf16.mxu0 %v5209_v31 }
 0x1aa   : > { %v1216_v13 = vadd.f32 %v1200_v26, %v1184_v17 }
 0x1ab   : > { %3840 = vmatmul.mubr.f32.gmra.mrb[6].mxu0 %v1211_v2 }
 0x1ac   : > { %3842 = vmatprep.mubr.f32.mxu0 %v1212_v60  ;;  %4133 = vmatpush3.bf16.msra.mxu0 %v5209_v31  ;;  %v5497_v31 = vld [vmem:[%s4949_s28 + $0x78] sm:$0xff] }
 0x1ad   : > { %4135 = vmatprep.subr.bf16.mxu0 %v5225_v36  ;;  %6994 = vst [vmem:[#allocation24_spill] sm:$0xff] %v5497_v31  ;;  %v1203_v3 = vmul.f32 %v1171_v37, %v5497_v31 }
 0x1af   : > { %3843 = vmatmul.mubr.f32.gmra.mrb[8].mxu0 %v1213_v24  ;;  %v1219_v18 = vadd.f32 %v1203_v3, %v1187_v55 }
 0x1b0   : > { %3845 = vmatprep.mubr.f32.mxu0 %v1214_v20  ;;  %4137 = vmatpush3.bf16.msra.mxu0 %v5225_v36  ;;  %v1038_v36 = vlaneseq }
 0x1b1   : > { %4139 = vmatprep.subr.bf16.mxu0 %v5241_v41 }
 0x1b2   : > { %v5508_v57 = vshrl.u32 %v1038_v36, 7  ;;  %v1073_v45 = vand.u32 127, %v1038_v36 }
 0x1b3   : > { %3846 = vmatmul.mubr.f32.gmra.mrb[10].mxu0 %v1215_v54 }
 0x1b4   : > { %3848 = vmatprep.mubr.f32.mxu0 %v1216_v13  ;;  %4141 = vmatpush3.bf16.msra.mxu0 %v5241_v41  ;;  %v1040_v48 = vadd.s32 8, %v5508_v57  ;;  %v5513_v41 = vstv %s3656_s9  ;;  %v1042_v30 = vadd.s32 24, %v5508_v57  ;;  %v1041_v59 = vadd.s32 16, %v5508_v57 }
 0x1b5   : > { %4143 = vmatprep.subr.bf16.mxu0 %v5257_v46  ;;  %v1043_v50 = vadd.s32 32, %v5508_v57  ;;  %v1044_v35 = vadd.s32 40, %v5508_v57  ;;  %v1045_v53 = vadd.s32 48, %v5508_v57  ;;  %v1046_v8 = vadd.s32 56, %v5508_v57 }
 0x1b6   : > { %v5518_v2 = vadd.s32 %v5513_v41, %v1040_v48  ;;  %v5531_v16 = vadd.s32 %v5513_v41, %v1042_v30  ;;  %v5542_v24 = vadd.s32 %v5513_v41, %v1041_v59  ;;  %v1047_v37 = vadd.s32 64, %v5508_v57 }
 0x1b7   : > { %3849 = vmatmul.mubr.f32.gmra.mrb[12].mxu0 %v1217_v42  ;;  %v5555_v29 = vadd.s32 %v5513_v41, %v1043_v50  ;;  %v5566_v28 = vadd.s32 %v5513_v41, %v1044_v35  ;;  %v5573_v38 = vadd.s32 %v5513_v41, %v1045_v53  ;;  %v1049_v30 = vadd.s32 80, %v5508_v57 }
 0x1b8   : > { %3851 = vmatprep.mubr.f32.mxu0 %v1218_v56  ;;  %4145 = vmatpush3.bf16.msra.mxu0 %v5257_v46  ;;  %6997 = vst [vmem:[#allocation25_spill] sm:$0xff] %v5518_v2  ;;  %v5520_v46 = vadd.s32 %v1074_v49, %v1073_v45  ;;  %7000 = vst [vmem:[#allocation28_spill] sm:$0xff] %v5531_v16  ;;  %v5584_v56 = vadd.s32 %v5513_v41, %v1046_v8  ;;  %v1050_v50 = vadd.s32 88, %v5508_v57 }
 0x1b9   : > { %4147 = vmatprep.subr.bf16.mxu0 %v5273_v51  ;;  %7001 = vst [vmem:[#allocation29_spill] sm:$0xff] %v5542_v24  ;;  %7002 = vst [vmem:[#allocation30_spill] sm:$0xff] %v5555_v29  ;;  %v5597_v49 = vadd.s32 %v5513_v41, %v1047_v37  ;;  %v4594_v37 = vmov 0  }
 0x1ba   : > { %6998 = vst [vmem:[#allocation26_spill] sm:$0xff] %v5520_v46  ;;  %vm1077_vm1 = vcmp.le.s32.totalorder %v5520_v46, %v5518_v2  ;;  %vm1079_vm3 = vcmp.le.s32.totalorder %v5520_v46, %v5531_v16  ;;  %vm1078_vm4 = vcmp.le.s32.totalorder %v5520_v46, %v5542_v24  ;;  %7003 = vst [vmem:[#allocation31_spill] sm:$0xff] %v5566_v28  ;;  %4276 = vset.pattern.permute.xlu0 %v4594_v37 }
 0x1bb   : > { %3852 = vmatmul.mubr.f32.gmra.mrb[14].mxu0 %v1219_v18  ;;  %vm1080_vm5 = vcmp.le.s32.totalorder %v5520_v46, %v5555_v29  ;;  %7004 = vst [vmem:[#allocation32_spill] sm:$0xff] %v5573_v38  ;;  %vm1081_vm6 = vcmp.le.s32.totalorder %v5520_v46, %v5566_v28  ;;  %7005 = vst [vmem:[#allocation33_spill] sm:$0xff] %v5584_v56  ;;  %v1048_v18 = vadd.s32 72, %v5508_v57  ;;  %4275 = vset.pattern.permute.xlu1 %v4594_v37 }
 0x1bc   : > { %4149 = vmatpush3.bf16.msra.mxu0 %v5273_v51  ;;  %v5525_v51 = vadd.s32 %v5513_v41, %v5508_v57  ;;  %vm1082_vm7 = vcmp.le.s32.totalorder %v5520_v46, %v5573_v38  ;;  %7006 = vst [vmem:[#allocation34_spill] sm:$0xff] %v5597_v49  ;;  %vm1083_vm8 = vcmp.le.s32.totalorder %v5520_v46, %v5584_v56  ;;  %v5829_v56 = vld [vmem:[#allocation2 + $0x68] sm:$0xff]  ;;  %v5946_v38 = vld [vmem:[%s4961_s3 + $0xf8] sm:$0xff] }
 0x1bd   : > { %vm1084_vm9 = vcmp.le.s32.totalorder %v5520_v46, %v5597_v49  ;;  %7041 = vst [vmem:[#allocation69_spill] sm:$0xff] %v5829_v56 }
 0x1be   : > { %6999 = vst [vmem:[#allocation27_spill] sm:$0xff] %v5525_v51  ;;  %vm1076_vm2 = vcmp.le.s32.totalorder %v5520_v46, %v5525_v51 }
 0x272   : > { %v3832_v34 = vpop.f32.mrb[0].mxu0 }
 0x273   : > { %v1366_v60 = vmul.f32 0.088388346, %v3832_v34  ;;  %v1286_v21 = vpop.f32.mrb[1].mxu0 }
 0x274   : > { %v1365_v11 = vmul.f32 0.088388346, %v1286_v21  ;;  %v5608_v21 = vadd.s32 %v5513_v41, %v1048_v18 }
 0x275   : > { %v5539_v52 = vsel %vm1077_vm1, %v1366_v60, -inf }
 0x276   : > { %1415 = vmax.xlane.f32.xlu1 %v5539_v52  ;;  %v5549_v17 = vsel %vm1076_vm2, %v1365_v11, -inf  ;;  %v3835_v7 = vpop.f32.mrb[2].mxu0  ;;  %7007 = vst [vmem:[#allocation35_spill] sm:$0xff] %v5608_v21  ;;  %vm1085_vm10 = vcmp.le.s32.totalorder %v5520_v46, %v5608_v21 }
 0x277   : > { %1413 = vmax.xlane.f32.xlu0 %v5549_v17  ;;  %v1368_v20 = vmul.f32 0.088388346, %v3835_v7  ;;  %v1296_v26 = vpop.f32.mrb[3].mxu0 }
 0x278   : > { %v1367_v12 = vmul.f32 0.088388346, %v1296_v26  ;;  %v1051_v26 = vadd.s32 96, %v5508_v57 }
 0x279   : > { %v5561_v54 = vsel %vm1079_vm3, %v1368_v20, -inf  ;;  %v5621_v20 = vadd.s32 %v5513_v41, %v1049_v30 }
 0x27a   : > { %v3838_v44 = vpop.f32.mrb[4].mxu0  ;;  %v5579_v3 = vsel %vm1078_vm4, %v1367_v12, -inf }
 0x27b   : > { %1419 = vmax.xlane.f32.xlu0 %v5561_v54  ;;  %v1306_v13 = vpop.f32.mrb[5].mxu0  ;;  %v1370_v55 = vmul.f32 0.088388346, %v3838_v44  ;;  %7008 = vst [vmem:[#allocation36_spill] sm:$0xff] %v5621_v20  ;;  %v5632_v44 = vadd.s32 %v5513_v41, %v1050_v50  ;;  %vm1086_vm11 = vcmp.le.s32.totalorder %v5520_v46, %v5621_v20 }
 0x27c   : > { %v1369_v42 = vmul.f32 0.088388346, %v1306_v13  ;;  %v1052_v13 = vadd.s32 104, %v5508_v57 }
 0x27d   : > { %v5603_v60 = vsel %vm1081_vm6, %v1370_v55, -inf  ;;  %7009 = vst [vmem:[#allocation37_spill] sm:$0xff] %v5632_v44  ;;  %vm1087_vm12 = vcmp.le.s32.totalorder %v5520_v46, %v5632_v44  ;;  %v5752_v44 = vld [vmem:[#allocation2 + $0x30] sm:$0xff] }
 0x27e   : > { %v3841_v36 = vpop.f32.mrb[6].mxu0  ;;  %v5590_v48 = vsel %vm1080_vm5, %v1369_v42, -inf  ;;  %v5656_v50 = vadd.s32 %v5513_v41, %v1052_v13  ;;  %7025 = vst [vmem:[#allocation53_spill] sm:$0xff] %v5752_v44 }
 0x27f   : > { %1417 = vmax.xlane.f32.xlu0 %v5579_v3  ;;  %1421 = vmax.xlane.f32.xlu1 %v5590_v48  ;;  %v1316_v45 = vpop.f32.mrb[7].mxu0  ;;  %v1372_v59 = vmul.f32 0.088388346, %v3841_v36  ;;  %v5645_v36 = vadd.s32 %v5513_v41, %v1051_v26 }
 0x280   : > { %v1371_v34 = vmul.f32 0.088388346, %v1316_v45  ;;  %v1053_v45 = vadd.s32 112, %v5508_v57  ;;  %7011 = vst [vmem:[#allocation39_spill] sm:$0xff] %v5656_v50  ;;  %vm6880_vm14 = vcmp.le.s32.totalorder %v5520_v46, %v5656_v50 }
 0x281   : > { %v5627_v8 = vsel %vm1083_vm8, %v1372_v59, -inf  ;;  %7010 = vst [vmem:[#allocation38_spill] sm:$0xff] %v5645_v36  ;;  %vm1088_vm13 = vcmp.le.s32.totalorder %v5520_v46, %v5645_v36  ;;  %v5750_v36 = vld [vmem:[#allocation2 + $0x28] sm:$0xff] }
 0x282   : > { %v3844_v11 = vpop.f32.mrb[8].mxu0  ;;  %v5614_v35 = vsel %vm1082_vm7, %v1371_v34, -inf  ;;  %7024 = vst [vmem:[#allocation52_spill] sm:$0xff] %v5750_v36 }
 0x283   : > { %1423 = vmax.xlane.f32.xlu0 %v5603_v60  ;;  %1425 = vmax.xlane.f32.xlu1 %v5614_v35  ;;  %v1326_v7 = vpop.f32.mrb[9].mxu0  ;;  %v1374_v53 = vmul.f32 0.088388346, %v3844_v11  ;;  %v1054_v11 = vadd.s32 120, %v5508_v57 }
 0x284   : > { %v1373_v12 = vmul.f32 0.088388346, %v1326_v7 }
 0x285   : > { %v5651_v34 = vsel %vm1085_vm10, %v1374_v53, -inf  ;;  %v5668_v53 = vadd.s32 %v5513_v41, %v1053_v45 }
 0x286   : > { %v3847_v55 = vpop.f32.mrb[10].mxu0  ;;  %v5638_v42 = vsel %vm1084_vm9, %v1373_v12, -inf }
 0x287   : > { %1429 = vmax.xlane.f32.xlu1 %v5638_v42  ;;  %v1336_v18 = vpop.f32.mrb[11].mxu0  ;;  %1427 = vmax.xlane.f32.xlu0 %v5627_v8  ;;  %v1376_v30 = vmul.f32 0.088388346, %v3847_v55  ;;  %7012 = vst [vmem:[#allocation40_spill] sm:$0xff] %v5668_v53  ;;  %v5679_v55 = vadd.s32 %v5513_v41, %v1054_v11  ;;  %vm1090_vm15 = vcmp.le.s32.totalorder %v5520_v46, %v5668_v53 }
 0x288   : > { %v1375_v59 = vmul.f32 0.088388346, %v1336_v18 }
 0x289   : > { %v5674_v57 = vsel %vm1087_vm12, %v1376_v30, -inf  ;;  %7013 = vst [vmem:[#allocation41_spill] sm:$0xff] %v5679_v55  ;;  %vm1091_vm0 = vcmp.le.s32.totalorder %v5520_v46, %v5679_v55  ;;  %v5735_v55 = vld [vmem:[#allocation2 + $0x10] sm:$0xff] }
 0x28a   : > { %v3850_v7 = vpop.f32.mrb[12].mxu0  ;;  %v5662_v26 = vsel %vm1086_vm11, %v1375_v59, -inf  ;;  %7020 = vst [vmem:[#allocation48_spill] sm:$0xff] %v5735_v55 }
 0x28b   : > { %1433 = vmax.xlane.f32.xlu1 %v5662_v26  ;;  %v1346_v12 = vpop.f32.mrb[13].mxu0  ;;  %1431 = vmax.xlane.f32.xlu0 %v5651_v34  ;;  %v1378_v13 = vmul.f32 0.088388346, %v3850_v7 }
 0x28c   : > { %v1377_v37 = vmul.f32 0.088388346, %v1346_v12 }
 0x28d   : > { %v5693_v41 = vsel %vm6880_vm14, %v1378_v13, -inf  ;;  %v5710_v13 = vld [vmem:[#allocation2 + $0x8] sm:$0xff]  ;;  %vm1717_vm14 = vcmask 7168  }
 0x28e   : > { %v3853_v18 = vpop.f32.mrb[14].mxu0  ;;  %v5684_v45 = vsel %vm1088_vm13, %v1377_v37, -inf  ;;  %7014 = vst [vmem:[#allocation42_spill] sm:$0xff] %v5710_v13  ;;  %v5712_v37 = vld [vmem:[#allocation2] sm:$0xff] }
 0x28f   : > { %1437 = vmax.xlane.f32.xlu1 %v5684_v45  ;;  %v1356_v59 = vpop.f32.mrb[15].mxu0  ;;  %1435 = vmax.xlane.f32.xlu0 %v5674_v57  ;;  %v1380_v30 = vmul.f32 0.088388346, %v3853_v18  ;;  %7015 = vst [vmem:[#allocation43_spill] sm:$0xff] %v5712_v37 }
 0x290   : > { %v1379_v7 = vmul.f32 0.088388346, %v1356_v59 }
 0x291   : > { %v5707_v12 = vsel %vm1091_vm0, %v1380_v30, -inf  ;;  %v5725_v30 = vld [vmem:[#allocation2 + $0x18] sm:$0xff] }
 0x292   : > { %v5700_v11 = vsel %vm1090_vm15, %v1379_v7, -inf  ;;  %7018 = vst [vmem:[#allocation46_spill] sm:$0xff] %v5725_v30 }
 0x293   : > { %1441 = vmax.xlane.f32.xlu1 %v5700_v11  ;;  %1439 = vmax.xlane.f32.xlu0 %v5693_v41 }
 0x297   : > { %1443 = vmax.xlane.f32.xlu0 %v5707_v12 }
 0x303   : > { %v1416_v18 = vpop.xlane.xlu1 %1415 }
 0x304   : > { %v5715_v59 = vmax.f32 %v5710_v13, %v1416_v18  ;;  %v1414_v7 = vpop.xlane.xlu0 %1413  ;;  %v5737_v13 = vld [vmem:[#allocation2 + $0x20] sm:$0xff] }
 0x305   : > { %v5718_v53 = vmax.f32 %v5712_v37, %v1414_v7  ;;  %7021 = vst [vmem:[#allocation49_spill] sm:$0xff] %v5737_v13 }
 0x306   : > { %7016 = vst [vmem:[#allocation44_spill] sm:$0xff] %v5715_v59  ;;  %2024 = vst.msk [vmem:[#allocation2 + $0x8] sm:$0xff] %vm1717_vm14, %v5715_v59  ;;  %1516 = vperm.xlu0 %4276, %v5715_v59   ;;  %v5769_v59 = vld [vmem:[#allocation2 + $0x40] sm:$0xff] }
 0x307   : > { %7017 = vst [vmem:[#allocation45_spill] sm:$0xff] %v5718_v53  ;;  %2023 = vst.msk [vmem:[#allocation2] sm:$0xff] %vm1717_vm14, %v5718_v53  ;;  %1511 = vperm.xlu1 %4275, %v5718_v53  }
 0x308   : > { %v1420_v18 = vpop.xlane.xlu0 %1419  ;;  %7028 = vst [vmem:[#allocation56_spill] sm:$0xff] %v5769_v59 }
 0x309   : > { %v5733_v7 = vmax.f32 %v5725_v30, %v1420_v18 }
 0x30b   : > { %7019 = vst [vmem:[#allocation47_spill] sm:$0xff] %v5733_v7  ;;  %2026 = vst.msk [vmem:[#allocation2 + $0x18] sm:$0xff] %vm1717_vm14, %v5733_v7  ;;  %1526 = vperm.xlu1 %4275, %v5733_v7   ;;  %v5788_v7 = vld [vmem:[#allocation2 + $0x50] sm:$0xff] }
 0x30c   : > { %v1418_v50 = vpop.xlane.xlu0 %1417  ;;  %v1422_v37 = vpop.xlane.xlu1 %1421  ;;  %7032 = vst [vmem:[#allocation60_spill] sm:$0xff] %v5788_v7 }
 0x30d   : > { %v5745_v53 = vmax.f32 %v5735_v55, %v1418_v50  ;;  %v5748_v18 = vmax.f32 %v5737_v13, %v1422_v37  ;;  %v5771_v55 = vld [vmem:[#allocation2 + $0x38] sm:$0xff]  ;;  %v5807_v13 = vld [vmem:[#allocation2 + $0x60] sm:$0xff] }
 0x30e   : > { %7029 = vst [vmem:[#allocation57_spill] sm:$0xff] %v5771_v55  ;;  %7036 = vst [vmem:[#allocation64_spill] sm:$0xff] %v5807_v13 }
 0x30f   : > { %7022 = vst [vmem:[#allocation50_spill] sm:$0xff] %v5745_v53  ;;  %7023 = vst [vmem:[#allocation51_spill] sm:$0xff] %v5748_v18  ;;  %1521 = vperm.xlu1 %4275, %v5745_v53  }
 0x310   : > { %2025 = vst.msk [vmem:[#allocation2 + $0x10] sm:$0xff] %vm1717_vm14, %v5745_v53  ;;  %2027 = vst.msk [vmem:[#allocation2 + $0x20] sm:$0xff] %vm1717_vm14, %v5748_v18  ;;  %v1424_v50 = vpop.xlane.xlu0 %1423  ;;  %v1426_v37 = vpop.xlane.xlu1 %1425 }
 0x311   : > { %v5764_v30 = vmax.f32 %v5750_v36, %v1424_v50  ;;  %v5767_v20 = vmax.f32 %v5752_v44, %v1426_v37  ;;  %v5790_v36 = vld [vmem:[#allocation2 + $0x48] sm:$0xff] }
 0x312   : > { %7033 = vst [vmem:[#allocation61_spill] sm:$0xff] %v5790_v36 }
 0x313   : > { %7026 = vst [vmem:[#allocation54_spill] sm:$0xff] %v5764_v30  ;;  %7027 = vst [vmem:[#allocation55_spill] sm:$0xff] %v5767_v20  ;;  %1536 = vperm.xlu1 %4275, %v5764_v30  }
 0x314   : > { %2028 = vst.msk [vmem:[#allocation2 + $0x28] sm:$0xff] %vm1717_vm14, %v5764_v30  ;;  %2029 = vst.msk [vmem:[#allocation2 + $0x30] sm:$0xff] %vm1717_vm14, %v5767_v20  ;;  %v1430_v50 = vpop.xlane.xlu1 %1429  ;;  %v1428_v37 = vpop.xlane.xlu0 %1427 }
 0x315   : > { %v5783_v53 = vmax.f32 %v5769_v59, %v1430_v50  ;;  %v5786_v21 = vmax.f32 %v5771_v55, %v1428_v37  ;;  %v5809_v59 = vld [vmem:[#allocation2 + $0x58] sm:$0xff] }
 0x316   : > { %7037 = vst [vmem:[#allocation65_spill] sm:$0xff] %v5809_v59 }
 0x317   : > { %7030 = vst [vmem:[#allocation58_spill] sm:$0xff] %v5783_v53  ;;  %7031 = vst [vmem:[#allocation59_spill] sm:$0xff] %v5786_v21  ;;  %1531 = vperm.xlu1 %4275, %v5748_v18  }
 0x318   : > { %2031 = vst.msk [vmem:[#allocation2 + $0x40] sm:$0xff] %vm1717_vm14, %v5783_v53  ;;  %2030 = vst.msk [vmem:[#allocation2 + $0x38] sm:$0xff] %vm1717_vm14, %v5786_v21  ;;  %v1434_v50 = vpop.xlane.xlu1 %1433  ;;  %v1432_v37 = vpop.xlane.xlu0 %1431 }
 0x319   : > { %v5802_v30 = vmax.f32 %v5788_v7, %v1434_v50  ;;  %v5805_v49 = vmax.f32 %v5790_v36, %v1432_v37  ;;  %v5827_v7 = vld [vmem:[#allocation2 + $0x70] sm:$0xff] }
 0x31a   : > { %7040 = vst [vmem:[#allocation68_spill] sm:$0xff] %v5827_v7 }
 0x31b   : > { %7034 = vst [vmem:[#allocation62_spill] sm:$0xff] %v5802_v30  ;;  %7035 = vst [vmem:[#allocation63_spill] sm:$0xff] %v5805_v49  ;;  %1561 = vperm.xlu0 %4276, %v5802_v30   ;;  %1546 = vperm.xlu1 %4275, %v5786_v21   ;;  %v5931_v21 = vld [vmem:[%s4961_s3 + $0x98] sm:$0xff] }
 0x31c   : > { %2033 = vst.msk [vmem:[#allocation2 + $0x50] sm:$0xff] %vm1717_vm14, %v5802_v30  ;;  %2032 = vst.msk [vmem:[#allocation2 + $0x48] sm:$0xff] %vm1717_vm14, %v5805_v49  ;;  %v1438_v37 = vpop.xlane.xlu1 %1437  ;;  %v1436_v44 = vpop.xlane.xlu0 %1435 }
 0x31d   : > { %v5822_v55 = vmax.f32 %v5807_v13, %v1438_v37  ;;  %v5825_v18 = vmax.f32 %v5809_v59, %v1436_v44  ;;  %v5847_v13 = vld [vmem:[#allocation2 + $0x78] sm:$0xff]  ;;  %v5860_v37 = vld [vmem:[%s4961_s3 + $0x8] sm:$0xff] }
 0x31e   : > { %7044 = vst [vmem:[#allocation72_spill] sm:$0xff] %v5847_v13  ;;  %v5921_v59 = vld [vmem:[%s4961_s3 + $0x78] sm:$0xff] }
 0x31f   : > { %7038 = vst [vmem:[#allocation66_spill] sm:$0xff] %v5822_v55  ;;  %7039 = vst [vmem:[#allocation67_spill] sm:$0xff] %v5825_v18  ;;  %1571 = vperm.xlu0 %4276, %v5822_v55   ;;  %1541 = vperm.xlu1 %4275, %v5767_v20   ;;  %v5941_v20 = vld [vmem:[%s4961_s3 + $0xd8] sm:$0xff] }
 0x320   : > { %2035 = vst.msk [vmem:[#allocation2 + $0x60] sm:$0xff] %vm1717_vm14, %v5822_v55  ;;  %2034 = vst.msk [vmem:[#allocation2 + $0x58] sm:$0xff] %vm1717_vm14, %v5825_v18  ;;  %v1442_v44 = vpop.xlane.xlu1 %1441  ;;  %v1440_v50 = vpop.xlane.xlu0 %1439 }
 0x321   : > { %v5842_v36 = vmax.f32 %v5827_v7, %v1442_v44  ;;  %v5845_v30 = vmax.f32 %v5829_v56, %v1440_v50  ;;  %v5873_v44 = vld [vmem:[%s4961_s3 + $0x28] sm:$0xff]  ;;  %7047 = vst [vmem:[#allocation75_spill] sm:$0xff] %v5941_v20 }
 0x322   : > { %v5894_v56 = vld [vmem:[%s4961_s3 + $0x88] sm:$0xff] }
 0x323   : > { %7042 = vst [vmem:[#allocation70_spill] sm:$0xff] %v5842_v36  ;;  %7043 = vst [vmem:[#allocation71_spill] sm:$0xff] %v5845_v30  ;;  %1551 = vperm.xlu1 %4275, %v5783_v53   ;;  %1581 = vperm.xlu0 %4276, %v5842_v36   ;;  %v5904_v7 = vld [vmem:[%s4961_s3 + $0xa8] sm:$0xff]  ;;  %v5936_v53 = vld [vmem:[%s4961_s3 + $0xb8] sm:$0xff] }
 0x324   : > { %2037 = vst.msk [vmem:[#allocation2 + $0x70] sm:$0xff] %vm1717_vm14, %v5842_v36  ;;  %2036 = vst.msk [vmem:[#allocation2 + $0x68] sm:$0xff] %vm1717_vm14, %v5845_v30  ;;  %v1444_v50 = vpop.xlane.xlu0 %1443  ;;  %v5885_v36 = vld [vmem:[%s4961_s3 + $0x68] sm:$0xff] }
 0x325   : > { %v5863_v55 = vmax.f32 %v5847_v13, %v1444_v50  ;;  %v5879_v50 = vld [vmem:[%s4961_s3 + $0x48] sm:$0xff]  ;;  %v5891_v13 = vld [vmem:[%s4961_s3 + $0x18] sm:$0xff] }
 0x327   : > { %7045 = vst [vmem:[#allocation73_spill] sm:$0xff] %v5863_v55  ;;  %1556 = vperm.xlu1 %4275, %v5805_v49   ;;  %2038 = vst.msk [vmem:[#allocation2 + $0x78] sm:$0xff] %vm1717_vm14, %v5863_v55  ;;  %2087 = vrot.lane.b32.xlu0 %v5860_v37, %s4593_s30  ;;  %v5924_v49 = vld [vmem:[%s4961_s3 + $0xe8] sm:$0xff] }
 0x328   : > { %7046 = vst [vmem:[#allocation74_spill] sm:$0xff] %v5924_v49 }
 0x32b   : > { %1566 = vperm.xlu1 %4275, %v5825_v18   ;;  %2091 = vrot.lane.b32.xlu0 %v5873_v44, %s4593_s30  ;;  %v5914_v18 = vld [vmem:[%s4961_s3 + $0xc8] sm:$0xff] }
 0x32f   : > { %1576 = vperm.xlu1 %4275, %v5845_v30   ;;  %2095 = vrot.lane.b32.xlu0 %v5879_v50, %s4593_s30  ;;  %v5901_v30 = vld [vmem:[%s4961_s3 + $0x38] sm:$0xff] }
 0x333   : > { %1586 = vperm.xlu1 %4275, %v5863_v55   ;;  %2099 = vrot.lane.b32.xlu0 %v5885_v36, %s4593_s30  ;;  %v5911_v55 = vld [vmem:[%s4961_s3 + $0x58] sm:$0xff] }
 0x337   : > { %2089 = vrot.lane.b32.xlu1 %v5891_v13, %s4593_s30  ;;  %2103 = vrot.lane.b32.xlu0 %v5894_v56, %s4593_s30 }
 0x33b   : > { %2093 = vrot.lane.b32.xlu1 %v5901_v30, %s4593_s30  ;;  %2107 = vrot.lane.b32.xlu0 %v5904_v7, %s4593_s30 }
 0x33f   : > { %2097 = vrot.lane.b32.xlu1 %v5911_v55, %s4593_s30  ;;  %2111 = vrot.lane.b32.xlu0 %v5914_v18, %s4593_s30 }
 0x343   : > { %2101 = vrot.lane.b32.xlu1 %v5921_v59, %s4593_s30  ;;  %2115 = vrot.lane.b32.xlu0 %v5924_v49, %s4593_s30 }
 0x347   : > { %2105 = vrot.lane.b32.xlu1 %v5931_v21, %s4593_s30 }
 0x34b   : > { %2109 = vrot.lane.b32.xlu1 %v5936_v53, %s4593_s30 }
 0x34f   : > { %2113 = vrot.lane.b32.xlu1 %v5941_v20, %s4593_s30 }
 0x353   : > { %2117 = vrot.lane.b32.xlu1 %v5946_v38, %s4593_s30 }
 0x385   : > { %v1517_v28 = vpop.permute.xlu0 %1516 }
 0x386   : > { %v1590_v29 = vsub.f32 %v5539_v52, %v1517_v28  ;;  %v1512_v16 = vpop.permute.xlu1 %1511 }
 0x387   : > { %v1589_v24 = vsub.f32 %v5549_v17, %v1512_v16 }
 0x388   : > { %v1607_v51 = vmul.f32 1.442695, %v1590_v29 }
 0x389   : > { %v1605_v2 = vmul.f32 1.442695, %v1589_v24 }
 0x38a   : > { %v1527_v46 = vpop.permute.xlu1 %1526 }
 0x38b   : > { %4277 = vpow2.f32 %v1605_v2  ;;  %v1592_v31 = vsub.f32 %v5561_v54, %v1527_v46 }
 0x38c   : > { %4279 = vpow2.f32 %v1607_v51 }
 0x38d   : > { %v1611_v39 = vmul.f32 1.442695, %v1592_v31 }
 0x38e   : > { %v1522_v23 = vpop.permute.xlu1 %1521 }
 0x38f   : > { %v1591_v49 = vsub.f32 %v5579_v3, %v1522_v23 }
 0x391   : > { %v1609_v20 = vmul.f32 1.442695, %v1591_v49 }
 0x392   : > { %v1537_v10 = vpop.permute.xlu1 %1536 }
 0x393   : > { %4281 = vpow2.f32 %v1609_v20  ;;  %v1594_v52 = vsub.f32 %v5603_v60, %v1537_v10 }
 0x394   : > { %4283 = vpow2.f32 %v1611_v39 }
 0x395   : > { %v5955_v28 = vpop.eup %4277  ;;  %v1615_v46 = vmul.f32 1.442695, %v1594_v52 }
 0x396   : > { %v5957_v16 = vpop.eup %4279  ;;  %3886 = vmatprep.mubr.f32.mxu1 %v5955_v28  ;;  %v1532_v2 = vpop.permute.xlu1 %1531 }
 0x397   : > { %v1593_v51 = vsub.f32 %v5590_v48, %v1532_v2  ;;  %3887 = vmatmul.mubr.f32.vlgmr.msra.gmra.mrb[0].mxu1 %v5957_v16 }
 0x398   : > { %4089 = vmatpush3.bf16.xpose.msra.mxu1 %v5332_v0 }
 0x399   : > { %v1613_v23 = vmul.f32 1.442695, %v1593_v51  ;;  %4091 = vmatprep.subr.bf16.mxu1 %v5334_v1 }
 0x39a   : > { %v1547_v39 = vpop.permute.xlu1 %1546  ;;  %v1562_v31 = vpop.permute.xlu0 %1561 }
 0x39b   : > { %4285 = vpow2.f32 %v1613_v23  ;;  %v1596_v24 = vsub.f32 %v5627_v8, %v1547_v39  ;;  %v1599_v20 = vsub.f32 %v5662_v26, %v1562_v31 }
 0x39c   : > { %4287 = vpow2.f32 %v1615_v46 }
 0x39d   : > { %v5964_v10 = vpop.eup %4281  ;;  %v1619_v0 = vmul.f32 1.442695, %v1596_v24  ;;  %v1625_v51 = vmul.f32 1.442695, %v1599_v20 }
 0x39e   : > { %v5967_v17 = vpop.eup %4283  ;;  %3889 = vmatprep.mubr.f32.mxu1 %v5964_v10  ;;  %v1542_v29 = vpop.permute.xlu1 %1541 }
 0x39f   : > { %v1595_v54 = vsub.f32 %v5614_v35, %v1542_v29  ;;  %3890 = vmatmul.mubr.f32.gmra.mrb[2].mxu1 %v5967_v17  ;;  %v1572_v49 = vpop.permute.xlu0 %1571 }
 0x3a0   : > { %4093 = vmatpush3.bf16.xpose.msra.mxu1 %v5334_v1  ;;  %v1601_v46 = vsub.f32 %v5684_v45, %v1572_v49 }
 0x3a1   : > { %v1617_v3 = vmul.f32 1.442695, %v1595_v54  ;;  %4095 = vmatprep.subr.bf16.mxu1 %v5346_v33 }
 0x3a2   : > { %v1552_v48 = vpop.permute.xlu1 %1551  ;;  %v1629_v31 = vmul.f32 1.442695, %v1601_v46 }
 0x3a3   : > { %v1597_v60 = vsub.f32 %v5638_v42, %v1552_v48  ;;  %4289 = vpow2.f32 %v1617_v3  ;;  %v1582_v42 = vpop.permute.xlu0 %1581 }
 0x3a4   : > { %4291 = vpow2.f32 %v1619_v0 }
 0x3a5   : > { %v5976_v8 = vpop.eup %4285  ;;  %v1621_v52 = vmul.f32 1.442695, %v1597_v60 }
 0x3a6   : > { %v5978_v35 = vpop.eup %4287  ;;  %3892 = vmatprep.mubr.f32.mxu1 %v5976_v8  ;;  %v1557_v1 = vpop.permute.xlu1 %1556 }
 0x3a7   : > { %v1598_v2 = vsub.f32 %v5651_v34, %v1557_v1  ;;  %3893 = vmatmul.mubr.f32.gmra.mrb[4].mxu1 %v5978_v35  ;;  %4293 = vpow2.f32 %v1621_v52  ;;  %v1603_v34 = vsub.f32 %v5700_v11, %v1582_v42 }
 0x3a8   : > { %4097 = vmatpush3.bf16.xpose.msra.mxu1 %v5346_v33 }
 0x3a9   : > { %v1623_v26 = vmul.f32 1.442695, %v1598_v2  ;;  %4099 = vmatprep.subr.bf16.mxu1 %v5354_v5  ;;  %v1633_v0 = vmul.f32 1.442695, %v1603_v34 }
 0x3aa   : > { %v1567_v23 = vpop.permute.xlu1 %1566 }
 0x3ab   : > { %4295 = vpow2.f32 %v1623_v26  ;;  %v1600_v39 = vsub.f32 %v5674_v57, %v1567_v23  ;;  %v2056_v26 = vld [vmem:[%s4944_s21 + $0x8] sm:$0xff] }
 0x3ac   : > { %4297 = vpow2.f32 %v1625_v51 }
 0x3ad   : > { %v1627_v24 = vmul.f32 1.442695, %v1600_v39  ;;  %v5988_v29 = vpop.eup %4289  ;;  %v2057_v39 = vld [vmem:[%s4944_s21 + $0x10] sm:$0xff] }
 0x3ae   : > { %v1577_v54 = vpop.permute.xlu1 %1576  ;;  %v5990_v45 = vpop.eup %4291  ;;  %3895 = vmatprep.mubr.f32.mxu1 %v5988_v29 }
 0x3af   : > { %4299 = vpow2.f32 %v1627_v24  ;;  %v1602_v33 = vsub.f32 %v5693_v41, %v1577_v54  ;;  %3896 = vmatmul.mubr.f32.gmra.mrb[6].mxu1 %v5990_v45  ;;  %v2121_v24 = vmul.f32 %v2057_v39, %v5873_v44  ;;  %v2058_v54 = vld [vmem:[%s4944_s21 + $0x18] sm:$0xff]  ;;  %v2065_v39 = vld [vmem:[%s4944_s21 + $0x50] sm:$0xff] }
 0x3b0   : > { %4301 = vpow2.f32 %v1629_v31  ;;  %4101 = vmatpush3.bf16.xpose.msra.mxu1 %v5354_v5  ;;  %v2088_v5 = vpop.permute.xlu0 %2087 }
 0x3b1   : > { %v1631_v57 = vmul.f32 1.442695, %v1602_v33  ;;  %v5996_v3 = vpop.eup %4293  ;;  %4103 = vmatprep.subr.bf16.mxu1 %v5364_v22  ;;  %v2135_v1 = vmul.f32 %v2088_v5, %v5386_v6  ;;  %v2059_v33 = vld [vmem:[%s4944_s21 + $0x20] sm:$0xff]  ;;  %v2061_v5 = vld [vmem:[%s4944_s21 + $0x30] sm:$0xff] }
 0x3b2   : > { %v1587_v11 = vpop.permute.xlu1 %1586  ;;  %3898 = vmatprep.mubr.f32.mxu1 %v5996_v3 }
 0x3b3   : > { %4303 = vpow2.f32 %v1631_v57  ;;  %v1604_v48 = vsub.f32 %v5707_v12, %v1587_v11  ;;  %v2119_v12 = vmul.f32 %v5860_v37, %v5380_v62  ;;  %v2122_v57 = vmul.f32 %v2058_v54, %v5901_v30  ;;  %v2067_v54 = vld [vmem:[%s4944_s21 + $0x60] sm:$0xff] }
 0x3b4   : > { %4305 = vpow2.f32 %v1633_v0  ;;  %v2092_v6 = vpop.permute.xlu0 %2091  ;;  %v2125_v30 = vmul.f32 %v2061_v5, %v5885_v36  ;;  %v2064_v36 = vld [vmem:[%s4944_s21 + $0x48] sm:$0xff] }
 0x3b5   : > { %v6001_v49 = vpop.eup %4295  ;;  %v1635_v41 = vmul.f32 1.442695, %v1604_v48 }
 0x3b6   : > { %v6003_v60 = vpop.eup %4297  ;;  %3899 = vmatmul.mubr.f32.gmra.mrb[8].mxu1 %v6001_v49  ;;  %v2090_v62 = vpop.permute.xlu1 %2089 }
 0x3b7   : > { %4307 = vpow2.f32 %v1635_v41  ;;  %3901 = vmatprep.mubr.f32.mxu1 %v6003_v60  ;;  %v2136_v31 = vmul.f32 %v2090_v62, %v5403_v32  ;;  %v2060_v32 = vld [vmem:[%s4944_s21 + $0x28] sm:$0xff] }
 0x3b8   : > { %4105 = vmatpush3.bf16.xpose.msra.mxu1 %v5364_v22  ;;  %v2151_v22 = vadd.f32 %v2135_v1, %v2119_v12  ;;  %v2096_v42 = vpop.permute.xlu0 %2095 }
 0x3b9   : > { %v6007_v20 = vpop.eup %4299  ;;  %4107 = vmatprep.subr.bf16.mxu1 %v5372_v43  ;;  %v2139_v44 = vmul.f32 %v2096_v42, %v5420_v15 }
 0x3ba   : > { %v6010_v52 = vpop.eup %4301  ;;  %3902 = vmatmul.mubr.f32.gmra.mrb[10].mxu1 %v6007_v20  ;;  %v2094_v37 = vpop.permute.xlu1 %2093 }
 0x3bb   : > { %3904 = vmatprep.mubr.f32.mxu1 %v6010_v52  ;;  %v2138_v48 = vmul.f32 %v2094_v37, %v5416_v58 }
 0x3bc   : > { %v2100_v34 = vpop.permute.xlu0 %2099 }
 0x3bd   : > { %v6018_v2 = vpop.eup %4303 }
 0x3be   : > { %v6020_v51 = vpop.eup %4305  ;;  %3905 = vmatmul.mubr.f32.gmra.mrb[12].mxu1 %v6018_v2  ;;  %v2098_v23 = vpop.permute.xlu1 %2097 }
 0x3bf   : > { %3907 = vmatprep.mubr.f32.mxu1 %v6020_v51  ;;  %v2140_v1 = vmul.f32 %v2098_v23, %v5429_v14 }
 0x3c0   : > { %4109 = vmatpush3.bf16.xpose.msra.mxu1 %v5372_v43  ;;  %v2120_v43 = vmul.f32 %v2056_v26, %v5891_v13  ;;  %v2123_v13 = vmul.f32 %v2059_v33, %v5879_v50  ;;  %v2104_v12 = vpop.permute.xlu0 %2103  ;;  %v2141_v50 = vmul.f32 %v2100_v34, %v5433_v25  ;;  %v2066_v34 = vld [vmem:[%s4944_s21 + $0x58] sm:$0xff] }
 0x3c1   : > { %v6024_v46 = vpop.eup %4307  ;;  %4111 = vmatprep.subr.bf16.mxu1 %v5383_v63  ;;  %v2143_v23 = vmul.f32 %v2104_v12, %v5446_v40  ;;  %v2130_v40 = vmul.f32 %v2066_v34, %v5936_v53  ;;  %v7050_v53 = vld [vmem:[#allocation22_spill] sm:$0xff] }
 0x3c2   : > { %3908 = vmatmul.mubr.f32.gmra.mrb[14].mxu1 %v6024_v46  ;;  %v2102_v0 = vpop.permute.xlu1 %2101  ;;  %v2152_v11 = vadd.f32 %v2136_v31, %v2120_v43  ;;  %v2155_v58 = vadd.f32 %v2139_v44, %v2123_v13  ;;  %v2157_v26 = vadd.f32 %v2141_v50, %v2125_v30  ;;  %v2128_v43 = vmul.f32 %v2064_v36, %v5931_v21  ;;  %v2069_v13 = vld [vmem:[%s4944_s21 + $0x70] sm:$0xff]  ;;  %v7051_v12 = vld [vmem:[#allocation74_spill] sm:$0xff]  ;;  %v7053_v50 = vld [vmem:[#allocation24_spill] sm:$0xff] }
 0x3c3   : > { %3942 = vmatprep.mubr.f32.mxu1 %v2151_v22  ;;  %v2062_v22 = vld [vmem:[%s4944_s21 + $0x38] sm:$0xff] }
 0x3c4   : > { %v2126_v15 = vmul.f32 %v2062_v22, %v5921_v59  ;;  %v2108_v42 = vpop.permute.xlu0 %2107 }
 0x3c6   : > { %v2106_v62 = vpop.permute.xlu1 %2105 }
 0x3c7   : > { %v2144_v31 = vmul.f32 %v2106_v62, %v5455_v47  ;;  %v2068_v47 = vld [vmem:[%s4944_s21 + $0x68] sm:$0xff] }
 0x3c8   : > { %4113 = vmatpush3.bf16.xpose.msra.mxu1 %v5383_v63  ;;  %v2137_v63 = vmul.f32 %v2092_v6, %v5407_v9  ;;  %v2154_v9 = vadd.f32 %v2138_v48, %v2122_v57  ;;  %v2063_v6 = vld [vmem:[%s4944_s21 + $0x40] sm:$0xff] }
 0x3c9   : > { %4115 = vmatprep.subr.bf16.mxu1 %v5390_v19  ;;  %v2127_v14 = vmul.f32 %v2063_v6, %v5894_v56  ;;  %v2160_v33 = vadd.f32 %v2144_v31, %v2128_v43 }
 0x3ca   : > { %v2153_v41 = vadd.f32 %v2137_v63, %v2121_v24  ;;  %v2110_v25 = vpop.permute.xlu1 %2109  ;;  %v2145_v24 = vmul.f32 %v2108_v42, %v5460_v4  ;;  %v2112_v63 = vpop.permute.xlu0 %2111  ;;  %v7049_v4 = vld [vmem:[#allocation75_spill] sm:$0xff] }
 0x3cb   : > { %v2159_v56 = vadd.f32 %v2143_v23, %v2127_v14  ;;  %v2146_v21 = vmul.f32 %v2110_v25, %v5469_v61 }
 0x3cd   : > { %v2162_v44 = vadd.f32 %v2146_v21, %v2130_v40 }
 0x3ce   : > { %v2114_v48 = vpop.permute.xlu1 %2113 }
 0x3cf   : > { %v2148_v5 = vmul.f32 %v2114_v48, %v7050_v53 }
 0x3d0   : > { %4117 = vmatpush3.bf16.xpose.msra.mxu1 %v5390_v19  ;;  %v2124_v19 = vmul.f32 %v2060_v32, %v5911_v55  ;;  %v2142_v55 = vmul.f32 %v2102_v0, %v5441_v27  ;;  %v2129_v27 = vmul.f32 %v2065_v39, %v5904_v7  ;;  %v2131_v0 = vmul.f32 %v2067_v54, %v5914_v18  ;;  %v7048_v7 = vld [vmem:[#allocation21_spill] sm:$0xff]  ;;  %v2116_v32 = vpop.permute.xlu0 %2115  ;;  %v7052_v18 = vld [vmem:[#allocation23_spill] sm:$0xff] }
 0x3d2   : > { %v2156_v37 = vadd.f32 %v2140_v1, %v2124_v19  ;;  %v2158_v59 = vadd.f32 %v2142_v55, %v2126_v15  ;;  %v2161_v57 = vadd.f32 %v2145_v24, %v2129_v27  ;;  %v2133_v19 = vmul.f32 %v2069_v13, %v7051_v12  ;;  %v2118_v30 = vpop.permute.xlu1 %2117 }
 0x3d3   : > { %v2149_v1 = vmul.f32 %v2116_v32, %v7052_v18  ;;  %v2150_v62 = vmul.f32 %v2118_v30, %v7053_v50 }
 0x3d5   : > { %v2165_v6 = vadd.f32 %v2149_v1, %v2133_v19 }
 0x3d7   : > { %3943 = vmatmul.mubr.f32.vlgmr.msra.gmra.mrb[16].mxu1 %v2152_v11  ;;  %v2147_v11 = vmul.f32 %v2112_v63, %v7048_v7 }
 0x3d8   : > { %3945 = vmatprep.mubr.f32.mxu1 %v2153_v41  ;;  %v2132_v41 = vmul.f32 %v2068_v47, %v7049_v4 }
 0x3d9   : > { %v2163_v61 = vadd.f32 %v2147_v11, %v2131_v0 }
 0x3db   : > { %3946 = vmatmul.mubr.f32.gmra.mrb[18].mxu1 %v2154_v9  ;;  %v2070_v9 = vld [vmem:[%s4944_s21 + $0x78] sm:$0xff] }
 0x3dc   : > { %3948 = vmatprep.mubr.f32.mxu1 %v2155_v58  ;;  %v2134_v22 = vmul.f32 %v2070_v9, %v5946_v38  ;;  %v2164_v58 = vadd.f32 %v2148_v5, %v2132_v41 }
 0x3de   : > { %v2166_v15 = vadd.f32 %v2150_v62, %v2134_v22 }
 0x3df   : > { %3949 = vmatmul.mubr.f32.gmra.mrb[20].mxu1 %v2156_v37 }
 0x3e0   : > { %3951 = vmatprep.mubr.f32.mxu1 %v2157_v26 }
 0x3e3   : > { %3952 = vmatmul.mubr.f32.gmra.mrb[22].mxu1 %v2158_v59 }
 0x3e4   : > { %3954 = vmatprep.mubr.f32.mxu1 %v2159_v56 }
 0x3e7   : > { %3955 = vmatmul.mubr.f32.gmra.mrb[24].mxu1 %v2160_v33  ;;  %v7070_v33 = vld [vmem:[#allocation26_spill] sm:$0xff] }
 0x3e8   : > { %3957 = vmatprep.mubr.f32.mxu1 %v2161_v57 }
 0x3eb   : > { %3958 = vmatmul.mubr.f32.gmra.mrb[26].mxu1 %v2162_v44 }
 0x3ec   : > { %3960 = vmatprep.mubr.f32.mxu1 %v2163_v61 }
 0x3ef   : > { %3961 = vmatmul.mubr.f32.gmra.mrb[28].mxu1 %v2164_v58 }
 0x3f0   : > { %3963 = vmatprep.mubr.f32.mxu1 %v2165_v6 }
 0x3f3   : > { %3964 = vmatmul.mubr.f32.gmra.mrb[30].mxu1 %v2166_v15 }
 0x46a   : > { %v6077_v37 = vpop.f32.mrb[0].mxu1 }
 0x46b   : > { %7054 = vst [vmem:[#allocation21_spill] sm:$0xff] %v6077_v37  ;;  %v6079_v55 = vpop.f32.mrb[1].mxu1  ;;  %v7118_v37 = vld [vmem:[#allocation55_spill] sm:$0xff] }
 0x46c   : > { %7055 = vst [vmem:[#allocation75_spill] sm:$0xff] %v6079_v55 }
 0x472   : > { %v6081_v42 = vpop.f32.mrb[2].mxu1 }
 0x473   : > { %7056 = vst [vmem:[#allocation22_spill] sm:$0xff] %v6081_v42  ;;  %v6083_v14 = vpop.f32.mrb[3].mxu1  ;;  %v6327_v42 = vld [vmem:[#allocation2 + $0xd8] sm:$0xff] }
 0x474   : > { %7057 = vst [vmem:[#allocation74_spill] sm:$0xff] %v6083_v14  ;;  %7112 = vst [vmem:[#allocation34_spill] sm:$0xff] %v6327_v42  ;;  %v7117_v14 = vld [vmem:[#allocation53_spill] sm:$0xff] }
 0x475   : > { %v7119_v55 = vsub.f32 %v7117_v14, %v7118_v37 }
 0x47a   : > { %v6085_v36 = vpop.f32.mrb[4].mxu1 }
 0x47b   : > { %7058 = vst [vmem:[#allocation23_spill] sm:$0xff] %v6085_v36  ;;  %v6087_v38 = vpop.f32.mrb[5].mxu1 }
 0x47c   : > { %7059 = vst [vmem:[#allocation24_spill] sm:$0xff] %v6087_v38  ;;  %v6329_v38 = vld [vmem:[#allocation2 + $0xe0] sm:$0xff] }
 0x482   : > { %v6089_v26 = vpop.f32.mrb[6].mxu1 }
 0x483   : > { %7060 = vst [vmem:[#allocation76_spill] sm:$0xff] %v6089_v26  ;;  %v6091_v23 = vpop.f32.mrb[7].mxu1 }
 0x484   : > { %7061 = vst [vmem:[#allocation77_spill] sm:$0xff] %v6091_v23 }
 0x489   : > { %v6093_v39 = vpop.f32.mrb[8].mxu1 }
 0x48a   : > { %7062 = vst [vmem:[#allocation78_spill] sm:$0xff] %v6093_v39  ;;  %v6095_v25 = vpop.f32.mrb[9].mxu1  ;;  %v6301_v39 = vld [vmem:[#allocation2 + $0xc8] sm:$0xff] }
 0x48b   : > { %7063 = vst [vmem:[#allocation79_spill] sm:$0xff] %v6095_v25  ;;  %v7110_v25 = vld [vmem:[#allocation51_spill] sm:$0xff] }
 0x48d   : > { %v6097_v43 = vpop.f32.mrb[10].mxu1 }
 0x48e   : > { %7064 = vst [vmem:[#allocation80_spill] sm:$0xff] %v6097_v43  ;;  %v6099_v59 = vpop.f32.mrb[11].mxu1 }
 0x48f   : > { %7065 = vst [vmem:[#allocation81_spill] sm:$0xff] %v6099_v59  ;;  %v6303_v59 = vld [vmem:[#allocation2 + $0xd0] sm:$0xff] }
 0x491   : > { %v6101_v31 = vpop.f32.mrb[12].mxu1 }
 0x492   : > { %7066 = vst [vmem:[#allocation82_spill] sm:$0xff] %v6101_v31  ;;  %v6103_v27 = vpop.f32.mrb[13].mxu1 }
 0x493   : > { %7067 = vst [vmem:[#allocation83_spill] sm:$0xff] %v6103_v27 }
 0x495   : > { %v6105_v34 = vpop.f32.mrb[14].mxu1 }
 0x496   : > { %7068 = vst [vmem:[#allocation84_spill] sm:$0xff] %v6105_v34  ;;  %v6107_v56 = vpop.f32.mrb[15].mxu1 }
 0x497   : > { %7069 = vst [vmem:[#allocation85_spill] sm:$0xff] %v6107_v56  ;;  %v7104_v56 = vld [vmem:[#allocation50_spill] sm:$0xff] }
 0x4aa   : > { %v3944_v24 = vpop.f32.mrb[16].mxu1 }
 0x4ab   : > { %v2313_v54 = vmul.f32 0.088388346, %v3944_v24  ;;  %v2233_v63 = vpop.f32.mrb[17].mxu1 }
 0x4ac   : > { %v2312_v40 = vmul.f32 0.088388346, %v2233_v63 }
 0x4ad   : > { %v6112_v0 = vsel %vm1077_vm1, %v2313_v54, -inf }
 0x4ae   : > { %2363 = vmax.xlane.f32.xlu1 %v6112_v0  ;;  %v3947_v47 = vpop.f32.mrb[18].mxu1  ;;  %v6118_v7 = vsel %vm1076_vm2, %v2312_v40, -inf }
 0x4af   : > { %2361 = vmax.xlane.f32.xlu0 %v6118_v7  ;;  %v2243_v11 = vpop.f32.mrb[19].mxu1  ;;  %v2315_v13 = vmul.f32 0.088388346, %v3947_v47 }
 0x4b0   : > { %v2314_v48 = vmul.f32 0.088388346, %v2243_v11 }
 0x4b1   : > { %v6130_v9 = vsel %vm1079_vm3, %v2315_v13, -inf }
 0x4b2   : > { %v3950_v32 = vpop.f32.mrb[20].mxu1  ;;  %v6124_v41 = vsel %vm1078_vm4, %v2314_v48, -inf }
 0x4b3   : > { %2365 = vmax.xlane.f32.xlu0 %v6124_v41  ;;  %v2253_v44 = vpop.f32.mrb[21].mxu1  ;;  %v2317_v5 = vmul.f32 0.088388346, %v3950_v32 }
 0x4b4   : > { %v2316_v53 = vmul.f32 0.088388346, %v2253_v44 }
 0x4b5   : > { %v6142_v62 = vsel %vm1081_vm6, %v2317_v5, -inf }
 0x4b6   : > { %v3953_v12 = vpop.f32.mrb[22].mxu1  ;;  %v6135_v18 = vsel %vm1080_vm5, %v2316_v53, -inf }
 0x4b7   : > { %2367 = vmax.xlane.f32.xlu0 %v6130_v9  ;;  %2369 = vmax.xlane.f32.xlu1 %v6135_v18  ;;  %v2263_v1 = vpop.f32.mrb[23].mxu1  ;;  %v2319_v22 = vmul.f32 0.088388346, %v3953_v12 }
 0x4b8   : > { %v2318_v30 = vmul.f32 0.088388346, %v2263_v1 }
 0x4b9   : > { %v6154_v47 = vsel %vm1083_vm8, %v2319_v22, -inf }
 0x4ba   : > { %v3956_v58 = vpop.f32.mrb[24].mxu1  ;;  %v6147_v15 = vsel %vm1082_vm7, %v2318_v30, -inf  ;;  %7079 = vst [vmem:[#allocation26_spill] sm:$0xff] %v6154_v47 }
 0x4bb   : > { %2371 = vmax.xlane.f32.xlu0 %v6142_v62  ;;  %2373 = vmax.xlane.f32.xlu1 %v6147_v15  ;;  %v2273_v24 = vpop.f32.mrb[25].mxu1  ;;  %v2321_v63 = vmul.f32 0.088388346, %v3956_v58 }
 0x4bc   : > { %v2320_v54 = vmul.f32 0.088388346, %v2273_v24 }
 0x4bd   : > { %v6166_v53 = vsel %vm1085_vm10, %v2321_v63, -inf }
 0x4be   : > { %v3959_v40 = vpop.f32.mrb[26].mxu1  ;;  %v6159_v11 = vsel %vm1084_vm9, %v2320_v54, -inf  ;;  %7083 = vst [vmem:[#allocation27_spill] sm:$0xff] %v6166_v53 }
 0x4bf   : > { %7081 = vst [vmem:[#allocation25_spill] sm:$0xff] %v6159_v11  ;;  %2375 = vmax.xlane.f32.xlu0 %v6154_v47  ;;  %2377 = vmax.xlane.f32.xlu1 %v6159_v11  ;;  %v2283_v48 = vpop.f32.mrb[27].mxu1  ;;  %v2323_v32 = vmul.f32 0.088388346, %v3959_v40  ;;  %v7090_v40 = vld [vmem:[#allocation39_spill] sm:$0xff]  ;;  %v1642_v47 = vld [vmem:[#allocation3 + $0x28] sm:$0xff] }
 0x4c0   : > { %v2322_v13 = vmul.f32 0.088388346, %v2283_v48  ;;  %vm7091_vm1 = vcmp.le.s32.totalorder %v7070_v33, %v7090_v40  ;;  %v6214_v33 = vld [vmem:[#allocation2 + $0x80] sm:$0xff] }
 0x4c1   : > { %v6178_v22 = vsel %vm1087_vm12, %v2323_v32, -inf }
 0x4c2   : > { %v3962_v4 = vpop.f32.mrb[28].mxu1  ;;  %v6171_v12 = vsel %vm1086_vm11, %v2322_v13, -inf  ;;  %7087 = vst [vmem:[#allocation28_spill] sm:$0xff] %v6178_v22  ;;  %v6255_v13 = vld [vmem:[#allocation2 + $0xa8] sm:$0xff] }
 0x4c3   : > { %7085 = vst [vmem:[#allocation29_spill] sm:$0xff] %v6171_v12  ;;  %2379 = vmax.xlane.f32.xlu0 %v6166_v53  ;;  %2381 = vmax.xlane.f32.xlu1 %v6171_v12  ;;  %v2293_v19 = vpop.f32.mrb[29].mxu1  ;;  %v2325_v1 = vmul.f32 0.088388346, %v3962_v4  ;;  %v1640_v12 = vld [vmem:[#allocation3 + $0x18] sm:$0xff]  ;;  %v1641_v53 = vld [vmem:[#allocation3 + $0x20] sm:$0xff] }
 0x4c4   : > { %v2324_v61 = vmul.f32 0.088388346, %v2293_v19  ;;  %v6237_v19 = vld [vmem:[#allocation2 + $0x98] sm:$0xff] }
 0x4c5   : > { %v6190_v21 = vsel %vm7091_vm1, %v2325_v1, -inf }
 0x4c6   : > { %v6183_v50 = vsel %vm1088_vm13, %v2324_v61, -inf  ;;  %v3965_v6 = vpop.f32.mrb[30].mxu1  ;;  %7092 = vst [vmem:[#allocation31_spill] sm:$0xff] %v6190_v21  ;;  %v6239_v61 = vld [vmem:[#allocation2 + $0xa0] sm:$0xff] }
 0x4c7   : > { %7089 = vst [vmem:[#allocation30_spill] sm:$0xff] %v6183_v50  ;;  %2383 = vmax.xlane.f32.xlu0 %v6178_v22  ;;  %2385 = vmax.xlane.f32.xlu1 %v6183_v50  ;;  %v2303_v24 = vpop.f32.mrb[31].mxu1  ;;  %v2327_v54 = vmul.f32 0.088388346, %v3965_v6 }
 0x4c8   : > { %v2326_v63 = vmul.f32 0.088388346, %v2303_v24 }
 0x4c9   : > { %v6197_v48 = vsel %vm1091_vm0, %v2327_v54, -inf  ;;  %v7097_v54 = vld [vmem:[#allocation43_spill] sm:$0xff] }
 0x4ca   : > { %7094 = vst [vmem:[#allocation32_spill] sm:$0xff] %v6197_v48  ;;  %v6202_v32 = vsel %vm1090_vm15, %v2326_v63, -inf  ;;  %v7098_v63 = vld [vmem:[#allocation45_spill] sm:$0xff] }
 0x4cb   : > { %2387 = vmax.xlane.f32.xlu0 %v6190_v21  ;;  %1669 = vadd.xlane.f32.xlu1 %v5955_v28  ;;  %7096 = vst [vmem:[#allocation33_spill] sm:$0xff] %v6202_v32  ;;  %v6212_v28 = vld [vmem:[#allocation2 + $0x88] sm:$0xff]  ;;  %v7099_v40 = vsub.f32 %v7097_v54, %v7098_v63 }
 0x4cd   : > { %v1477_v57 = vmul.f32 1.442695, %v7099_v40  ;;  %v6275_v40 = vld [vmem:[#allocation2 + $0xb8] sm:$0xff] }
 0x4cf   : > { %2391 = vmax.xlane.f32.xlu0 %v6197_v48  ;;  %2389 = vmax.xlane.f32.xlu1 %v6202_v32  ;;  %4309 = vpow2.f32 %v1477_v57  ;;  %v1489_v32 = vmul.f32 1.442695, %v7119_v55  ;;  %v6355_v48 = vld [vmem:[#allocation2 + $0xe8] sm:$0xff] }
 0x4d0   : > { %7120 = vst [vmem:[#allocation36_spill] sm:$0xff] %v6355_v48 }
 0x4d3   : > { %1671 = vadd.xlane.f32.xlu0 %v5957_v16  ;;  %1673 = vadd.xlane.f32.xlu1 %v5964_v10 }
 0x4d7   : > { %1675 = vadd.xlane.f32.xlu0 %v5967_v17  ;;  %1677 = vadd.xlane.f32.xlu1 %v5976_v8  ;;  %v6227_v17 = vld [vmem:[#allocation2 + $0x90] sm:$0xff]  ;;  %v7101_v8 = vld [vmem:[#allocation44_spill] sm:$0xff] }
 0x4db   : > { %1679 = vadd.xlane.f32.xlu0 %v5978_v35  ;;  %1681 = vadd.xlane.f32.xlu1 %v5988_v29 }
 0x53b   : > { %v2364_v4 = vpop.xlane.xlu1 %2363 }
 0x53c   : > { %v6217_v44 = vmax.f32 %v6212_v28, %v2364_v4  ;;  %v2362_v5 = vpop.xlane.xlu0 %2361  ;;  %v6257_v4 = vld [vmem:[#allocation2 + $0xb0] sm:$0xff] }
 0x53d   : > { %v6220_v16 = vmax.f32 %v6214_v33, %v2362_v5  ;;  %v6277_v5 = vld [vmem:[#allocation2 + $0xc0] sm:$0xff] }
 0x53e   : > { %2973 = vst.msk [vmem:[#allocation2 + $0x88] sm:$0xff] %vm1717_vm14, %v6217_v44  ;;  %2464 = vperm.xlu1 %4275, %v6217_v44  }
 0x53f   : > { %2972 = vst.msk [vmem:[#allocation2 + $0x80] sm:$0xff] %vm1717_vm14, %v6220_v16  ;;  %2459 = vperm.xlu0 %4276, %v6220_v16  }
 0x540   : > { %v2366_v35 = vpop.xlane.xlu0 %2365 }
 0x541   : > { %v6235_v29 = vmax.f32 %v6227_v17, %v2366_v35  ;;  %v7103_v35 = vld [vmem:[#allocation48_spill] sm:$0xff] }
 0x542   : > { %v7105_v43 = vsub.f32 %v7103_v35, %v7104_v56  ;;  %v7107_v35 = vld [vmem:[#allocation47_spill] sm:$0xff] }
 0x543   : > { %2974 = vst.msk [vmem:[#allocation2 + $0x90] sm:$0xff] %vm1717_vm14, %v6235_v29  ;;  %2469 = vperm.xlu1 %4275, %v6235_v29  }
 0x544   : > { %v2368_v30 = vpop.xlane.xlu0 %2367  ;;  %v2370_v58 = vpop.xlane.xlu1 %2369  ;;  %v1481_v27 = vmul.f32 1.442695, %v7105_v43 }
 0x545   : > { %v6247_v6 = vmax.f32 %v6237_v19, %v2368_v30  ;;  %v6250_v24 = vmax.f32 %v6239_v61, %v2370_v58 }
 0x547   : > { %2975 = vst.msk [vmem:[#allocation2 + $0x98] sm:$0xff] %vm1717_vm14, %v6247_v6  ;;  %2976 = vst.msk [vmem:[#allocation2 + $0xa0] sm:$0xff] %vm1717_vm14, %v6250_v24  ;;  %2474 = vperm.xlu0 %4276, %v6247_v6   ;;  %2479 = vperm.xlu1 %4275, %v6250_v24  }
 0x548   : > { %v2372_v30 = vpop.xlane.xlu0 %2371  ;;  %v2374_v58 = vpop.xlane.xlu1 %2373 }
 0x549   : > { %v6270_v54 = vmax.f32 %v6255_v13, %v2372_v30  ;;  %v6273_v63 = vmax.f32 %v6257_v4, %v2374_v58  ;;  %v7100_v58 = vld [vmem:[#allocation42_spill] sm:$0xff] }
 0x54a   : > { %v7102_v10 = vsub.f32 %v7100_v58, %v7101_v8  ;;  %v7106_v8 = vld [vmem:[#allocation46_spill] sm:$0xff] }
 0x54b   : > { %2977 = vst.msk [vmem:[#allocation2 + $0xa8] sm:$0xff] %vm1717_vm14, %v6270_v54  ;;  %2978 = vst.msk [vmem:[#allocation2 + $0xb0] sm:$0xff] %vm1717_vm14, %v6273_v63  ;;  %2484 = vperm.xlu0 %4276, %v6270_v54   ;;  %2489 = vperm.xlu1 %4275, %v6273_v63  }
 0x54c   : > { %v2376_v57 = vpop.xlane.xlu0 %2375  ;;  %v2378_v30 = vpop.xlane.xlu1 %2377  ;;  %v1479_v34 = vmul.f32 1.442695, %v7102_v10  ;;  %v7109_v10 = vld [vmem:[#allocation49_spill] sm:$0xff] }
 0x54d   : > { %v6293_v1 = vmax.f32 %v6275_v40, %v2376_v57  ;;  %v6296_v31 = vmax.f32 %v6277_v5, %v2378_v30  ;;  %v7108_v57 = vsub.f32 %v7106_v8, %v7107_v35  ;;  %v7111_v36 = vsub.f32 %v7109_v10, %v7110_v25  ;;  %v1637_v10 = vld [vmem:[#allocation3] sm:$0xff]  ;;  %v7114_v8 = vld [vmem:[#allocation54_spill] sm:$0xff] }
 0x54e   : > { %4311 = vpow2.f32 %v1479_v34 }
 0x54f   : > { %2979 = vst.msk [vmem:[#allocation2 + $0xb8] sm:$0xff] %vm1717_vm14, %v6293_v1  ;;  %2980 = vst.msk [vmem:[#allocation2 + $0xc0] sm:$0xff] %vm1717_vm14, %v6296_v31  ;;  %2494 = vperm.xlu0 %4276, %v6293_v1   ;;  %2499 = vperm.xlu1 %4275, %v6296_v31   ;;  %v1483_v30 = vmul.f32 1.442695, %v7108_v57  ;;  %4313 = vpow2.f32 %v1481_v27  ;;  %v1485_v23 = vmul.f32 1.442695, %v7111_v36  ;;  %v6341_v36 = vpop.eup %4309 }
 0x550   : > { %v2380_v43 = vpop.xlane.xlu0 %2379  ;;  %v2382_v56 = vpop.xlane.xlu1 %2381  ;;  %v1653_v37 = vmul.f32 %v6341_v36, %v1637_v10  ;;  %v1638_v10 = vld [vmem:[#allocation3 + $0x8] sm:$0xff] }
 0x551   : > { %v6319_v58 = vmax.f32 %v6301_v39, %v2380_v43  ;;  %v6322_v26 = vmax.f32 %v6303_v59, %v2382_v56  ;;  %4315 = vpow2.f32 %v1483_v30  ;;  %v7113_v56 = vld [vmem:[#allocation52_spill] sm:$0xff] }
 0x552   : > { %v7115_v35 = vsub.f32 %v7113_v56, %v7114_v8  ;;  %4317 = vpow2.f32 %v1485_v23  ;;  %v6371_v56 = vld [vmem:[#allocation2 + $0xf8] sm:$0xff]  ;;  %v6373_v8 = vld [vmem:[#allocation2 + $0xf0] sm:$0xff] }
 0x553   : > { %2981 = vst.msk [vmem:[#allocation2 + $0xc8] sm:$0xff] %vm1717_vm14, %v6319_v58  ;;  %2982 = vst.msk [vmem:[#allocation2 + $0xd0] sm:$0xff] %vm1717_vm14, %v6322_v26  ;;  %2504 = vperm.xlu0 %4276, %v6319_v58   ;;  %2509 = vperm.xlu1 %4275, %v6322_v26  }
 0x554   : > { %v2384_v25 = vpop.xlane.xlu0 %2383  ;;  %v2386_v27 = vpop.xlane.xlu1 %2385  ;;  %v1487_v57 = vmul.f32 1.442695, %v7115_v35  ;;  %7122 = vst [vmem:[#allocation38_spill] sm:$0xff] %v6371_v56  ;;  %7123 = vst [vmem:[#allocation39_spill] sm:$0xff] %v6373_v8 }
 0x555   : > { %v6347_v34 = vmax.f32 %v6327_v42, %v2384_v25  ;;  %v6350_v43 = vmax.f32 %v6329_v38, %v2386_v27 }
 0x556   : > { %4319 = vpow2.f32 %v1487_v57 }
 0x557   : > { %7116 = vst [vmem:[#allocation35_spill] sm:$0xff] %v6347_v34  ;;  %2983 = vst.msk [vmem:[#allocation2 + $0xd8] sm:$0xff] %vm1717_vm14, %v6347_v34  ;;  %2514 = vperm.xlu0 %4276, %v6347_v34   ;;  %2519 = vperm.xlu1 %4275, %v6350_v43   ;;  %4321 = vpow2.f32 %v1489_v32 }
 0x558   : > { %2984 = vst.msk [vmem:[#allocation2 + $0xe0] sm:$0xff] %vm1717_vm14, %v6350_v43  ;;  %v2388_v55 = vpop.xlane.xlu0 %2387  ;;  %v1670_v14 = vpop.xlane.xlu1 %1669 }
 0x559   : > { %v6369_v23 = vmax.f32 %v6355_v48, %v2388_v55  ;;  %v1701_v27 = vadd.f32 %v1670_v14, %v1653_v37  ;;  %v6375_v35 = vpop.eup %4311  ;;  %v1639_v55 = vld [vmem:[#allocation3 + $0x10] sm:$0xff] }
 0x55a   : > { %v4314_v57 = vpop.eup %4313  ;;  %v1654_v30 = vmul.f32 %v6375_v35, %v1638_v10 }
 0x55b   : > { %7121 = vst [vmem:[#allocation37_spill] sm:$0xff] %v6369_v23  ;;  %2985 = vst.msk [vmem:[#allocation2 + $0xe8] sm:$0xff] %vm1717_vm14, %v6369_v23  ;;  %2524 = vperm.xlu0 %4276, %v6369_v23   ;;  %v4316_v21 = vpop.eup %4315 }
 0x55c   : > { %1718 = vst.msk [vmem:[#allocation3] sm:$0xff] %vm1717_vm14, %v1701_v27  ;;  %v2392_v37 = vpop.xlane.xlu0 %2391  ;;  %v2390_v32 = vpop.xlane.xlu1 %2389  ;;  %v1656_v27 = vmul.f32 %v4316_v21, %v1640_v12  ;;  %v7133_v12 = vld [vmem:[#allocation62_spill] sm:$0xff] }
 0x55d   : > { %v6384_v14 = vmax.f32 %v6371_v56, %v2392_v37  ;;  %v6387_v25 = vmax.f32 %v6373_v8, %v2390_v32  ;;  %v1655_v37 = vmul.f32 %v4314_v57, %v1639_v55  ;;  %v4318_v32 = vpop.eup %4317 }
 0x55e   : > { %v1657_v8 = vmul.f32 %v4318_v32, %v1641_v53 }
 0x55f   : > { %7124 = vst [vmem:[#allocation41_spill] sm:$0xff] %v6384_v14  ;;  %7125 = vst [vmem:[#allocation40_spill] sm:$0xff] %v6387_v25  ;;  %2534 = vperm.xlu0 %4276, %v6384_v14   ;;  %2529 = vperm.xlu1 %4275, %v6387_v25  }
 0x560   : > { %2987 = vst.msk [vmem:[#allocation2 + $0xf8] sm:$0xff] %vm1717_vm14, %v6384_v14  ;;  %2986 = vst.msk [vmem:[#allocation2 + $0xf0] sm:$0xff] %vm1717_vm14, %v6387_v25  ;;  %v1672_v10 = vpop.xlane.xlu0 %1671  ;;  %v1674_v22 = vpop.xlane.xlu1 %1673  ;;  %v1643_v25 = vld [vmem:[#allocation3 + $0x30] sm:$0xff] }
 0x561   : > { %v1702_v50 = vadd.f32 %v1672_v10, %v1654_v30  ;;  %v1703_v56 = vadd.f32 %v1674_v22, %v1655_v37  ;;  %v4320_v23 = vpop.eup %4319 }
 0x562   : > { %v4322_v48 = vpop.eup %4321  ;;  %v1658_v30 = vmul.f32 %v4320_v23, %v1642_v47  ;;  %v7126_v47 = vld [vmem:[#allocation56_spill] sm:$0xff] }
 0x563   : > { %1719 = vst.msk [vmem:[#allocation3 + $0x8] sm:$0xff] %vm1717_vm14, %v1702_v50  ;;  %1720 = vst.msk [vmem:[#allocation3 + $0x10] sm:$0xff] %vm1717_vm14, %v1703_v56  ;;  %v1659_v22 = vmul.f32 %v4322_v48, %v1643_v25  ;;  %v7138_v56 = vld [vmem:[#allocation64_spill] sm:$0xff] }
 0x564   : > { %v1676_v11 = vpop.xlane.xlu0 %1675  ;;  %v1678_v14 = vpop.xlane.xlu1 %1677 }
 0x565   : > { %v1704_v55 = vadd.f32 %v1676_v11, %v1656_v27  ;;  %v1705_v34 = vadd.f32 %v1678_v14, %v1657_v8  ;;  %v7141_v27 = vld [vmem:[#allocation65_spill] sm:$0xff] }
 0x567   : > { %1721 = vst.msk [vmem:[#allocation3 + $0x18] sm:$0xff] %vm1717_vm14, %v1704_v55  ;;  %1722 = vst.msk [vmem:[#allocation3 + $0x20] sm:$0xff] %vm1717_vm14, %v1705_v34  ;;  %v7142_v55 = vld [vmem:[#allocation67_spill] sm:$0xff] }
 0x568   : > { %v1680_v37 = vpop.xlane.xlu0 %1679  ;;  %v1682_v10 = vpop.xlane.xlu1 %1681 }
 0x569   : > { %v1706_v50 = vadd.f32 %v1680_v37, %v1658_v30  ;;  %v1707_v42 = vadd.f32 %v1682_v10, %v1659_v22  ;;  %v7143_v30 = vsub.f32 %v7141_v27, %v7142_v55 }
 0x56b   : > { %1723 = vst.msk [vmem:[#allocation3 + $0x28] sm:$0xff] %vm1717_vm14, %v1706_v50  ;;  %1724 = vst.msk [vmem:[#allocation3 + $0x30] sm:$0xff] %vm1717_vm14, %v1707_v42  ;;  %v7127_v42 = vld [vmem:[#allocation58_spill] sm:$0xff]  ;;  %v1499_v22 = vmul.f32 1.442695, %v7143_v30  ;;  %v7147_v50 = vld [vmem:[#allocation69_spill] sm:$0xff] }
 0x56c   : > { %v7128_v11 = vsub.f32 %v7126_v47, %v7127_v42  ;;  %v7148_v47 = vld [vmem:[#allocation71_spill] sm:$0xff] }
 0x56d   : > { %v7149_v42 = vsub.f32 %v7147_v50, %v7148_v47 }
 0x57e   : > { %1685 = vadd.xlane.f32.xlu0 %v5996_v3  ;;  %v1493_v3 = vmul.f32 1.442695, %v7128_v11  ;;  %v1503_v11 = vmul.f32 1.442695, %v7149_v42 }
 0x580   : > { %4323 = vpow2.f32 %v1493_v3 }
 0x582   : > { %1687 = vadd.xlane.f32.xlu0 %v6001_v49  ;;  %v7129_v49 = vld [vmem:[#allocation57_spill] sm:$0xff] }
 0x583   : > { %1683 = vadd.xlane.f32.xlu1 %v5990_v45  ;;  %v7130_v45 = vld [vmem:[#allocation59_spill] sm:$0xff] }
 0x584   : > { %v7131_v53 = vsub.f32 %v7129_v49, %v7130_v45  ;;  %v7151_v49 = vld [vmem:[#allocation73_spill] sm:$0xff] }
 0x586   : > { %1691 = vadd.xlane.f32.xlu0 %v6007_v20  ;;  %v1491_v20 = vmul.f32 1.442695, %v7131_v53 }
 0x587   : > { %1689 = vadd.xlane.f32.xlu1 %v6003_v60  ;;  %v7132_v60 = vld [vmem:[#allocation60_spill] sm:$0xff] }
 0x588   : > { %4325 = vpow2.f32 %v1491_v20 }
 0x58a   : > { %1695 = vadd.xlane.f32.xlu0 %v6018_v2  ;;  %v7134_v2 = vsub.f32 %v7132_v60, %v7133_v12  ;;  %v6441_v3 = vpop.eup %4323  ;;  %v7154_v12 = vsub.f32 %v6214_v33, %v6220_v16  ;;  %v7157_v33 = vsub.f32 %v6257_v4, %v6273_v63 }
 0x58b   : > { %1693 = vadd.xlane.f32.xlu1 %v6010_v52  ;;  %v7135_v52 = vld [vmem:[#allocation61_spill] sm:$0xff] }
 0x58c   : > { %v1497_v34 = vmul.f32 1.442695, %v7134_v2  ;;  %v2425_v2 = vmul.f32 1.442695, %v7154_v12  ;;  %v2437_v16 = vmul.f32 1.442695, %v7157_v33 }
 0x58e   : > { %1699 = vadd.xlane.f32.xlu0 %v6024_v46  ;;  %4327 = vpow2.f32 %v1497_v34  ;;  %v7155_v34 = vsub.f32 %v6239_v61, %v6250_v24 }
 0x58f   : > { %1697 = vadd.xlane.f32.xlu1 %v6020_v51  ;;  %v7136_v51 = vld [vmem:[#allocation63_spill] sm:$0xff] }
 0x590   : > { %v7137_v46 = vsub.f32 %v7135_v52, %v7136_v51  ;;  %v2433_v52 = vmul.f32 1.442695, %v7155_v34  ;;  %v7156_v51 = vsub.f32 %v6227_v17, %v6235_v29  ;;  %v7159_v17 = vsub.f32 %v6277_v5, %v6296_v31 }
 0x591   : > { %v7161_v31 = vsub.f32 %v6303_v59, %v6322_v26  ;;  %v7163_v26 = vsub.f32 %v6329_v38, %v6350_v43  ;;  %v7164_v38 = vsub.f32 %v6301_v39, %v6319_v58  ;;  %v7165_v58 = vld [vmem:[#allocation34_spill] sm:$0xff] }
 0x592   : > { %v1495_v25 = vmul.f32 1.442695, %v7137_v46  ;;  %v2429_v46 = vmul.f32 1.442695, %v7156_v51  ;;  %v2441_v29 = vmul.f32 1.442695, %v7159_v17 }
 0x593   : > { %v2445_v5 = vmul.f32 1.442695, %v7161_v31  ;;  %v2449_v59 = vmul.f32 1.442695, %v7163_v26  ;;  %v2443_v43 = vmul.f32 1.442695, %v7164_v38 }
 0x594   : > { %4329 = vpow2.f32 %v1495_v25  ;;  %v7158_v25 = vsub.f32 %v6237_v19, %v6247_v6  ;;  %v7170_v17 = vld [vmem:[#allocation36_spill] sm:$0xff]  ;;  %v7176_v38 = vld [vmem:[#allocation30_spill] sm:$0xff] }
 0x5a0   : > { %1752 = vperm.xlu1 %4275, %v6341_v36   ;;  %v7139_v36 = vld [vmem:[#allocation66_spill] sm:$0xff] }
 0x5a1   : > { %v7140_v8 = vsub.f32 %v7138_v56, %v7139_v36  ;;  %v2431_v56 = vmul.f32 1.442695, %v7158_v25  ;;  %v7160_v36 = vsub.f32 %v6255_v13, %v6270_v54 }
 0x5a3   : > { %v1501_v14 = vmul.f32 1.442695, %v7140_v8  ;;  %v2435_v8 = vmul.f32 1.442695, %v7160_v36 }
 0x5a4   : > { %1757 = vperm.xlu0 %4276, %v6375_v35   ;;  %1762 = vperm.xlu1 %4275, %v4314_v57   ;;  %v7144_v35 = vld [vmem:[#allocation68_spill] sm:$0xff]  ;;  %v7145_v57 = vld [vmem:[#allocation70_spill] sm:$0xff] }
 0x5a5   : > { %4331 = vpow2.f32 %v1501_v14  ;;  %v7146_v37 = vsub.f32 %v7144_v35, %v7145_v57 }
 0x5a6   : > { %4333 = vpow2.f32 %v1499_v22  ;;  %v7162_v22 = vsub.f32 %v6275_v40, %v6293_v1 }
 0x5a7   : > { %v1505_v10 = vmul.f32 1.442695, %v7146_v37 }
 0x5a8   : > { %1772 = vperm.xlu0 %4276, %v4318_v32   ;;  %1767 = vperm.xlu1 %4275, %v4316_v21   ;;  %v6443_v21 = vpop.eup %4325  ;;  %v7150_v32 = vld [vmem:[#allocation72_spill] sm:$0xff]  ;;  %v2439_v35 = vmul.f32 1.442695, %v7162_v22 }
 0x5a9   : > { %4335 = vpow2.f32 %v1505_v10  ;;  %v7152_v45 = vsub.f32 %v7150_v32, %v7151_v49  ;;  %v6453_v20 = vpop.eup %4327 }
 0x5aa   : > { %4337 = vpow2.f32 %v1503_v11  ;;  %v6455_v60 = vpop.eup %4329 }
 0x5ab   : > { %v1507_v53 = vmul.f32 1.442695, %v7152_v45 }
 0x5ac   : > { %1782 = vperm.xlu0 %4276, %v4322_v48   ;;  %1777 = vperm.xlu1 %4275, %v4320_v23   ;;  %v7153_v48 = vsub.f32 %v6212_v28, %v6217_v44 }
 0x5ad   : > { %4339 = vpow2.f32 %v1507_v53 }
 0x5ae   : > { %v2427_v23 = vmul.f32 1.442695, %v7153_v48  ;;  %v7166_v48 = vld [vmem:[#allocation35_spill] sm:$0xff] }
 0x5af   : > { %v6465_v28 = vpop.eup %4331 }
 0x5b0   : > { %1792 = vperm.xlu0 %4276, %v6441_v3   ;;  %1787 = vperm.xlu1 %4275, %v6443_v21   ;;  %4341 = vpow2.f32 %v2427_v23  ;;  %v6467_v44 = vpop.eup %4333  ;;  %v7167_v23 = vsub.f32 %v7165_v58, %v7166_v48  ;;  %v7177_v58 = vld [vmem:[#allocation31_spill] sm:$0xff] }
 0x5b1   : > { %4343 = vpow2.f32 %v2425_v2 }
 0x5b2   : > { %4345 = vpow2.f32 %v2433_v52  ;;  %v2447_v12 = vmul.f32 1.442695, %v7167_v23 }
 0x5b3   : > { %v6477_v61 = vpop.eup %4335  ;;  %4347 = vpow2.f32 %v2429_v46  ;;  %v7168_v46 = vld [vmem:[#allocation26_spill] sm:$0xff] }
 0x5b4   : > { %1802 = vperm.xlu0 %4276, %v6453_v20   ;;  %1797 = vperm.xlu1 %4275, %v6455_v60   ;;  %v6479_v24 = vpop.eup %4337  ;;  %4349 = vpow2.f32 %v2437_v16  ;;  %v7169_v16 = vld [vmem:[#allocation25_spill] sm:$0xff] }
 0x5b5   : > { %4351 = vpow2.f32 %v2431_v56 }
 0x5b6   : > { %4353 = vpow2.f32 %v2441_v29  ;;  %v7171_v29 = vld [vmem:[#allocation37_spill] sm:$0xff] }
 0x5b7   : > { %v6489_v63 = vpop.eup %4339  ;;  %4355 = vpow2.f32 %v2435_v8 }
 0x5b8   : > { %1812 = vperm.xlu0 %4276, %v6465_v28   ;;  %1807 = vperm.xlu1 %4275, %v6467_v44  }
 0x5ba   : > { %v6495_v6 = vpop.eup %4341 }
 0x5bb   : > { %v6503_v54 = vpop.eup %4343 }
 0x5bc   : > { %1822 = vperm.xlu0 %4276, %v6477_v61   ;;  %1817 = vperm.xlu1 %4275, %v6479_v24   ;;  %v6505_v30 = vpop.eup %4345 }
 0x5bd   : > { %v2465_v4 = vpop.permute.xlu1 %2464  ;;  %v6516_v37 = vpop.eup %4347 }
 0x5be   : > { %v2538_v14 = vsub.f32 %v6112_v0, %v2465_v4  ;;  %v2460_v19 = vpop.permute.xlu0 %2459  ;;  %v7172_v4 = vsub.f32 %v7170_v17, %v7171_v29 }
 0x5bf   : > { %v2537_v27 = vsub.f32 %v6118_v7, %v2460_v19 }
 0x5c0   : > { %v2555_v55 = vmul.f32 1.442695, %v2538_v14  ;;  %2706 = vperm.xlu0 %4276, %v6495_v6   ;;  %1827 = vperm.xlu1 %4275, %v6489_v63   ;;  %v2451_v36 = vmul.f32 1.442695, %v7172_v4 }
 0x5c1   : > { %v2553_v13 = vmul.f32 1.442695, %v2537_v27 }
 0x5c2   : > { %v2470_v0 = vpop.permute.xlu1 %2469 }
 0x5c3   : > { %4357 = vpow2.f32 %v2553_v13  ;;  %v2539_v7 = vsub.f32 %v6124_v41, %v2470_v0  ;;  %v6518_v41 = vpop.eup %4349  ;;  %v7174_v0 = vld [vmem:[#allocation29_spill] sm:$0xff] }
 0x5c4   : > { %4359 = vpow2.f32 %v2555_v55  ;;  %2721 = vperm.xlu0 %4276, %v6505_v30   ;;  %2701 = vperm.xlu1 %4275, %v6503_v54   ;;  %v6527_v11 = vpop.eup %4351 }
 0x5c5   : > { %4361 = vpow2.f32 %v2445_v5  ;;  %v2557_v57 = vmul.f32 1.442695, %v2539_v7  ;;  %v6529_v45 = vpop.eup %4353  ;;  %v7173_v5 = vld [vmem:[#allocation27_spill] sm:$0xff] }
 0x5c6   : > { %v2475_v10 = vpop.permute.xlu0 %2474  ;;  %v2480_v50 = vpop.permute.xlu1 %2479 }
 0x5c7   : > { %4363 = vpow2.f32 %v2557_v57  ;;  %v2540_v1 = vsub.f32 %v6130_v9, %v2475_v10  ;;  %v2541_v40 = vsub.f32 %v6135_v18, %v2480_v50  ;;  %v6533_v53 = vpop.eup %4355 }
 0x5c8   : > { %4365 = vpow2.f32 %v2439_v35  ;;  %2731 = vperm.xlu0 %4276, %v6518_v41   ;;  %2711 = vperm.xlu1 %4275, %v6516_v37  }
 0x5c9   : > { %4367 = vpow2.f32 %v2449_v59  ;;  %v2559_v47 = vmul.f32 1.442695, %v2540_v1  ;;  %v2561_v42 = vmul.f32 1.442695, %v2541_v40  ;;  %v7175_v1 = vld [vmem:[#allocation28_spill] sm:$0xff] }
 0x5ca   : > { %v2485_v32 = vpop.permute.xlu0 %2484  ;;  %v2490_v49 = vpop.permute.xlu1 %2489 }
 0x5cb   : > { %4369 = vpow2.f32 %v2559_v47  ;;  %v2542_v9 = vsub.f32 %v6142_v62, %v2485_v32  ;;  %v2543_v18 = vsub.f32 %v6147_v15, %v2490_v49 }
 0x5cc   : > { %4371 = vpow2.f32 %v2561_v42  ;;  %2741 = vperm.xlu0 %4276, %v6529_v45   ;;  %2716 = vperm.xlu1 %4275, %v6527_v11  }
 0x5cd   : > { %v6537_v39 = vpop.eup %4357  ;;  %4373 = vpow2.f32 %v2443_v43  ;;  %v2563_v2 = vmul.f32 1.442695, %v2542_v9  ;;  %v2565_v34 = vmul.f32 1.442695, %v2543_v18 }
 0x5ce   : > { %v6542_v52 = vpop.eup %4359  ;;  %3998 = vmatprep.mubr.f32.mxu0 %v6537_v39  ;;  %v2495_v62 = vpop.permute.xlu0 %2494 }
 0x5cf   : > { %v2500_v15 = vpop.permute.xlu1 %2499  ;;  %v6545_v51 = vpop.eup %4361  ;;  %4375 = vpow2.f32 %v2563_v2  ;;  %v2544_v33 = vsub.f32 %v7168_v46, %v2495_v62  ;;  %3999 = vmatmul.mubr.f32.vlgmr.msra.gmra.mrb[16].mxu0 %v6542_v52  ;;  %v7178_v46 = vld [vmem:[#allocation32_spill] sm:$0xff] }
 0x5d0   : > { %v2545_v25 = vsub.f32 %v7169_v16, %v2500_v15  ;;  %4377 = vpow2.f32 %v2565_v34  ;;  %2751 = vperm.xlu0 %4276, %v6545_v51   ;;  %2726 = vperm.xlu1 %4275, %v6533_v53   ;;  %v7179_v16 = vld [vmem:[#allocation33_spill] sm:$0xff] }
 0x5d1   : > { %v6552_v56 = vpop.eup %4363  ;;  %4379 = vpow2.f32 %v2447_v12  ;;  %v2567_v8 = vmul.f32 1.442695, %v2544_v33 }
 0x5d2   : > { %v2569_v14 = vmul.f32 1.442695, %v2545_v25  ;;  %v6557_v19 = vpop.eup %4365  ;;  %v2505_v27 = vpop.permute.xlu0 %2504  ;;  %4001 = vmatprep.mubr.f32.mxu0 %v6552_v56 }
 0x5d3   : > { %v2510_v55 = vpop.permute.xlu1 %2509  ;;  %v6560_v31 = vpop.eup %4367  ;;  %4381 = vpow2.f32 %v2567_v8  ;;  %v2546_v13 = vsub.f32 %v7173_v5, %v2505_v27 }
 0x5d4   : > { %v2547_v7 = vsub.f32 %v7174_v0, %v2510_v55  ;;  %4383 = vpow2.f32 %v2569_v14  ;;  %2761 = vperm.xlu0 %4276, %v6560_v31   ;;  %2736 = vperm.xlu1 %4275, %v6557_v19  }
 0x5d5   : > { %v4370_v22 = vpop.eup %4369  ;;  %4385 = vpow2.f32 %v2451_v36  ;;  %v2571_v35 = vmul.f32 1.442695, %v2546_v13  ;;  %v1645_v13 = vld [vmem:[#allocation3 + $0x40] sm:$0xff] }
 0x5d6   : > { %v2573_v26 = vmul.f32 1.442695, %v2547_v7  ;;  %v4372_v59 = vpop.eup %4371  ;;  %v2515_v57 = vpop.permute.xlu0 %2514  ;;  %4002 = vmatmul.mubr.f32.gmra.mrb[18].mxu0 %v4370_v22  ;;  %v1661_v0 = vmul.f32 %v6441_v3, %v1645_v13  ;;  %v1736_v13 = vld [vmem:[#allocation4 + $0x10] sm:$0xff] }
 0x5d7   : > { %v2520_v10 = vpop.permute.xlu1 %2519  ;;  %v6566_v50 = vpop.eup %4373  ;;  %4387 = vpow2.f32 %v2571_v35  ;;  %v2548_v40 = vsub.f32 %v7175_v1, %v2515_v57  ;;  %4004 = vmatprep.mubr.f32.mxu0 %v4372_v59  ;;  %v1646_v35 = vld [vmem:[#allocation3 + $0x48] sm:$0xff]  ;;  %v1644_v57 = vld [vmem:[#allocation3 + $0x38] sm:$0xff]  ;;  %v1647_v1 = vld [vmem:[#allocation3 + $0x50] sm:$0xff] }
 0x5d8   : > { %v2549_v43 = vsub.f32 %v7176_v38, %v2520_v10  ;;  %4389 = vpow2.f32 %v2573_v26  ;;  %2746 = vperm.xlu1 %4275, %v6566_v50  }
 0x5d9   : > { %v4376_v47 = vpop.eup %4375  ;;  %v2575_v42 = vmul.f32 1.442695, %v2548_v40 }
 0x5da   : > { %v2577_v32 = vmul.f32 1.442695, %v2549_v43  ;;  %v4378_v49 = vpop.eup %4377  ;;  %v2525_v9 = vpop.permute.xlu0 %2524  ;;  %4005 = vmatmul.mubr.f32.gmra.mrb[20].mxu0 %v4376_v47  ;;  %v1650_v43 = vld [vmem:[#allocation3 + $0x68] sm:$0xff] }
 0x5db   : > { %v6571_v18 = vpop.eup %4379  ;;  %4391 = vpow2.f32 %v2575_v42  ;;  %v2550_v48 = vsub.f32 %v7177_v58, %v2525_v9  ;;  %4007 = vmatprep.mubr.f32.mxu0 %v4378_v49  ;;  %v1649_v42 = vld [vmem:[#allocation3 + $0x60] sm:$0xff]  ;;  %v1652_v58 = vld [vmem:[#allocation3 + $0x78] sm:$0xff] }
 0x5dc   : > { %4393 = vpow2.f32 %v2577_v32  ;;  %2756 = vperm.xlu1 %4275, %v6571_v18  }
 0x5dd   : > { %v4382_v23 = vpop.eup %4381  ;;  %v2579_v12 = vmul.f32 1.442695, %v2550_v48 }
 0x5de   : > { %v4384_v2 = vpop.eup %4383  ;;  %v2535_v34 = vpop.permute.xlu0 %2534  ;;  %4008 = vmatmul.mubr.f32.gmra.mrb[22].mxu0 %v4382_v23 }
 0x5df   : > { %v2530_v62 = vpop.permute.xlu1 %2529  ;;  %v6575_v15 = vpop.eup %4385  ;;  %4395 = vpow2.f32 %v2579_v12  ;;  %v2552_v33 = vsub.f32 %v7178_v46, %v2535_v34  ;;  %4010 = vmatprep.mubr.f32.mxu0 %v4384_v2  ;;  %v7181_v34 = vld [vmem:[#allocation40_spill] sm:$0xff] }
 0x5e0   : > { %v2551_v25 = vsub.f32 %v7179_v16, %v2530_v62  ;;  %2766 = vperm.xlu1 %4275, %v6575_v15  }
 0x5e1   : > { %v4388_v17 = vpop.eup %4387  ;;  %v2583_v29 = vmul.f32 1.442695, %v2552_v33  ;;  %v1668_v33 = vmul.f32 %v6489_v63, %v1652_v58 }
 0x5e2   : > { %v2581_v4 = vmul.f32 1.442695, %v2551_v25  ;;  %v4390_v36 = vpop.eup %4389  ;;  %4011 = vmatmul.mubr.f32.gmra.mrb[24].mxu0 %v4388_v17 }
 0x5e3   : > { %4397 = vpow2.f32 %v2583_v29  ;;  %4013 = vmatprep.mubr.f32.mxu0 %v4390_v36  ;;  %v7183_v29 = vld [vmem:[#allocation38_spill] sm:$0xff] }
 0x5e4   : > { %4399 = vpow2.f32 %v2581_v4  ;;  %v7184_v4 = vld [vmem:[#allocation41_spill] sm:$0xff] }
 0x5e5   : > { %v4392_v8 = vpop.eup %4391 }
 0x5e6   : > { %v4394_v14 = vpop.eup %4393  ;;  %4014 = vmatmul.mubr.f32.gmra.mrb[26].mxu0 %v4392_v8 }
 0x5e7   : > { %4016 = vmatprep.mubr.f32.mxu0 %v4394_v14 }
 0x5e9   : > { %v4396_v27 = vpop.eup %4395 }
 0x5ea   : > { %4017 = vmatmul.mubr.f32.gmra.mrb[28].mxu0 %v4396_v27 }
 0x5ed   : > { %v4398_v55 = vpop.eup %4397 }
 0x5ee   : > { %v4400_v5 = vpop.eup %4399 }
 0x5ef   : > { %4019 = vmatprep.mubr.f32.mxu0 %v4400_v5 }
 0x5f0   : > { %4020 = vmatmul.mubr.f32.gmra.mrb[30].mxu0 %v4398_v55 }
 0x5f3   : > { %2618 = vadd.xlane.f32.xlu0 %v6537_v39  ;;  %v1662_v39 = vmul.f32 %v6455_v60, %v1646_v35  ;;  %v1663_v60 = vmul.f32 %v6453_v20, %v1647_v1  ;;  %v1651_v20 = vld [vmem:[#allocation3 + $0x70] sm:$0xff] }
 0x5f4   : > { %v1667_v16 = vmul.f32 %v6477_v61, %v1651_v20  ;;  %v7186_v61 = vld [vmem:[#allocation75_spill] sm:$0xff]  ;;  %v7191_v20 = vld [vmem:[#allocation77_spill] sm:$0xff] }
 0x5f7   : > { %2624 = vadd.xlane.f32.xlu0 %v4370_v22  ;;  %v1660_v22 = vmul.f32 %v6443_v21, %v1644_v57  ;;  %v1738_v57 = vld [vmem:[#allocation4 + $0x20] sm:$0xff] }
 0x5fb   : > { %2622 = vadd.xlane.f32.xlu0 %v6552_v56 }
 0x5ff   : > { %2628 = vadd.xlane.f32.xlu0 %v4376_v47 }
 0x603   : > { %2632 = vadd.xlane.f32.xlu0 %v4382_v23 }
 0x604   : > { %2620 = vadd.xlane.f32.xlu1 %v6542_v52  ;;  %v1648_v52 = vld [vmem:[#allocation3 + $0x58] sm:$0xff] }
 0x605   : > { %v1664_v40 = vmul.f32 %v6467_v44, %v1648_v52  ;;  %v1665_v44 = vmul.f32 %v6465_v28, %v1649_v42  ;;  %v7188_v52 = vld [vmem:[#allocation74_spill] sm:$0xff] }
 0x606   : > { %v7190_v42 = vld [vmem:[#allocation22_spill] sm:$0xff] }
 0x607   : > { %2636 = vadd.xlane.f32.xlu0 %v4388_v17 }
 0x608   : > { %2626 = vadd.xlane.f32.xlu1 %v4372_v59 }
 0x60b   : > { %v1686_v7 = vpop.xlane.xlu0 %1685  ;;  %2640 = vadd.xlane.f32.xlu0 %v4392_v8 }
 0x60c   : > { %v1709_v26 = vadd.f32 %v1686_v7, %v1661_v0  ;;  %2630 = vadd.xlane.f32.xlu1 %v4378_v49  ;;  %v1666_v49 = vmul.f32 %v6479_v24, %v1650_v43  ;;  %v7189_v43 = vld [vmem:[#allocation24_spill] sm:$0xff] }
 0x60e   : > { %1726 = vst.msk [vmem:[#allocation3 + $0x40] sm:$0xff] %vm1717_vm14, %v1709_v26 }
 0x60f   : > { %v1688_v56 = vpop.xlane.xlu0 %1687  ;;  %2644 = vadd.xlane.f32.xlu0 %v4396_v27 }
 0x610   : > { %v1710_v10 = vadd.f32 %v1688_v56, %v1662_v39  ;;  %2634 = vadd.xlane.f32.xlu1 %v4384_v2  ;;  %v1684_v59 = vpop.xlane.xlu1 %1683  ;;  %v7180_v2 = vld [vmem:[#allocation39_spill] sm:$0xff]  ;;  %v7187_v39 = vld [vmem:[#allocation21_spill] sm:$0xff] }
 0x611   : > { %v1708_v3 = vadd.f32 %v1684_v59, %v1660_v22  ;;  %v7182_v62 = vsub.f32 %v7180_v2, %v7181_v34  ;;  %v1737_v22 = vld [vmem:[#allocation4 + $0x18] sm:$0xff]  ;;  %v7192_v34 = vld [vmem:[#allocation23_spill] sm:$0xff] }
 0x612   : > { %1727 = vst.msk [vmem:[#allocation3 + $0x48] sm:$0xff] %vm1717_vm14, %v1710_v10  ;;  %v1741_v2 = vld [vmem:[#allocation4 + $0x38] sm:$0xff] }
 0x613   : > { %1725 = vst.msk [vmem:[#allocation3 + $0x38] sm:$0xff] %vm1717_vm14, %v1708_v3  ;;  %v1692_v38 = vpop.xlane.xlu0 %1691  ;;  %2648 = vadd.xlane.f32.xlu0 %v4398_v55  ;;  %v2453_v46 = vmul.f32 1.442695, %v7182_v62  ;;  %v1735_v55 = vld [vmem:[#allocation4 + $0x8] sm:$0xff] }
 0x614   : > { %v1712_v47 = vadd.f32 %v1692_v38, %v1664_v40  ;;  %2638 = vadd.xlane.f32.xlu1 %v4390_v36  ;;  %v1690_v21 = vpop.xlane.xlu1 %1689  ;;  %v7185_v36 = vsub.f32 %v7183_v29, %v7184_v4  ;;  %v1743_v29 = vld [vmem:[#allocation4 + $0x48] sm:$0xff]  ;;  %v7194_v4 = vld [vmem:[#allocation76_spill] sm:$0xff] }
 0x615   : > { %v1711_v32 = vadd.f32 %v1690_v21, %v1663_v60  ;;  %4401 = vpow2.f32 %v2453_v46  ;;  %v1740_v60 = vld [vmem:[#allocation4 + $0x30] sm:$0xff]  ;;  %v1739_v21 = vld [vmem:[#allocation4 + $0x28] sm:$0xff] }
 0x616   : > { %1729 = vst.msk [vmem:[#allocation3 + $0x58] sm:$0xff] %vm1717_vm14, %v1712_v47  ;;  %v2455_v8 = vmul.f32 1.442695, %v7185_v36 }
 0x617   : > { %1728 = vst.msk [vmem:[#allocation3 + $0x50] sm:$0xff] %vm1717_vm14, %v1711_v32  ;;  %v1696_v9 = vpop.xlane.xlu0 %1695 }
 0x618   : > { %v1714_v48 = vadd.f32 %v1696_v9, %v1666_v49  ;;  %2642 = vadd.xlane.f32.xlu1 %v4394_v14  ;;  %v1694_v23 = vpop.xlane.xlu1 %1693  ;;  %v1734_v14 = vld [vmem:[#allocation4] sm:$0xff]  ;;  %4403 = vpow2.f32 %v2455_v8 }
 0x619   : > { %v1713_v12 = vadd.f32 %v1694_v23, %v1665_v44  ;;  %v1742_v23 = vld [vmem:[#allocation4 + $0x40] sm:$0xff] }
 0x61a   : > { %1731 = vst.msk [vmem:[#allocation3 + $0x68] sm:$0xff] %vm1717_vm14, %v1714_v48 }
 0x61b   : > { %1730 = vst.msk [vmem:[#allocation3 + $0x60] sm:$0xff] %vm1717_vm14, %v1713_v12  ;;  %v1700_v24 = vpop.xlane.xlu0 %1699 }
 0x61c   : > { %v1716_v28 = vadd.f32 %v1700_v24, %v1668_v33  ;;  %2646 = vadd.xlane.f32.xlu1 %v4400_v5  ;;  %v1698_v25 = vpop.xlane.xlu1 %1697 }
 0x61d   : > { %v1715_v17 = vadd.f32 %v1698_v25, %v1667_v16  ;;  %v7193_v25 = vld [vmem:[#allocation79_spill] sm:$0xff] }
 0x61e   : > { %1733 = vst.msk [vmem:[#allocation3 + $0x78] sm:$0xff] %vm1717_vm14, %v1716_v28  ;;  %v1744_v28 = vld [vmem:[#allocation4 + $0x50] sm:$0xff] }
 0x61f   : > { %1732 = vst.msk [vmem:[#allocation3 + $0x70] sm:$0xff] %vm1717_vm14, %v1715_v17  ;;  %v6610_v1 = vpop.eup %4401 }
 0x620   : > { %v1753_v63 = vpop.permute.xlu1 %1752 }
 0x621   : > { %v1830_v27 = vmul.f32 %v1753_v63, %v1734_v14 }
 0x622   : > { %v6615_v9 = vpop.eup %4403 }
 0x623   : > { %v1991_v0 = vadd.f32 %v7186_v61, %v1830_v27  ;;  %v1758_v5 = vpop.permute.xlu0 %1757 }
 0x624   : > { %v1831_v7 = vmul.f32 %v1758_v5, %v1735_v55  ;;  %v1763_v35 = vpop.permute.xlu1 %1762  ;;  %v1746_v55 = vld [vmem:[#allocation4 + $0x60] sm:$0xff]  ;;  %v7196_v5 = vld [vmem:[#allocation78_spill] sm:$0xff] }
 0x625   : > { %2007 = vst [vmem:[#allocation4] sm:$0xff] %v1991_v0  ;;  %v1832_v26 = vmul.f32 %v1763_v35, %v1736_v13  ;;  %v7195_v13 = vld [vmem:[#allocation81_spill] sm:$0xff]  ;;  %v1745_v0 = vld [vmem:[#allocation4 + $0x58] sm:$0xff] }
 0x626   : > { %v1992_v56 = vadd.f32 %v7187_v39, %v1831_v7 }
 0x627   : > { %v1993_v10 = vadd.f32 %v7188_v52, %v1832_v26  ;;  %v1773_v59 = vpop.permute.xlu0 %1772 }
 0x628   : > { %2008 = vst [vmem:[#allocation4 + $0x8] sm:$0xff] %v1992_v56  ;;  %v1834_v3 = vmul.f32 %v1773_v59, %v1738_v57  ;;  %v1768_v40 = vpop.permute.xlu1 %1767  ;;  %v1748_v56 = vld [vmem:[#allocation4 + $0x70] sm:$0xff]  ;;  %v7198_v59 = vld [vmem:[#allocation80_spill] sm:$0xff] }
 0x629   : > { %2009 = vst [vmem:[#allocation4 + $0x10] sm:$0xff] %v1993_v10  ;;  %v1833_v38 = vmul.f32 %v1768_v40, %v1737_v22  ;;  %2771 = vperm.xlu0 %4276, %v6610_v1   ;;  %v7197_v22 = vld [vmem:[#allocation83_spill] sm:$0xff]  ;;  %v1747_v10 = vld [vmem:[#allocation4 + $0x68] sm:$0xff] }
 0x62a   : > { %v1995_v47 = vadd.f32 %v7189_v43, %v1834_v3 }
 0x62b   : > { %v1994_v32 = vadd.f32 %v7190_v42, %v1833_v38  ;;  %v1783_v49 = vpop.permute.xlu0 %1782  ;;  %v1749_v42 = vld [vmem:[#allocation4 + $0x78] sm:$0xff] }
 0x62c   : > { %2011 = vst [vmem:[#allocation4 + $0x20] sm:$0xff] %v1995_v47  ;;  %v1836_v44 = vmul.f32 %v1783_v49, %v1740_v60  ;;  %v1778_v58 = vpop.permute.xlu1 %1777  ;;  %v7199_v47 = vld [vmem:[#allocation85_spill] sm:$0xff] }
 0x62d   : > { %2010 = vst [vmem:[#allocation4 + $0x18] sm:$0xff] %v1994_v32  ;;  %v1835_v48 = vmul.f32 %v1778_v58, %v1739_v21  ;;  %2776 = vperm.xlu1 %4275, %v6615_v9   ;;  %v7200_v32 = vld [vmem:[#allocation82_spill] sm:$0xff] }
 0x62e   : > { %v1997_v12 = vadd.f32 %v7191_v20, %v1836_v44 }
 0x62f   : > { %v1996_v62 = vadd.f32 %v7192_v34, %v1835_v48  ;;  %v1793_v46 = vpop.permute.xlu0 %1792  ;;  %v7201_v48 = vld [vmem:[#allocation84_spill] sm:$0xff] }
 0x630   : > { %2013 = vst [vmem:[#allocation4 + $0x30] sm:$0xff] %v1997_v12  ;;  %v1838_v33 = vmul.f32 %v1793_v46, %v1742_v23  ;;  %v1788_v24 = vpop.permute.xlu1 %1787 }
 0x631   : > { %2012 = vst [vmem:[#allocation4 + $0x28] sm:$0xff] %v1996_v62  ;;  %v1837_v16 = vmul.f32 %v1788_v24, %v1741_v2 }
 0x632   : > { %v1999_v17 = vadd.f32 %v7193_v25, %v1838_v33 }
 0x633   : > { %v1998_v36 = vadd.f32 %v7194_v4, %v1837_v16  ;;  %v1803_v8 = vpop.permute.xlu0 %1802 }
 0x634   : > { %2015 = vst [vmem:[#allocation4 + $0x40] sm:$0xff] %v1999_v17  ;;  %v1840_v14 = vmul.f32 %v1803_v8, %v1744_v28  ;;  %v1798_v63 = vpop.permute.xlu1 %1797  ;;  %v2586_v17 = vld [vmem:[#allocation3 + $0x80] sm:$0xff] }
 0x635   : > { %2014 = vst [vmem:[#allocation4 + $0x38] sm:$0xff] %v1998_v36  ;;  %v1839_v27 = vmul.f32 %v1798_v63, %v1743_v29  ;;  %v2602_v29 = vmul.f32 %v6503_v54, %v2586_v17  ;;  %v2589_v36 = vld [vmem:[#allocation3 + $0x98] sm:$0xff]  ;;  %v2591_v54 = vld [vmem:[#allocation3 + $0xa8] sm:$0xff] }
 0x636   : > { %v2001_v61 = vadd.f32 %v7195_v13, %v1840_v14  ;;  %v2605_v63 = vmul.f32 %v6527_v11, %v2589_v36 }
 0x637   : > { %v2000_v7 = vadd.f32 %v7196_v5, %v1839_v27  ;;  %v1813_v35 = vpop.permute.xlu0 %1812 }
 0x638   : > { %2017 = vst [vmem:[#allocation4 + $0x50] sm:$0xff] %v2001_v61  ;;  %v1842_v26 = vmul.f32 %v1813_v35, %v1746_v55  ;;  %v1808_v57 = vpop.permute.xlu1 %1807  ;;  %v2588_v55 = vld [vmem:[#allocation3 + $0x90] sm:$0xff]  ;;  %v2607_v35 = vmul.f32 %v6533_v53, %v2591_v54 }
 0x639   : > { %2016 = vst [vmem:[#allocation4 + $0x48] sm:$0xff] %v2000_v7  ;;  %v1841_v39 = vmul.f32 %v1808_v57, %v1745_v0  ;;  %v2604_v0 = vmul.f32 %v6516_v37, %v2588_v55  ;;  %v2593_v57 = vld [vmem:[#allocation3 + $0xb8] sm:$0xff]  ;;  %v2683_v55 = vld [vmem:[#allocation4 + $0x80] sm:$0xff] }
 0x63a   : > { %v2003_v52 = vadd.f32 %v7197_v22, %v1842_v26  ;;  %v2609_v22 = vmul.f32 %v6557_v19, %v2593_v57 }
 0x63b   : > { %v2002_v3 = vadd.f32 %v7198_v59, %v1841_v39  ;;  %v1823_v40 = vpop.permute.xlu0 %1822 }
 0x63c   : > { %2019 = vst [vmem:[#allocation4 + $0x60] sm:$0xff] %v2003_v52  ;;  %v1844_v38 = vmul.f32 %v1823_v40, %v1748_v56  ;;  %v1818_v60 = vpop.permute.xlu1 %1817  ;;  %v2587_v56 = vld [vmem:[#allocation3 + $0x88] sm:$0xff]  ;;  %v2590_v40 = vld [vmem:[#allocation3 + $0xa0] sm:$0xff] }
 0x63d   : > { %2018 = vst [vmem:[#allocation4 + $0x58] sm:$0xff] %v2002_v3  ;;  %v1843_v43 = vmul.f32 %v1818_v60, %v1747_v10  ;;  %v2603_v37 = vmul.f32 %v6495_v6, %v2587_v56  ;;  %v2595_v10 = vld [vmem:[#allocation3 + $0xc8] sm:$0xff] }
 0x63e   : > { %v2005_v21 = vadd.f32 %v7199_v47, %v1844_v38  ;;  %v2611_v53 = vmul.f32 %v6566_v50, %v2595_v10  ;;  %v2597_v47 = vld [vmem:[#allocation3 + $0xd8] sm:$0xff]  ;;  %v2599_v50 = vld [vmem:[#allocation3 + $0xe8] sm:$0xff] }
 0x63f   : > { %v2004_v49 = vadd.f32 %v7200_v32, %v1843_v43  ;;  %v6629_v20 = vpop.permute.xlu0 %2706  ;;  %v2606_v43 = vmul.f32 %v6505_v30, %v2590_v40  ;;  %v2613_v6 = vmul.f32 %v6571_v18, %v2597_v47  ;;  %v2615_v30 = vmul.f32 %v6575_v15, %v2599_v50  ;;  %v2601_v18 = vld [vmem:[#allocation3 + $0xf8] sm:$0xff]  ;;  %v2688_v40 = vld [vmem:[#allocation4 + $0xa8] sm:$0xff] }
 0x640   : > { %2021 = vst [vmem:[#allocation4 + $0x70] sm:$0xff] %v2005_v21  ;;  %v1828_v44 = vpop.permute.xlu1 %1827 }
 0x641   : > { %2020 = vst [vmem:[#allocation4 + $0x68] sm:$0xff] %v2004_v49  ;;  %v1845_v58 = vmul.f32 %v1828_v44, %v1749_v42  ;;  %v2592_v42 = vld [vmem:[#allocation3 + $0xb0] sm:$0xff] }
 0x642   : > { %v2608_v44 = vmul.f32 %v6518_v41, %v2592_v42  ;;  %v2690_v42 = vld [vmem:[#allocation4 + $0xb8] sm:$0xff] }
 0x643   : > { %v2006_v23 = vadd.f32 %v7201_v48, %v1845_v58  ;;  %v6633_v2 = vpop.permute.xlu0 %2721 }
 0x644   : > { %v6631_v12 = vpop.permute.xlu1 %2701 }
 0x645   : > { %2022 = vst [vmem:[#allocation4 + $0x78] sm:$0xff] %v2006_v23  ;;  %v2594_v23 = vld [vmem:[#allocation3 + $0xc0] sm:$0xff] }
 0x647   : > { %v6637_v62 = vpop.permute.xlu0 %2731 }
 0x648   : > { %v6635_v34 = vpop.permute.xlu1 %2711 }
 0x64b   : > { %v6641_v33 = vpop.permute.xlu0 %2741 }
 0x64c   : > { %v6639_v46 = vpop.permute.xlu1 %2716 }
 0x64f   : > { %v6645_v16 = vpop.permute.xlu0 %2751 }
 0x650   : > { %v6643_v24 = vpop.permute.xlu1 %2726 }
 0x653   : > { %v6649_v25 = vpop.permute.xlu0 %2761 }
 0x654   : > { %v6647_v28 = vpop.permute.xlu1 %2736 }
 0x658   : > { %v6652_v8 = vpop.permute.xlu1 %2746 }
 0x65c   : > { %v6656_v61 = vpop.permute.xlu1 %2756 }
 0x660   : > { %v6662_v39 = vpop.permute.xlu1 %2766 }
 0x680   : > { %v2619_v4 = vpop.xlane.xlu0 %2618 }
 0x681   : > { %v2650_v14 = vadd.f32 %v2619_v4, %v2602_v29  ;;  %v2610_v4 = vmul.f32 %v6529_v45, %v2594_v23 }
 0x683   : > { %2666 = vst.msk [vmem:[#allocation3 + $0x80] sm:$0xff] %vm1717_vm14, %v2650_v14 }
 0x684   : > { %v2625_v27 = vpop.xlane.xlu0 %2624 }
 0x685   : > { %v2653_v13 = vadd.f32 %v2625_v27, %v2605_v63  ;;  %v2596_v63 = vld [vmem:[#allocation3 + $0xd0] sm:$0xff]  ;;  %v2684_v27 = vld [vmem:[#allocation4 + $0x88] sm:$0xff] }
 0x686   : > { %v2612_v15 = vmul.f32 %v6545_v51, %v2596_v63 }
 0x687   : > { %2669 = vst.msk [vmem:[#allocation3 + $0x98] sm:$0xff] %vm1717_vm14, %v2653_v13  ;;  %v2617_v13 = vmul.f32 %v6615_v9, %v2601_v18 }
 0x688   : > { %v2623_v5 = vpop.xlane.xlu0 %2622 }
 0x689   : > { %v2652_v7 = vadd.f32 %v2623_v5, %v2604_v0  ;;  %v2780_v5 = vmul.f32 %v6629_v20, %v2684_v27  ;;  %v2600_v20 = vld [vmem:[#allocation3 + $0xf0] sm:$0xff] }
 0x68b   : > { %2668 = vst.msk [vmem:[#allocation3 + $0x90] sm:$0xff] %vm1717_vm14, %v2652_v7  ;;  %v2598_v7 = vld [vmem:[#allocation3 + $0xe0] sm:$0xff] }
 0x68c   : > { %v2629_v26 = vpop.xlane.xlu0 %2628 }
 0x68d   : > { %v2655_v11 = vadd.f32 %v2629_v26, %v2607_v35  ;;  %v2779_v35 = vmul.f32 %v6631_v12, %v2683_v55 }
 0x68f   : > { %2671 = vst.msk [vmem:[#allocation3 + $0xa8] sm:$0xff] %vm1717_vm14, %v2655_v11 }
 0x690   : > { %v2633_v52 = vpop.xlane.xlu0 %2632 }
 0x691   : > { %v2657_v59 = vadd.f32 %v2633_v52, %v2609_v22  ;;  %v2621_v3 = vpop.xlane.xlu1 %2620  ;;  %v2614_v22 = vmul.f32 %v6560_v31, %v2598_v7  ;;  %v2686_v52 = vld [vmem:[#allocation4 + $0x98] sm:$0xff] }
 0x692   : > { %v2651_v38 = vadd.f32 %v2621_v3, %v2603_v37  ;;  %v2685_v37 = vld [vmem:[#allocation4 + $0x90] sm:$0xff]  ;;  %v2782_v12 = vmul.f32 %v6639_v46, %v2686_v52 }
 0x693   : > { %2673 = vst.msk [vmem:[#allocation3 + $0xb8] sm:$0xff] %vm1717_vm14, %v2657_v59  ;;  %v2616_v59 = vmul.f32 %v6610_v1, %v2600_v20  ;;  %v2781_v3 = vmul.f32 %v6635_v34, %v2685_v37 }
 0x694   : > { %2667 = vst.msk [vmem:[#allocation3 + $0x88] sm:$0xff] %vm1717_vm14, %v2651_v38  ;;  %v2637_v60 = vpop.xlane.xlu0 %2636 }
 0x695   : > { %v2659_v21 = vadd.f32 %v2637_v60, %v2611_v53  ;;  %v2627_v19 = vpop.xlane.xlu1 %2626  ;;  %v2687_v60 = vld [vmem:[#allocation4 + $0xa0] sm:$0xff] }
 0x696   : > { %v2654_v32 = vadd.f32 %v2627_v19, %v2606_v43  ;;  %v2784_v19 = vmul.f32 %v6643_v24, %v2688_v40  ;;  %v2783_v46 = vmul.f32 %v6633_v2, %v2687_v60 }
 0x697   : > { %2675 = vst.msk [vmem:[#allocation3 + $0xc8] sm:$0xff] %vm1717_vm14, %v2659_v21 }
 0x698   : > { %2670 = vst.msk [vmem:[#allocation3 + $0xa0] sm:$0xff] %vm1717_vm14, %v2654_v32  ;;  %v2641_v49 = vpop.xlane.xlu0 %2640  ;;  %v2689_v32 = vld [vmem:[#allocation4 + $0xb0] sm:$0xff] }
 0x699   : > { %v2661_v58 = vadd.f32 %v2641_v49, %v2613_v6  ;;  %v2631_v48 = vpop.xlane.xlu1 %2630  ;;  %v2785_v50 = vmul.f32 %v6637_v62, %v2689_v32 }
 0x69a   : > { %v2656_v17 = vadd.f32 %v2631_v48, %v2608_v44  ;;  %v2786_v44 = vmul.f32 %v6647_v28, %v2690_v42  ;;  %v2691_v48 = vld [vmem:[#allocation4 + $0xc0] sm:$0xff] }
 0x69b   : > { %2677 = vst.msk [vmem:[#allocation3 + $0xd8] sm:$0xff] %vm1717_vm14, %v2661_v58  ;;  %v2692_v58 = vld [vmem:[#allocation4 + $0xc8] sm:$0xff] }
 0x69c   : > { %2672 = vst.msk [vmem:[#allocation3 + $0xb0] sm:$0xff] %vm1717_vm14, %v2656_v17  ;;  %v2645_v29 = vpop.xlane.xlu0 %2644  ;;  %v2788_v2 = vmul.f32 %v6652_v8, %v2692_v58 }
 0x69d   : > { %v2663_v36 = vadd.f32 %v2645_v29, %v2615_v30  ;;  %v2635_v14 = vpop.xlane.xlu1 %2634  ;;  %v2787_v29 = vmul.f32 %v6641_v33, %v2691_v48 }
 0x69e   : > { %v2658_v41 = vadd.f32 %v2635_v14, %v2610_v4  ;;  %v2694_v4 = vld [vmem:[#allocation4 + $0xd8] sm:$0xff] }
 0x69f   : > { %2679 = vst.msk [vmem:[#allocation3 + $0xe8] sm:$0xff] %vm1717_vm14, %v2663_v36  ;;  %v2693_v36 = vld [vmem:[#allocation4 + $0xd0] sm:$0xff]  ;;  %v2790_v62 = vmul.f32 %v6656_v61, %v2694_v4  ;;  %v2698_v61 = vld [vmem:[#allocation4 + $0xf8] sm:$0xff] }
 0x6a0   : > { %2674 = vst.msk [vmem:[#allocation3 + $0xc0] sm:$0xff] %vm1717_vm14, %v2658_v41  ;;  %v2649_v0 = vpop.xlane.xlu0 %2648  ;;  %v2789_v27 = vmul.f32 %v6645_v16, %v2693_v36  ;;  %v2696_v41 = vld [vmem:[#allocation4 + $0xe8] sm:$0xff]  ;;  %v2697_v16 = vld [vmem:[#allocation4 + $0xf0] sm:$0xff] }
 0x6a1   : > { %v2665_v54 = vadd.f32 %v2649_v0, %v2617_v13  ;;  %v2639_v45 = vpop.xlane.xlu1 %2638  ;;  %v2695_v13 = vld [vmem:[#allocation4 + $0xe0] sm:$0xff]  ;;  %v2792_v33 = vmul.f32 %v6662_v39, %v2696_v41 }
 0x6a2   : > { %v2660_v26 = vadd.f32 %v2639_v45, %v2612_v15  ;;  %v4000_v57 = vpop.f32.mrb[16].mxu0 }
 0x6a3   : > { %2681 = vst.msk [vmem:[#allocation3 + $0xf8] sm:$0xff] %vm1717_vm14, %v2665_v54  ;;  %v2941_v11 = vadd.f32 %v4000_v57, %v2780_v5  ;;  %v2861_v56 = vpop.f32.mrb[17].mxu0  ;;  %v2791_v5 = vmul.f32 %v6649_v25, %v2695_v13 }
 0x6a4   : > { %2676 = vst.msk [vmem:[#allocation3 + $0xd0] sm:$0xff] %vm1717_vm14, %v2660_v26  ;;  %v2940_v9 = vadd.f32 %v2861_v56, %v2779_v35 }
 0x6a5   : > { %2957 = vst [vmem:[#allocation4 + $0x88] sm:$0xff] %v2941_v11  ;;  %v2643_v51 = vpop.xlane.xlu1 %2642 }
 0x6a6   : > { %2956 = vst [vmem:[#allocation4 + $0x80] sm:$0xff] %v2940_v9  ;;  %v2662_v10 = vadd.f32 %v2643_v51, %v2614_v22 }
 0x6a8   : > { %2678 = vst.msk [vmem:[#allocation3 + $0xe0] sm:$0xff] %vm1717_vm14, %v2662_v10  ;;  %v2772_v57 = vpop.permute.xlu0 %2771 }
 0x6a9   : > { %v4003_v38 = vpop.f32.mrb[18].mxu0  ;;  %v2647_v53 = vpop.xlane.xlu1 %2646  ;;  %v2793_v56 = vmul.f32 %v2772_v57, %v2697_v16 }
 0x6aa   : > { %v2943_v31 = vadd.f32 %v4003_v38, %v2782_v12  ;;  %v2664_v43 = vadd.f32 %v2647_v53, %v2616_v59  ;;  %v2871_v47 = vpop.f32.mrb[19].mxu0 }
 0x6ab   : > { %v2942_v21 = vadd.f32 %v2871_v47, %v2781_v3 }
 0x6ac   : > { %2959 = vst [vmem:[#allocation4 + $0x98] sm:$0xff] %v2943_v31  ;;  %2680 = vst.msk [vmem:[#allocation3 + $0xf0] sm:$0xff] %vm1717_vm14, %v2664_v43 }
 0x6ad   : > { %2958 = vst [vmem:[#allocation4 + $0x90] sm:$0xff] %v2942_v21  ;;  %v4006_v1 = vpop.f32.mrb[20].mxu0  ;;  %v2777_v35 = vpop.permute.xlu1 %2776 }
 0x6ae   : > { %v2945_v34 = vadd.f32 %v4006_v1, %v2784_v19  ;;  %v2881_v6 = vpop.f32.mrb[21].mxu0  ;;  %v2794_v11 = vmul.f32 %v2777_v35, %v2698_v61 }
 0x6af   : > { %v2944_v49 = vadd.f32 %v2881_v6, %v2783_v46 }
 0x6b0   : > { %2961 = vst [vmem:[#allocation4 + $0xa8] sm:$0xff] %v2945_v34 }
 0x6b1   : > { %2960 = vst [vmem:[#allocation4 + $0xa0] sm:$0xff] %v2944_v49  ;;  %v4009_v24 = vpop.f32.mrb[22].mxu0 }
 0x6b2   : > { %v2947_v23 = vadd.f32 %v4009_v24, %v2786_v44  ;;  %v2891_v17 = vpop.f32.mrb[23].mxu0 }
 0x6b3   : > { %v2946_v30 = vadd.f32 %v2891_v17, %v2785_v50 }
 0x6b4   : > { %2963 = vst [vmem:[#allocation4 + $0xb8] sm:$0xff] %v2947_v23 }
 0x6b5   : > { %2962 = vst [vmem:[#allocation4 + $0xb0] sm:$0xff] %v2946_v30  ;;  %v4012_v18 = vpop.f32.mrb[24].mxu0 }
 0x6b6   : > { %v2949_v28 = vadd.f32 %v4012_v18, %v2788_v2  ;;  %v2901_v14 = vpop.f32.mrb[25].mxu0 }
 0x6b7   : > { %v2948_v63 = vadd.f32 %v2901_v14, %v2787_v29 }
 0x6b8   : > { %2965 = vst [vmem:[#allocation4 + $0xc8] sm:$0xff] %v2949_v28 }
 0x6b9   : > { %2964 = vst [vmem:[#allocation4 + $0xc0] sm:$0xff] %v2948_v63  ;;  %v4015_v55 = vpop.f32.mrb[26].mxu0 }
 0x6ba   : > { %v2951_v8 = vadd.f32 %v4015_v55, %v2790_v62  ;;  %v2911_v0 = vpop.f32.mrb[27].mxu0 }
 0x6bb   : > { %v2950_v15 = vadd.f32 %v2911_v0, %v2789_v27 }
 0x6bc   : > { %2967 = vst [vmem:[#allocation4 + $0xd8] sm:$0xff] %v2951_v8 }
 0x6bd   : > { %2966 = vst [vmem:[#allocation4 + $0xd0] sm:$0xff] %v2950_v15  ;;  %v4018_v54 = vpop.f32.mrb[28].mxu0 }
 0x6be   : > { %v2953_v45 = vadd.f32 %v4018_v54, %v2792_v33  ;;  %v2921_v7 = vpop.f32.mrb[29].mxu0 }
 0x6bf   : > { %v2952_v26 = vadd.f32 %v2921_v7, %v2791_v5 }
 0x6c0   : > { %2969 = vst [vmem:[#allocation4 + $0xe8] sm:$0xff] %v2953_v45 }
 0x6c1   : > { %2968 = vst [vmem:[#allocation4 + $0xe0] sm:$0xff] %v2952_v26 }
 0x6c3   : > { %v4021_v9 = vpop.f32.mrb[30].mxu0 }
 0x6c4   : > { %v2955_v22 = vadd.f32 %v4021_v9, %v2794_v11  ;;  %v2931_v52 = vpop.f32.mrb[31].mxu0 }
 0x6c5   : > { %v2954_v39 = vadd.f32 %v2931_v52, %v2793_v56 }
 0x6c6   : > { %2971 = vst [vmem:[#allocation4 + $0xf8] sm:$0xff] %v2955_v22 }
 0x6c7   : > { %2970 = vst [vmem:[#allocation4 + $0xf0] sm:$0xff] %v2954_v39 }
 0x6c8 PF: > { %s7202_s6 = sld [smem:[#allocation9_spill]] }
 0x6ce   : > { %p3659_p13 = scmp.ne.s32.totalorder %s7202_s6, 1 }
 0x6cf   : > { %v2994_v25 = vld [vmem:[#allocation3 + $0x10] sm:$0xff] (!%p3659_p13)  ;;  %v2992_v51 = vld [vmem:[#allocation3] sm:$0xff] (!%p3659_p13)  ;;  %v2995_v20 = vld [vmem:[#allocation3 + $0x18] sm:$0xff] (!%p3659_p13)  ;;  %v4595_v37 = vmov (!%p3659_p13), 0  }
 0x6d0   : > { %2991 = sbr.rel (%p3659_p13) target bundleno = 1947 (0x79b), region = 159  ;;  %4406 = vset.pattern.permute.xlu1 (!%p3659_p13), %v4595_v37  ;;  %4405 = vset.pattern.permute.xlu0 (!%p3659_p13), %v4595_v37  ;;  %4407 = vrcp.f32 (!%p3659_p13), %v2994_v25  ;;  %v2993_v10 = vld [vmem:[#allocation3 + $0x8] sm:$0xff] (!%p3659_p13)  ;;  %v2996_v59 = vld [vmem:[#allocation3 + $0x20] sm:$0xff] (!%p3659_p13)  ;;  %v2999_v3 = vld [vmem:[#allocation3 + $0x38] sm:$0xff] (!%p3659_p13) }
 0x6d1   : > { %4409 = vrcp.f32 (!%p3659_p13), %v2992_v51  ;;  %v2997_v12 = vld [vmem:[#allocation3 + $0x28] sm:$0xff] (!%p3659_p13)  ;;  %v2998_v40 = vld [vmem:[#allocation3 + $0x30] sm:$0xff] (!%p3659_p13)  ;;  %v3000_v43 = vld [vmem:[#allocation3 + $0x40] sm:$0xff] (!%p3659_p13) }
 0x6d2   : > { %4411 = vrcp.f32 (!%p3659_p13), %v2995_v20  ;;  %v3001_v60 = vld [vmem:[#allocation3 + $0x48] sm:$0xff] (!%p3659_p13)  ;;  %v3003_v21 = vld [vmem:[#allocation3 + $0x58] sm:$0xff] (!%p3659_p13)  ;;  %v3002_v46 = vld [vmem:[#allocation3 + $0x50] sm:$0xff] (!%p3659_p13) }
 0x6d3   : > { %4413 = vrcp.f32 (!%p3659_p13), %v2993_v10  ;;  %v3005_v1 = vld [vmem:[#allocation3 + $0x68] sm:$0xff] (!%p3659_p13)  ;;  %v3004_v34 = vld [vmem:[#allocation3 + $0x60] sm:$0xff] (!%p3659_p13)  ;;  %v3007_v49 = vld [vmem:[#allocation3 + $0x78] sm:$0xff] (!%p3659_p13) }
 0x6d4   : > { %4415 = vrcp.f32 (!%p3659_p13), %v2997_v12  ;;  %v3006_v50 = vld [vmem:[#allocation3 + $0x70] sm:$0xff] (!%p3659_p13)  ;;  %v3154_v24 = vld [vmem:[#allocation3 + $0x88] sm:$0xff] (!%p3659_p13)  ;;  %v3153_v23 = vld [vmem:[#allocation3 + $0x80] sm:$0xff] (!%p3659_p13) }
 0x6d5   : > { %4417 = vrcp.f32 (!%p3659_p13), %v2996_v59  ;;  %v3156_v30 = vld [vmem:[#allocation3 + $0x98] sm:$0xff] (!%p3659_p13)  ;;  %v3155_v29 = vld [vmem:[#allocation3 + $0x90] sm:$0xff] (!%p3659_p13)  ;;  %v3158_v18 = vld [vmem:[#allocation3 + $0xa8] sm:$0xff] (!%p3659_p13) }
 0x6d6   : > { %4419 = vrcp.f32 (!%p3659_p13), %v2999_v3  ;;  %v3157_v28 = vld [vmem:[#allocation3 + $0xa0] sm:$0xff] (!%p3659_p13)  ;;  %v3160_v63 = vld [vmem:[#allocation3 + $0xb8] sm:$0xff] (!%p3659_p13)  ;;  %v3159_v27 = vld [vmem:[#allocation3 + $0xb0] sm:$0xff] (!%p3659_p13) }
 0x6d7   : > { %4421 = vrcp.f32 %v2998_v40  ;;  %v3162_v55 = vld [vmem:[#allocation3 + $0xc8] sm:$0xff]  ;;  %v3161_v8 = vld [vmem:[#allocation3 + $0xc0] sm:$0xff]  ;;  %v3164_v15 = vld [vmem:[#allocation3 + $0xd8] sm:$0xff] }
 0x6d8   : > { %4423 = vrcp.f32 %v3001_v60  ;;  %v3163_v5 = vld [vmem:[#allocation3 + $0xd0] sm:$0xff]  ;;  %v3166_v45 = vld [vmem:[#allocation3 + $0xe8] sm:$0xff]  ;;  %v3165_v61 = vld [vmem:[#allocation3 + $0xe0] sm:$0xff] }
 0x6d9   : > { %4425 = vrcp.f32 %v3000_v43  ;;  %v3168_v26 = vld [vmem:[#allocation3 + $0xf8] sm:$0xff]  ;;  %v3167_v57 = vld [vmem:[#allocation3 + $0xf0] sm:$0xff]  ;;  %v3024_v20 = vld [vmem:[#allocation4] sm:$0xff] }
 0x6da   : > { %v4408_v38 = vpop.eup %4407  ;;  %4427 = vrcp.f32 %v3003_v21  ;;  %v3026_v51 = vld [vmem:[#allocation4 + $0x10] sm:$0xff]  ;;  %v3027_v3 = vld [vmem:[#allocation4 + $0x18] sm:$0xff]  ;;  %v3025_v40 = vld [vmem:[#allocation4 + $0x8] sm:$0xff] }
 0x6db   : > { %v4410_v53 = vpop.eup %4409  ;;  %3052 = vperm.xlu1 %4406, %v4408_v38   ;;  %4429 = vrcp.f32 %v3002_v46  ;;  %v3029_v43 = vld [vmem:[#allocation4 + $0x28] sm:$0xff] }
 0x6dc   : > { %v4412_v31 = vpop.eup %4411  ;;  %3042 = vperm.xlu0 %4405, %v4410_v53   ;;  %4431 = vrcp.f32 %v3005_v1  ;;  %v3031_v1 = vld [vmem:[#allocation4 + $0x38] sm:$0xff] }
 0x6dd   : > { %v4414_v47 = vpop.eup %4413  ;;  %4433 = vrcp.f32 %v3004_v34 }
 0x6de   : > { %v4416_v19 = vpop.eup %4415  ;;  %4435 = vrcp.f32 %v3007_v49 }
 0x6df   : > { %3057 = vperm.xlu1 %4406, %v4412_v31   ;;  %v4418_v42 = vpop.eup %4417  ;;  %4437 = vrcp.f32 %v3006_v50  ;;  %v3033_v50 = vld [vmem:[#allocation4 + $0x48] sm:$0xff] }
 0x6e0   : > { %3047 = vperm.xlu0 %4405, %v4414_v47   ;;  %v4420_v32 = vpop.eup %4419  ;;  %4439 = vrcp.f32 %v3154_v24  ;;  %v3028_v47 = vld [vmem:[#allocation4 + $0x20] sm:$0xff] }
 0x6e1   : > { %v4422_v6 = vpop.eup %4421  ;;  %4441 = vrcp.f32 %v3153_v23 }
 0x6e2   : > { %v4424_v44 = vpop.eup %4423  ;;  %4443 = vrcp.f32 %v3156_v30  ;;  %v3035_v30 = vld [vmem:[#allocation4 + $0x58] sm:$0xff] }
 0x6e3   : > { %3067 = vperm.xlu1 %4406, %v4416_v19   ;;  %v4426_v58 = vpop.eup %4425  ;;  %4445 = vrcp.f32 %v3155_v29 }
 0x6e4   : > { %3062 = vperm.xlu0 %4405, %v4418_v42   ;;  %v4428_v48 = vpop.eup %4427  ;;  %4447 = vrcp.f32 %v3158_v18 }
 0x6e5   : > { %v4430_v17 = vpop.eup %4429  ;;  %4449 = vrcp.f32 %v3157_v28  ;;  %v3037_v28 = vld [vmem:[#allocation4 + $0x68] sm:$0xff] }
 0x6e6   : > { %v4432_v2 = vpop.eup %4431  ;;  %4451 = vrcp.f32 %v3160_v63 }
 0x6e7   : > { %3077 = vperm.xlu1 %4406, %v4420_v32   ;;  %v4434_v4 = vpop.eup %4433  ;;  %4453 = vrcp.f32 %v3159_v27  ;;  %v3030_v32 = vld [vmem:[#allocation4 + $0x30] sm:$0xff] }
 0x6e8   : > { %3072 = vperm.xlu0 %4405, %v4422_v6   ;;  %v4436_v36 = vpop.eup %4435  ;;  %4455 = vrcp.f32 %v3162_v55  ;;  %v3039_v55 = vld [vmem:[#allocation4 + $0x78] sm:$0xff] }
 0x6e9   : > { %v4438_v14 = vpop.eup %4437  ;;  %4457 = vrcp.f32 %v3161_v8 }
 0x6ea   : > { %v4440_v62 = vpop.eup %4439  ;;  %4459 = vrcp.f32 %v3164_v15 }
 0x6eb   : > { %3087 = vperm.xlu1 %4406, %v4424_v44   ;;  %v4442_v41 = vpop.eup %4441  ;;  %4461 = vrcp.f32 %v3163_v5  ;;  %v3187_v5 = vld [vmem:[#allocation4 + $0x88] sm:$0xff] }
 0x6ec   : > { %3082 = vperm.xlu0 %4405, %v4426_v58   ;;  %v4444_v13 = vpop.eup %4443  ;;  %4463 = vrcp.f32 %v3166_v45  ;;  %v3032_v58 = vld [vmem:[#allocation4 + $0x40] sm:$0xff] }
 0x6ed   : > { %v4446_v0 = vpop.eup %4445  ;;  %4465 = vrcp.f32 %v3165_v61 }
 0x6ee   : > { %v4448_v33 = vpop.eup %4447  ;;  %4467 = vrcp.f32 %v3168_v26  ;;  %v3189_v26 = vld [vmem:[#allocation4 + $0x98] sm:$0xff] }
 0x6ef   : > { %3097 = vperm.xlu1 %4406, %v4428_v48   ;;  %v4450_v54 = vpop.eup %4449  ;;  %4469 = vrcp.f32 %v3167_v57 }
 0x6f0   : > { %3092 = vperm.xlu0 %4405, %v4430_v17   ;;  %v4452_v7 = vpop.eup %4451 }
 0x6f1   : > { %v4454_v35 = vpop.eup %4453 }
 0x6f2   : > { %v4456_v16 = vpop.eup %4455 }
 0x6f3   : > { %3107 = vperm.xlu1 %4406, %v4432_v2   ;;  %v4458_v11 = vpop.eup %4457  ;;  %v3034_v2 = vld [vmem:[#allocation4 + $0x50] sm:$0xff] }
 0x6f4   : > { %3102 = vperm.xlu0 %4405, %v4434_v4   ;;  %v4460_v56 = vpop.eup %4459 }
 0x6f5   : > { %v4462_v9 = vpop.eup %4461 }
 0x6f6   : > { %v4464_v22 = vpop.eup %4463 }
 0x6f7   : > { %3117 = vperm.xlu1 %4406, %v4436_v36   ;;  %v4466_v52 = vpop.eup %4465 }
 0x6f8   : > { %3112 = vperm.xlu0 %4405, %v4438_v14   ;;  %v4468_v39 = vpop.eup %4467  ;;  %v3036_v14 = vld [vmem:[#allocation4 + $0x60] sm:$0xff] }
 0x6f9   : > { %v4470_v25 = vpop.eup %4469 }
 0x6fb   : > { %3209 = vperm.xlu1 %4406, %v4440_v62  }
 0x6fc   : > { %3204 = vperm.xlu0 %4405, %v4442_v41  }
 0x6ff   : > { %3219 = vperm.xlu1 %4406, %v4444_v13   ;;  %v3038_v13 = vld [vmem:[#allocation4 + $0x70] sm:$0xff] }
 0x700   : > { %3214 = vperm.xlu0 %4405, %v4446_v0  }
 0x703   : > { %3229 = vperm.xlu1 %4406, %v4448_v33  }
 0x704   : > { %3224 = vperm.xlu0 %4405, %v4450_v54   ;;  %v3186_v54 = vld [vmem:[#allocation4 + $0x80] sm:$0xff] }
 0x707   : > { %3239 = vperm.xlu1 %4406, %v4452_v7  }
 0x708   : > { %3234 = vperm.xlu0 %4405, %v4454_v35  }
 0x70b   : > { %3249 = vperm.xlu1 %4406, %v4456_v16   ;;  %v3188_v16 = vld [vmem:[#allocation4 + $0x90] sm:$0xff] }
 0x70c   : > { %3244 = vperm.xlu0 %4405, %v4458_v11  }
 0x70f   : > { %3259 = vperm.xlu1 %4406, %v4460_v56  }
 0x710   : > { %3254 = vperm.xlu0 %4405, %v4462_v9  }
 0x713   : > { %3269 = vperm.xlu1 %4406, %v4464_v22   ;;  %v3191_v22 = vld [vmem:[#allocation4 + $0xa8] sm:$0xff] }
 0x714   : > { %3264 = vperm.xlu0 %4405, %v4466_v52   ;;  %v3190_v52 = vld [vmem:[#allocation4 + $0xa0] sm:$0xff] }
 0x717   : > { %3279 = vperm.xlu1 %4406, %v4468_v39  }
 0x718   : > { %3274 = vperm.xlu0 %4405, %v4470_v25  }
 0x75a   : > { %v3053_v37 = vpop.permute.xlu1 %3052 }
 0x75b   : > { %v3122_v10 = vmul.f32 %v3053_v37, %v3026_v51  ;;  %v3043_v12 = vpop.permute.xlu0 %3042  ;;  %v3193_v37 = vld [vmem:[#allocation4 + $0xb8] sm:$0xff] }
 0x75c   : > { %v3120_v59 = vmul.f32 %v3043_v12, %v3024_v20 }
 0x75d   : > { %3138 = vst [vmem:[%s4967_s1 + $0x20] sm:$0xff] %v3122_v10  ;;  %v3192_v10 = vld [vmem:[#allocation4 + $0xb0] sm:$0xff] }
 0x75e   : > { %3136 = vst [vmem:[%s4967_s1] sm:$0xff] %v3120_v59  ;;  %v3058_v38 = vpop.permute.xlu1 %3057 }
 0x75f   : > { %v3123_v53 = vmul.f32 %v3058_v38, %v3027_v3  ;;  %v3048_v60 = vpop.permute.xlu0 %3047  ;;  %v3195_v38 = vld [vmem:[#allocation4 + $0xc8] sm:$0xff] }
 0x760   : > { %v3121_v31 = vmul.f32 %v3048_v60, %v3025_v40 }
 0x761   : > { %3139 = vst [vmem:[%s4967_s1 + $0x30] sm:$0xff] %v3123_v53  ;;  %v3194_v53 = vld [vmem:[#allocation4 + $0xc0] sm:$0xff] }
 0x762   : > { %3137 = vst [vmem:[%s4967_s1 + $0x10] sm:$0xff] %v3121_v31  ;;  %v3068_v21 = vpop.permute.xlu1 %3067 }
 0x763   : > { %v3125_v19 = vmul.f32 %v3068_v21, %v3029_v43  ;;  %v3063_v46 = vpop.permute.xlu0 %3062  ;;  %v3197_v21 = vld [vmem:[#allocation4 + $0xd8] sm:$0xff] }
 0x764   : > { %v3124_v42 = vmul.f32 %v3063_v46, %v3028_v47 }
 0x765   : > { %3141 = vst [vmem:[%s4967_s1 + $0x50] sm:$0xff] %v3125_v19  ;;  %v3196_v19 = vld [vmem:[#allocation4 + $0xd0] sm:$0xff] }
 0x766   : > { %3140 = vst [vmem:[%s4967_s1 + $0x40] sm:$0xff] %v3124_v42  ;;  %v3078_v34 = vpop.permute.xlu1 %3077 }
 0x767   : > { %v3127_v6 = vmul.f32 %v3078_v34, %v3031_v1  ;;  %v3073_v49 = vpop.permute.xlu0 %3072  ;;  %v3199_v34 = vld [vmem:[#allocation4 + $0xe8] sm:$0xff] }
 0x768   : > { %v3126_v44 = vmul.f32 %v3073_v49, %v3030_v32 }
 0x769   : > { %3143 = vst [vmem:[%s4967_s1 + $0x70] sm:$0xff] %v3127_v6  ;;  %v3198_v6 = vld [vmem:[#allocation4 + $0xe0] sm:$0xff] }
 0x76a   : > { %3142 = vst [vmem:[%s4967_s1 + $0x60] sm:$0xff] %v3126_v44  ;;  %v3088_v24 = vpop.permute.xlu1 %3087 }
 0x76b   : > { %v3129_v48 = vmul.f32 %v3088_v24, %v3033_v50  ;;  %v3083_v23 = vpop.permute.xlu0 %3082  ;;  %v3201_v24 = vld [vmem:[#allocation4 + $0xf8] sm:$0xff] }
 0x76c   : > { %v3128_v17 = vmul.f32 %v3083_v23, %v3032_v58 }
 0x76d   : > { %3145 = vst [vmem:[%s4967_s1 + $0x90] sm:$0xff] %v3129_v48  ;;  %v3200_v48 = vld [vmem:[#allocation4 + $0xf0] sm:$0xff] }
 0x76e   : > { %3144 = vst [vmem:[%s4967_s1 + $0x80] sm:$0xff] %v3128_v17  ;;  %v3098_v29 = vpop.permute.xlu1 %3097 }
 0x76f   : > { %v3131_v4 = vmul.f32 %v3098_v29, %v3035_v30  ;;  %v3093_v18 = vpop.permute.xlu0 %3092 }
 0x770   : > { %v3130_v36 = vmul.f32 %v3093_v18, %v3034_v2 }
 0x771   : > { %3147 = vst [vmem:[%s4967_s1 + $0xb0] sm:$0xff] %v3131_v4 }
 0x772   : > { %3146 = vst [vmem:[%s4967_s1 + $0xa0] sm:$0xff] %v3130_v36  ;;  %v3108_v63 = vpop.permute.xlu1 %3107 }
 0x773   : > { %v3133_v62 = vmul.f32 %v3108_v63, %v3037_v28  ;;  %v3103_v27 = vpop.permute.xlu0 %3102 }
 0x774   : > { %v3132_v41 = vmul.f32 %v3103_v27, %v3036_v14 }
 0x775   : > { %3149 = vst [vmem:[%s4967_s1 + $0xd0] sm:$0xff] %v3133_v62 }
 0x776   : > { %3148 = vst [vmem:[%s4967_s1 + $0xc0] sm:$0xff] %v3132_v41  ;;  %v3118_v8 = vpop.permute.xlu1 %3117 }
 0x777   : > { %v3135_v0 = vmul.f32 %v3118_v8, %v3039_v55  ;;  %v3113_v15 = vpop.permute.xlu0 %3112 }
 0x778   : > { %v3134_v33 = vmul.f32 %v3113_v15, %v3038_v13 }
 0x779   : > { %3151 = vst [vmem:[%s4967_s1 + $0xf0] sm:$0xff] %v3135_v0 }
 0x77a   : > { %3150 = vst [vmem:[%s4967_s1 + $0xe0] sm:$0xff] %v3134_v33  ;;  %v3210_v45 = vpop.permute.xlu1 %3209 }
 0x77b   : > { %v3283_v7 = vmul.f32 %v3210_v45, %v3187_v5  ;;  %v3205_v61 = vpop.permute.xlu0 %3204 }
 0x77c   : > { %v3282_v35 = vmul.f32 %v3205_v61, %v3186_v54 }
 0x77d   : > { %3299 = vst [vmem:[%s4967_s1 + $0x18] sm:$0xff] %v3283_v7 }
 0x77e   : > { %3298 = vst [vmem:[%s4967_s1 + $0x8] sm:$0xff] %v3282_v35  ;;  %v3220_v57 = vpop.permute.xlu1 %3219 }
 0x77f   : > { %v3285_v11 = vmul.f32 %v3220_v57, %v3189_v26  ;;  %v3215_v56 = vpop.permute.xlu0 %3214 }
 0x780   : > { %v3284_v9 = vmul.f32 %v3215_v56, %v3188_v16 }
 0x781   : > { %3301 = vst [vmem:[%s4967_s1 + $0x38] sm:$0xff] %v3285_v11 }
 0x782   : > { %3300 = vst [vmem:[%s4967_s1 + $0x28] sm:$0xff] %v3284_v9  ;;  %v3230_v39 = vpop.permute.xlu1 %3229 }
 0x783   : > { %v3287_v25 = vmul.f32 %v3230_v39, %v3191_v22  ;;  %v3225_v51 = vpop.permute.xlu0 %3224 }
 0x784   : > { %v3286_v20 = vmul.f32 %v3225_v51, %v3190_v52 }
 0x785   : > { %3303 = vst [vmem:[%s4967_s1 + $0x58] sm:$0xff] %v3287_v25 }
 0x786   : > { %3302 = vst [vmem:[%s4967_s1 + $0x48] sm:$0xff] %v3286_v20  ;;  %v3240_v12 = vpop.permute.xlu1 %3239 }
 0x787   : > { %v3289_v59 = vmul.f32 %v3240_v12, %v3193_v37  ;;  %v3235_v3 = vpop.permute.xlu0 %3234 }
 0x788   : > { %v3288_v40 = vmul.f32 %v3235_v3, %v3192_v10 }
 0x789   : > { %3305 = vst [vmem:[%s4967_s1 + $0x78] sm:$0xff] %v3289_v59 }
 0x78a   : > { %3304 = vst [vmem:[%s4967_s1 + $0x68] sm:$0xff] %v3288_v40  ;;  %v3250_v60 = vpop.permute.xlu1 %3249 }
 0x78b   : > { %v3291_v31 = vmul.f32 %v3250_v60, %v3195_v38  ;;  %v3245_v43 = vpop.permute.xlu0 %3244 }
 0x78c   : > { %v3290_v47 = vmul.f32 %v3245_v43, %v3194_v53 }
 0x78d   : > { %3307 = vst [vmem:[%s4967_s1 + $0x98] sm:$0xff] %v3291_v31 }
 0x78e   : > { %3306 = vst [vmem:[%s4967_s1 + $0x88] sm:$0xff] %v3290_v47  ;;  %v3260_v46 = vpop.permute.xlu1 %3259 }
 0x78f   : > { %v3293_v42 = vmul.f32 %v3260_v46, %v3197_v21  ;;  %v3255_v1 = vpop.permute.xlu0 %3254 }
 0x790   : > { %v3292_v32 = vmul.f32 %v3255_v1, %v3196_v19 }
 0x791   : > { %3309 = vst [vmem:[%s4967_s1 + $0xb8] sm:$0xff] %v3293_v42 }
 0x792   : > { %3308 = vst [vmem:[%s4967_s1 + $0xa8] sm:$0xff] %v3292_v32  ;;  %v3270_v49 = vpop.permute.xlu1 %3269 }
 0x793   : > { %v3295_v44 = vmul.f32 %v3270_v49, %v3199_v34  ;;  %v3265_v50 = vpop.permute.xlu0 %3264 }
 0x794   : > { %v3294_v58 = vmul.f32 %v3265_v50, %v3198_v6 }
 0x795   : > { %3311 = vst [vmem:[%s4967_s1 + $0xd8] sm:$0xff] %v3295_v44 }
 0x796   : > { %3310 = vst [vmem:[%s4967_s1 + $0xc8] sm:$0xff] %v3294_v58  ;;  %v3280_v23 = vpop.permute.xlu1 %3279 }
 0x797   : > { %v3297_v17 = vmul.f32 %v3280_v23, %v3201_v24  ;;  %v3275_v30 = vpop.permute.xlu0 %3274 }
 0x798   : > { %v3296_v2 = vmul.f32 %v3275_v30, %v3200_v48 }
 0x799   : > { %3313 = vst [vmem:[%s4967_s1 + $0xf8] sm:$0xff] %v3297_v17 }
 0x79a   : > { %3312 = vst [vmem:[%s4967_s1 + $0xe8] sm:$0xff] %v3296_v2 }
 0x79b PF: > { %3320 = sbr.rel (!%p4792_p6) target bundleno = 1975 (0x7b7), region = 163  ;;  %s7203_s21 = sld [smem:[#allocation11_spill]] (%p4792_p6)  ;;  %v3341_v29 = vld [vmem:[%s4967_s1] sm:$0xff] (%p4792_p6)  ;;  %v3343_v4 = vld [vmem:[%s4967_s1 + $0x8] sm:$0xff] (%p4792_p6)  ;;  %v3345_v18 = vld [vmem:[%s4967_s1 + $0x10] sm:$0xff] (%p4792_p6) }
 0x79c   : > { %s7204_s28 = sld [smem:[#allocation10_spill]] (%p4792_p6)  ;;  %s7205_s26 = sld [smem:[#allocation12_spill]] (%p4792_p6)  ;;  %v3347_v36 = vld [vmem:[%s4967_s1 + $0x18] sm:$0xff] (%p4792_p6)  ;;  %v3349_v28 = vld [vmem:[%s4967_s1 + $0x20] sm:$0xff] (%p4792_p6)  ;;  %v3351_v14 = vld [vmem:[%s4967_s1 + $0x28] sm:$0xff] (%p4792_p6) }
 0x79d   : > { %v3353_v63 = vld [vmem:[%s4967_s1 + $0x30] sm:$0xff] (%p4792_p6)  ;;  %v3355_v62 = vld [vmem:[%s4967_s1 + $0x38] sm:$0xff] (%p4792_p6)  ;;  %v3357_v27 = vld [vmem:[%s4967_s1 + $0x40] sm:$0xff] (%p4792_p6)  ;;  %s7206_s3 = sld [smem:[#allocation93_spill]] (%p4792_p6) }
 0x79e   : > { %v3359_v41 = vld [vmem:[%s4967_s1 + $0x48] sm:$0xff] (%p4792_p6)  ;;  %v3361_v55 = vld [vmem:[%s4967_s1 + $0x50] sm:$0xff] (%p4792_p6)  ;;  %v3363_v13 = vld [vmem:[%s4967_s1 + $0x58] sm:$0xff] (%p4792_p6) }
 0x79f   : > { %v3365_v8 = vld [vmem:[%s4967_s1 + $0x60] sm:$0xff] (%p4792_p6)  ;;  %v3367_v0 = vld [vmem:[%s4967_s1 + $0x68] sm:$0xff] (%p4792_p6)  ;;  %v3369_v15 = vld [vmem:[%s4967_s1 + $0x70] sm:$0xff] (%p4792_p6) }
 0x7a0   : > { %v3371_v33 = vld [vmem:[%s4967_s1 + $0x78] sm:$0xff] (%p4792_p6)  ;;  %v3373_v5 = vld [vmem:[%s4967_s1 + $0x80] sm:$0xff] (%p4792_p6)  ;;  %v3375_v54 = vld [vmem:[%s4967_s1 + $0x88] sm:$0xff] (%p4792_p6) }
 0x7a1   : > { %s3662_s24 = sshll.u32 (%p4792_p6), %s7203_s21, 1  ;;  %v3377_v45 = vld [vmem:[%s4967_s1 + $0x90] sm:$0xff] (%p4792_p6)  ;;  %v3379_v7 = vld [vmem:[%s4967_s1 + $0x98] sm:$0xff] (%p4792_p6)  ;;  %v3381_v61 = vld [vmem:[%s4967_s1 + $0xa0] sm:$0xff] (%p4792_p6) }
 0x7a2   : > { %s3669_s20 = sshll.u32 %s7204_s28, 6  ;;  %s3664_s22 = sshll.u32 %s7205_s26, 7  ;;  %v3383_v35 = vld [vmem:[%s4967_s1 + $0xa8] sm:$0xff]  ;;  %v3385_v26 = vld [vmem:[%s4967_s1 + $0xb0] sm:$0xff]  ;;  %v3387_v16 = vld [vmem:[%s4967_s1 + $0xb8] sm:$0xff] }
 0x7a3   : > { %s3324_s23 = sadd.s32 %s3669_s20, %s3662_s24  ;;  %v3389_v57 = vld [vmem:[%s4967_s1 + $0xc0] sm:$0xff]  ;;  %v3391_v11 = vld [vmem:[%s4967_s1 + $0xc8] sm:$0xff]  ;;  %v3393_v56 = vld [vmem:[%s4967_s1 + $0xd0] sm:$0xff] }
 0x7a4   : > { %s3326_s19 = sadd.s32 %s3664_s22, %s3324_s23  ;;  %v3395_v9 = vld [vmem:[%s4967_s1 + $0xd8] sm:$0xff]  ;;  %v3397_v22 = vld [vmem:[%s4967_s1 + $0xe0] sm:$0xff]  ;;  %v3399_v52 = vld [vmem:[%s4967_s1 + $0xe8] sm:$0xff] }
 0x7a5   : > { %s3665_s8 = sshll.u32 %s3326_s19, 3  ;;  %v3401_v39 = vld [vmem:[%s4967_s1 + $0xf0] sm:$0xff]  ;;  %v3403_v25 = vld [vmem:[%s4967_s1 + $0xf8] sm:$0xff] }
 0x7a6   : > { %s6756_s7 = scalar_lea.vmem %s7206_s3, %s3665_s8 }
 0x7a7   : > { %3342 = vst [vmem:[%s6756_s7] sm:$0xff] %v3341_v29  ;;  %3344 = vst [vmem:[%s6756_s7 + $0x8] sm:$0xff] %v3343_v4 }
 0x7a8   : > { %3346 = vst [vmem:[%s6756_s7 + $0x20] sm:$0xff] %v3345_v18  ;;  %3348 = vst [vmem:[%s6756_s7 + $0x28] sm:$0xff] %v3347_v36 }
 0x7a9   : > { %3350 = vst [vmem:[%s6756_s7 + $0x40] sm:$0xff] %v3349_v28  ;;  %3352 = vst [vmem:[%s6756_s7 + $0x48] sm:$0xff] %v3351_v14 }
 0x7aa   : > { %3354 = vst [vmem:[%s6756_s7 + $0x60] sm:$0xff] %v3353_v63  ;;  %3356 = vst [vmem:[%s6756_s7 + $0x68] sm:$0xff] %v3355_v62 }
 0x7ab   : > { %3358 = vst [vmem:[%s6756_s7 + $0x80] sm:$0xff] %v3357_v27  ;;  %3360 = vst [vmem:[%s6756_s7 + $0x88] sm:$0xff] %v3359_v41 }
 0x7ac   : > { %3362 = vst [vmem:[%s6756_s7 + $0xa0] sm:$0xff] %v3361_v55  ;;  %3364 = vst [vmem:[%s6756_s7 + $0xa8] sm:$0xff] %v3363_v13 }
 0x7ad   : > { %3366 = vst [vmem:[%s6756_s7 + $0xc0] sm:$0xff] %v3365_v8  ;;  %3368 = vst [vmem:[%s6756_s7 + $0xc8] sm:$0xff] %v3367_v0 }
 0x7ae   : > { %3370 = vst [vmem:[%s6756_s7 + $0xe0] sm:$0xff] %v3369_v15  ;;  %3372 = vst [vmem:[%s6756_s7 + $0xe8] sm:$0xff] %v3371_v33 }
 0x7af   : > { %3374 = vst [vmem:[%s6756_s7 + $0x100] sm:$0xff] %v3373_v5  ;;  %3376 = vst [vmem:[%s6756_s7 + $0x108] sm:$0xff] %v3375_v54 }
 0x7b0   : > { %3378 = vst [vmem:[%s6756_s7 + $0x120] sm:$0xff] %v3377_v45  ;;  %3380 = vst [vmem:[%s6756_s7 + $0x128] sm:$0xff] %v3379_v7 }
 0x7b1   : > { %3382 = vst [vmem:[%s6756_s7 + $0x140] sm:$0xff] %v3381_v61  ;;  %3384 = vst [vmem:[%s6756_s7 + $0x148] sm:$0xff] %v3383_v35 }
 0x7b2   : > { %3386 = vst [vmem:[%s6756_s7 + $0x160] sm:$0xff] %v3385_v26  ;;  %3388 = vst [vmem:[%s6756_s7 + $0x168] sm:$0xff] %v3387_v16 }
 0x7b3   : > { %3390 = vst [vmem:[%s6756_s7 + $0x180] sm:$0xff] %v3389_v57  ;;  %3392 = vst [vmem:[%s6756_s7 + $0x188] sm:$0xff] %v3391_v11 }
 0x7b4   : > { %3394 = vst [vmem:[%s6756_s7 + $0x1a0] sm:$0xff] %v3393_v56  ;;  %3396 = vst [vmem:[%s6756_s7 + $0x1a8] sm:$0xff] %v3395_v9 }
 0x7b5   : > { %3398 = vst [vmem:[%s6756_s7 + $0x1c0] sm:$0xff] %v3397_v22  ;;  %3400 = vst [vmem:[%s6756_s7 + $0x1c8] sm:$0xff] %v3399_v52 }
 0x7b6   : > { %3402 = vst [vmem:[%s6756_s7 + $0x1e0] sm:$0xff] %v3401_v39  ;;  %3404 = vst [vmem:[%s6756_s7 + $0x1e8] sm:$0xff] %v3403_v25 }
 0x7b7 PF: > { %s17_s15 = sadd.s32 1, %s4589_s15   ;;  %s7208_s2 = sld [smem:[#allocation20_spill]] }
 0x7b8   : > { %p6811_p0 = scmp.ge.s32.totalorder %s17_s15, 18   ;;  %s7209_s30 = sld [smem:[#allocation13_spill]] }
 0x7b9   : > { %s7210_s9 = sld [smem:[#allocation14_spill]]  ;;  %s7211_s10 = sld [smem:[#allocation15_spill]] }
 0x7ba   : > { %s7212_s11 = sld [smem:[#allocation16_spill]]  ;;  %s7213_s1 = sld [smem:[#allocation17_spill]] }
 0x7bb   : > { %s7214_s13 = sld [smem:[#allocation18_spill]]  ;;  %s7215_s14 = sld [smem:[#allocation19_spill]] }
 0x7bc   : > { %s7216_s24 = smov %s4537_s25  ;;  %s7217_s25 = smov %s4797_s5 }
 0x7bd   : > { %s7218_s26 = smov %s4545_s27  ;;  %s7219_s27 = smov %s4775_s17 }
 0x7be   : > { %s7220_s28 = smov %s4553_s29  ;;  %s7221_s29 = smov %s7208_s2 }
 0x7bf   : > { %s7222_s8 = smov %s4577_s12  ;;  %16 = sbr.rel (!%p6811_p0) target bundleno = 17 (0x11), region = 250 }
 0x7c0   : > { %s7223_s12 = smov %s7213_s1 }

</bundles_post_ra>
